<compile_context>
chip_gen: v7x
topology: tpu7x:2x2x1
jax: 0.10.0
libtpu: 0.0.40
codegen_flags: <defaults>
</compile_context>

<pallas_src>
import math
import functools

import jax
import jax.numpy as jnp
from jax.experimental import pallas as pl
from jax.experimental.pallas import tpu as pltpu


# ---------------------------------------------------------------------------
# exact-GELU helper (PyTorch nn.GELU default = erf-based).
# erf via Abramowitz & Stegun 7.1.26 (|err| < 1.5e-7); only exp/mul/div.
# ---------------------------------------------------------------------------
def _erf(x):
    a1, a2, a3 = 0.254829592, -0.284496736, 1.421413741
    a4, a5, p = -1.453152027, 1.061405429, 0.3275911
    sign = jnp.where(x < 0.0, -1.0, 1.0)
    ax = jnp.abs(x)
    t = 1.0 / (1.0 + p * ax)
    poly = ((((a5 * t + a4) * t + a3) * t + a2) * t + a1) * t
    return sign * (1.0 - poly * jnp.exp(-ax * ax))


def _gelu(x):
    return 0.5 * x * (1.0 + _erf(x * 0.7071067811865476))


# ---------------------------------------------------------------------------
# Fused time-MLP kernel: Linear -> GELU -> Linear -> GELU (M = batch, tiny).
# ---------------------------------------------------------------------------
def _time_mlp_kernel(e_ref, w1_ref, b1_ref, w2_ref, b2_ref, o_ref):
    h = jnp.dot(e_ref[...].astype(jnp.bfloat16), w1_ref[...],
                preferred_element_type=jnp.float32) + b1_ref[...]
    h = _gelu(h)
    h = jnp.dot(h.astype(jnp.bfloat16), w2_ref[...],
                preferred_element_type=jnp.float32) + b2_ref[...]
    o_ref[...] = _gelu(h)


def _time_mlp(emb, w1, b1, w2, b2):
    B, K = emb.shape
    H1 = w1.shape[1]
    N = w2.shape[1]
    return pl.pallas_call(
        _time_mlp_kernel,
        out_shape=jax.ShapeDtypeStruct((B, N), jnp.float32),
        grid=(1,),
        in_specs=[
            pl.BlockSpec((B, K), lambda i: (0, 0)),
            pl.BlockSpec((K, H1), lambda i: (0, 0)),
            pl.BlockSpec((1, H1), lambda i: (0, 0)),
            pl.BlockSpec((H1, N), lambda i: (0, 0)),
            pl.BlockSpec((1, N), lambda i: (0, 0)),
        ],
        out_specs=pl.BlockSpec((B, N), lambda i: (0, 0)),
    )(emb, w1, b1, w2, b2)


# ---------------------------------------------------------------------------
# Fused whole-network kernel: project -> L encoder layers -> output head.
# grid = (batch, layer).  The hidden activation accumulates in hid_ref (its
# block index only depends on batch, so it stays VMEM-resident across layers).
# ---------------------------------------------------------------------------
def _transformer_kernel(x_ref, lmr_ref, lmc_ref, scale_ref,
                        cos_ref, sin_ref,
                        pw_ref, pb_ref,
                        wproj_ref, wo_ref, bo_ref,
                        w1_ref, b1_ref, w2_ref, b2_ref,
                        ow_ref, ob_ref,
                        out_ref, hid_ref, *, num_heads):
    l = pl.program_id(1)
    num_l = pl.num_programs(1)
    S = hid_ref.shape[1]
    D = hid_ref.shape[2]
    hd = D // num_heads

    # ---- input projection (once per batch row, at layer 0) ----
    @pl.when(l == 0)
    def _():
        xb = x_ref[0].astype(jnp.bfloat16)
        hid_ref[0] = (jnp.dot(xb, pw_ref[...],
                              preferred_element_type=jnp.float32) + pb_ref[...])

    x = hid_ref[0]                                  # (S, D) f32 running activation
    cos = cos_ref[...]                              # (S, hd)
    sin = sin_ref[...]                              # (S, hd)
    # attention mask built in-kernel from O(S) length masks: mask[i,j]=lm[i]&lm[j]
    mask = (lmr_ref[0] * lmc_ref[0]) > 0.5          # (S, S) bool

    sc4 = scale_ref[0, 0]                           # (4, D): [gamma0, gamma1, beta0, beta1]
    g0, g1 = sc4[0:1, :], sc4[1:2, :]
    be0, be1 = sc4[2:3, :], sc4[3:4, :]

    def layer_norm(v):                              # nn.LayerNorm(eps=1e-5, no affine)
        mu = jnp.mean(v, axis=-1, keepdims=True)
        c = v - mu
        var = jnp.mean(c * c, axis=-1, keepdims=True)
        return c * jax.lax.rsqrt(var + 1e-5)

    # ---------------- self-attention sub-block ----------------
    h = layer_norm(x)
    h = g0 * h + be0
    hb = jnp.broadcast_to(h.astype(jnp.bfloat16)[None], (num_heads, S, D))
    # Fused per-head projection producing [q, rot_half(q), k, rot_half(k), v];
    # the interleaved rotate_half permutation and the 1/sqrt(hd) score scale
    # are folded into the weights at pack time, so no roll / transpose / score
    # scaling is needed here.  K = D (full contraction depth).
    proj = jnp.einsum("hsd,hde->hse", hb, wproj_ref[0],
                      preferred_element_type=jnp.float32)          # (H, S, 5*hd)
    q = proj[:, :, 0 * hd:1 * hd] * cos + proj[:, :, 1 * hd:2 * hd] * sin
    k = proj[:, :, 2 * hd:3 * hd] * cos + proj[:, :, 3 * hd:4 * hd] * sin
    v = proj[:, :, 4 * hd:5 * hd]

    scores = jnp.einsum("hqd,hkd->hqk", q.astype(jnp.bfloat16),
                        k.astype(jnp.bfloat16),
                        preferred_element_type=jnp.float32)        # (H, S, S)
    scores = jnp.where(jnp.broadcast_to(mask, scores.shape), scores, -1.0e9)
    scores = scores - jnp.max(scores, axis=-1, keepdims=True)
    p = jnp.exp(scores)
    p = p * pl.reciprocal(jnp.sum(p, axis=-1, keepdims=True), approx=True)
    ctx = jnp.einsum("hqk,hkd->hqd", p.astype(jnp.bfloat16),
                     v.astype(jnp.bfloat16),
                     preferred_element_type=jnp.float32)            # (H, S, hd)
    outh = jnp.einsum("hsk,hkd->hsd", ctx.astype(jnp.bfloat16), wo_ref[0],
                      preferred_element_type=jnp.float32)           # (H, S, D)
    attn = outh[0]
    for hh in range(1, num_heads):                  # cheap unrolled head-sum
        attn = attn + outh[hh]
    attn = attn + bo_ref[0]
    x = x + attn                                    # residual (dropout p=0)

    # ---------------- feed-forward sub-block ----------------
    h = layer_norm(x)
    h = g1 * h + be1
    h = jnp.dot(h.astype(jnp.bfloat16), w1_ref[0],
                preferred_element_type=jnp.float32) + b1_ref[0]
    h = _gelu(h)
    h = jnp.dot(h.astype(jnp.bfloat16), w2_ref[0],
                preferred_element_type=jnp.float32) + b2_ref[0]
    x = x + h                                       # residual (dropout p=0)

    hid_ref[0] = x

    # ---- output head (once per batch row, at the last layer) ----
    @pl.when(l == num_l - 1)
    def _():
        out_ref[0] = (jnp.dot(x.astype(jnp.bfloat16), ow_ref[...],
                              preferred_element_type=jnp.float32) + ob_ref[...])


# ---------------------------------------------------------------------------
# Parameter init (deterministic, synthetic — shapes follow the nn.Module,
# stored as raw f32) and packing into the kernel-ready bf16 layout.
# ---------------------------------------------------------------------------
def init_params(key, *, input_dim, target_dim, model_dim, num_layers,
                learned_sinusoidal_dim):
    D = model_dim
    keys = iter(jax.random.split(key, 24))

    def nrm(shape, scale=0.02):
        return scale * jax.random.normal(next(keys), shape, dtype=jnp.float32)

    return {
        "sinu_w": jax.random.normal(next(keys), (learned_sinusoidal_dim // 2,),
                                    dtype=jnp.float32),
        "tw1": nrm((learned_sinusoidal_dim, 128)), "tb1": nrm((128,)),
        "tw2": nrm((128, num_layers * 4 * D)), "tb2": nrm((num_layers * 4 * D,)),
        "pw": nrm((input_dim, D)), "pb": nrm((D,)),
        "wq": nrm((num_layers, D, D)),           # qkv_bias=False
        "wk": nrm((num_layers, D, D)),
        "wv": nrm((num_layers, D, D)),
        "wo": nrm((num_layers, D, D)), "bo": nrm((num_layers, D)),
        "w1": nrm((num_layers, D, 4 * D)), "b1": nrm((num_layers, 4 * D)),
        "w2": nrm((num_layers, 4 * D, D)), "b2": nrm((num_layers, D)),
        "ow": nrm((D, target_dim)), "ob": nrm((target_dim,)),
    }


def pack_params(p, *, num_heads):
    """Fold rotate_half + 1/sqrt(hd) into QK columns, split heads, cast bf16."""
    L, D, _ = p["wq"].shape
    hd = D // num_heads
    inv_sqrt = 1.0 / math.sqrt(hd)
    bf16 = jnp.bfloat16

    def fold_rotate_half(w):      # columns: wr[:,2i] = -w[:,2i+1]; wr[:,2i+1] = w[:,2i]
        wp = w.reshape(L, D, D // 2, 2)
        wr = jnp.stack([-wp[..., 1], wp[..., 0]], axis=-1)
        return wr.reshape(L, D, D)

    def per_head(w):              # (L, D, D) -> (L, H, D, hd) over the output dim
        return jnp.transpose(w.reshape(L, D, num_heads, hd), (0, 2, 1, 3))

    wproj = jnp.concatenate(
        [per_head(p["wq"]) * inv_sqrt,                   # score scale folded into q
         per_head(fold_rotate_half(p["wq"])) * inv_sqrt,
         per_head(p["wk"]),
         per_head(fold_rotate_half(p["wk"])),
         per_head(p["wv"])], axis=-1).astype(bf16)       # (L, H, D, 5*hd)
    wo_h = p["wo"].reshape(L, num_heads, hd, D).astype(bf16)  # (L, H, hd, D)

    return {
        "sinu_w": p["sinu_w"],
        "tw1": p["tw1"].astype(bf16), "tb1": p["tb1"].reshape(1, -1),
        "tw2": p["tw2"].astype(bf16), "tb2": p["tb2"].reshape(1, -1),
        "pw": p["pw"].astype(bf16), "pb": p["pb"].reshape(1, -1),
        "wproj": wproj, "wo_h": wo_h, "bo": p["bo"][:, None, :],
        "w1": p["w1"].astype(bf16), "b1": p["b1"][:, None, :],
        "w2": p["w2"].astype(bf16), "b2": p["b2"][:, None, :],
        "ow": p["ow"].astype(bf16), "ob": p["ob"].reshape(1, -1),
    }


# ---------------------------------------------------------------------------
# Full forward pass (eval mode: dropout/layerdrop are no-ops).
# ---------------------------------------------------------------------------
def transformer_forward(params, x, t, length_mask, *, model_dim, num_layers,
                        num_heads=8, rotary_dim=32):
    B, S, input_dim = x.shape
    D = model_dim
    L = num_layers
    H = num_heads
    hd = D // num_heads
    T = params["ow"].shape[1]
    H4 = 4 * D
    assert hd == rotary_dim and hd % 2 == 0   # RotaryEmbedding(dim=32) rotates full head

    # ---- time_mlp: LearnedSinusoidalPosEmb -> Linear -> GELU -> Linear -> GELU
    freq = t[:, None] * params["sinu_w"][None, :] * (2.0 * math.pi)
    temb = jnp.concatenate([jnp.sin(freq), jnp.cos(freq)], axis=-1)       # (B, 128)
    temb = _time_mlp(temb, params["tw1"], params["tb1"],
                     params["tw2"], params["tb2"])                         # (B, L*4*D)
    scales = temb.reshape(B, L, 4, D)       # per layer: [gamma0, gamma1, beta0, beta1]

    # ---- rotary tables (glue): per head_dim, interleaved-repeated freqs
    inv_freq = 1.0 / (10000.0 ** (jnp.arange(0, hd, 2, dtype=jnp.float32) / hd))
    pos = jnp.arange(S, dtype=jnp.float32)
    freqs = jnp.repeat(pos[:, None] * inv_freq[None, :], 2, axis=-1)       # (S, hd)
    cos_hd = jnp.cos(freqs)
    sin_hd = jnp.sin(freqs)

    # ---- O(S) length masks (the (S,S) attention mask is built in-kernel)
    lm = length_mask.astype(jnp.float32)
    lm_row = lm[:, :, None]                 # (B, S, 1)
    lm_col = lm[:, None, :]                 # (B, 1, S)

    kernel = functools.partial(_transformer_kernel, num_heads=num_heads)
    out, hidden = pl.pallas_call(
        kernel,
        out_shape=(jax.ShapeDtypeStruct((B, S, T), jnp.float32),
                   jax.ShapeDtypeStruct((B, S, D), jnp.float32)),
        grid=(B, L),
        in_specs=[
            pl.BlockSpec((1, S, input_dim), lambda b, l: (b, 0, 0)),     # x
            pl.BlockSpec((1, S, 1), lambda b, l: (b, 0, 0)),             # length mask rows
            pl.BlockSpec((1, 1, S), lambda b, l: (b, 0, 0)),             # length mask cols
            pl.BlockSpec((1, 1, 4, D), lambda b, l: (b, l, 0, 0)),       # time scales/shifts
            pl.BlockSpec((S, hd), lambda b, l: (0, 0)),                  # rotary cos
            pl.BlockSpec((S, hd), lambda b, l: (0, 0)),                  # rotary sin
            pl.BlockSpec((input_dim, D), lambda b, l: (0, 0)),           # project W (bf16)
            pl.BlockSpec((1, D), lambda b, l: (0, 0)),                   # project b
            pl.BlockSpec((1, H, D, 5 * hd), lambda b, l: (l, 0, 0, 0)),  # fused qkv(+rot) W
            pl.BlockSpec((1, H, hd, D), lambda b, l: (l, 0, 0, 0)),      # attn out W
            pl.BlockSpec((1, 1, D), lambda b, l: (l, 0, 0)),             # attn out b
            pl.BlockSpec((1, D, H4), lambda b, l: (l, 0, 0)),            # ffn W1
            pl.BlockSpec((1, 1, H4), lambda b, l: (l, 0, 0)),            # ffn b1
            pl.BlockSpec((1, H4, D), lambda b, l: (l, 0, 0)),            # ffn W2
            pl.BlockSpec((1, 1, D), lambda b, l: (l, 0, 0)),             # ffn b2
            pl.BlockSpec((D, T), lambda b, l: (0, 0)),                   # out head W
            pl.BlockSpec((1, T), lambda b, l: (0, 0)),                   # out head b
        ],
        out_specs=[
            pl.BlockSpec((1, S, T), lambda b, l: (b, 0, 0)),             # model output
            pl.BlockSpec((1, S, D), lambda b, l: (b, 0, 0)),             # final hidden
        ],
        compiler_params=pltpu.CompilerParams(
            dimension_semantics=("parallel", "arbitrary")),
    )(x, lm_row, lm_col, scales, cos_hd, sin_hd,
      params["pw"], params["pb"],
      params["wproj"], params["wo_h"], params["bo"],
      params["w1"], params["b1"], params["w2"], params["b2"],
      params["ow"], params["ob"])
    return out, hidden


if __name__ == "__main__":
    # head_dim must equal 32 (RotaryEmbedding(dim=32), 8 heads) -> model_dim=256.
    B, S = 2, 8
    INPUT_DIM, TARGET_DIM = 16, 16
    MODEL_DIM, NUM_LAYERS, NUM_HEADS = 256, 2, 8
    LEARNED_SINUSOIDAL_DIM = 128

    root = jax.random.PRNGKey(0)
    k_param, k_x, k_t = jax.random.split(root, 3)

    raw_params = init_params(k_param, input_dim=INPUT_DIM, target_dim=TARGET_DIM,
                             model_dim=MODEL_DIM, num_layers=NUM_LAYERS,
                             learned_sinusoidal_dim=LEARNED_SINUSOIDAL_DIM)
    packed = pack_params(raw_params, num_heads=NUM_HEADS)

    x = jax.random.normal(k_x, (B, S, INPUT_DIM), dtype=jnp.float32)
    t = jax.random.uniform(k_t, (B,), dtype=jnp.float32) * 100.0
    length_mask = jnp.array([[1, 1, 1, 1, 1, 1, 1, 1],
                             [1, 1, 1, 1, 1, 1, 0, 0]], dtype=jnp.float32)

    fwd = jax.jit(functools.partial(transformer_forward, model_dim=MODEL_DIM,
                                    num_layers=NUM_LAYERS, num_heads=NUM_HEADS))
    out, hidden = fwd(packed, x, t, length_mask)
    jax.block_until_ready((out, hidden))

    assert out.shape == (B, S, TARGET_DIM) and hidden.shape == (B, S, MODEL_DIM)
    assert bool(jnp.all(jnp.isfinite(out))) and bool(jnp.all(jnp.isfinite(hidden)))
    print("KERNEL_OK")
</pallas_src>

<mosaic_0001>
module attributes {stable_mosaic.version = 11 : i64} {
  func.func @_time_mlp_kernel(%arg0: i32, %arg1: memref<2x128xf32, #tpu.memory_space<vmem>>, %arg2: memref<128x128xbf16, #tpu.memory_space<vmem>>, %arg3: memref<1x128xf32, #tpu.memory_space<vmem>>, %arg4: memref<128x2048xbf16, #tpu.memory_space<vmem>>, %arg5: memref<1x2048xf32, #tpu.memory_space<vmem>>, %arg6: memref<2x2048xf32, #tpu.memory_space<vmem>>) attributes {dimension_semantics = [#tpu.dimension_semantics<arbitrary>], iteration_bounds = array<i64: 1>, scalar_prefetch = 0 : i64, scratch_operands = 0 : i64, tpu.core_type = #tpu.core_type<tc>, window_params = [{pipeline_mode = #tpu.pipeline_mode<synchronous>, transform_indices = @transform_0, window_bounds = array<i64: 2, 128>}, {pipeline_mode = #tpu.pipeline_mode<synchronous>, transform_indices = @transform_1, window_bounds = array<i64: 128, 128>}, {pipeline_mode = #tpu.pipeline_mode<synchronous>, transform_indices = @transform_2, window_bounds = array<i64: 1, 128>}, {pipeline_mode = #tpu.pipeline_mode<synchronous>, transform_indices = @transform_3, window_bounds = array<i64: 128, 2048>}, {pipeline_mode = #tpu.pipeline_mode<synchronous>, transform_indices = @transform_4, window_bounds = array<i64: 1, 2048>}, {pipeline_mode = #tpu.pipeline_mode<synchronous>, transform_indices = @transform_5, window_bounds = array<i64: 2, 2048>}]} {
    %c0 = arith.constant 0 : index
    %c0_0 = arith.constant 0 : index
    %0 = vector.load %arg1[%c0, %c0_0] : memref<2x128xf32, #tpu.memory_space<vmem>>, vector<2x128xf32>
    %1 = arith.truncf %0 : vector<2x128xf32> to vector<2x128xbf16>
    %c0_1 = arith.constant 0 : index
    %c0_2 = arith.constant 0 : index
    %2 = vector.load %arg2[%c0_1, %c0_2] : memref<128x128xbf16, #tpu.memory_space<vmem>>, vector<128x128xbf16>
    %cst = arith.constant dense<0.000000e+00> : vector<2x128xf32>
    %3 = tpu.matmul %1, %2, %cst {dimension_numbers = #tpu.dot_dimension_numbers<[1], [0], [0], [1], [0, 0, 1, 1], [], []>} : vector<2x128xbf16>, vector<128x128xbf16>, vector<2x128xf32> -> vector<2x128xf32>
    %c0_3 = arith.constant 0 : index
    %c0_4 = arith.constant 0 : index
    %4 = vector.load %arg3[%c0_3, %c0_4] : memref<1x128xf32, #tpu.memory_space<vmem>>, vector<1x128xf32>
    %5 = vector.broadcast %4 : vector<1x128xf32> to vector<2x128xf32>
    %6 = arith.addf %3, %5 : vector<2x128xf32>
    %cst_5 = arith.constant 5.000000e-01 : f32
    %7 = vector.broadcast %cst_5 : f32 to vector<2x128xf32>
    %8 = arith.mulf %7, %6 : vector<2x128xf32>
    %cst_6 = arith.constant 0.707106769 : f32
    %9 = vector.broadcast %cst_6 : f32 to vector<2x128xf32>
    %10 = arith.mulf %6, %9 : vector<2x128xf32>
    %cst_7 = arith.constant 0.000000e+00 : f32
    %11 = vector.broadcast %cst_7 : f32 to vector<2x128xf32>
    %12 = arith.cmpf olt, %10, %11 : vector<2x128xf32>
    %cst_8 = arith.constant -1.000000e+00 : f32
    %cst_9 = arith.constant 1.000000e+00 : f32
    %13 = vector.broadcast %cst_8 : f32 to vector<2x128xf32>
    %14 = vector.broadcast %cst_9 : f32 to vector<2x128xf32>
    %15 = arith.select %12, %13, %14 : vector<2x128xi1>, vector<2x128xf32>
    %16 = math.absf %10 : vector<2x128xf32>
    %cst_10 = arith.constant 0.327591091 : f32
    %17 = vector.broadcast %cst_10 : f32 to vector<2x128xf32>
    %18 = arith.mulf %17, %16 : vector<2x128xf32>
    %cst_11 = arith.constant 1.000000e+00 : f32
    %19 = vector.broadcast %cst_11 : f32 to vector<2x128xf32>
    %20 = arith.addf %19, %18 : vector<2x128xf32>
    %cst_12 = arith.constant 1.000000e+00 : f32
    %21 = vector.broadcast %cst_12 : f32 to vector<2x128xf32>
    %22 = arith.divf %21, %20 : vector<2x128xf32>
    %cst_13 = arith.constant 1.06140542 : f32
    %23 = vector.broadcast %cst_13 : f32 to vector<2x128xf32>
    %24 = arith.mulf %23, %22 : vector<2x128xf32>
    %cst_14 = arith.constant -1.45315206 : f32
    %25 = vector.broadcast %cst_14 : f32 to vector<2x128xf32>
    %26 = arith.addf %24, %25 : vector<2x128xf32>
    %27 = arith.mulf %26, %22 : vector<2x128xf32>
    %cst_15 = arith.constant 1.42141378 : f32
    %28 = vector.broadcast %cst_15 : f32 to vector<2x128xf32>
    %29 = arith.addf %27, %28 : vector<2x128xf32>
    %30 = arith.mulf %29, %22 : vector<2x128xf32>
    %cst_16 = arith.constant -0.284496725 : f32
    %31 = vector.broadcast %cst_16 : f32 to vector<2x128xf32>
    %32 = arith.addf %30, %31 : vector<2x128xf32>
    %33 = arith.mulf %32, %22 : vector<2x128xf32>
    %cst_17 = arith.constant 0.254829586 : f32
    %34 = vector.broadcast %cst_17 : f32 to vector<2x128xf32>
    %35 = arith.addf %33, %34 : vector<2x128xf32>
    %36 = arith.mulf %35, %22 : vector<2x128xf32>
    %cst_18 = arith.constant 0.000000e+00 : f32
    %37 = vector.broadcast %cst_18 : f32 to vector<2x128xf32>
    %38 = arith.subf %37, %16 : vector<2x128xf32>
    %39 = arith.mulf %38, %16 : vector<2x128xf32>
    %40 = math.exp %39 : vector<2x128xf32>
    %41 = arith.mulf %36, %40 : vector<2x128xf32>
    %cst_19 = arith.constant 1.000000e+00 : f32
    %42 = vector.broadcast %cst_19 : f32 to vector<2x128xf32>
    %43 = arith.subf %42, %41 : vector<2x128xf32>
    %44 = arith.mulf %15, %43 : vector<2x128xf32>
    %cst_20 = arith.constant 1.000000e+00 : f32
    %45 = vector.broadcast %cst_20 : f32 to vector<2x128xf32>
    %46 = arith.addf %45, %44 : vector<2x128xf32>
    %47 = arith.mulf %8, %46 : vector<2x128xf32>
    %48 = arith.truncf %47 : vector<2x128xf32> to vector<2x128xbf16>
    %c0_21 = arith.constant 0 : index
    %c0_22 = arith.constant 0 : index
    %49 = vector.load %arg4[%c0_21, %c0_22] : memref<128x2048xbf16, #tpu.memory_space<vmem>>, vector<128x2048xbf16>
    %cst_23 = arith.constant dense<0.000000e+00> : vector<2x2048xf32>
    %50 = tpu.matmul %48, %49, %cst_23 {dimension_numbers = #tpu.dot_dimension_numbers<[1], [0], [0], [1], [0, 0, 1, 1], [], []>} : vector<2x128xbf16>, vector<128x2048xbf16>, vector<2x2048xf32> -> vector<2x2048xf32>
    %c0_24 = arith.constant 0 : index
    %c0_25 = arith.constant 0 : index
    %51 = vector.load %arg5[%c0_24, %c0_25] : memref<1x2048xf32, #tpu.memory_space<vmem>>, vector<1x2048xf32>
    %52 = vector.broadcast %51 : vector<1x2048xf32> to vector<2x2048xf32>
    %53 = arith.addf %50, %52 : vector<2x2048xf32>
    %cst_26 = arith.constant 5.000000e-01 : f32
    %54 = vector.broadcast %cst_26 : f32 to vector<2x2048xf32>
    %55 = arith.mulf %54, %53 : vector<2x2048xf32>
    %cst_27 = arith.constant 0.707106769 : f32
    %56 = vector.broadcast %cst_27 : f32 to vector<2x2048xf32>
    %57 = arith.mulf %53, %56 : vector<2x2048xf32>
    %cst_28 = arith.constant 0.000000e+00 : f32
    %58 = vector.broadcast %cst_28 : f32 to vector<2x2048xf32>
    %59 = arith.cmpf olt, %57, %58 : vector<2x2048xf32>
    %cst_29 = arith.constant -1.000000e+00 : f32
    %cst_30 = arith.constant 1.000000e+00 : f32
    %60 = vector.broadcast %cst_29 : f32 to vector<2x2048xf32>
    %61 = vector.broadcast %cst_30 : f32 to vector<2x2048xf32>
    %62 = arith.select %59, %60, %61 : vector<2x2048xi1>, vector<2x2048xf32>
    %63 = math.absf %57 : vector<2x2048xf32>
    %cst_31 = arith.constant 0.327591091 : f32
    %64 = vector.broadcast %cst_31 : f32 to vector<2x2048xf32>
    %65 = arith.mulf %64, %63 : vector<2x2048xf32>
    %cst_32 = arith.constant 1.000000e+00 : f32
    %66 = vector.broadcast %cst_32 : f32 to vector<2x2048xf32>
    %67 = arith.addf %66, %65 : vector<2x2048xf32>
    %cst_33 = arith.constant 1.000000e+00 : f32
    %68 = vector.broadcast %cst_33 : f32 to vector<2x2048xf32>
    %69 = arith.divf %68, %67 : vector<2x2048xf32>
    %cst_34 = arith.constant 1.06140542 : f32
    %70 = vector.broadcast %cst_34 : f32 to vector<2x2048xf32>
    %71 = arith.mulf %70, %69 : vector<2x2048xf32>
    %cst_35 = arith.constant -1.45315206 : f32
    %72 = vector.broadcast %cst_35 : f32 to vector<2x2048xf32>
    %73 = arith.addf %71, %72 : vector<2x2048xf32>
    %74 = arith.mulf %73, %69 : vector<2x2048xf32>
    %cst_36 = arith.constant 1.42141378 : f32
    %75 = vector.broadcast %cst_36 : f32 to vector<2x2048xf32>
    %76 = arith.addf %74, %75 : vector<2x2048xf32>
    %77 = arith.mulf %76, %69 : vector<2x2048xf32>
    %cst_37 = arith.constant -0.284496725 : f32
    %78 = vector.broadcast %cst_37 : f32 to vector<2x2048xf32>
    %79 = arith.addf %77, %78 : vector<2x2048xf32>
    %80 = arith.mulf %79, %69 : vector<2x2048xf32>
    %cst_38 = arith.constant 0.254829586 : f32
    %81 = vector.broadcast %cst_38 : f32 to vector<2x2048xf32>
    %82 = arith.addf %80, %81 : vector<2x2048xf32>
    %83 = arith.mulf %82, %69 : vector<2x2048xf32>
    %cst_39 = arith.constant 0.000000e+00 : f32
    %84 = vector.broadcast %cst_39 : f32 to vector<2x2048xf32>
    %85 = arith.subf %84, %63 : vector<2x2048xf32>
    %86 = arith.mulf %85, %63 : vector<2x2048xf32>
    %87 = math.exp %86 : vector<2x2048xf32>
    %88 = arith.mulf %83, %87 : vector<2x2048xf32>
    %cst_40 = arith.constant 1.000000e+00 : f32
    %89 = vector.broadcast %cst_40 : f32 to vector<2x2048xf32>
    %90 = arith.subf %89, %88 : vector<2x2048xf32>
    %91 = arith.mulf %62, %90 : vector<2x2048xf32>
    %cst_41 = arith.constant 1.000000e+00 : f32
    %92 = vector.broadcast %cst_41 : f32 to vector<2x2048xf32>
    %93 = arith.addf %92, %91 : vector<2x2048xf32>
    %94 = arith.mulf %55, %93 : vector<2x2048xf32>
    %c0_42 = arith.constant 0 : index
    %c0_43 = arith.constant 0 : index
    %95 = vector.load %arg6[%c0_42, %c0_43] : memref<2x2048xf32, #tpu.memory_space<vmem>>, vector<2x2048xf32>
    tpu.vector_store %arg6[%c0_42, %c0_43], %94 {strides = array<i32>} : memref<2x2048xf32, #tpu.memory_space<vmem>>, vector<2x2048xf32>,
    return
  }
  func.func @transform_0(%arg0: i32) -> (i32, i32) {
    %c0_i32 = arith.constant 0 : i32
    %c0_i32_0 = arith.constant 0 : i32
    %c0_i32_1 = arith.constant 0 : i32
    return %c0_i32, %c0_i32_0 : i32, i32
  }
  func.func @transform_1(%arg0: i32) -> (i32, i32) {
    %c0_i32 = arith.constant 0 : i32
    %c0_i32_0 = arith.constant 0 : i32
    %c0_i32_1 = arith.constant 0 : i32
    return %c0_i32, %c0_i32_0 : i32, i32
  }
  func.func @transform_2(%arg0: i32) -> (i32, i32) {
    %c0_i32 = arith.constant 0 : i32
    %c0_i32_0 = arith.constant 0 : i32
    %c0_i32_1 = arith.constant 0 : i32
    return %c0_i32, %c0_i32_0 : i32, i32
  }
  func.func @transform_3(%arg0: i32) -> (i32, i32) {
    %c0_i32 = arith.constant 0 : i32
    %c0_i32_0 = arith.constant 0 : i32
    %c0_i32_1 = arith.constant 0 : i32
    return %c0_i32, %c0_i32_0 : i32, i32
  }
  func.func @transform_4(%arg0: i32) -> (i32, i32) {
    %c0_i32 = arith.constant 0 : i32
    %c0_i32_0 = arith.constant 0 : i32
    %c0_i32_1 = arith.constant 0 : i32
    return %c0_i32, %c0_i32_0 : i32, i32
  }
  func.func @transform_5(%arg0: i32) -> (i32, i32) {
    %c0_i32 = arith.constant 0 : i32
    %c0_i32_0 = arith.constant 0 : i32
    %c0_i32_1 = arith.constant 0 : i32
    return %c0_i32, %c0_i32_0 : i32, i32
  }
}

module attributes {stable_mosaic.version = 11 : i64} {
  func.func @_transformer_kernel(%arg0: i32, %arg1: i32, %arg2: memref<1x8x16xf32, #tpu.memory_space<vmem>>, %arg3: memref<1x8x1xf32, #tpu.memory_space<vmem>>, %arg4: memref<1x1x8xf32, #tpu.memory_space<vmem>>, %arg5: memref<1x1x4x256xf32, #tpu.memory_space<vmem>>, %arg6: memref<8x32xf32, #tpu.memory_space<vmem>>, %arg7: memref<8x32xf32, #tpu.memory_space<vmem>>, %arg8: memref<16x256xbf16, #tpu.memory_space<vmem>>, %arg9: memref<1x256xf32, #tpu.memory_space<vmem>>, %arg10: memref<1x8x256x160xbf16, #tpu.memory_space<vmem>>, %arg11: memref<1x8x32x256xbf16, #tpu.memory_space<vmem>>, %arg12: memref<1x1x256xf32, #tpu.memory_space<vmem>>, %arg13: memref<1x256x1024xbf16, #tpu.memory_space<vmem>>, %arg14: memref<1x1x1024xf32, #tpu.memory_space<vmem>>, %arg15: memref<1x1024x256xbf16, #tpu.memory_space<vmem>>, %arg16: memref<1x1x256xf32, #tpu.memory_space<vmem>>, %arg17: memref<256x16xbf16, #tpu.memory_space<vmem>>, %arg18: memref<1x16xf32, #tpu.memory_space<vmem>>, %arg19: memref<1x8x16xf32, #tpu.memory_space<vmem>>, %arg20: memref<1x8x256xf32, #tpu.memory_space<vmem>>) attributes {dimension_semantics = [#tpu.dimension_semantics<parallel>, #tpu.dimension_semantics<arbitrary>], iteration_bounds = array<i64: 2, 2>, scalar_prefetch = 0 : i64, scratch_operands = 0 : i64, tpu.core_type = #tpu.core_type<tc>, window_params = [{transform_indices = @transform_0, window_bounds = array<i64: 1, 8, 16>}, {transform_indices = @transform_1, window_bounds = array<i64: 1, 8, 1>}, {transform_indices = @transform_2, window_bounds = array<i64: 1, 1, 8>}, {transform_indices = @transform_3, window_bounds = array<i64: 1, 1, 4, 256>}, {pipeline_mode = #tpu.pipeline_mode<synchronous>, transform_indices = @transform_4, window_bounds = array<i64: 8, 32>}, {pipeline_mode = #tpu.pipeline_mode<synchronous>, transform_indices = @transform_5, window_bounds = array<i64: 8, 32>}, {pipeline_mode = #tpu.pipeline_mode<synchronous>, transform_indices = @transform_6, window_bounds = array<i64: 16, 256>}, {pipeline_mode = #tpu.pipeline_mode<synchronous>, transform_indices = @transform_7, window_bounds = array<i64: 1, 256>}, {transform_indices = @transform_8, window_bounds = array<i64: 1, 8, 256, 160>}, {transform_indices = @transform_9, window_bounds = array<i64: 1, 8, 32, 256>}, {transform_indices = @transform_10, window_bounds = array<i64: 1, 1, 256>}, {transform_indices = @transform_11, window_bounds = array<i64: 1, 256, 1024>}, {transform_indices = @transform_12, window_bounds = array<i64: 1, 1, 1024>}, {transform_indices = @transform_13, window_bounds = array<i64: 1, 1024, 256>}, {transform_indices = @transform_14, window_bounds = array<i64: 1, 1, 256>}, {pipeline_mode = #tpu.pipeline_mode<synchronous>, transform_indices = @transform_15, window_bounds = array<i64: 256, 16>}, {pipeline_mode = #tpu.pipeline_mode<synchronous>, transform_indices = @transform_16, window_bounds = array<i64: 1, 16>}, {transform_indices = @transform_17, window_bounds = array<i64: 1, 8, 16>}, {transform_indices = @transform_18, window_bounds = array<i64: 1, 8, 256>}]} {
    %c0_i32 = arith.constant 0 : i32
    %0 = arith.cmpi eq, %arg1, %c0_i32 : i32
    %1 = arith.extui %0 : i1 to i32
    %c0_i32_0 = arith.constant 0 : i32
    %2 = arith.cmpi ne, %1, %c0_i32_0 : i32
    scf.if %2 {
      %c0_79 = arith.constant 0 : index
      %c0_80 = arith.constant 0 : index
      %c0_81 = arith.constant 0 : index
      %204 = vector.load %arg2[%c0_79, %c0_80, %c0_81] : memref<1x8x16xf32, #tpu.memory_space<vmem>>, vector<1x8x16xf32>
      %205 = vector.shape_cast %204 : vector<1x8x16xf32> to vector<8x16xf32>
      %206 = arith.truncf %205 : vector<8x16xf32> to vector<8x16xbf16>
      %c0_82 = arith.constant 0 : index
      %c0_83 = arith.constant 0 : index
      %207 = vector.load %arg8[%c0_82, %c0_83] : memref<16x256xbf16, #tpu.memory_space<vmem>>, vector<16x256xbf16>
      %cst_84 = arith.constant dense<0.000000e+00> : vector<8x256xf32>
      %208 = tpu.matmul %206, %207, %cst_84 {dimension_numbers = #tpu.dot_dimension_numbers<[1], [0], [0], [1], [0, 0, 1, 1], [], []>} : vector<8x16xbf16>, vector<16x256xbf16>, vector<8x256xf32> -> vector<8x256xf32>
      %c0_85 = arith.constant 0 : index
      %c0_86 = arith.constant 0 : index
      %209 = vector.load %arg9[%c0_85, %c0_86] : memref<1x256xf32, #tpu.memory_space<vmem>>, vector<1x256xf32>
      %210 = vector.broadcast %209 : vector<1x256xf32> to vector<8x256xf32>
      %211 = arith.addf %208, %210 : vector<8x256xf32>
      %c0_87 = arith.constant 0 : index
      %c0_88 = arith.constant 0 : index
      %c0_89 = arith.constant 0 : index
      %212 = vector.load %arg20[%c0_87, %c0_88, %c0_89] : memref<1x8x256xf32, #tpu.memory_space<vmem>>, vector<1x8x256xf32>
      %213 = vector.shape_cast %212 : vector<1x8x256xf32> to vector<8x256xf32>
      %214 = vector.shape_cast %211 : vector<8x256xf32> to vector<1x8x256xf32>
      tpu.vector_store %arg20[%c0_87, %c0_88, %c0_89], %214 {strides = array<i32>} : memref<1x8x256xf32, #tpu.memory_space<vmem>>, vector<1x8x256xf32>,
    } else {
    }
    %c0 = arith.constant 0 : index
    %c0_1 = arith.constant 0 : index
    %c0_2 = arith.constant 0 : index
    %3 = vector.load %arg20[%c0, %c0_1, %c0_2] : memref<1x8x256xf32, #tpu.memory_space<vmem>>, vector<1x8x256xf32>
    %4 = vector.shape_cast %3 : vector<1x8x256xf32> to vector<8x256xf32>
    %c0_3 = arith.constant 0 : index
    %c0_4 = arith.constant 0 : index
    %5 = vector.load %arg6[%c0_3, %c0_4] : memref<8x32xf32, #tpu.memory_space<vmem>>, vector<8x32xf32>
    %c0_5 = arith.constant 0 : index
    %c0_6 = arith.constant 0 : index
    %6 = vector.load %arg7[%c0_5, %c0_6] : memref<8x32xf32, #tpu.memory_space<vmem>>, vector<8x32xf32>
    %c0_7 = arith.constant 0 : index
    %c0_8 = arith.constant 0 : index
    %c0_9 = arith.constant 0 : index
    %7 = vector.load %arg3[%c0_7, %c0_8, %c0_9] : memref<1x8x1xf32, #tpu.memory_space<vmem>>, vector<1x8x1xf32>
    %8 = vector.shape_cast %7 : vector<1x8x1xf32> to vector<8x1xf32>
    %c0_10 = arith.constant 0 : index
    %c0_11 = arith.constant 0 : index
    %c0_12 = arith.constant 0 : index
    %9 = vector.load %arg4[%c0_10, %c0_11, %c0_12] : memref<1x1x8xf32, #tpu.memory_space<vmem>>, vector<1x1x8xf32>
    %10 = vector.shape_cast %9 : vector<1x1x8xf32> to vector<1x8xf32>
    %11 = vector.broadcast %8 : vector<8x1xf32> to vector<8x8xf32>
    %12 = vector.broadcast %10 : vector<1x8xf32> to vector<8x8xf32>
    %13 = arith.mulf %11, %12 : vector<8x8xf32>
    %cst = arith.constant 5.000000e-01 : f32
    %14 = vector.broadcast %cst : f32 to vector<8x8xf32>
    %15 = arith.cmpf ogt, %13, %14 : vector<8x8xf32>
    %c0_13 = arith.constant 0 : index
    %c0_14 = arith.constant 0 : index
    %c0_15 = arith.constant 0 : index
    %c0_16 = arith.constant 0 : index
    %16 = vector.load %arg5[%c0_13, %c0_14, %c0_15, %c0_16] : memref<1x1x4x256xf32, #tpu.memory_space<vmem>>, vector<1x1x4x256xf32>
    %17 = vector.shape_cast %16 : vector<1x1x4x256xf32> to vector<4x256xf32>
    %18 = vector.extract_strided_slice %17 {offsets = [0, 0], sizes = [1, 256], strides = [1, 1]} : vector<4x256xf32> to vector<1x256xf32>
    %19 = vector.extract_strided_slice %17 {offsets = [1, 0], sizes = [1, 256], strides = [1, 1]} : vector<4x256xf32> to vector<1x256xf32>
    %20 = vector.extract_strided_slice %17 {offsets = [2, 0], sizes = [1, 256], strides = [1, 1]} : vector<4x256xf32> to vector<1x256xf32>
    %21 = vector.extract_strided_slice %17 {offsets = [3, 0], sizes = [1, 256], strides = [1, 1]} : vector<4x256xf32> to vector<1x256xf32>
    %cst_17 = arith.constant dense<0.000000e+00> : vector<8xf32>
    %22 = vector.multi_reduction <add>, %4, %cst_17 [1] : vector<8x256xf32> to vector<8xf32>
    %23 = vector.shape_cast %22 : vector<8xf32> to vector<8x1xf32>
    %cst_18 = arith.constant 2.560000e+02 : f32
    %24 = vector.broadcast %cst_18 : f32 to vector<8x1xf32>
    %25 = arith.divf %23, %24 : vector<8x1xf32>
    %26 = vector.broadcast %25 : vector<8x1xf32> to vector<8x256xf32>
    %27 = arith.subf %4, %26 : vector<8x256xf32>
    %28 = arith.mulf %27, %27 : vector<8x256xf32>
    %cst_19 = arith.constant dense<0.000000e+00> : vector<8xf32>
    %29 = vector.multi_reduction <add>, %28, %cst_19 [1] : vector<8x256xf32> to vector<8xf32>
    %30 = vector.shape_cast %29 : vector<8xf32> to vector<8x1xf32>
    %cst_20 = arith.constant 2.560000e+02 : f32
    %31 = vector.broadcast %cst_20 : f32 to vector<8x1xf32>
    %32 = arith.divf %30, %31 : vector<8x1xf32>
    %cst_21 = arith.constant 9.99999974E-6 : f32
    %33 = vector.broadcast %cst_21 : f32 to vector<8x1xf32>
    %34 = arith.addf %32, %33 : vector<8x1xf32>
    %35 = math.rsqrt %34 : vector<8x1xf32>
    %36 = vector.broadcast %35 : vector<8x1xf32> to vector<8x256xf32>
    %37 = arith.mulf %27, %36 : vector<8x256xf32>
    %38 = vector.broadcast %18 : vector<1x256xf32> to vector<8x256xf32>
    %39 = arith.mulf %38, %37 : vector<8x256xf32>
    %40 = vector.broadcast %20 : vector<1x256xf32> to vector<8x256xf32>
    %41 = arith.addf %39, %40 : vector<8x256xf32>
    %42 = arith.truncf %41 : vector<8x256xf32> to vector<8x256xbf16>
    %43 = vector.shape_cast %42 : vector<8x256xbf16> to vector<1x8x256xbf16>
    %44 = vector.shape_cast %43 : vector<1x8x256xbf16> to vector<1x8x256xbf16>
    %45 = vector.broadcast %44 : vector<1x8x256xbf16> to vector<8x8x256xbf16>
    %c0_22 = arith.constant 0 : index
    %c0_23 = arith.constant 0 : index
    %c0_24 = arith.constant 0 : index
    %c0_25 = arith.constant 0 : index
    %46 = vector.load %arg10[%c0_22, %c0_23, %c0_24, %c0_25] : memref<1x8x256x160xbf16, #tpu.memory_space<vmem>>, vector<1x8x256x160xbf16>
    %47 = vector.shape_cast %46 : vector<1x8x256x160xbf16> to vector<8x256x160xbf16>
    "tpu.trace_start"() <{level = 10 : i32, message = "hsd,hde->hse"}> : () -> ()
    %cst_26 = arith.constant dense<0.000000e+00> : vector<8x8x160xf32>
    %48 = tpu.matmul %45, %47, %cst_26 {dimension_numbers = #tpu.dot_dimension_numbers<[2], [1], [1], [2], [0, 0, 0, 1, 1, 2], [0], [0]>} : vector<8x8x256xbf16>, vector<8x256x160xbf16>, vector<8x8x160xf32> -> vector<8x8x160xf32>
    "tpu.trace_stop"() : () -> ()
    %49 = vector.extract_strided_slice %48 {offsets = [0, 0, 0], sizes = [8, 8, 32], strides = [1, 1, 1]} : vector<8x8x160xf32> to vector<8x8x32xf32>
    %50 = vector.shape_cast %5 : vector<8x32xf32> to vector<1x8x32xf32>
    %51 = vector.broadcast %50 : vector<1x8x32xf32> to vector<8x8x32xf32>
    %52 = arith.mulf %49, %51 : vector<8x8x32xf32>
    %53 = vector.extract_strided_slice %48 {offsets = [0, 0, 32], sizes = [8, 8, 32], strides = [1, 1, 1]} : vector<8x8x160xf32> to vector<8x8x32xf32>
    %54 = vector.shape_cast %6 : vector<8x32xf32> to vector<1x8x32xf32>
    %55 = vector.broadcast %54 : vector<1x8x32xf32> to vector<8x8x32xf32>
    %56 = arith.mulf %53, %55 : vector<8x8x32xf32>
    %57 = arith.addf %52, %56 : vector<8x8x32xf32>
    %58 = vector.extract_strided_slice %48 {offsets = [0, 0, 64], sizes = [8, 8, 32], strides = [1, 1, 1]} : vector<8x8x160xf32> to vector<8x8x32xf32>
    %59 = vector.shape_cast %5 : vector<8x32xf32> to vector<1x8x32xf32>
    %60 = vector.broadcast %59 : vector<1x8x32xf32> to vector<8x8x32xf32>
    %61 = arith.mulf %58, %60 : vector<8x8x32xf32>
    %62 = vector.extract_strided_slice %48 {offsets = [0, 0, 96], sizes = [8, 8, 32], strides = [1, 1, 1]} : vector<8x8x160xf32> to vector<8x8x32xf32>
    %63 = vector.shape_cast %6 : vector<8x32xf32> to vector<1x8x32xf32>
    %64 = vector.broadcast %63 : vector<1x8x32xf32> to vector<8x8x32xf32>
    %65 = arith.mulf %62, %64 : vector<8x8x32xf32>
    %66 = arith.addf %61, %65 : vector<8x8x32xf32>
    %67 = vector.extract_strided_slice %48 {offsets = [0, 0, 128], sizes = [8, 8, 32], strides = [1, 1, 1]} : vector<8x8x160xf32> to vector<8x8x32xf32>
    %68 = arith.truncf %57 : vector<8x8x32xf32> to vector<8x8x32xbf16>
    %69 = arith.truncf %66 : vector<8x8x32xf32> to vector<8x8x32xbf16>
    "tpu.trace_start"() <{level = 10 : i32, message = "hqd,hkd->hqk"}> : () -> ()
    %cst_27 = arith.constant dense<0.000000e+00> : vector<8x8x8xf32>
    %70 = tpu.matmul %68, %69, %cst_27 {dimension_numbers = #tpu.dot_dimension_numbers<[2], [2], [1], [1], [0, 0, 0, 1, 1, 1], [0], [0]>} : vector<8x8x32xbf16>, vector<8x8x32xbf16>, vector<8x8x8xf32> -> vector<8x8x8xf32>
    "tpu.trace_stop"() : () -> ()
    %71 = vector.shape_cast %15 : vector<8x8xi1> to vector<1x8x8xi1>
    %72 = vector.broadcast %71 : vector<1x8x8xi1> to vector<8x8x8xi1>
    %cst_28 = arith.constant -1.000000e+09 : f32
    %73 = vector.broadcast %cst_28 : f32 to vector<8x8x8xf32>
    %74 = arith.select %72, %70, %73 : vector<8x8x8xi1>, vector<8x8x8xf32>
    %cst_29 = arith.constant dense<0xFF800000> : vector<8x8xf32>
    %75 = vector.multi_reduction <maximumf>, %74, %cst_29 [2] : vector<8x8x8xf32> to vector<8x8xf32>
    %76 = vector.shape_cast %75 : vector<8x8xf32> to vector<8x8x1xf32>
    %77 = vector.broadcast %76 : vector<8x8x1xf32> to vector<8x8x8xf32>
    %78 = arith.subf %74, %77 : vector<8x8x8xf32>
    %79 = math.exp %78 : vector<8x8x8xf32>
    %cst_30 = arith.constant dense<0.000000e+00> : vector<8x8xf32>
    %80 = vector.multi_reduction <add>, %79, %cst_30 [2] : vector<8x8x8xf32> to vector<8x8xf32>
    %81 = vector.shape_cast %80 : vector<8x8xf32> to vector<8x8x1xf32>
    %82 = tpu.reciprocal %81 {approx = true} : vector<8x8x1xf32> -> vector<8x8x1xf32>
    %83 = vector.broadcast %82 : vector<8x8x1xf32> to vector<8x8x8xf32>
    %84 = arith.mulf %79, %83 : vector<8x8x8xf32>
    %85 = arith.truncf %84 : vector<8x8x8xf32> to vector<8x8x8xbf16>
    %86 = arith.truncf %67 : vector<8x8x32xf32> to vector<8x8x32xbf16>
    "tpu.trace_start"() <{level = 10 : i32, message = "hqk,hkd->hqd"}> : () -> ()
    %cst_31 = arith.constant dense<0.000000e+00> : vector<8x8x32xf32>
    %87 = tpu.matmul %85, %86, %cst_31 {dimension_numbers = #tpu.dot_dimension_numbers<[2], [1], [1], [2], [0, 0, 0, 1, 1, 2], [0], [0]>} : vector<8x8x8xbf16>, vector<8x8x32xbf16>, vector<8x8x32xf32> -> vector<8x8x32xf32>
    "tpu.trace_stop"() : () -> ()
    %88 = arith.truncf %87 : vector<8x8x32xf32> to vector<8x8x32xbf16>
    %c0_32 = arith.constant 0 : index
    %c0_33 = arith.constant 0 : index
    %c0_34 = arith.constant 0 : index
    %c0_35 = arith.constant 0 : index
    %89 = vector.load %arg11[%c0_32, %c0_33, %c0_34, %c0_35] : memref<1x8x32x256xbf16, #tpu.memory_space<vmem>>, vector<1x8x32x256xbf16>
    %90 = vector.shape_cast %89 : vector<1x8x32x256xbf16> to vector<8x32x256xbf16>
    "tpu.trace_start"() <{level = 10 : i32, message = "hsk,hkd->hsd"}> : () -> ()
    %cst_36 = arith.constant dense<0.000000e+00> : vector<8x8x256xf32>
    %91 = tpu.matmul %88, %90, %cst_36 {dimension_numbers = #tpu.dot_dimension_numbers<[2], [1], [1], [2], [0, 0, 0, 1, 1, 2], [0], [0]>} : vector<8x8x32xbf16>, vector<8x32x256xbf16>, vector<8x8x256xf32> -> vector<8x8x256xf32>
    "tpu.trace_stop"() : () -> ()
    %92 = vector.extract_strided_slice %91 {offsets = [0, 0, 0], sizes = [1, 8, 256], strides = [1, 1, 1]} : vector<8x8x256xf32> to vector<1x8x256xf32>
    %93 = vector.shape_cast %92 : vector<1x8x256xf32> to vector<8x256xf32>
    %94 = vector.extract_strided_slice %91 {offsets = [1, 0, 0], sizes = [1, 8, 256], strides = [1, 1, 1]} : vector<8x8x256xf32> to vector<1x8x256xf32>
    %95 = vector.shape_cast %94 : vector<1x8x256xf32> to vector<8x256xf32>
    %96 = arith.addf %93, %95 : vector<8x256xf32>
    %97 = vector.extract_strided_slice %91 {offsets = [2, 0, 0], sizes = [1, 8, 256], strides = [1, 1, 1]} : vector<8x8x256xf32> to vector<1x8x256xf32>
    %98 = vector.shape_cast %97 : vector<1x8x256xf32> to vector<8x256xf32>
    %99 = arith.addf %96, %98 : vector<8x256xf32>
    %100 = vector.extract_strided_slice %91 {offsets = [3, 0, 0], sizes = [1, 8, 256], strides = [1, 1, 1]} : vector<8x8x256xf32> to vector<1x8x256xf32>
    %101 = vector.shape_cast %100 : vector<1x8x256xf32> to vector<8x256xf32>
    %102 = arith.addf %99, %101 : vector<8x256xf32>
    %103 = vector.extract_strided_slice %91 {offsets = [4, 0, 0], sizes = [1, 8, 256], strides = [1, 1, 1]} : vector<8x8x256xf32> to vector<1x8x256xf32>
    %104 = vector.shape_cast %103 : vector<1x8x256xf32> to vector<8x256xf32>
    %105 = arith.addf %102, %104 : vector<8x256xf32>
    %106 = vector.extract_strided_slice %91 {offsets = [5, 0, 0], sizes = [1, 8, 256], strides = [1, 1, 1]} : vector<8x8x256xf32> to vector<1x8x256xf32>
    %107 = vector.shape_cast %106 : vector<1x8x256xf32> to vector<8x256xf32>
    %108 = arith.addf %105, %107 : vector<8x256xf32>
    %109 = vector.extract_strided_slice %91 {offsets = [6, 0, 0], sizes = [1, 8, 256], strides = [1, 1, 1]} : vector<8x8x256xf32> to vector<1x8x256xf32>
    %110 = vector.shape_cast %109 : vector<1x8x256xf32> to vector<8x256xf32>
    %111 = arith.addf %108, %110 : vector<8x256xf32>
    %112 = vector.extract_strided_slice %91 {offsets = [7, 0, 0], sizes = [1, 8, 256], strides = [1, 1, 1]} : vector<8x8x256xf32> to vector<1x8x256xf32>
    %113 = vector.shape_cast %112 : vector<1x8x256xf32> to vector<8x256xf32>
    %114 = arith.addf %111, %113 : vector<8x256xf32>
    %c0_37 = arith.constant 0 : index
    %c0_38 = arith.constant 0 : index
    %c0_39 = arith.constant 0 : index
    %115 = vector.load %arg12[%c0_37, %c0_38, %c0_39] : memref<1x1x256xf32, #tpu.memory_space<vmem>>, vector<1x1x256xf32>
    %116 = vector.shape_cast %115 : vector<1x1x256xf32> to vector<1x256xf32>
    %117 = vector.broadcast %116 : vector<1x256xf32> to vector<8x256xf32>
    %118 = arith.addf %114, %117 : vector<8x256xf32>
    %119 = arith.addf %4, %118 : vector<8x256xf32>
    %cst_40 = arith.constant dense<0.000000e+00> : vector<8xf32>
    %120 = vector.multi_reduction <add>, %119, %cst_40 [1] : vector<8x256xf32> to vector<8xf32>
    %121 = vector.shape_cast %120 : vector<8xf32> to vector<8x1xf32>
    %cst_41 = arith.constant 2.560000e+02 : f32
    %122 = vector.broadcast %cst_41 : f32 to vector<8x1xf32>
    %123 = arith.divf %121, %122 : vector<8x1xf32>
    %124 = vector.broadcast %123 : vector<8x1xf32> to vector<8x256xf32>
    %125 = arith.subf %119, %124 : vector<8x256xf32>
    %126 = arith.mulf %125, %125 : vector<8x256xf32>
    %cst_42 = arith.constant dense<0.000000e+00> : vector<8xf32>
    %127 = vector.multi_reduction <add>, %126, %cst_42 [1] : vector<8x256xf32> to vector<8xf32>
    %128 = vector.shape_cast %127 : vector<8xf32> to vector<8x1xf32>
    %cst_43 = arith.constant 2.560000e+02 : f32
    %129 = vector.broadcast %cst_43 : f32 to vector<8x1xf32>
    %130 = arith.divf %128, %129 : vector<8x1xf32>
    %cst_44 = arith.constant 9.99999974E-6 : f32
    %131 = vector.broadcast %cst_44 : f32 to vector<8x1xf32>
    %132 = arith.addf %130, %131 : vector<8x1xf32>
    %133 = math.rsqrt %132 : vector<8x1xf32>
    %134 = vector.broadcast %133 : vector<8x1xf32> to vector<8x256xf32>
    %135 = arith.mulf %125, %134 : vector<8x256xf32>
    %136 = vector.broadcast %19 : vector<1x256xf32> to vector<8x256xf32>
    %137 = arith.mulf %136, %135 : vector<8x256xf32>
    %138 = vector.broadcast %21 : vector<1x256xf32> to vector<8x256xf32>
    %139 = arith.addf %137, %138 : vector<8x256xf32>
    %140 = arith.truncf %139 : vector<8x256xf32> to vector<8x256xbf16>
    %c0_45 = arith.constant 0 : index
    %c0_46 = arith.constant 0 : index
    %c0_47 = arith.constant 0 : index
    %141 = vector.load %arg13[%c0_45, %c0_46, %c0_47] : memref<1x256x1024xbf16, #tpu.memory_space<vmem>>, vector<1x256x1024xbf16>
    %142 = vector.shape_cast %141 : vector<1x256x1024xbf16> to vector<256x1024xbf16>
    %cst_48 = arith.constant dense<0.000000e+00> : vector<8x1024xf32>
    %143 = tpu.matmul %140, %142, %cst_48 {dimension_numbers = #tpu.dot_dimension_numbers<[1], [0], [0], [1], [0, 0, 1, 1], [], []>} : vector<8x256xbf16>, vector<256x1024xbf16>, vector<8x1024xf32> -> vector<8x1024xf32>
    %c0_49 = arith.constant 0 : index
    %c0_50 = arith.constant 0 : index
    %c0_51 = arith.constant 0 : index
    %144 = vector.load %arg14[%c0_49, %c0_50, %c0_51] : memref<1x1x1024xf32, #tpu.memory_space<vmem>>, vector<1x1x1024xf32>
    %145 = vector.shape_cast %144 : vector<1x1x1024xf32> to vector<1x1024xf32>
    %146 = vector.broadcast %145 : vector<1x1024xf32> to vector<8x1024xf32>
    %147 = arith.addf %143, %146 : vector<8x1024xf32>
    %cst_52 = arith.constant 5.000000e-01 : f32
    %148 = vector.broadcast %cst_52 : f32 to vector<8x1024xf32>
    %149 = arith.mulf %148, %147 : vector<8x1024xf32>
    %cst_53 = arith.constant 0.707106769 : f32
    %150 = vector.broadcast %cst_53 : f32 to vector<8x1024xf32>
    %151 = arith.mulf %147, %150 : vector<8x1024xf32>
    %cst_54 = arith.constant 0.000000e+00 : f32
    %152 = vector.broadcast %cst_54 : f32 to vector<8x1024xf32>
    %153 = arith.cmpf olt, %151, %152 : vector<8x1024xf32>
    %cst_55 = arith.constant -1.000000e+00 : f32
    %cst_56 = arith.constant 1.000000e+00 : f32
    %154 = vector.broadcast %cst_55 : f32 to vector<8x1024xf32>
    %155 = vector.broadcast %cst_56 : f32 to vector<8x1024xf32>
    %156 = arith.select %153, %154, %155 : vector<8x1024xi1>, vector<8x1024xf32>
    %157 = math.absf %151 : vector<8x1024xf32>
    %cst_57 = arith.constant 0.327591091 : f32
    %158 = vector.broadcast %cst_57 : f32 to vector<8x1024xf32>
    %159 = arith.mulf %158, %157 : vector<8x1024xf32>
    %cst_58 = arith.constant 1.000000e+00 : f32
    %160 = vector.broadcast %cst_58 : f32 to vector<8x1024xf32>
    %161 = arith.addf %160, %159 : vector<8x1024xf32>
    %cst_59 = arith.constant 1.000000e+00 : f32
    %162 = vector.broadcast %cst_59 : f32 to vector<8x1024xf32>
    %163 = arith.divf %162, %161 : vector<8x1024xf32>
    %cst_60 = arith.constant 1.06140542 : f32
    %164 = vector.broadcast %cst_60 : f32 to vector<8x1024xf32>
    %165 = arith.mulf %164, %163 : vector<8x1024xf32>
    %cst_61 = arith.constant -1.45315206 : f32
    %166 = vector.broadcast %cst_61 : f32 to vector<8x1024xf32>
    %167 = arith.addf %165, %166 : vector<8x1024xf32>
    %168 = arith.mulf %167, %163 : vector<8x1024xf32>
    %cst_62 = arith.constant 1.42141378 : f32
    %169 = vector.broadcast %cst_62 : f32 to vector<8x1024xf32>
    %170 = arith.addf %168, %169 : vector<8x1024xf32>
    %171 = arith.mulf %170, %163 : vector<8x1024xf32>
    %cst_63 = arith.constant -0.284496725 : f32
    %172 = vector.broadcast %cst_63 : f32 to vector<8x1024xf32>
    %173 = arith.addf %171, %172 : vector<8x1024xf32>
    %174 = arith.mulf %173, %163 : vector<8x1024xf32>
    %cst_64 = arith.constant 0.254829586 : f32
    %175 = vector.broadcast %cst_64 : f32 to vector<8x1024xf32>
    %176 = arith.addf %174, %175 : vector<8x1024xf32>
    %177 = arith.mulf %176, %163 : vector<8x1024xf32>
    %cst_65 = arith.constant 0.000000e+00 : f32
    %178 = vector.broadcast %cst_65 : f32 to vector<8x1024xf32>
    %179 = arith.subf %178, %157 : vector<8x1024xf32>
    %180 = arith.mulf %179, %157 : vector<8x1024xf32>
    %181 = math.exp %180 : vector<8x1024xf32>
    %182 = arith.mulf %177, %181 : vector<8x1024xf32>
    %cst_66 = arith.constant 1.000000e+00 : f32
    %183 = vector.broadcast %cst_66 : f32 to vector<8x1024xf32>
    %184 = arith.subf %183, %182 : vector<8x1024xf32>
    %185 = arith.mulf %156, %184 : vector<8x1024xf32>
    %cst_67 = arith.constant 1.000000e+00 : f32
    %186 = vector.broadcast %cst_67 : f32 to vector<8x1024xf32>
    %187 = arith.addf %186, %185 : vector<8x1024xf32>
    %188 = arith.mulf %149, %187 : vector<8x1024xf32>
    %189 = arith.truncf %188 : vector<8x1024xf32> to vector<8x1024xbf16>
    %c0_68 = arith.constant 0 : index
    %c0_69 = arith.constant 0 : index
    %c0_70 = arith.constant 0 : index
    %190 = vector.load %arg15[%c0_68, %c0_69, %c0_70] : memref<1x1024x256xbf16, #tpu.memory_space<vmem>>, vector<1x1024x256xbf16>
    %191 = vector.shape_cast %190 : vector<1x1024x256xbf16> to vector<1024x256xbf16>
    %cst_71 = arith.constant dense<0.000000e+00> : vector<8x256xf32>
    %192 = tpu.matmul %189, %191, %cst_71 {dimension_numbers = #tpu.dot_dimension_numbers<[1], [0], [0], [1], [0, 0, 1, 1], [], []>} : vector<8x1024xbf16>, vector<1024x256xbf16>, vector<8x256xf32> -> vector<8x256xf32>
    %c0_72 = arith.constant 0 : index
    %c0_73 = arith.constant 0 : index
    %c0_74 = arith.constant 0 : index
    %193 = vector.load %arg16[%c0_72, %c0_73, %c0_74] : memref<1x1x256xf32, #tpu.memory_space<vmem>>, vector<1x1x256xf32>
    %194 = vector.shape_cast %193 : vector<1x1x256xf32> to vector<1x256xf32>
    %195 = vector.broadcast %194 : vector<1x256xf32> to vector<8x256xf32>
    %196 = arith.addf %192, %195 : vector<8x256xf32>
    %197 = arith.addf %119, %196 : vector<8x256xf32>
    %c0_75 = arith.constant 0 : index
    %c0_76 = arith.constant 0 : index
    %c0_77 = arith.constant 0 : index
    %198 = vector.load %arg20[%c0_75, %c0_76, %c0_77] : memref<1x8x256xf32, #tpu.memory_space<vmem>>, vector<1x8x256xf32>
    %199 = vector.shape_cast %198 : vector<1x8x256xf32> to vector<8x256xf32>
    %200 = vector.shape_cast %197 : vector<8x256xf32> to vector<1x8x256xf32>
    tpu.vector_store %arg20[%c0_75, %c0_76, %c0_77], %200 {strides = array<i32>} : memref<1x8x256xf32, #tpu.memory_space<vmem>>, vector<1x8x256xf32>,
    %c1_i32 = arith.constant 1 : i32
    %201 = arith.cmpi eq, %arg1, %c1_i32 : i32
    %202 = arith.extui %201 : i1 to i32
    %c0_i32_78 = arith.constant 0 : i32
    %203 = arith.cmpi ne, %202, %c0_i32_78 : i32
    scf.if %203 {
      %204 = arith.truncf %197 : vector<8x256xf32> to vector<8x256xbf16>
      %c0_79 = arith.constant 0 : index
      %c0_80 = arith.constant 0 : index
      %205 = vector.load %arg17[%c0_79, %c0_80] : memref<256x16xbf16, #tpu.memory_space<vmem>>, vector<256x16xbf16>
      %cst_81 = arith.constant dense<0.000000e+00> : vector<8x16xf32>
      %206 = tpu.matmul %204, %205, %cst_81 {dimension_numbers = #tpu.dot_dimension_numbers<[1], [0], [0], [1], [0, 0, 1, 1], [], []>} : vector<8x256xbf16>, vector<256x16xbf16>, vector<8x16xf32> -> vector<8x16xf32>
      %c0_82 = arith.constant 0 : index
      %c0_83 = arith.constant 0 : index
      %207 = vector.load %arg18[%c0_82, %c0_83] : memref<1x16xf32, #tpu.memory_space<vmem>>, vector<1x16xf32>
      %208 = vector.broadcast %207 : vector<1x16xf32> to vector<8x16xf32>
      %209 = arith.addf %206, %208 : vector<8x16xf32>
      %c0_84 = arith.constant 0 : index
      %c0_85 = arith.constant 0 : index
      %c0_86 = arith.constant 0 : index
      %210 = vector.load %arg19[%c0_84, %c0_85, %c0_86] : memref<1x8x16xf32, #tpu.memory_space<vmem>>, vector<1x8x16xf32>
      %211 = vector.shape_cast %210 : vector<1x8x16xf32> to vector<8x16xf32>
      %212 = vector.shape_cast %209 : vector<8x16xf32> to vector<1x8x16xf32>
      tpu.vector_store %arg19[%c0_84, %c0_85, %c0_86], %212 {strides = array<i32>} : memref<1x8x16xf32, #tpu.memory_space<vmem>>, vector<1x8x16xf32>,
    } else {
    }
    return
  }
  func.func @transform_0(%arg0: i32, %arg1: i32) -> (i32, i32, i32) {
    %c0_i32 = arith.constant 0 : i32
    %c0_i32_0 = arith.constant 0 : i32
    %c0_i32_1 = arith.constant 0 : i32
    return %arg0, %c0_i32, %c0_i32_0 : i32, i32, i32
  }
  func.func @transform_1(%arg0: i32, %arg1: i32) -> (i32, i32, i32) {
    %c0_i32 = arith.constant 0 : i32
    %c0_i32_0 = arith.constant 0 : i32
    %c0_i32_1 = arith.constant 0 : i32
    return %arg0, %c0_i32, %c0_i32_0 : i32, i32, i32
  }
  func.func @transform_2(%arg0: i32, %arg1: i32) -> (i32, i32, i32) {
    %c0_i32 = arith.constant 0 : i32
    %c0_i32_0 = arith.constant 0 : i32
    %c0_i32_1 = arith.constant 0 : i32
    return %arg0, %c0_i32, %c0_i32_0 : i32, i32, i32
  }
  func.func @transform_3(%arg0: i32, %arg1: i32) -> (i32, i32, i32, i32) {
    %c0_i32 = arith.constant 0 : i32
    %c0_i32_0 = arith.constant 0 : i32
    %c0_i32_1 = arith.constant 0 : i32
    return %arg0, %arg1, %c0_i32, %c0_i32_0 : i32, i32, i32, i32
  }
  func.func @transform_4(%arg0: i32, %arg1: i32) -> (i32, i32) {
    %c0_i32 = arith.constant 0 : i32
    %c0_i32_0 = arith.constant 0 : i32
    %c0_i32_1 = arith.constant 0 : i32
    return %c0_i32, %c0_i32_0 : i32, i32
  }
  func.func @transform_5(%arg0: i32, %arg1: i32) -> (i32, i32) {
    %c0_i32 = arith.constant 0 : i32
    %c0_i32_0 = arith.constant 0 : i32
    %c0_i32_1 = arith.constant 0 : i32
    return %c0_i32, %c0_i32_0 : i32, i32
  }
  func.func @transform_6(%arg0: i32, %arg1: i32) -> (i32, i32) {
    %c0_i32 = arith.constant 0 : i32
    %c0_i32_0 = arith.constant 0 : i32
    %c0_i32_1 = arith.constant 0 : i32
    return %c0_i32, %c0_i32_0 : i32, i32
  }
  func.func @transform_7(%arg0: i32, %arg1: i32) -> (i32, i32) {
    %c0_i32 = arith.constant 0 : i32
    %c0_i32_0 = arith.constant 0 : i32
    %c0_i32_1 = arith.constant 0 : i32
    return %c0_i32, %c0_i32_0 : i32, i32
  }
  func.func @transform_8(%arg0: i32, %arg1: i32) -> (i32, i32, i32, i32) {
    %c0_i32 = arith.constant 0 : i32
    %c0_i32_0 = arith.constant 0 : i32
    %c0_i32_1 = arith.constant 0 : i32
    %c0_i32_2 = arith.constant 0 : i32
    return %arg1, %c0_i32, %c0_i32_0, %c0_i32_1 : i32, i32, i32, i32
  }
  func.func @transform_9(%arg0: i32, %arg1: i32) -> (i32, i32, i32, i32) {
    %c0_i32 = arith.constant 0 : i32
    %c0_i32_0 = arith.constant 0 : i32
    %c0_i32_1 = arith.constant 0 : i32
    %c0_i32_2 = arith.constant 0 : i32
    return %arg1, %c0_i32, %c0_i32_0, %c0_i32_1 : i32, i32, i32, i32
  }
  func.func @transform_10(%arg0: i32, %arg1: i32) -> (i32, i32, i32) {
    %c0_i32 = arith.constant 0 : i32
    %c0_i32_0 = arith.constant 0 : i32
    %c0_i32_1 = arith.constant 0 : i32
    return %arg1, %c0_i32, %c0_i32_0 : i32, i32, i32
  }
  func.func @transform_11(%arg0: i32, %arg1: i32) -> (i32, i32, i32) {
    %c0_i32 = arith.constant 0 : i32
    %c0_i32_0 = arith.constant 0 : i32
    %c0_i32_1 = arith.constant 0 : i32
    return %arg1, %c0_i32, %c0_i32_0 : i32, i32, i32
  }
  func.func @transform_12(%arg0: i32, %arg1: i32) -> (i32, i32, i32) {
    %c0_i32 = arith.constant 0 : i32
    %c0_i32_0 = arith.constant 0 : i32
    %c0_i32_1 = arith.constant 0 : i32
    return %arg1, %c0_i32, %c0_i32_0 : i32, i32, i32
  }
  func.func @transform_13(%arg0: i32, %arg1: i32) -> (i32, i32, i32) {
    %c0_i32 = arith.constant 0 : i32
    %c0_i32_0 = arith.constant 0 : i32
    %c0_i32_1 = arith.constant 0 : i32
    return %arg1, %c0_i32, %c0_i32_0 : i32, i32, i32
  }
  func.func @transform_14(%arg0: i32, %arg1: i32) -> (i32, i32, i32) {
    %c0_i32 = arith.constant 0 : i32
    %c0_i32_0 = arith.constant 0 : i32
    %c0_i32_1 = arith.constant 0 : i32
    return %arg1, %c0_i32, %c0_i32_0 : i32, i32, i32
  }
  func.func @transform_15(%arg0: i32, %arg1: i32) -> (i32, i32) {
    %c0_i32 = arith.constant 0 : i32
    %c0_i32_0 = arith.constant 0 : i32
    %c0_i32_1 = arith.constant 0 : i32
    return %c0_i32, %c0_i32_0 : i32, i32
  }
  func.func @transform_16(%arg0: i32, %arg1: i32) -> (i32, i32) {
    %c0_i32 = arith.constant 0 : i32
    %c0_i32_0 = arith.constant 0 : i32
    %c0_i32_1 = arith.constant 0 : i32
    return %c0_i32, %c0_i32_0 : i32, i32
  }
  func.func @transform_17(%arg0: i32, %arg1: i32) -> (i32, i32, i32) {
    %c0_i32 = arith.constant 0 : i32
    %c0_i32_0 = arith.constant 0 : i32
    %c0_i32_1 = arith.constant 0 : i32
    return %arg0, %c0_i32, %c0_i32_0 : i32, i32, i32
  }
  func.func @transform_18(%arg0: i32, %arg1: i32) -> (i32, i32, i32) {
    %c0_i32 = arith.constant 0 : i32
    %c0_i32_0 = arith.constant 0 : i32
    %c0_i32_1 = arith.constant 0 : i32
    return %arg0, %c0_i32, %c0_i32_0 : i32, i32, i32
  }
}

</mosaic_0001>

<bundles_post_ra>
// kernel: transformer_forward.2
= control target key start
LH: loop header
LB: loop body
LE: loop exit
PB: predicated region body
PF: predicated region fallthrough
CT: control target
= control target key end

     0   :  { %10 = vsyncpa [#allocation3], 0  ;;  %s2753_s0 = inlined_call_operand.vmem [shape: f32[2,128], index: 0, kind: input, shape index: {}]   ;;  %s2754_s1 = inlined_call_operand.hbm [shape: bf16[128,128], index: 1, kind: input, shape index: {}]   ;;  %s2755_s2 = inlined_call_operand.hbm [shape: f32[1,128], index: 2, kind: input, shape index: {}]   ;;  %s2756_s3 = inlined_call_operand.hbm [shape: bf16[128,2048], index: 3, kind: input, shape index: {}]   ;;  %s2757_s4 = inlined_call_operand.hbm [shape: f32[1,2048], index: 4, kind: input, shape index: {}]   ;;  %s2758_s5 = inlined_call_operand.vmem [shape: f32[2,2048], index: 5, kind: output, shape index: {}]  }
   0x1   :  { %11 = vsyncpa [#allocation5], 0 }
   0x2   :  { %12 = vsyncpa [#allocation8], 0  ;;  %s2272_s18 = smov [#allocation4]   ;;  %s2273_s20 = smov [#allocation2]  }
   0x3   :  { %s33_s19 = sshll.u32 %s2272_s18, 4  ;;  %s20_s21 = sshll.u32 %s2273_s20, 4  ;;  %s34_s19 = int_to_ptr.vmem [resolvable:$true] %s33_s19  ;;  %s2314_s21 = int_to_ptr.vmem [resolvable:$true] %s20_s21 }
   0x4   :  { %s2178_s24 = scalar_lea.hbm %s2755_s2, 16 }
   0x5   :  { %p2179_p0 = scmp.ne.s32.totalorder %s2755_s2, %s2178_s24  ;;  %p2182_p1 = scmp.lt.u32.totalorder %s2178_s24, %s2755_s2 }
   0x7   :  { %p2184_p2 = pnand %p2182_p1, %p2179_p0 }
   0x9   :  { %2187 = shalt.err (!%p2184_p2)
}
   0xa   :  { %s2188_s29 = scalar_lea.vmem %s34_s19, 16  ;;  %s2192_s30 = scalar_lea.vmem %s34_s19, 32 }
   0xb   :  { %p2189_p3 = scmp.ne.s32.totalorder %s34_s19, %s2188_s29  ;;  %p2193_p4 = scmp.lt.s32.totalorder %s34_s19, %s34_s19 }
   0xc   :  { %p2194_p5 = scmp.lt.s32.totalorder %s2192_s30, %s2188_s29 }
   0xe   :  { %p2195_p6 = por %p2194_p5, %p2193_p4 }
  0x10   :  { %p2196_p7 = pnand %p2195_p6, %p2189_p3 }
  0x12   :  { %2199 = shalt.err (!%p2196_p7)
}
  0x13   :  { %36 = dma.hbm_to_vmem [thread:$0]  %s2755_s2, 16, %s34_s19, [#allocation5]  }
  0x14   :  { %s2200_s10 = scalar_lea.hbm %s2754_s1, 1024 }
  0x15   :  { %p2201_p8 = scmp.ne.s32.totalorder %s2754_s1, %s2200_s10  ;;  %p2204_p9 = scmp.lt.u32.totalorder %s2200_s10, %s2754_s1 }
  0x17   :  { %p2206_p10 = pnand %p2204_p9, %p2201_p8 }
  0x19   :  { %2209 = shalt.err (!%p2206_p10)
}
  0x1a   :  { %s2210_s15 = scalar_lea.vmem %s2314_s21, 1024  ;;  %p2215_p12 = scmp.lt.s32.totalorder %s2314_s21, %s2314_s21 }
  0x1b   :  { %p2211_p11 = scmp.ne.s32.totalorder %s2314_s21, %s2210_s15  ;;  %p2216_p13 = scmp.lt.s32.totalorder %s2210_s15, %s2210_s15 }
  0x1d   :  { %p2217_p0 = por %p2216_p13, %p2215_p12 }
  0x1f   :  { %p2218_p1 = pnand %p2217_p0, %p2211_p11 }
  0x21   :  { %2221 = shalt.err (!%p2218_p1)
}
  0x22   :  { %s2274_s2 = smov 64   ;;  %s2275_s16 = smov 4  }
  0x23   :  { %26 = dma.hbm_to_vmem [thread:$0]  %s2754_s1, 1024, %s2314_s21, [#allocation3], %s2274_s2, %s2274_s2, %s2275_s16  }
  0x24   :  { %s2276_s19 = smov [#allocation6]   ;;  %s2277_s22 = smov [#allocation7]  }
  0x25   :  { %s42_s20 = sshll.u32 %s2276_s19, 4  ;;  %s55_s23 = sshll.u32 %s2277_s22, 4  ;;  %s43_s20 = int_to_ptr.vmem [resolvable:$true] %s42_s20  ;;  %s56_s23 = int_to_ptr.vmem [resolvable:$true] %s55_s23 }
  0x26   :  { %s2222_s26 = scalar_lea.hbm %s2756_s3, 16384 }
  0x27   :  { %p2223_p2 = scmp.ne.s32.totalorder %s2756_s3, %s2222_s26  ;;  %p2226_p3 = scmp.lt.u32.totalorder %s2222_s26, %s2756_s3 }
  0x29   :  { %p2228_p4 = pnand %p2226_p3, %p2223_p2 }
  0x2b   :  { %2231 = shalt.err (!%p2228_p4)
}
  0x2c   :  { %s2232_s1 = scalar_lea.vmem %s43_s20, 16384  ;;  %p2237_p6 = scmp.lt.s32.totalorder %s43_s20, %s43_s20 }
  0x2d   :  { %p2233_p5 = scmp.ne.s32.totalorder %s43_s20, %s2232_s1  ;;  %p2238_p7 = scmp.lt.s32.totalorder %s2232_s1, %s2232_s1 }
  0x2f   :  { %p2239_p8 = por %p2238_p7, %p2237_p6 }
  0x31   :  { %p2240_p9 = pnand %p2239_p8, %p2233_p5 }
  0x33   :  { %2243 = shalt.err (!%p2240_p9)
}
  0x34   :  { %s2278_s21 = smov 1024   ;;  %s2244_s10 = scalar_lea.hbm %s2757_s4, 256 }
  0x35   :  { %48 = dma.hbm_to_vmem [thread:$0]  %s2756_s3, 16384, %s43_s20, [#allocation5], %s2278_s21, %s2278_s21, %s2274_s2  }
  0x36   :  { %p2245_p10 = scmp.ne.s32.totalorder %s2757_s4, %s2244_s10  ;;  %p2248_p11 = scmp.lt.u32.totalorder %s2244_s10, %s2757_s4 }
  0x38   :  { %p2250_p12 = pnand %p2248_p11, %p2245_p10 }
  0x3a   :  { %2253 = shalt.err (!%p2250_p12)
}
  0x3b   :  { %s2254_s15 = scalar_lea.vmem %s56_s23, 256  ;;  %p2259_p0 = scmp.lt.s32.totalorder %s56_s23, %s56_s23 }
  0x3c   :  { %p2255_p13 = scmp.ne.s32.totalorder %s56_s23, %s2254_s15  ;;  %p2260_p1 = scmp.lt.s32.totalorder %s2254_s15, %s2254_s15 }
  0x3e   :  { %p2261_p2 = por %p2260_p1, %p2259_p0 }
  0x40   :  { %p2262_p3 = pnand %p2261_p2, %p2255_p13 }
  0x42   :  { %2265 = shalt.err (!%p2262_p3)
}
  0x43   :  { %58 = dma.hbm_to_vmem [thread:$0]  %s2757_s4, 256, %s56_s23, [#allocation8]  }
  0x44   :  { %2266 = dma.done.wait [#allocation3], 1024  }
  0x45   :  { %2267 = vsyncadd [#allocation3], 4294966272 }
  0x46   :  { %2268 = dma.done.wait [#allocation5], 16400  }
  0x47   :  { %2269 = vsyncadd [#allocation5], 4294950896 }
  0x48   :  { %2270 = dma.done.wait [#allocation8], 256  }
  0x49   :  { %2271 = vsyncadd [#allocation8], 4294967040  ;;  %v2279_v0 = vmov 0.0   ;;  %vm2280_vm0 = vmmov 0   ;;  %v2102_v1 = vld [vmem:[#allocation2] sm:$0xff]   ;;  %v2103_v2 = vld [vmem:[#allocation2 + $0x8] sm:$0xff]  }
  0x4a   :  { %2070 = vmatprep.subr.bf16.mxu0 %v2279_v0  ;;  %2086 = vmatprep.mubr.msk.bf16.mxu0 %vm2280_vm0, %v2279_v0  ;;  %v2104_v3 = vld [vmem:[#allocation2 + $0x10] sm:$0xff]   ;;  %v2105_v4 = vld [vmem:[#allocation2 + $0x18] sm:$0xff]   ;;  %v2106_v5 = vld [vmem:[#allocation2 + $0x20] sm:$0xff]  }
  0x4b   :  { %2071 = vmatpush3.bf16.msra.mxu0 %v2102_v1  ;;  %v2107_v6 = vld [vmem:[#allocation2 + $0x28] sm:$0xff]   ;;  %v2108_v7 = vld [vmem:[#allocation2 + $0x30] sm:$0xff]   ;;  %v2109_v8 = vld [vmem:[#allocation2 + $0x38] sm:$0xff]  }
  0x4c   :  { %2072 = vmatprep.subr.bf16.mxu0 %v2279_v0  ;;  %v72_v9 = vld [vmem:[%s2753_s0] sm:$0x3]  ;;  %v213_v11 = vld [vmem:[#allocation6] sm:$0xff]  ;;  %v214_v13 = vld [vmem:[#allocation6 + $0x8] sm:$0xff] }
  0x4d   :  { %v73_v10 = vpack.c.bf16 %v72_v9, %v72_v9  ;;  %v221_v12 = vld [vmem:[#allocation6 + $0x40] sm:$0xff]  ;;  %v222_v15 = vld [vmem:[#allocation6 + $0x48] sm:$0xff] }
  0x4e   :  { %v1934_v14 = vcombine.high %v213_v11, %v221_v12  ;;  %v1935_v16 = vcombine.low %v214_v13, %v222_v15  ;;  %v1936_v17 = vcombine.high %v214_v13, %v222_v15  ;;  %v1933_v18 = vcombine.low %v213_v11, %v221_v12  ;;  %v229_v19 = vld [vmem:[#allocation6 + $0x80] sm:$0xff]  ;;  %v230_v21 = vld [vmem:[#allocation6 + $0x88] sm:$0xff]  ;;  %v215_v11 = vld [vmem:[#allocation6 + $0x10] sm:$0xff] }
  0x4f   :  { %2073 = vmatpush3.bf16.msra.mxu0 %v2103_v2  ;;  %v237_v20 = vld [vmem:[#allocation6 + $0xc0] sm:$0xff]  ;;  %v238_v23 = vld [vmem:[#allocation6 + $0xc8] sm:$0xff]  ;;  %v223_v12 = vld [vmem:[#allocation6 + $0x50] sm:$0xff] }
  0x50   :  { %2074 = vmatprep.subr.bf16.mxu0 %v2279_v0  ;;  %1065 = vmatprep.subr.bf16.mxu1 %v1934_v14  ;;  %v1950_v22 = vcombine.high %v229_v19, %v237_v20  ;;  %v1951_v24 = vcombine.low %v230_v21, %v238_v23  ;;  %v1952_v25 = vcombine.high %v230_v21, %v238_v23  ;;  %v245_v27 = vld [vmem:[#allocation6 + $0x100] sm:$0xff]  ;;  %v246_v29 = vld [vmem:[#allocation6 + $0x108] sm:$0xff]  ;;  %v216_v13 = vld [vmem:[#allocation6 + $0x18] sm:$0xff] }
  0x51   :  { %1066 = vmatpush1.bf16.msra.mxu1 %v1933_v18  ;;  %v1949_v26 = vcombine.low %v229_v19, %v237_v20  ;;  %v253_v28 = vld [vmem:[#allocation6 + $0x140] sm:$0xff]  ;;  %v254_v31 = vld [vmem:[#allocation6 + $0x148] sm:$0xff]  ;;  %v1938_v14 = vcombine.high %v215_v11, %v223_v12  ;;  %v224_v15 = vld [vmem:[#allocation6 + $0x58] sm:$0xff]  ;;  %v2281_v19 = vmov 0  }
  0x52   :  { %1067 = vmatprep.subr.bf16.mxu1 %v1950_v22  ;;  %v1966_v30 = vcombine.high %v245_v27, %v253_v28  ;;  %v1967_v32 = vcombine.low %v246_v29, %v254_v31  ;;  %v1968_v33 = vcombine.high %v246_v29, %v254_v31  ;;  %v1965_v34 = vcombine.low %v245_v27, %v253_v28  ;;  %v261_v35 = vld [vmem:[#allocation6 + $0x180] sm:$0xff]  ;;  %v262_v37 = vld [vmem:[#allocation6 + $0x188] sm:$0xff]  ;;  %v1924_v20 = vld [vmem:[#allocation4] ss:$0 sm:$0xff] }
  0x53   :  { %2075 = vmatpush3.bf16.msra.mxu0 %v2104_v3  ;;  %v269_v36 = vld [vmem:[#allocation6 + $0x1c0] sm:$0xff]  ;;  %v270_v39 = vld [vmem:[#allocation6 + $0x1c8] sm:$0xff]  ;;  %v1940_v18 = vcombine.high %v216_v13, %v224_v15  ;;  %1097 = vmatprep.mubr.bf16.mxu1 %v2281_v19 }
  0x54   :  { %2076 = vmatprep.subr.bf16.mxu0 %v2279_v0  ;;  %v1982_v38 = vcombine.high %v261_v35, %v269_v36  ;;  %v1983_v40 = vcombine.low %v262_v37, %v270_v39  ;;  %v1984_v41 = vcombine.high %v262_v37, %v270_v39  ;;  %v1981_v42 = vcombine.low %v261_v35, %v269_v36  ;;  %v277_v43 = vld [vmem:[#allocation6 + $0x200] sm:$0xff]  ;;  %v278_v45 = vld [vmem:[#allocation6 + $0x208] sm:$0xff] }
  0x55   :  { %1068 = vmatpush1.bf16.msra.mxu1 %v1949_v26  ;;  %v285_v44 = vld [vmem:[#allocation6 + $0x240] sm:$0xff]  ;;  %v286_v47 = vld [vmem:[#allocation6 + $0x248] sm:$0xff] }
  0x56   :  { %1069 = vmatprep.subr.bf16.mxu1 %v1966_v30  ;;  %v1998_v46 = vcombine.high %v277_v43, %v285_v44  ;;  %v1999_v48 = vcombine.low %v278_v45, %v286_v47  ;;  %v2000_v49 = vcombine.high %v278_v45, %v286_v47  ;;  %v1997_v50 = vcombine.low %v277_v43, %v285_v44  ;;  %v293_v51 = vld [vmem:[#allocation6 + $0x280] sm:$0xff]  ;;  %v294_v53 = vld [vmem:[#allocation6 + $0x288] sm:$0xff] }
  0x57   :  { %2077 = vmatpush3.bf16.msra.mxu0 %v2105_v4  ;;  %v301_v52 = vld [vmem:[#allocation6 + $0x2c0] sm:$0xff]  ;;  %v302_v55 = vld [vmem:[#allocation6 + $0x2c8] sm:$0xff] }
  0x58   :  { %2078 = vmatprep.subr.bf16.mxu0 %v2279_v0  ;;  %v2014_v54 = vcombine.high %v293_v51, %v301_v52  ;;  %v2015_v56 = vcombine.low %v294_v53, %v302_v55  ;;  %v2016_v57 = vcombine.high %v294_v53, %v302_v55  ;;  %v2013_v58 = vcombine.low %v293_v51, %v301_v52  ;;  %v309_v59 = vld [vmem:[#allocation6 + $0x300] sm:$0xff]  ;;  %v310_v61 = vld [vmem:[#allocation6 + $0x308] sm:$0xff]  ;;  %v231_v51 = vld [vmem:[#allocation6 + $0x90] sm:$0xff] }
  0x59   :  { %1070 = vmatpush1.bf16.msra.mxu1 %v1965_v34  ;;  %v317_v60 = vld [vmem:[#allocation6 + $0x340] sm:$0xff]  ;;  %v318_v63 = vld [vmem:[#allocation6 + $0x348] sm:$0xff]  ;;  %v239_v52 = vld [vmem:[#allocation6 + $0xd0] sm:$0xff] }
  0x5a   :  { %1071 = vmatprep.subr.bf16.mxu1 %v1982_v38  ;;  %v2030_v62 = vcombine.high %v309_v59, %v317_v60  ;;  %v2032_v1 = vcombine.high %v310_v61, %v318_v63  ;;  %v2029_v2 = vcombine.low %v309_v59, %v317_v60  ;;  %v325_v3 = vld [vmem:[#allocation6 + $0x380] sm:$0xff]  ;;  %v232_v53 = vld [vmem:[#allocation6 + $0x98] sm:$0xff]  ;;  %v247_v59 = vld [vmem:[#allocation6 + $0x110] sm:$0xff] }
  0x5b   :  { %2079 = vmatpush3.bf16.msra.mxu0 %v2106_v5  ;;  %v333_v4 = vld [vmem:[#allocation6 + $0x3c0] sm:$0xff]  ;;  %v326_v5 = vld [vmem:[#allocation6 + $0x388] sm:$0xff]  ;;  %v255_v60 = vld [vmem:[#allocation6 + $0x150] sm:$0xff] }
  0x5c   :  { %2080 = vmatprep.subr.bf16.mxu0 %v2279_v0 }
  0x5d   :  { %1072 = vmatpush1.bf16.msra.mxu1 %v1981_v42 }
  0x5e   :  { %1073 = vmatprep.subr.bf16.mxu1 %v1998_v46  ;;  %v2282_v46 = vmov 1.0  }
  0x5f   :  { %2081 = vmatpush3.bf16.msra.mxu0 %v2107_v6  ;;  %v2046_v6 = vcombine.high %v325_v3, %v333_v4 }
  0x60   :  { %2082 = vmatprep.subr.bf16.mxu0 %v2279_v0 }
  0x61   :  { %1074 = vmatpush1.bf16.msra.mxu1 %v1997_v50 }
  0x62   :  { %1075 = vmatprep.subr.bf16.mxu1 %v2014_v54  ;;  %v240_v54 = vld [vmem:[#allocation6 + $0xd8] sm:$0xff] }
  0x63   :  { %2083 = vmatpush3.bf16.msra.mxu0 %v2108_v7  ;;  %v334_v7 = vld [vmem:[#allocation6 + $0x3c8] sm:$0xff] }
  0x64   :  { %2084 = vmatprep.subr.bf16.mxu0 %v2279_v0  ;;  %v2031_v0 = vcombine.low %v310_v61, %v318_v63  ;;  %v2048_v9 = vcombine.high %v326_v5, %v334_v7  ;;  %v248_v61 = vld [vmem:[#allocation6 + $0x118] sm:$0xff]  ;;  %v1953_v63 = vcombine.low %v231_v51, %v239_v52 }
  0x65   :  { %1076 = vmatpush1.bf16.msra.mxu1 %v2013_v58  ;;  %v1956_v58 = vcombine.high %v232_v53, %v240_v54 }
  0x66   :  { %1077 = vmatprep.subr.bf16.mxu1 %v2030_v62  ;;  %v256_v62 = vld [vmem:[#allocation6 + $0x158] sm:$0xff] }
  0x67   :  { %2085 = vmatpush3.bf16.msra.mxu0 %v2109_v8  ;;  %v2047_v8 = vcombine.low %v326_v5, %v334_v7  ;;  %v264_v5 = vld [vmem:[#allocation6 + $0x198] sm:$0xff]  ;;  %v1969_v7 = vcombine.low %v247_v59, %v255_v60 }
  0x68   :  { %1106 = vmatprep.subr.bf16.mxu0 %v1936_v17  ;;  %v1939_v17 = vcombine.low %v216_v13, %v224_v15  ;;  %v280_v13 = vld [vmem:[#allocation6 + $0x218] sm:$0xff] }
  0x69   :  { %1078 = vmatpush1.bf16.msra.mxu1 %v2029_v2  ;;  %v1972_v2 = vcombine.high %v248_v61, %v256_v62 }
  0x6a   :  { %2087 = vmatmul.mubr.bf16.vlgmr.msra.gmra.mrb[0].mxu0 %v73_v10  ;;  %v2045_v10 = vcombine.low %v325_v3, %v333_v4  ;;  %1079 = vmatprep.subr.bf16.mxu1 %v2046_v6  ;;  %v263_v3 = vld [vmem:[#allocation6 + $0x190] sm:$0xff]  ;;  %v272_v6 = vld [vmem:[#allocation6 + $0x1d8] sm:$0xff] }
  0x6b   :  { %1107 = vmatpush1.bf16.msra.mxu0 %v1935_v16  ;;  %v1937_v16 = vcombine.low %v215_v11, %v223_v12  ;;  %1138 = vmatprep.mubr.bf16.mxu0 %v2281_v19  ;;  %v271_v4 = vld [vmem:[#allocation6 + $0x1d0] sm:$0xff] }
  0x6c   :  { %1108 = vmatprep.subr.bf16.mxu0 %v1952_v25  ;;  %v279_v11 = vld [vmem:[#allocation6 + $0x210] sm:$0xff]  ;;  %v1985_v15 = vcombine.low %v263_v3, %v271_v4 }
  0x6d   :  { %1080 = vmatpush1.bf16.msra.mxu1 %v2045_v10  ;;  %v1988_v10 = vcombine.high %v264_v5, %v272_v6  ;;  %v287_v12 = vld [vmem:[#allocation6 + $0x250] sm:$0xff] }
  0x6e   :  { %1147 = vmatprep.subr.bf16.mxu1 %v1938_v14  ;;  %v288_v14 = vld [vmem:[#allocation6 + $0x258] sm:$0xff] }
  0x6f   :  { %1109 = vmatpush1.bf16.msra.mxu0 %v1951_v24 }
  0x70   :  { %1110 = vmatprep.subr.bf16.mxu0 %v1968_v33 }
  0x73   :  { %1111 = vmatpush1.bf16.msra.mxu0 %v1967_v32 }
  0x74   :  { %1112 = vmatprep.subr.bf16.mxu0 %v1984_v41 }
  0x77   :  { %1113 = vmatpush1.bf16.msra.mxu0 %v1983_v40 }
  0x78   :  { %1114 = vmatprep.subr.bf16.mxu0 %v2000_v49 }
  0x7b   :  { %1115 = vmatpush1.bf16.msra.mxu0 %v1999_v48 }
  0x7c   :  { %1116 = vmatprep.subr.bf16.mxu0 %v2016_v57  ;;  %v1954_v57 = vcombine.high %v231_v51, %v239_v52 }
  0x7f   :  { %1117 = vmatpush1.bf16.msra.mxu0 %v2015_v56 }
  0x80   :  { %1118 = vmatprep.subr.bf16.mxu0 %v2032_v1  ;;  %v1970_v1 = vcombine.high %v247_v59, %v255_v60 }
  0x83   :  { %1119 = vmatpush1.bf16.msra.mxu0 %v2031_v0  ;;  %v1955_v0 = vcombine.low %v232_v53, %v240_v54  ;;  %v233_v53 = vld [vmem:[#allocation6 + $0xa0] sm:$0xff] }
  0x84   :  { %1120 = vmatprep.subr.bf16.mxu0 %v2048_v9  ;;  %v1986_v9 = vcombine.high %v263_v3, %v271_v4  ;;  %v241_v54 = vld [vmem:[#allocation6 + $0xe0] sm:$0xff] }
  0x85   :  { %v1958_v60 = vcombine.high %v233_v53, %v241_v54 }
  0x87   :  { %1121 = vmatpush1.bf16.msra.mxu0 %v2047_v8  ;;  %v1971_v8 = vcombine.low %v248_v61, %v256_v62  ;;  %v249_v62 = vld [vmem:[#allocation6 + $0x120] sm:$0xff] }
  0x88   :  { %1188 = vmatprep.subr.bf16.mxu0 %v1940_v18  ;;  %v2004_v18 = vcombine.high %v280_v13, %v288_v14 }
 0x13d   :  { %v179_v21 = vpop.f32.mrb[0].mxu0 }
 0x13e   :  { %v180_v22 = vadd.f32 %v1924_v20, %v179_v21  ;;  %v2088_v23 = vpop.f32.mrb[1].mxu0  ;;  %v295_v20 = vld [vmem:[#allocation6 + $0x290] sm:$0xff] }
 0x13f   :  { %v182_v24 = vpop.f32.mrb[2].mxu0  ;;  %v303_v21 = vld [vmem:[#allocation6 + $0x2d0] sm:$0xff]  ;;  %v304_v23 = vld [vmem:[#allocation6 + $0x2d8] sm:$0xff] }
 0x140   :  { %v186_v25 = vmul.f32 0.70710677, %v180_v22  ;;  %v2089_v26 = vpop.f32.mrb[3].mxu0  ;;  %v185_v49 = vmul.f32 0.5, %v180_v22  ;;  %v296_v22 = vld [vmem:[#allocation6 + $0x298] sm:$0xff]  ;;  %v2001_v24 = vcombine.low %v279_v11, %v287_v12 }
 0x141   :  { %v2018_v26 = vcombine.high %v295_v20, %v303_v21 }
 0x142   :  { %v189_v27 = vand.u32 2147483647, %v186_v25  ;;  %vm187_vm1 = vcmp.lt.f32.partialorder %v186_v25, 0.0  ;;  %v2003_v25 = vcombine.low %v280_v13, %v288_v14  ;;  %v281_v14 = vld [vmem:[#allocation6 + $0x220] sm:$0xff] }
 0x143   :  { %v188_v47 = vsel %vm187_vm1, -1.0, %v2282_v46 }
 0x144   :  { %v190_v28 = vmul.f32 0.3275911, %v189_v27  ;;  %v203_v30 = vsub.f32 0.0, %v189_v27 }
 0x146   :  { %v191_v29 = vadd.f32 1.0, %v190_v28  ;;  %v204_v32 = vmul.f32 %v203_v30, %v189_v27  ;;  %v2020_v27 = vcombine.high %v296_v22, %v304_v23  ;;  %v311_v28 = vld [vmem:[#allocation6 + $0x310] sm:$0xff]  ;;  %v312_v30 = vld [vmem:[#allocation6 + $0x318] sm:$0xff] }
 0x148   :  { %2110 = vrcp.f32 %v191_v29  ;;  %v205_v35 = vmul.f32 1.442695, %v204_v32  ;;  %v319_v29 = vld [vmem:[#allocation6 + $0x350] sm:$0xff]  ;;  %v2017_v32 = vcombine.low %v295_v20, %v303_v21 }
 0x14a   :  { %2112 = vpow2.f32 %v205_v35 }
 0x152   :  { %v2111_v31 = vpop.eup %2110 }
 0x153   :  { %v194_v33 = vmul.f32 1.0614054, %v2111_v31 }
 0x154   :  { %v2113_v43 = vpop.eup %2112 }
 0x155   :  { %v195_v34 = vadd.f32 -1.4531521, %v194_v33  ;;  %v2019_v33 = vcombine.low %v296_v22, %v304_v23  ;;  %v297_v23 = vld [vmem:[#allocation6 + $0x2a0] sm:$0xff] }
 0x157   :  { %v196_v36 = vmul.f32 %v2111_v31, %v195_v34  ;;  %v2034_v34 = vcombine.high %v311_v28, %v319_v29 }
 0x159   :  { %v197_v37 = vadd.f32 1.4214138, %v196_v36  ;;  %v327_v36 = vld [vmem:[#allocation6 + $0x390] sm:$0xff] }
 0x15b   :  { %v198_v38 = vmul.f32 %v2111_v31, %v197_v37  ;;  %v335_v37 = vld [vmem:[#allocation6 + $0x3d0] sm:$0xff] }
 0x15d   :  { %v199_v39 = vadd.f32 -0.28449672, %v198_v38  ;;  %v328_v38 = vld [vmem:[#allocation6 + $0x398] sm:$0xff] }
 0x15f   :  { %v200_v40 = vmul.f32 %v2111_v31, %v199_v39  ;;  %v336_v39 = vld [vmem:[#allocation6 + $0x3d8] sm:$0xff] }
 0x161   :  { %v201_v41 = vadd.f32 0.2548296, %v200_v40  ;;  %v2033_v40 = vcombine.low %v311_v28, %v319_v29 }
 0x163   :  { %v202_v42 = vmul.f32 %v2111_v31, %v201_v41  ;;  %v320_v31 = vld [vmem:[#allocation6 + $0x358] sm:$0xff] }
 0x164   :  { %v2036_v35 = vcombine.high %v312_v30, %v320_v31  ;;  %v2035_v41 = vcombine.low %v312_v30, %v320_v31  ;;  %v313_v31 = vld [vmem:[#allocation6 + $0x320] sm:$0xff] }
 0x165   :  { %v207_v44 = vmul.f32 %v2113_v43, %v202_v42  ;;  %v2050_v42 = vcombine.high %v327_v36, %v335_v37  ;;  %v2052_v43 = vcombine.high %v328_v38, %v336_v39 }
 0x167   :  { %v208_v45 = vsub.f32 1.0, %v207_v44  ;;  %v217_v44 = vld [vmem:[#allocation6 + $0x20] sm:$0xff] }
 0x169   :  { %v209_v48 = vmul.f32 %v208_v45, %v188_v47  ;;  %v225_v45 = vld [vmem:[#allocation6 + $0x60] sm:$0xff]  ;;  %v218_v47 = vld [vmem:[#allocation6 + $0x28] sm:$0xff] }
 0x16a   :  { %v1942_v51 = vcombine.high %v217_v44, %v225_v45 }
 0x16b   :  { %v210_v50 = vadd.f32 1.0, %v209_v48  ;;  %v226_v48 = vld [vmem:[#allocation6 + $0x68] sm:$0xff] }
 0x16c   :  { %v1944_v52 = vcombine.high %v218_v47, %v226_v48  ;;  %v1943_v59 = vcombine.low %v218_v47, %v226_v48  ;;  %v219_v48 = vld [vmem:[#allocation6 + $0x30] sm:$0xff] }
 0x16d   :  { %v211_v55 = vmul.f32 %v210_v50, %v185_v49  ;;  %v2049_v49 = vcombine.low %v327_v36, %v335_v37  ;;  %v2051_v50 = vcombine.low %v328_v38, %v336_v39  ;;  %v329_v39 = vld [vmem:[#allocation6 + $0x3a0] sm:$0xff] }
 0x16f   :  { %v2375_v56 = vpack.c.bf16 %v211_v55, %v211_v55  ;;  %v234_v55 = vld [vmem:[#allocation6 + $0xa8] sm:$0xff] }
 0x171   :  { %1098 = vmatmul.mubr.bf16.vlgmr.msra.gmra.mrb[0].mxu1 %v2375_v56  ;;  %1139 = vmatmul.mubr.bf16.vlgmr.msra.gmra.mrb[4].mxu0 %v2375_v56 }
 0x172   :  { %1148 = vmatpush1.bf16.msra.mxu1 %v1937_v16  ;;  %1189 = vmatpush1.bf16.msra.mxu0 %v1939_v17  ;;  %v1987_v16 = vcombine.low %v264_v5, %v272_v6  ;;  %v2002_v17 = vcombine.high %v279_v11, %v287_v12  ;;  %v265_v6 = vld [vmem:[#allocation6 + $0x1a0] sm:$0xff] }
 0x173   :  { %1149 = vmatprep.subr.bf16.mxu1 %v1954_v57  ;;  %1190 = vmatprep.subr.bf16.mxu0 %v1956_v58  ;;  %v242_v57 = vld [vmem:[#allocation6 + $0xe8] sm:$0xff]  ;;  %v1941_v58 = vcombine.low %v217_v44, %v225_v45 }
 0x174   :  { %1179 = vmatprep.mubr.bf16.mxu1 %v2281_v19  ;;  %1220 = vmatprep.mubr.bf16.mxu0 %v2281_v19  ;;  %v1960_v61 = vcombine.high %v234_v55, %v242_v57  ;;  %v1959_v3 = vcombine.low %v234_v55, %v242_v57  ;;  %v235_v57 = vld [vmem:[#allocation6 + $0xb0] sm:$0xff] }
 0x176   :  { %1150 = vmatpush1.bf16.msra.mxu1 %v1953_v63  ;;  %1191 = vmatpush1.bf16.msra.mxu0 %v1955_v0  ;;  %v257_v63 = vld [vmem:[#allocation6 + $0x160] sm:$0xff]  ;;  %v250_v0 = vld [vmem:[#allocation6 + $0x128] sm:$0xff] }
 0x177   :  { %1151 = vmatprep.subr.bf16.mxu1 %v1970_v1  ;;  %1192 = vmatprep.subr.bf16.mxu0 %v1972_v2  ;;  %v258_v1 = vld [vmem:[#allocation6 + $0x168] sm:$0xff]  ;;  %v1957_v2 = vcombine.low %v233_v53, %v241_v54  ;;  %v1974_v4 = vcombine.high %v249_v62, %v257_v63 }
 0x178   :  { %v1976_v5 = vcombine.high %v250_v0, %v258_v1  ;;  %v1975_v11 = vcombine.low %v250_v0, %v258_v1  ;;  %v251_v1 = vld [vmem:[#allocation6 + $0x130] sm:$0xff] }
 0x17a   :  { %1152 = vmatpush1.bf16.msra.mxu1 %v1969_v7  ;;  %1193 = vmatpush1.bf16.msra.mxu0 %v1971_v8  ;;  %v273_v7 = vld [vmem:[#allocation6 + $0x1e0] sm:$0xff]  ;;  %v266_v8 = vld [vmem:[#allocation6 + $0x1a8] sm:$0xff] }
 0x17b   :  { %1153 = vmatprep.subr.bf16.mxu1 %v1986_v9  ;;  %1194 = vmatprep.subr.bf16.mxu0 %v1988_v10  ;;  %v274_v9 = vld [vmem:[#allocation6 + $0x1e8] sm:$0xff]  ;;  %v1973_v10 = vcombine.low %v249_v62, %v257_v63  ;;  %v1990_v12 = vcombine.high %v265_v6, %v273_v7 }
 0x17c   :  { %v1992_v13 = vcombine.high %v266_v8, %v274_v9  ;;  %v1991_v20 = vcombine.low %v266_v8, %v274_v9  ;;  %v267_v9 = vld [vmem:[#allocation6 + $0x1b0] sm:$0xff] }
 0x17e   :  { %1154 = vmatpush1.bf16.msra.mxu1 %v1985_v15  ;;  %1195 = vmatpush1.bf16.msra.mxu0 %v1987_v16  ;;  %v289_v15 = vld [vmem:[#allocation6 + $0x260] sm:$0xff]  ;;  %v282_v16 = vld [vmem:[#allocation6 + $0x228] sm:$0xff] }
 0x17f   :  { %1155 = vmatprep.subr.bf16.mxu1 %v2002_v17  ;;  %1196 = vmatprep.subr.bf16.mxu0 %v2004_v18  ;;  %v290_v17 = vld [vmem:[#allocation6 + $0x268] sm:$0xff]  ;;  %v1989_v18 = vcombine.low %v265_v6, %v273_v7  ;;  %v2006_v21 = vcombine.high %v281_v14, %v289_v15 }
 0x180   :  { %v2008_v22 = vcombine.high %v282_v16, %v290_v17  ;;  %v2007_v28 = vcombine.low %v282_v16, %v290_v17  ;;  %v283_v17 = vld [vmem:[#allocation6 + $0x230] sm:$0xff] }
 0x182   :  { %1156 = vmatpush1.bf16.msra.mxu1 %v2001_v24  ;;  %1197 = vmatpush1.bf16.msra.mxu0 %v2003_v25  ;;  %v305_v24 = vld [vmem:[#allocation6 + $0x2e0] sm:$0xff]  ;;  %v298_v25 = vld [vmem:[#allocation6 + $0x2a8] sm:$0xff] }
 0x183   :  { %1157 = vmatprep.subr.bf16.mxu1 %v2018_v26  ;;  %1198 = vmatprep.subr.bf16.mxu0 %v2020_v27  ;;  %v306_v26 = vld [vmem:[#allocation6 + $0x2e8] sm:$0xff]  ;;  %v2005_v27 = vcombine.low %v281_v14, %v289_v15  ;;  %v2022_v29 = vcombine.high %v297_v23, %v305_v24 }
 0x184   :  { %v2024_v30 = vcombine.high %v298_v25, %v306_v26  ;;  %v2023_v36 = vcombine.low %v298_v25, %v306_v26  ;;  %v299_v25 = vld [vmem:[#allocation6 + $0x2b0] sm:$0xff] }
 0x185   :  { %v307_v26 = vld [vmem:[#allocation6 + $0x2f0] sm:$0xff] }
 0x186   :  { %1158 = vmatpush1.bf16.msra.mxu1 %v2017_v32  ;;  %1199 = vmatpush1.bf16.msra.mxu0 %v2019_v33  ;;  %v321_v32 = vld [vmem:[#allocation6 + $0x360] sm:$0xff]  ;;  %v314_v33 = vld [vmem:[#allocation6 + $0x328] sm:$0xff] }
 0x187   :  { %1159 = vmatprep.subr.bf16.mxu1 %v2034_v34  ;;  %1200 = vmatprep.subr.bf16.mxu0 %v2036_v35  ;;  %v322_v34 = vld [vmem:[#allocation6 + $0x368] sm:$0xff]  ;;  %v2021_v35 = vcombine.low %v297_v23, %v305_v24  ;;  %v2038_v37 = vcombine.high %v313_v31, %v321_v32 }
 0x188   :  { %v2040_v38 = vcombine.high %v314_v33, %v322_v34  ;;  %v2039_v44 = vcombine.low %v314_v33, %v322_v34  ;;  %v315_v33 = vld [vmem:[#allocation6 + $0x330] sm:$0xff] }
 0x189   :  { %v323_v34 = vld [vmem:[#allocation6 + $0x370] sm:$0xff] }
 0x18a   :  { %1160 = vmatpush1.bf16.msra.mxu1 %v2033_v40  ;;  %1201 = vmatpush1.bf16.msra.mxu0 %v2035_v41  ;;  %v337_v40 = vld [vmem:[#allocation6 + $0x3e0] sm:$0xff]  ;;  %v330_v41 = vld [vmem:[#allocation6 + $0x3a8] sm:$0xff] }
 0x18b   :  { %1161 = vmatprep.subr.bf16.mxu1 %v2050_v42  ;;  %1202 = vmatprep.subr.bf16.mxu0 %v2052_v43  ;;  %v338_v42 = vld [vmem:[#allocation6 + $0x3e8] sm:$0xff]  ;;  %v2037_v43 = vcombine.low %v313_v31, %v321_v32  ;;  %v2054_v45 = vcombine.high %v329_v39, %v337_v40  ;;  %v2026_v31 = vcombine.high %v299_v25, %v307_v26 }
 0x18c   :  { %v2056_v47 = vcombine.high %v330_v41, %v338_v42  ;;  %v2055_v53 = vcombine.low %v330_v41, %v338_v42  ;;  %v331_v41 = vld [vmem:[#allocation6 + $0x3b0] sm:$0xff] }
 0x18d   :  { %v339_v42 = vld [vmem:[#allocation6 + $0x3f0] sm:$0xff] }
 0x18e   :  { %1162 = vmatpush1.bf16.msra.mxu1 %v2049_v49  ;;  %1203 = vmatpush1.bf16.msra.mxu0 %v2051_v50  ;;  %v227_v49 = vld [vmem:[#allocation6 + $0x70] sm:$0xff]  ;;  %v220_v50 = vld [vmem:[#allocation6 + $0x38] sm:$0xff] }
 0x18f   :  { %1229 = vmatprep.subr.bf16.mxu1 %v1942_v51  ;;  %1270 = vmatprep.subr.bf16.mxu0 %v1944_v52  ;;  %v228_v51 = vld [vmem:[#allocation6 + $0x78] sm:$0xff]  ;;  %v2053_v52 = vcombine.low %v329_v39, %v337_v40  ;;  %v1946_v54 = vcombine.high %v219_v48, %v227_v49  ;;  %v2042_v39 = vcombine.high %v315_v33, %v323_v34 }
 0x190   :  { %v1948_v55 = vcombine.high %v220_v50, %v228_v51  ;;  %v1947_v62 = vcombine.low %v220_v50, %v228_v51  ;;  %v2057_v50 = vcombine.low %v331_v41, %v339_v42 }
 0x191   :  { %1180 = vmatmul.mubr.bf16.vlgmr.msra.gmra.mrb[4].mxu1 %v2375_v56  ;;  %1221 = vmatmul.mubr.bf16.vlgmr.msra.gmra.mrb[8].mxu0 %v2375_v56 }
 0x192   :  { %1230 = vmatpush1.bf16.msra.mxu1 %v1941_v58  ;;  %1271 = vmatpush1.bf16.msra.mxu0 %v1943_v59  ;;  %v243_v58 = vld [vmem:[#allocation6 + $0xf0] sm:$0xff]  ;;  %v236_v59 = vld [vmem:[#allocation6 + $0xb8] sm:$0xff] }
 0x193   :  { %1231 = vmatprep.subr.bf16.mxu1 %v1958_v60  ;;  %1272 = vmatprep.subr.bf16.mxu0 %v1960_v61  ;;  %v244_v60 = vld [vmem:[#allocation6 + $0xf8] sm:$0xff]  ;;  %v1945_v61 = vcombine.low %v219_v48, %v227_v49  ;;  %v1962_v63 = vcombine.high %v235_v57, %v243_v58  ;;  %v2058_v48 = vcombine.high %v331_v41, %v339_v42 }
 0x194   :  { %1261 = vmatprep.mubr.bf16.mxu1 %v2281_v19  ;;  %1302 = vmatprep.mubr.bf16.mxu0 %v2281_v19  ;;  %v1964_v0 = vcombine.high %v236_v59, %v244_v60  ;;  %v1963_v6 = vcombine.low %v236_v59, %v244_v60 }
 0x196   :  { %1232 = vmatpush1.bf16.msra.mxu1 %v1957_v2  ;;  %1273 = vmatpush1.bf16.msra.mxu0 %v1959_v3  ;;  %v259_v2 = vld [vmem:[#allocation6 + $0x170] sm:$0xff]  ;;  %v252_v3 = vld [vmem:[#allocation6 + $0x138] sm:$0xff] }
 0x197   :  { %1233 = vmatprep.subr.bf16.mxu1 %v1974_v4  ;;  %1274 = vmatprep.subr.bf16.mxu0 %v1976_v5  ;;  %v260_v4 = vld [vmem:[#allocation6 + $0x178] sm:$0xff]  ;;  %v1961_v5 = vcombine.low %v235_v57, %v243_v58  ;;  %v1978_v7 = vcombine.high %v251_v1, %v259_v2  ;;  %v2395_v57 = vld [vmem:[#allocation7] sm:$0xff] }
 0x198   :  { %v1980_v8 = vcombine.high %v252_v3, %v260_v4  ;;  %v1979_v14 = vcombine.low %v252_v3, %v260_v4 }
 0x19a   :  { %1234 = vmatpush1.bf16.msra.mxu1 %v1973_v10  ;;  %1275 = vmatpush1.bf16.msra.mxu0 %v1975_v11  ;;  %v275_v10 = vld [vmem:[#allocation6 + $0x1f0] sm:$0xff]  ;;  %v268_v11 = vld [vmem:[#allocation6 + $0x1b8] sm:$0xff] }
 0x19b   :  { %1235 = vmatprep.subr.bf16.mxu1 %v1990_v12  ;;  %1276 = vmatprep.subr.bf16.mxu0 %v1992_v13  ;;  %v276_v12 = vld [vmem:[#allocation6 + $0x1f8] sm:$0xff]  ;;  %v1977_v13 = vcombine.low %v251_v1, %v259_v2  ;;  %v1994_v15 = vcombine.high %v267_v9, %v275_v10 }
 0x19c   :  { %v1996_v16 = vcombine.high %v268_v11, %v276_v12  ;;  %v1995_v23 = vcombine.low %v268_v11, %v276_v12 }
 0x19e   :  { %1236 = vmatpush1.bf16.msra.mxu1 %v1989_v18  ;;  %1277 = vmatpush1.bf16.msra.mxu0 %v1991_v20  ;;  %v291_v18 = vld [vmem:[#allocation6 + $0x270] sm:$0xff]  ;;  %v284_v20 = vld [vmem:[#allocation6 + $0x238] sm:$0xff] }
 0x19f   :  { %1237 = vmatprep.subr.bf16.mxu1 %v2006_v21  ;;  %1278 = vmatprep.subr.bf16.mxu0 %v2008_v22  ;;  %v292_v21 = vld [vmem:[#allocation6 + $0x278] sm:$0xff]  ;;  %v1993_v22 = vcombine.low %v267_v9, %v275_v10  ;;  %v2010_v24 = vcombine.high %v283_v17, %v291_v18 }
 0x1a2   :  { %1238 = vmatpush1.bf16.msra.mxu1 %v2005_v27  ;;  %1279 = vmatpush1.bf16.msra.mxu0 %v2007_v28  ;;  %v300_v27 = vld [vmem:[#allocation6 + $0x2b8] sm:$0xff] }
 0x1a3   :  { %1239 = vmatprep.subr.bf16.mxu1 %v2022_v29  ;;  %1280 = vmatprep.subr.bf16.mxu0 %v2024_v30  ;;  %v308_v28 = vld [vmem:[#allocation6 + $0x2f8] sm:$0xff]  ;;  %v2009_v29 = vcombine.low %v283_v17, %v291_v18  ;;  %v2011_v30 = vcombine.low %v284_v20, %v292_v21 }
 0x1a4   :  { %v2028_v32 = vcombine.high %v300_v27, %v308_v28 }
 0x1a6   :  { %1240 = vmatpush1.bf16.msra.mxu1 %v2021_v35  ;;  %1281 = vmatpush1.bf16.msra.mxu0 %v2023_v36  ;;  %v316_v35 = vld [vmem:[#allocation6 + $0x338] sm:$0xff] }
 0x1a7   :  { %1241 = vmatprep.subr.bf16.mxu1 %v2038_v37  ;;  %1282 = vmatprep.subr.bf16.mxu0 %v2040_v38  ;;  %v324_v36 = vld [vmem:[#allocation6 + $0x378] sm:$0xff]  ;;  %v2025_v37 = vcombine.low %v299_v25, %v307_v26  ;;  %v2027_v38 = vcombine.low %v300_v27, %v308_v28 }
 0x1a8   :  { %v2044_v40 = vcombine.high %v316_v35, %v324_v36 }
 0x1aa   :  { %1242 = vmatpush1.bf16.msra.mxu1 %v2037_v43  ;;  %1283 = vmatpush1.bf16.msra.mxu0 %v2039_v44  ;;  %v332_v43 = vld [vmem:[#allocation6 + $0x3b8] sm:$0xff] }
 0x1ab   :  { %1243 = vmatprep.subr.bf16.mxu1 %v2054_v45  ;;  %1284 = vmatprep.subr.bf16.mxu0 %v2056_v47  ;;  %v340_v44 = vld [vmem:[#allocation6 + $0x3f8] sm:$0xff]  ;;  %v2041_v45 = vcombine.low %v315_v33, %v323_v34  ;;  %v2043_v47 = vcombine.low %v316_v35, %v324_v36 }
 0x1ac   :  { %v2060_v49 = vcombine.high %v332_v43, %v340_v44  ;;  %v2059_v51 = vcombine.low %v332_v43, %v340_v44 }
 0x1ae   :  { %1244 = vmatpush1.bf16.msra.mxu1 %v2053_v52  ;;  %1285 = vmatpush1.bf16.msra.mxu0 %v2055_v53  ;;  %v345_v52 = vlaneseq }
 0x1af   :  { %1311 = vmatprep.subr.bf16.mxu1 %v1946_v54  ;;  %1352 = vmatprep.subr.bf16.mxu0 %v1948_v55 }
 0x1b0   :  { %v2391_v53 = vshrl.u32 %v345_v52, 7 }
 0x1b1   :  { %1262 = vmatmul.mubr.bf16.vlgmr.msra.gmra.mrb[8].mxu1 %v2375_v56  ;;  %1303 = vmatmul.mubr.bf16.vlgmr.msra.gmra.mrb[12].mxu0 %v2375_v56 }
 0x1b2   :  { %1312 = vmatpush1.bf16.msra.mxu1 %v1945_v61  ;;  %1353 = vmatpush1.bf16.msra.mxu0 %v1947_v62  ;;  %v347_v54 = vsub.s32 0, %v2391_v53  ;;  %v355_v55 = vsub.s32 2, %v2391_v53  ;;  %v351_v58 = vsub.s32 1, %v2391_v53  ;;  %v359_v59 = vsub.s32 3, %v2391_v53 }
 0x1b3   :  { %1313 = vmatprep.subr.bf16.mxu1 %v1962_v63  ;;  %1354 = vmatprep.subr.bf16.mxu0 %v1964_v0 }
 0x1b4   :  { %1343 = vmatprep.mubr.bf16.mxu1 %v2281_v19  ;;  %1384 = vmatprep.mubr.bf16.mxu0 %v2281_v19  ;;  %v2012_v19 = vcombine.high %v284_v20, %v292_v21  ;;  %v348_v60 = vrot.slane %v2395_v57, %v347_v54  ;;  %v352_v61 = vrot.slane %v2395_v57, %v351_v58 }
 0x1b5   :  { %v360_v62 = vrot.slane %v2395_v57, %v359_v59 }
 0x1b6   :  { %1314 = vmatpush1.bf16.msra.mxu1 %v1961_v5  ;;  %1355 = vmatpush1.bf16.msra.mxu0 %v1963_v6 }
 0x1b7   :  { %1315 = vmatprep.subr.bf16.mxu1 %v1978_v7  ;;  %1356 = vmatprep.subr.bf16.mxu0 %v1980_v8 }
 0x1ba   :  { %1316 = vmatpush1.bf16.msra.mxu1 %v1977_v13  ;;  %1357 = vmatpush1.bf16.msra.mxu0 %v1979_v14 }
 0x1bb   :  { %1317 = vmatprep.subr.bf16.mxu1 %v1994_v15  ;;  %1358 = vmatprep.subr.bf16.mxu0 %v1996_v16 }
 0x1be   :  { %1318 = vmatpush1.bf16.msra.mxu1 %v1993_v22  ;;  %1359 = vmatpush1.bf16.msra.mxu0 %v1995_v23 }
 0x1bf   :  { %1319 = vmatprep.subr.bf16.mxu1 %v2010_v24  ;;  %1360 = vmatprep.subr.bf16.mxu0 %v2012_v19 }
 0x1c2   :  { %1320 = vmatpush1.bf16.msra.mxu1 %v2009_v29  ;;  %1361 = vmatpush1.bf16.msra.mxu0 %v2011_v30 }
 0x1c3   :  { %1321 = vmatprep.subr.bf16.mxu1 %v2026_v31  ;;  %1362 = vmatprep.subr.bf16.mxu0 %v2028_v32 }
 0x1c6   :  { %1322 = vmatpush1.bf16.msra.mxu1 %v2025_v37  ;;  %1363 = vmatpush1.bf16.msra.mxu0 %v2027_v38  ;;  %v363_v37 = vsub.s32 4, %v2391_v53 }
 0x1c7   :  { %1323 = vmatprep.subr.bf16.mxu1 %v2042_v39  ;;  %1364 = vmatprep.subr.bf16.mxu0 %v2044_v40  ;;  %v371_v39 = vsub.s32 6, %v2391_v53 }
 0x1ca   :  { %1324 = vmatpush1.bf16.msra.mxu1 %v2041_v45  ;;  %1365 = vmatpush1.bf16.msra.mxu0 %v2043_v47 }
 0x1cb   :  { %1325 = vmatprep.subr.bf16.mxu1 %v2058_v48  ;;  %1366 = vmatprep.subr.bf16.mxu0 %v2060_v49 }
 0x1ce   :  { %1326 = vmatpush1.bf16.msra.mxu1 %v2057_v50  ;;  %1367 = vmatpush1.bf16.msra.mxu0 %v2059_v51  ;;  %v364_v51 = vrot.slane %v2395_v57, %v363_v37 }
 0x1d1   :  { %1344 = vmatmul.mubr.bf16.vlgmr.msra.gmra.mrb[12].mxu1 %v2375_v56  ;;  %1385 = vmatmul.mubr.bf16.vlgmr.msra.gmra.mrb[16].mxu0 %v2375_v56  ;;  %v356_v56 = vrot.slane %v2395_v57, %v355_v55 }
 0x244   :  { %v1099_v63 = vpop.f32.mrb[0].mxu1  ;;  %v1140_v0 = vpop.f32.mrb[4].mxu0 }
 0x245   :  { %v2411_v1 = vadd.f32 %v1099_v63, %v348_v60  ;;  %v2413_v2 = vadd.f32 %v1140_v0, %v356_v56  ;;  %v1101_v3 = vpop.f32.mrb[1].mxu1  ;;  %v1142_v4 = vpop.f32.mrb[5].mxu0  ;;  %v367_v0 = vsub.s32 5, %v2391_v53 }
 0x246   :  { %v2415_v5 = vadd.f32 %v1101_v3, %v352_v61  ;;  %v2417_v6 = vadd.f32 %v1142_v4, %v360_v62  ;;  %v1103_v7 = vpop.f32.mrb[2].mxu1  ;;  %v1144_v8 = vpop.f32.mrb[6].mxu0  ;;  %v372_v61 = vrot.slane %v2395_v57, %v371_v39 }
 0x247   :  { %v2420_v9 = vmul.f32 0.70710677, %v2411_v1  ;;  %v2423_v10 = vmul.f32 0.70710677, %v2413_v2  ;;  %v1104_v16 = vpop.f32.mrb[3].mxu1  ;;  %v1145_v21 = vpop.f32.mrb[7].mxu0 }
 0x248   :  { %v2426_v11 = vmul.f32 0.70710677, %v2415_v5  ;;  %v2432_v15 = vmul.f32 0.70710677, %v2417_v6 }
 0x249   :  { %v1457_v12 = vand.u32 2147483647, %v2420_v9  ;;  %v1459_v13 = vand.u32 2147483647, %v2423_v10  ;;  %vm1425_vm2 = vcmp.lt.f32.partialorder %v2420_v9, 0.0  ;;  %vm1427_vm3 = vcmp.lt.f32.partialorder %v2423_v10, 0.0 }
 0x24a   :  { %v1458_v14 = vand.u32 2147483647, %v2426_v11  ;;  %v1460_v24 = vand.u32 2147483647, %v2432_v15  ;;  %vm1426_vm4 = vcmp.lt.f32.partialorder %v2426_v11, 0.0  ;;  %vm1428_vm5 = vcmp.lt.f32.partialorder %v2432_v15, 0.0 }
 0x24b   :  { %v1473_v17 = vmul.f32 0.3275911, %v1457_v12  ;;  %v1475_v18 = vmul.f32 0.3275911, %v1459_v13  ;;  %v1681_v27 = vsub.f32 0.0, %v1457_v12  ;;  %v1683_v28 = vsub.f32 0.0, %v1459_v13 }
 0x24c   :  { %v1474_v20 = vmul.f32 0.3275911, %v1458_v14  ;;  %v1476_v25 = vmul.f32 0.3275911, %v1460_v24  ;;  %v1682_v31 = vsub.f32 0.0, %v1458_v14  ;;  %v1684_v36 = vsub.f32 0.0, %v1460_v24 }
 0x24d   :  { %v1489_v22 = vadd.f32 1.0, %v1473_v17  ;;  %v1491_v23 = vadd.f32 1.0, %v1475_v18  ;;  %v1697_v30 = vmul.f32 %v1681_v27, %v1457_v12  ;;  %v1699_v34 = vmul.f32 %v1683_v28, %v1459_v13 }
 0x24e   :  { %v1490_v19 = vadd.f32 1.0, %v1474_v20  ;;  %v1492_v26 = vadd.f32 1.0, %v1476_v25  ;;  %v1698_v43 = vmul.f32 %v1682_v31, %v1458_v14  ;;  %v1700_v50 = vmul.f32 %v1684_v36, %v1460_v24 }
 0x24f   :  { %2114 = vrcp.f32 %v1489_v22  ;;  %v1713_v41 = vmul.f32 1.442695, %v1697_v30  ;;  %v1717_v45 = vmul.f32 1.442695, %v1699_v34  ;;  %v368_v27 = vrot.slane %v2395_v57, %v367_v0 }
 0x250   :  { %2116 = vrcp.f32 %v1491_v23  ;;  %v1715_v63 = vmul.f32 1.442695, %v1698_v43  ;;  %v1719_v12 = vmul.f32 1.442695, %v1700_v50  ;;  %v375_v34 = vsub.s32 7, %v2391_v53 }
 0x251   :  { %2118 = vrcp.f32 %v1490_v19  ;;  %v1442_v11 = vsel %vm1426_vm4, -1.0, %v2282_v46 }
 0x252   :  { %2120 = vrcp.f32 %v1492_v26 }
 0x253   :  { %2122 = vpow2.f32 %v1713_v41 }
 0x254   :  { %2124 = vpow2.f32 %v1717_v45 }
 0x255   :  { %2126 = vpow2.f32 %v1715_v63 }
 0x256   :  { %2128 = vpow2.f32 %v1719_v12 }
 0x259   :  { %v2435_v29 = vpop.eup %2114 }
 0x25a   :  { %v2437_v32 = vpop.eup %2116  ;;  %v1537_v33 = vmul.f32 1.0614054, %v2435_v29 }
 0x25b   :  { %v1539_v35 = vmul.f32 1.0614054, %v2437_v32  ;;  %v2443_v40 = vpop.eup %2118 }
 0x25c   :  { %v1553_v38 = vadd.f32 -1.4531521, %v1537_v33  ;;  %v1538_v47 = vmul.f32 1.0614054, %v2443_v40  ;;  %v2447_v48 = vpop.eup %2120 }
 0x25d   :  { %v1555_v42 = vadd.f32 -1.4531521, %v1539_v35  ;;  %v1540_v56 = vmul.f32 1.0614054, %v2447_v48 }
 0x25e   :  { %v1569_v44 = vmul.f32 %v2435_v29, %v1553_v38  ;;  %v1554_v60 = vadd.f32 -1.4531521, %v1538_v47 }
 0x25f   :  { %v1571_v49 = vmul.f32 %v2437_v32, %v1555_v42  ;;  %v1556_v7 = vadd.f32 -1.4531521, %v1540_v56 }
 0x260   :  { %v1585_v52 = vadd.f32 1.4214138, %v1569_v44  ;;  %v1570_v4 = vmul.f32 %v2443_v40, %v1554_v60 }
 0x261   :  { %v1587_v62 = vadd.f32 1.4214138, %v1571_v49  ;;  %v1572_v16 = vmul.f32 %v2447_v48, %v1556_v7 }
 0x262   :  { %v1601_v3 = vmul.f32 %v2435_v29, %v1585_v52  ;;  %v1586_v14 = vadd.f32 1.4214138, %v1570_v4 }
 0x263   :  { %v1603_v8 = vmul.f32 %v2437_v32, %v1587_v62  ;;  %v1588_v26 = vadd.f32 1.4214138, %v1572_v16 }
 0x264   :  { %v1617_v13 = vadd.f32 -0.28449672, %v1601_v3  ;;  %v1181_v17 = vpop.f32.mrb[4].mxu1  ;;  %v1222_v18 = vpop.f32.mrb[8].mxu0  ;;  %v1602_v25 = vmul.f32 %v2443_v40, %v1586_v14  ;;  %v2283_v3 = vmov 1983009808  }
 0x265   :  { %v1619_v20 = vadd.f32 -0.28449672, %v1603_v8  ;;  %v2462_v21 = vadd.f32 %v1181_v17, %v364_v51  ;;  %v2464_v22 = vadd.f32 %v1222_v18, %v372_v61  ;;  %v1183_v23 = vpop.f32.mrb[5].mxu1  ;;  %v2466_v24 = vpop.f32.mrb[9].mxu0  ;;  %v1604_v42 = vmul.f32 %v2447_v48, %v1588_v26 }
 0x266   :  { %v1633_v19 = vmul.f32 %v2435_v29, %v1617_v13  ;;  %v1185_v28 = vpop.f32.mrb[6].mxu1  ;;  %v1226_v30 = vpop.f32.mrb[10].mxu0  ;;  %v1618_v41 = vadd.f32 -0.28449672, %v1602_v25  ;;  %v2491_v56 = vadd.f32 %v1183_v23, %v368_v27  ;;  %v1844_v4 = vunpack.c.l.s4 %v2283_v3 }
 0x267   :  { %v1635_v31 = vmul.f32 %v2437_v32, %v1619_v20  ;;  %v2475_v33 = vmul.f32 0.70710677, %v2462_v21  ;;  %v1186_v35 = vpop.f32.mrb[7].mxu1  ;;  %v1227_v36 = vpop.f32.mrb[11].mxu0  ;;  %v2483_v45 = vmul.f32 0.70710677, %v2464_v22 }
 0x268   :  { %v1649_v38 = vadd.f32 0.2548296, %v1633_v19  ;;  %v1634_v49 = vmul.f32 %v2443_v40, %v1618_v41  ;;  %v1620_v50 = vadd.f32 -0.28449672, %v1604_v42  ;;  %v2123_v51 = vpop.eup %2122  ;;  %v2502_v20 = vmul.f32 0.70710677, %v2491_v56 }
 0x269   :  { %v1651_v43 = vadd.f32 0.2548296, %v1635_v31  ;;  %v2480_v44 = vand.u32 2147483647, %v2475_v33  ;;  %v2125_v61 = vpop.eup %2124  ;;  %v2496_v12 = vand.u32 2147483647, %v2483_v45  ;;  %v1845_v28 = vunpack.c.0.s8 %v1844_v4 }
 0x26a   :  { %v1665_v47 = vmul.f32 %v2435_v29, %v1649_v38  ;;  %v1650_v63 = vadd.f32 0.2548296, %v1634_v49  ;;  %v1636_v9 = vmul.f32 %v2447_v48, %v1620_v50  ;;  %v1441_v29 = vsel %vm1425_vm2, -1.0, %v2282_v46  ;;  %v2127_v16 = vpop.eup %2126 }
 0x26b   :  { %v1667_v52 = vmul.f32 %v2437_v32, %v1651_v43  ;;  %v1477_v60 = vmul.f32 0.3275911, %v2480_v44  ;;  %v1443_v32 = vsel %vm1427_vm3, -1.0, %v2282_v46  ;;  %v1479_v18 = vmul.f32 0.3275911, %v2496_v12  ;;  %v2129_v26 = vpop.eup %2128 }
 0x26c   :  { %v1745_v62 = vmul.f32 %v2123_v51, %v1665_v47  ;;  %v1666_v13 = vmul.f32 %v2443_v40, %v1650_v63  ;;  %v1652_v14 = vadd.f32 0.2548296, %v1636_v9  ;;  %v376_v40 = vrot.slane %v2395_v57, %v375_v34 }
 0x26d   :  { %v1747_v7 = vmul.f32 %v2125_v61, %v1667_v52  ;;  %v1493_v8 = vadd.f32 1.0, %v1477_v60  ;;  %v1495_v30 = vadd.f32 1.0, %v1479_v18  ;;  %v1393_v38 = vmul.f32 0.5, %v2411_v1 }
 0x26e   :  { %v1761_v10 = vsub.f32 1.0, %v1745_v62  ;;  %v1746_v19 = vmul.f32 %v2127_v16, %v1666_v13  ;;  %v1668_v25 = vmul.f32 %v2447_v48, %v1652_v14  ;;  %v1462_v48 = vand.u32 2147483647, %v2502_v20 }
 0x26f   :  { %v1763_v17 = vsub.f32 1.0, %v1747_v7  ;;  %2130 = vrcp.f32 %v1493_v8  ;;  %v1395_v41 = vmul.f32 0.5, %v2413_v2  ;;  %v1444_v49 = vsel %vm1428_vm5, -1.0, %v2282_v46 }
 0x270   :  { %v1777_v23 = vmul.f32 %v1761_v10, %v1441_v29  ;;  %v1762_v35 = vsub.f32 1.0, %v1746_v19  ;;  %v1748_v36 = vmul.f32 %v2129_v26, %v1668_v25  ;;  %2132 = vrcp.f32 %v1495_v30 }
 0x271   :  { %v1779_v27 = vmul.f32 %v1763_v17, %v1443_v32  ;;  %v1685_v57 = vsub.f32 0.0, %v2480_v44  ;;  %v1478_v50 = vmul.f32 0.3275911, %v1462_v48  ;;  %v2517_v15 = vadd.f32 %v2466_v24, %v376_v40 }
 0x272   :  { %v1793_v31 = vadd.f32 1.0, %v1777_v23  ;;  %v1778_v43 = vmul.f32 %v1762_v35, %v1442_v11  ;;  %v1764_v47 = vsub.f32 1.0, %v1748_v36  ;;  %v1394_v1 = vmul.f32 0.5, %v2415_v5 }
 0x273   :  { %v1795_v42 = vadd.f32 1.0, %v1779_v27  ;;  %v2521_v61 = vsub.s32 %v1845_v28, %v2391_v53  ;;  %v1494_v2 = vadd.f32 1.0, %v1478_v50  ;;  %v2524_v62 = vmul.f32 0.70710677, %v2517_v15  ;;  %v2536_v28 = vld [vmem:[#allocation7 + $0x8] sm:$0xff] }
 0x274   :  { %v1809_v51 = vmul.f32 %v1793_v31, %v1393_v38  ;;  %v1794_v52 = vadd.f32 1.0, %v1778_v43  ;;  %v1780_v60 = vmul.f32 %v1764_v47, %v1444_v49  ;;  %v1396_v4 = vmul.f32 0.5, %v2417_v6 }
 0x275   :  { %v1811_v63 = vmul.f32 %v1795_v42, %v1395_v41  ;;  %v1701_v24 = vmul.f32 %v1685_v57, %v2480_v44  ;;  %2134 = vrcp.f32 %v1494_v2  ;;  %v1464_v5 = vand.u32 2147483647, %v2524_v62 }
 0x276   :  { %v1810_v3 = vmul.f32 %v1794_v52, %v1394_v1  ;;  %v1796_v9 = vadd.f32 1.0, %v1780_v60  ;;  %v1687_v32 = vsub.f32 0.0, %v2496_v12  ;;  %v1686_v27 = vsub.f32 0.0, %v1462_v48 }
 0x277   :  { %v1480_v13 = vmul.f32 0.3275911, %v1464_v5  ;;  %v1721_v6 = vmul.f32 1.442695, %v1701_v24  ;;  %v380_v38 = vrot.slane %v2536_v28, %v347_v54  ;;  %v1688_v42 = vsub.f32 0.0, %v1464_v5 }
 0x278   :  { %v1841_v7 = vcombine.low %v1809_v51, %v1810_v3  ;;  %v1812_v8 = vmul.f32 %v1796_v9, %v1396_v4  ;;  %v1703_v26 = vmul.f32 %v1687_v32, %v2496_v12  ;;  %v1702_v41 = vmul.f32 %v1686_v27, %v1462_v48 }
 0x279   :  { %v2131_v29 = vpop.eup %2130  ;;  %v1496_v23 = vadd.f32 1.0, %v1480_v13  ;;  %v388_v43 = vrot.slane %v2536_v28, %v355_v55  ;;  %v1704_v3 = vmul.f32 %v1688_v42, %v1464_v5  ;;  %v384_v5 = vrot.slane %v2536_v28, %v351_v58 }
 0x27a   :  { %v1541_v10 = vmul.f32 1.0614054, %v2131_v29  ;;  %v1849_v14 = vrot.slane %v1841_v7, %v2521_v61  ;;  %v1842_v16 = vcombine.low %v1811_v63, %v1812_v8  ;;  %v2531_v18 = vpop.eup %2132  ;;  %v1725_v11 = vmul.f32 1.442695, %v1703_v26 }
 0x27b   :  { %v1543_v25 = vmul.f32 1.0614054, %v2531_v18  ;;  %2136 = vrcp.f32 %v1496_v23  ;;  %v1723_v48 = vmul.f32 1.442695, %v1702_v41  ;;  %vm1429_vm6 = vcmp.lt.f32.partialorder %v2475_v33, 0.0 }
 0x27c   :  { %v1557_v17 = vadd.f32 -1.4531521, %v1541_v10  ;;  %v1856_v19 = vrot.slane %v1842_v16, %v2521_v61  ;;  %2138 = vpow2.f32 %v1721_v6  ;;  %v1445_v33 = vsel %vm1429_vm6, -1.0, %v2282_v46 }
 0x27d   :  { %v1559_v31 = vadd.f32 -1.4531521, %v1543_v25  ;;  %2140 = vpow2.f32 %v1725_v11  ;;  %v1727_v25 = vmul.f32 1.442695, %v1704_v3  ;;  %vm1431_vm7 = vcmp.lt.f32.partialorder %v2483_v45, 0.0 }
 0x27e   :  { %v1573_v44 = vmul.f32 %v2131_v29, %v1557_v17  ;;  %v1857_v30 = vcombine.low %v1849_v14, %v1856_v19  ;;  %2142 = vpow2.f32 %v1723_v48  ;;  %vm1430_vm8 = vcmp.lt.f32.partialorder %v2502_v20, 0.0 }
 0x27f   :  { %v1575_v36 = vmul.f32 %v2531_v18, %v1559_v31  ;;  %v2545_v12 = vpop.eup %2134  ;;  %2144 = vpow2.f32 %v1727_v25  ;;  %v1398_v45 = vmul.f32 0.5, %v2491_v56  ;;  %vm1432_vm9 = vcmp.lt.f32.partialorder %v2524_v62, 0.0 }
 0x280   :  { %v1589_v40 = vadd.f32 1.4214138, %v1573_v44  ;;  %1913 = vst [vmem:[%s2758_s5] sm:$0xff] %v1857_v30  ;;  %v1542_v57 = vmul.f32 1.0614054, %v2545_v12  ;;  %v404_v62 = vrot.slane %v2536_v28, %v371_v39 }
 0x281   :  { %v1591_v49 = vadd.f32 1.4214138, %v1575_v36 }
 0x282   :  { %v1605_v35 = vmul.f32 %v2131_v29, %v1589_v40  ;;  %v1558_v60 = vadd.f32 -1.4531521, %v1542_v57 }
 0x283   :  { %v1607_v52 = vmul.f32 %v2531_v18, %v1591_v49 }
 0x284   :  { %v1621_v47 = vadd.f32 -0.28449672, %v1605_v35  ;;  %v1263_v50 = vpop.f32.mrb[8].mxu1  ;;  %v1304_v51 = vpop.f32.mrb[12].mxu0  ;;  %v1574_v8 = vmul.f32 %v2545_v12, %v1558_v60  ;;  %v392_v35 = vrot.slane %v2536_v28, %v359_v59 }
 0x285   :  { %v2552_v54 = vadd.f32 %v1263_v50, %v380_v38  ;;  %v1265_v2 = vpop.f32.mrb[9].mxu1  ;;  %v1306_v63 = vpop.f32.mrb[13].mxu0  ;;  %v2554_v4 = vadd.f32 %v1304_v51, %v388_v43  ;;  %v1623_v7 = vadd.f32 -0.28449672, %v1607_v52 }
 0x286   :  { %v1637_v1 = vmul.f32 %v2131_v29, %v1621_v47  ;;  %v1267_v55 = vpop.f32.mrb[10].mxu1  ;;  %v1308_v9 = vpop.f32.mrb[14].mxu0  ;;  %v1590_v6 = vadd.f32 1.4214138, %v1574_v8  ;;  %v2582_v43 = vadd.f32 %v1265_v2, %v384_v5  ;;  %v2585_v51 = vadd.f32 %v1306_v63, %v392_v35 }
 0x287   :  { %v1268_v10 = vpop.f32.mrb[11].mxu1  ;;  %v2557_v32 = vpop.eup %2136  ;;  %v2560_v13 = vmul.f32 0.70710677, %v2552_v54  ;;  %v2563_v14 = vmul.f32 0.70710677, %v2554_v4  ;;  %v1639_v17 = vmul.f32 %v2531_v18, %v1623_v7 }
 0x288   :  { %v1653_v24 = vadd.f32 0.2548296, %v1637_v1  ;;  %v1544_v23 = vmul.f32 1.0614054, %v2557_v32  ;;  %v1309_v19 = vpop.f32.mrb[15].mxu0  ;;  %v2139_v44 = vpop.eup %2138  ;;  %v1606_v31 = vmul.f32 %v2545_v12, %v1590_v6  ;;  %v1397_v10 = vmul.f32 0.5, %v2462_v21 }
 0x289   :  { %v1465_v26 = vand.u32 2147483647, %v2560_v13  ;;  %v2572_v27 = vand.u32 2147483647, %v2563_v14  ;;  %v1655_v40 = vadd.f32 0.2548296, %v1639_v17  ;;  %v2141_v50 = vpop.eup %2140 }
 0x28a   :  { %v1669_v16 = vmul.f32 %v2131_v29, %v1653_v24  ;;  %v1560_v58 = vadd.f32 -1.4531521, %v1544_v23  ;;  %v1622_v38 = vadd.f32 -0.28449672, %v1606_v31  ;;  %v2590_v60 = vmul.f32 0.70710677, %v2582_v43  ;;  %v2143_v55 = vpop.eup %2142 }
 0x28b   :  { %v1481_v29 = vmul.f32 0.3275911, %v1465_v26  ;;  %v1671_v36 = vmul.f32 %v2531_v18, %v1655_v40  ;;  %v1483_v42 = vmul.f32 0.3275911, %v2572_v27  ;;  %v2598_v9 = vmul.f32 0.70710677, %v2585_v51  ;;  %v2145_v25 = vpop.eup %2144 }
 0x28c   :  { %v1749_v30 = vmul.f32 %v2139_v44, %v1669_v16  ;;  %v1576_v11 = vmul.f32 %v2557_v32, %v1560_v58  ;;  %v1638_v49 = vmul.f32 %v2545_v12, %v1622_v38  ;;  %v2595_v63 = vand.u32 2147483647, %v2590_v60 }
 0x28d   :  { %v1497_v41 = vadd.f32 1.0, %v1481_v29  ;;  %v1499_v59 = vadd.f32 1.0, %v1483_v42  ;;  %v1751_v18 = vmul.f32 %v2141_v50, %v1671_v36  ;;  %v1447_v23 = vsel %vm1431_vm7, -1.0, %v2282_v46 }
 0x28e   :  { %v1765_v47 = vsub.f32 1.0, %v1749_v30  ;;  %v1592_v57 = vadd.f32 1.4214138, %v1576_v11  ;;  %v1654_v1 = vadd.f32 0.2548296, %v1638_v49  ;;  %v1446_v19 = vsel %vm1430_vm8, -1.0, %v2282_v46 }
 0x28f   :  { %2146 = vrcp.f32 %v1497_v41  ;;  %v1767_v24 = vsub.f32 1.0, %v1751_v18  ;;  %v1482_v5 = vmul.f32 0.3275911, %v2595_v63  ;;  %v1468_v20 = vand.u32 2147483647, %v2598_v9 }
 0x290   :  { %v1608_v52 = vmul.f32 %v2557_v32, %v1592_v57  ;;  %v1781_v2 = vmul.f32 %v1765_v47, %v1445_v33  ;;  %v1670_v48 = vmul.f32 %v2545_v12, %v1654_v1  ;;  %2148 = vrcp.f32 %v1499_v59 }
 0x291   :  { %v1689_v12 = vsub.f32 0.0, %v1465_v26  ;;  %v1498_v44 = vadd.f32 1.0, %v1482_v5  ;;  %v1783_v30 = vmul.f32 %v1767_v24, %v1447_v23  ;;  %v1691_v56 = vsub.f32 0.0, %v2572_v27 }
 0x292   :  { %v1624_v3 = vadd.f32 -0.28449672, %v1608_v52  ;;  %v1750_v7 = vmul.f32 %v2143_v55, %v1670_v48  ;;  %v1797_v16 = vadd.f32 1.0, %v1781_v2  ;;  %v1484_v29 = vmul.f32 0.3275911, %v1468_v20 }
 0x293   :  { %v1705_v58 = vmul.f32 %v1689_v12, %v1465_v26  ;;  %2150 = vrcp.f32 %v1498_v44  ;;  %v1399_v41 = vmul.f32 0.5, %v2464_v22  ;;  %v1799_v47 = vadd.f32 1.0, %v1783_v30 }
 0x294   :  { %v1640_v8 = vmul.f32 %v2557_v32, %v1624_v3  ;;  %v1766_v17 = vsub.f32 1.0, %v1750_v7  ;;  %v1813_v35 = vmul.f32 %v1797_v16, %v1397_v10  ;;  %v1500_v42 = vadd.f32 1.0, %v1484_v29 }
 0x295   :  { %v1448_v26 = vsel %vm1432_vm9, -1.0, %v2282_v46  ;;  %v1729_v59 = vmul.f32 1.442695, %v1705_v58  ;;  %v1707_v18 = vmul.f32 %v1691_v56, %v2572_v27  ;;  %v1400_v2 = vmul.f32 0.5, %v2517_v15 }
 0x296   :  { %v1656_v6 = vadd.f32 0.2548296, %v1640_v8  ;;  %v1782_v40 = vmul.f32 %v1766_v17, %v1446_v19  ;;  %2152 = vrcp.f32 %v1500_v42  ;;  %v1690_v48 = vsub.f32 0.0, %v2595_v63 }
 0x297   :  { %v396_v3 = vrot.slane %v2536_v28, %v363_v37  ;;  %v1815_v27 = vmul.f32 %v1799_v47, %v1399_v41  ;;  %2154 = vpow2.f32 %v1729_v59  ;;  %v1733_v8 = vmul.f32 1.442695, %v1707_v18 }
 0x298   :  { %v1672_v21 = vmul.f32 %v2557_v32, %v1656_v6  ;;  %v1798_v36 = vadd.f32 1.0, %v1782_v40  ;;  %v1692_v10 = vsub.f32 0.0, %v1468_v20  ;;  %v1706_v39 = vmul.f32 %v1690_v48, %v2595_v63 }
 0x299   :  { %v2610_v31 = vpop.eup %2146  ;;  %2156 = vpow2.f32 %v1733_v8  ;;  %vm1433_vm10 = vcmp.lt.f32.partialorder %v2560_v13, 0.0  ;;  %vm1435_vm11 = vcmp.lt.f32.partialorder %v2563_v14, 0.0  ;;  %vm1434_vm12 = vcmp.lt.f32.partialorder %v2590_v60, 0.0 }
 0x29a   :  { %v1752_v38 = vmul.f32 %v2145_v25, %v1672_v21  ;;  %v1545_v11 = vmul.f32 1.0614054, %v2610_v31  ;;  %v1814_v49 = vmul.f32 %v1798_v36, %v1398_v45  ;;  %v2615_v32 = vpop.eup %2148  ;;  %v1708_v58 = vmul.f32 %v1692_v10, %v1468_v20 }
 0x29b   :  { %v1547_v22 = vmul.f32 1.0614054, %v2615_v32  ;;  %v1731_v47 = vmul.f32 1.442695, %v1706_v39  ;;  %v1451_v60 = vsel %vm1435_vm11, -1.0, %v2282_v46  ;;  %v1402_v14 = vmul.f32 0.5, %v2582_v43 }
 0x29c   :  { %v1768_v57 = vsub.f32 1.0, %v1752_v38  ;;  %v1561_v50 = vadd.f32 -1.4531521, %v1545_v11  ;;  %v1858_v1 = vcombine.low %v1813_v35, %v1814_v49  ;;  %vm1436_vm13 = vcmp.lt.f32.partialorder %v2598_v9, 0.0 }
 0x29d   :  { %v1563_v7 = vadd.f32 -1.4531521, %v1547_v22  ;;  %v2633_v17 = vpop.eup %2150  ;;  %v400_v22 = vrot.slane %v2536_v28, %v367_v0  ;;  %2158 = vpow2.f32 %v1731_v47  ;;  %v1401_v47 = vmul.f32 0.5, %v2552_v54 }
 0x29e   :  { %v1784_v52 = vmul.f32 %v1768_v57, %v1448_v26  ;;  %v1577_v33 = vmul.f32 %v2610_v31, %v1561_v50  ;;  %v1866_v37 = vrot.slane %v1858_v1, %v2521_v61  ;;  %v1546_v21 = vmul.f32 1.0614054, %v2633_v17 }
 0x29f   :  { %v1579_v5 = vmul.f32 %v2615_v32, %v1563_v7 }
 0x2a0   :  { %v1800_v55 = vadd.f32 1.0, %v1784_v52  ;;  %v1593_v24 = vadd.f32 1.4214138, %v1577_v33  ;;  %v1562_v38 = vadd.f32 -1.4531521, %v1546_v21  ;;  %v2651_v42 = vpop.eup %2152 }
 0x2a1   :  { %v1595_v40 = vadd.f32 1.4214138, %v1579_v5  ;;  %v1548_v52 = vmul.f32 1.0614054, %v2651_v42 }
 0x2a2   :  { %v1816_v12 = vmul.f32 %v1800_v55, %v1400_v2  ;;  %v1609_v15 = vmul.f32 %v2610_v31, %v1593_v24  ;;  %v1578_v59 = vmul.f32 %v2633_v17, %v1562_v38 }
 0x2a3   :  { %v1611_v36 = vmul.f32 %v2615_v32, %v1595_v40  ;;  %v1564_v55 = vadd.f32 -1.4531521, %v1548_v52 }
 0x2a4   :  { %v1345_v16 = vpop.f32.mrb[12].mxu1  ;;  %v1386_v45 = vpop.f32.mrb[16].mxu0  ;;  %v1859_v25 = vcombine.low %v1815_v27, %v1816_v12  ;;  %v1625_v30 = vadd.f32 -0.28449672, %v1609_v15 }
 0x2a5   :  { %v2637_v6 = vadd.f32 %v1345_v16, %v396_v3  ;;  %v2639_v23 = vadd.f32 %v1386_v45, %v404_v62  ;;  %v1347_v19 = vpop.f32.mrb[13].mxu1  ;;  %v1388_v44 = vpop.f32.mrb[17].mxu0  ;;  %v1627_v26 = vadd.f32 -0.28449672, %v1611_v36  ;;  %v1594_v3 = vadd.f32 1.4214138, %v1578_v59 }
 0x2a6   :  { %v1873_v63 = vrot.slane %v1859_v25, %v2521_v61  ;;  %v1641_v35 = vmul.f32 %v2610_v31, %v1625_v30  ;;  %v1349_v11 = vpop.f32.mrb[14].mxu1  ;;  %v1390_v41 = vpop.f32.mrb[18].mxu0  ;;  %v1735_v62 = vmul.f32 1.442695, %v1708_v58  ;;  %v1580_v12 = vmul.f32 %v2651_v42, %v1564_v55 }
 0x2a7   :  { %v2643_v56 = vmul.f32 0.70710677, %v2637_v6  ;;  %v2646_v29 = vmul.f32 0.70710677, %v2639_v23  ;;  %v1350_v18 = vpop.f32.mrb[15].mxu1  ;;  %v1391_v1 = vpop.f32.mrb[19].mxu0  ;;  %v1643_v48 = vmul.f32 %v2615_v32, %v1627_v26  ;;  %v1610_v0 = vmul.f32 %v2633_v17, %v1594_v3 }
 0x2a8   :  { %v1874_v57 = vcombine.low %v1866_v37, %v1873_v63  ;;  %v1657_v50 = vadd.f32 0.2548296, %v1641_v35  ;;  %v2155_v27 = vpop.eup %2154  ;;  %v1596_v37 = vadd.f32 1.4214138, %v1580_v12  ;;  %v2677_v39 = vadd.f32 %v1347_v19, %v400_v22 }
 0x2a9   :  { %v2654_v20 = vand.u32 2147483647, %v2643_v56  ;;  %v2657_v49 = vand.u32 2147483647, %v2646_v29  ;;  %v1659_v10 = vadd.f32 0.2548296, %v1643_v48  ;;  %v2157_v45 = vpop.eup %2156 }
 0x2aa   :  { %1914 = vst [vmem:[%s2758_s5 + $0x8] sm:$0xff] %v1874_v57  ;;  %v1673_v2 = vmul.f32 %v2610_v31, %v1657_v50  ;;  %v408_v31 = vrot.slane %v2536_v28, %v375_v34  ;;  %v1626_v16 = vadd.f32 -0.28449672, %v1610_v0  ;;  %v1612_v21 = vmul.f32 %v2651_v42, %v1596_v37  ;;  %v2159_v36 = vpop.eup %2158 }
 0x2ab   :  { %v1485_v33 = vmul.f32 0.3275911, %v2654_v20  ;;  %v1487_v7 = vmul.f32 0.3275911, %v2657_v49  ;;  %v1675_v5 = vmul.f32 %v2615_v32, %v1659_v10  ;;  %v2683_v53 = vmul.f32 0.70710677, %v2677_v39 }
 0x2ac   :  { %v1753_v8 = vmul.f32 %v2155_v27, %v1673_v2  ;;  %v1642_v30 = vmul.f32 %v2633_v17, %v1626_v16  ;;  %v2685_v34 = vadd.f32 %v1388_v44, %v408_v31  ;;  %v1449_v32 = vsel %vm1433_vm10, -1.0, %v2282_v46 }
 0x2ad   :  { %v1501_v24 = vadd.f32 1.0, %v1485_v33  ;;  %v1503_v15 = vadd.f32 1.0, %v1487_v7  ;;  %v1755_v40 = vmul.f32 %v2157_v45, %v1675_v5  ;;  %v1628_v19 = vadd.f32 -0.28449672, %v1612_v21 }
 0x2ae   :  { %v1769_v25 = vsub.f32 1.0, %v1753_v8  ;;  %v1658_v28 = vadd.f32 0.2548296, %v1642_v30  ;;  %v2690_v13 = vand.u32 2147483647, %v2683_v53  ;;  %v1693_v35 = vsub.f32 0.0, %v2654_v20 }
 0x2af   :  { %2160 = vrcp.f32 %v1501_v24  ;;  %v1771_v38 = vsub.f32 1.0, %v1755_v40  ;;  %v1644_v44 = vmul.f32 %v2651_v42, %v1628_v19  ;;  %v2698_v41 = vmul.f32 0.70710677, %v2685_v34 }
 0x2b0   :  { %2162 = vpow2.f32 %v1735_v62  ;;  %v1785_v58 = vmul.f32 %v1769_v25, %v1449_v32  ;;  %v1674_v63 = vmul.f32 %v2633_v17, %v1658_v28  ;;  %v1486_v11 = vmul.f32 0.3275911, %v2690_v13 }
 0x2b1   :  { %2164 = vrcp.f32 %v1503_v15  ;;  %v1403_v57 = vmul.f32 0.5, %v2554_v4  ;;  %v1450_v17 = vsel %vm1434_vm12, -1.0, %v2282_v46  ;;  %v1660_v59 = vadd.f32 0.2548296, %v1644_v44 }
 0x2b2   :  { %v1754_v50 = vmul.f32 %v2159_v36, %v1674_v63  ;;  %v1502_v18 = vadd.f32 1.0, %v1486_v11  ;;  %v1801_v1 = vadd.f32 1.0, %v1785_v58  ;;  %v1709_v22 = vmul.f32 %v1693_v35, %v2654_v20 }
 0x2b3   :  { %v1787_v2 = vmul.f32 %v1771_v38, %v1451_v60  ;;  %v1676_v4 = vmul.f32 %v2651_v42, %v1660_v59  ;;  %v1472_v48 = vand.u32 2147483647, %v2698_v41  ;;  %v1695_v55 = vsub.f32 0.0, %v2657_v49 }
 0x2b4   :  { %v1770_v52 = vsub.f32 1.0, %v1754_v50  ;;  %2166 = vrcp.f32 %v1502_v18  ;;  %v1817_v8 = vmul.f32 %v1801_v1, %v1401_v47  ;;  %v1737_v0 = vmul.f32 1.442695, %v1709_v22 }
 0x2b5   :  { %v1488_v7 = vmul.f32 0.3275911, %v1472_v48  ;;  %v1803_v12 = vadd.f32 1.0, %v1787_v2  ;;  %v1452_v16 = vsel %vm1436_vm13, -1.0, %v2282_v46  ;;  %v1711_v37 = vmul.f32 %v1695_v55, %v2657_v49 }
 0x2b6   :  { %v1786_v62 = vmul.f32 %v1770_v52, %v1450_v17  ;;  %v1694_v30 = vsub.f32 0.0, %v2690_v13  ;;  %v1404_v21 = vmul.f32 0.5, %v2585_v51  ;;  %v1696_v17 = vsub.f32 0.0, %v1472_v48 }
 0x2b7   :  { %v1504_v5 = vadd.f32 1.0, %v1488_v7  ;;  %v1819_v32 = vmul.f32 %v1803_v12, %v1403_v57  ;;  %v1741_v38 = vmul.f32 1.442695, %v1711_v37  ;;  %vm1437_vm14 = vcmp.lt.f32.partialorder %v2643_v56, 0.0 }
 0x2b8   :  { %v1802_v10 = vadd.f32 1.0, %v1786_v62  ;;  %v1710_v44 = vmul.f32 %v1694_v30, %v2690_v13  ;;  %v1712_v2 = vmul.f32 %v1696_v17, %v1472_v48  ;;  %vm1439_vm15 = vcmp.lt.f32.partialorder %v2646_v29, 0.0 }
 0x2b9   :  { %v2702_v26 = vpop.eup %2160  ;;  %2168 = vrcp.f32 %v1504_v5  ;;  %vm1438_vm0 = vcmp.lt.f32.partialorder %v2683_v53, 0.0  ;;  %v1406_v29 = vmul.f32 0.5, %v2677_v39  ;;  %vm1440_vm1 = vcmp.lt.f32.partialorder %v2698_v41, 0.0 }
 0x2ba   :  { %v1549_v33 = vmul.f32 1.0614054, %v2702_v26  ;;  %v2163_v54 = vpop.eup %2162  ;;  %v1818_v43 = vmul.f32 %v1802_v10, %v1402_v14  ;;  %2170 = vpow2.f32 %v1737_v0  ;;  %v1739_v52 = vmul.f32 1.442695, %v1710_v44 }
 0x2bb   :  { %v2712_v3 = vpop.eup %2164  ;;  %v1756_v24 = vmul.f32 %v2163_v54, %v1676_v4  ;;  %2172 = vpow2.f32 %v1741_v38  ;;  %v1743_v7 = vmul.f32 1.442695, %v1712_v2 }
 0x2bc   :  { %v1565_v27 = vadd.f32 -1.4531521, %v1549_v33  ;;  %v1551_v20 = vmul.f32 1.0614054, %v2712_v3  ;;  %v1875_v40 = vcombine.low %v1817_v8, %v1818_v43  ;;  %2174 = vpow2.f32 %v1739_v52 }
 0x2bd   :  { %v1772_v15 = vsub.f32 1.0, %v1756_v24  ;;  %2176 = vpow2.f32 %v1743_v7  ;;  %v1453_v43 = vsel %vm1437_vm14, -1.0, %v2282_v46 }
 0x2be   :  { %v1581_v42 = vmul.f32 %v2702_v26, %v1565_v27  ;;  %v1567_v31 = vadd.f32 -1.4531521, %v1551_v20  ;;  %v2167_v35 = vpop.eup %2166  ;;  %v1883_v50 = vrot.slane %v1875_v40, %v2521_v61 }
 0x2bf   :  { %v1788_v9 = vmul.f32 %v1772_v15, %v1452_v16  ;;  %v1550_v47 = vmul.f32 1.0614054, %v2167_v35 }
 0x2c0   :  { %v1597_v45 = vadd.f32 1.4214138, %v1581_v42  ;;  %v1583_v25 = vmul.f32 %v2712_v3, %v1567_v31 }
 0x2c1   :  { %v1804_v19 = vadd.f32 1.0, %v1788_v9  ;;  %v1566_v59 = vadd.f32 -1.4531521, %v1550_v47 }
 0x2c2   :  { %v1613_v28 = vmul.f32 %v2702_v26, %v1597_v45  ;;  %v1599_v58 = vadd.f32 1.4214138, %v1583_v25 }
 0x2c3   :  { %v1820_v36 = vmul.f32 %v1804_v19, %v1404_v21  ;;  %v1582_v22 = vmul.f32 %v2167_v35, %v1566_v59  ;;  %v2169_v13 = vpop.eup %2168  ;;  %v1405_v19 = vmul.f32 0.5, %v2637_v6 }
 0x2c4   :  { %v1629_v63 = vadd.f32 -0.28449672, %v1613_v28  ;;  %v1615_v49 = vmul.f32 %v2712_v3, %v1599_v58  ;;  %v1552_v62 = vmul.f32 1.0614054, %v2169_v13  ;;  %v2171_v27 = vpop.eup %2170  ;;  %v1455_v28 = vsel %vm1439_vm15, -1.0, %v2282_v46 }
 0x2c5   :  { %v1876_v51 = vcombine.low %v1819_v32, %v1820_v36  ;;  %v1598_v14 = vadd.f32 1.4214138, %v1582_v22  ;;  %v2173_v12 = vpop.eup %2172  ;;  %v1454_v32 = vsel %vm1438_vm0, -1.0, %v2282_v46 }
 0x2c6   :  { %v1645_v11 = vmul.f32 %v2702_v26, %v1629_v63  ;;  %v1631_v60 = vadd.f32 -0.28449672, %v1615_v49  ;;  %v1568_v20 = vadd.f32 -1.4531521, %v1552_v62  ;;  %v2175_v9 = vpop.eup %2174 }
 0x2c7   :  { %v1890_v18 = vrot.slane %v1876_v51, %v2521_v61  ;;  %v1614_v24 = vmul.f32 %v2167_v35, %v1598_v14  ;;  %v2177_v36 = vpop.eup %2176  ;;  %v1407_v51 = vmul.f32 0.5, %v2639_v23 }
 0x2c8   :  { %v1661_v57 = vadd.f32 0.2548296, %v1645_v11  ;;  %v1647_v1 = vmul.f32 %v2712_v3, %v1631_v60  ;;  %v1584_v10 = vmul.f32 %v2169_v13, %v1568_v20 }
 0x2c9   :  { %v1891_v54 = vcombine.low %v1883_v50, %v1890_v18  ;;  %v1456_v50 = vsel %vm1440_vm1, -1.0, %v2282_v46 }
 0x2ca   :  { %v1677_v33 = vmul.f32 %v2702_v26, %v1661_v57  ;;  %v1663_v4 = vadd.f32 0.2548296, %v1647_v1  ;;  %v1630_v26 = vadd.f32 -0.28449672, %v1614_v24  ;;  %v1600_v0 = vadd.f32 1.4214138, %v1584_v10 }
 0x2cb   :  { %1915 = vst [vmem:[%s2758_s5 + $0x10] sm:$0xff] %v1891_v54  ;;  %v1408_v57 = vmul.f32 0.5, %v2685_v34 }
 0x2cc   :  { %v1757_v55 = vmul.f32 %v2171_v27, %v1677_v33  ;;  %v1679_v8 = vmul.f32 %v2712_v3, %v1663_v4  ;;  %v1646_v42 = vmul.f32 %v2167_v35, %v1630_v26  ;;  %v1616_v5 = vmul.f32 %v2169_v13, %v1600_v0 }
 0x2ce   :  { %v1773_v48 = vsub.f32 1.0, %v1757_v55  ;;  %v1759_v15 = vmul.f32 %v2173_v12, %v1679_v8  ;;  %v1662_v31 = vadd.f32 0.2548296, %v1646_v42  ;;  %v1632_v37 = vadd.f32 -0.28449672, %v1616_v5 }
 0x2d0   :  { %v1789_v16 = vmul.f32 %v1773_v48, %v1453_v43  ;;  %v1678_v45 = vmul.f32 %v2167_v35, %v1662_v31  ;;  %v1775_v3 = vsub.f32 1.0, %v1759_v15  ;;  %v1648_v25 = vmul.f32 %v2169_v13, %v1632_v37 }
 0x2d2   :  { %v1758_v56 = vmul.f32 %v2175_v9, %v1678_v45  ;;  %v1805_v30 = vadd.f32 1.0, %v1789_v16  ;;  %v1664_v21 = vadd.f32 0.2548296, %v1648_v25  ;;  %v1791_v58 = vmul.f32 %v1775_v3, %v1455_v28 }
 0x2d4   :  { %v1774_v40 = vsub.f32 1.0, %v1758_v56  ;;  %v1680_v35 = vmul.f32 %v2169_v13, %v1664_v21  ;;  %v1821_v49 = vmul.f32 %v1805_v30, %v1405_v19  ;;  %v1807_v44 = vadd.f32 1.0, %v1791_v58 }
 0x2d6   :  { %v1790_v63 = vmul.f32 %v1774_v40, %v1454_v32  ;;  %v1760_v53 = vmul.f32 %v2177_v36, %v1680_v35  ;;  %v1823_v17 = vmul.f32 %v1807_v44, %v1407_v51 }
 0x2d8   :  { %v1806_v38 = vadd.f32 1.0, %v1790_v63  ;;  %v1776_v47 = vsub.f32 1.0, %v1760_v53 }
 0x2da   :  { %v1822_v11 = vmul.f32 %v1806_v38, %v1406_v29  ;;  %v1792_v6 = vmul.f32 %v1776_v47, %v1456_v50 }
 0x2dc   :  { %v1892_v60 = vcombine.low %v1821_v49, %v1822_v11  ;;  %v1808_v59 = vadd.f32 1.0, %v1792_v6 }
 0x2de   :  { %v1824_v18 = vmul.f32 %v1808_v59, %v1408_v57  ;;  %v1900_v39 = vrot.slane %v1892_v60, %v2521_v61 }
 0x2e0   :  { %v1893_v1 = vcombine.low %v1823_v17, %v1824_v18 }
 0x2e2   :  { %v1907_v41 = vrot.slane %v1893_v1, %v2521_v61 }
 0x2e4   :  { %v1908_v52 = vcombine.low %v1900_v39, %v1907_v41 }
 0x2e6   :  { %1916 = vst [vmem:[%s2758_s5 + $0x18] sm:$0xff] %v1908_v52 }
 0x2e7   :  { %1921 = vsyncpa [#allocation3], 1 }
 0x2e8   :  { %1922 = vsyncpa [#allocation5], 1 }
 0x2e9   :  { %1923 = vsyncpa [#allocation8], 1 }

// kernel: transformer_forward.3
= control target key start
LH: loop header
LB: loop body
LE: loop exit
PB: predicated region body
PF: predicated region fallthrough
CT: control target
= control target key end

     0   :  { %s10239_s0 = inlined_call_operand.vmem [shape: f32[2,8,16], index: 0, kind: input, shape index: {}]   ;;  %s10240_s1 = inlined_call_operand.vmem [shape: f32[2,8,1], index: 1, kind: input, shape index: {}]   ;;  %s10241_s2 = inlined_call_operand.vmem [shape: f32[2,1,8], index: 2, kind: input, shape index: {}]   ;;  %s10242_s3 = inlined_call_operand.vmem [shape: f32[2,2,4,256], index: 3, kind: input, shape index: {}]   ;;  %s10243_s4 = inlined_call_operand.vmem [shape: f32[8,32], index: 4, kind: input, shape index: {}]   ;;  %s10244_s5 = inlined_call_operand.vmem [shape: f32[8,32], index: 5, kind: input, shape index: {}]   ;;  %s10245_s6 = inlined_call_operand.vmem [shape: bf16[16,256], index: 6, kind: input, shape index: {}]   ;;  %s10246_s7 = inlined_call_operand.vmem [shape: f32[1,256], index: 7, kind: input, shape index: {}]   ;;  %s10247_s8 = inlined_call_operand.vmem [shape: bf16[2,8,256,160], index: 8, kind: input, shape index: {}]   ;;  %s10248_s9 = inlined_call_operand.vmem [shape: bf16[2,8,32,256], index: 9, kind: input, shape index: {}]   ;;  %s10249_s10 = inlined_call_operand.vmem [shape: f32[2,1,256], index: 10, kind: input, shape index: {}]   ;;  %s10250_s11 = inlined_call_operand.vmem [shape: bf16[2,256,1024], index: 11, kind: input, shape index: {}]   ;;  %s10251_s12 = inlined_call_operand.vmem [shape: f32[2,1,1024], index: 12, kind: input, shape index: {}]   ;;  %s10252_s13 = inlined_call_operand.vmem [shape: bf16[2,1024,256], index: 13, kind: input, shape index: {}]   ;;  %s10253_s14 = inlined_call_operand.vmem [shape: f32[2,1,256], index: 14, kind: input, shape index: {}]   ;;  %s10254_s15 = inlined_call_operand.vmem [shape: bf16[256,16], index: 15, kind: input, shape index: {}]   ;;  %s10255_s16 = inlined_call_operand.vmem [shape: f32[1,16], index: 16, kind: input, shape index: {}]   ;;  %s10256_s17 = inlined_call_operand.hbm [shape: f32[2,8,16], index: 17, kind: output, shape index: {0}]   ;;  %s10257_s18 = inlined_call_operand.hbm [shape: f32[2,8,256], index: 18, kind: output, shape index: {1}]  }
   0x1   :  { %10279 = sst [smem:[#allocation23_spill]] %s10239_s0 }
   0x2   :  { %10280 = sst [smem:[#allocation24_spill]] %s10240_s1 }
   0x3   :  { %10281 = sst [smem:[#allocation25_spill]] %s10241_s2 }
   0x4   :  { %10282 = sst [smem:[#allocation26_spill]] %s10243_s4 }
   0x5   :  { %10283 = sst [smem:[#allocation27_spill]] %s10244_s5 }
   0x6   :  { %10284 = sst [smem:[#allocation28_spill]] %s10245_s6 }
   0x7   :  { %10285 = sst [smem:[#allocation29_spill]] %s10246_s7 }
   0x8   :  { %10286 = sst [smem:[#allocation30_spill]] %s10247_s8 }
   0x9   :  { %10287 = sst [smem:[#allocation31_spill]] %s10254_s15 }
   0xa   :  { %10288 = sst [smem:[#allocation32_spill]] %s10255_s16 }
   0xb   :  { %10289 = sst [smem:[#allocation33_spill]] %s10256_s17 }
   0xc   :  { %10290 = sst [smem:[#allocation34_spill]] %s10257_s18 }
   0xd   :  { %24 = vsyncpa [#allocation3], 0 }
   0xe   :  { %26 = vsyncpa [#allocation3 + $0x1], 0 }
   0xf   :  { %27 = vsyncpa [#allocation5], 0 }
  0x10   :  { %29 = vsyncpa [#allocation5 + $0x1], 0  ;;  %s8867_s27 = smov 0   ;;  %s8869_s28 = smov 0  }
  0x11   :  { %s8871_s29 = smov 0   ;;  %s8873_s30 = smov 0  }
  0x12   :  { %s8875_s0 = smov 0   ;;  %s8877_s19 = smov 0  }
  0x13   :  { %s8879_s1 = smov 0   ;;  %s8881_s20 = smov 0  }
  0x14 LB: > { %10291 = sst [smem:[#allocation8_spill]] %s8732_s27  ;;  %s7058_s21 = sadd.s32 4294967295, %s8760_s20   ;;  %s8760_s20 = sphi %s8881_s20, %s35_s20   ;;  %s8756_s1 = sphi %s8879_s1, %s10339_s1   ;;  %s8752_s19 = sphi %s8877_s19, %s10338_s19   ;;  %s8748_s0 = sphi %s8875_s0, %s10337_s0   ;;  %s8744_s30 = sphi %s8873_s30, %s10336_s30   ;;  %s8740_s29 = sphi %s8871_s29, %s10335_s29   ;;  %s8736_s28 = sphi %s8869_s28, %s10334_s28   ;;  %s8732_s27 = sphi %s8867_s27, %s10333_s27  }
  0x15   : > { %10292 = sst [smem:[#allocation9_spill]] %s8736_s28  ;;  %s7059_s22 = sadd.s32 4294967294, %s8760_s20  }
  0x16   : > { %10293 = sst [smem:[#allocation10_spill]] %s8740_s29  ;;  %s44_s2 = sadd.s32 1, %s8752_s19 }
  0x17   : > { %10294 = sst [smem:[#allocation11_spill]] %s8748_s0  ;;  %p45_p0 = scmp.ge.s32.totalorder %s44_s2, 2 }
  0x18   : > { %10295 = sst [smem:[#allocation12_spill]] %s8752_s19  ;;  %s47_s23 = sadd.s32 1, %s8756_s1 }
  0x19   : > { %10296 = sst [smem:[#allocation13_spill]] %s8756_s1  ;;  %p478_p1 = scmp.ne.s32.totalorder %s8740_s29, %s8736_s28 }
  0x1a   : > { %10297 = sst [smem:[#allocation14_spill]] %s8760_s20  ;;  %p479_p2 = scmp.eq.s32.totalorder %s7058_s21, 3 }
  0x1b   : > { %s10341_s2 = smov (%p45_p0, %s44_s2), 0  ;;  %s10343_s23 = smov (!%p45_p0, %s47_s23), %s8756_s1 }
  0x1c   : > { %10298 = sst [smem:[#allocation15_spill]] %s10341_s2  ;;  %p8916_p3 = por %p479_p2, %p478_p1 }
  0x1d   : > { %p484_p4 = scmp.ne.s32.totalorder %s8736_s28, %s8732_s27  ;;  %p49_p5 = scmp.ge.s32.totalorder %s10343_s23, 2 }
  0x1e   : > { %s10299_s24 = scalar_select %p8916_p3, 1, 0 }
  0x1f   : > { %p485_p6 = scmp.eq.s32.totalorder %s7059_s22, 3  ;;  %p7062_p7 = scmp.ge.s32.totalorder %s8760_s20, 1 }
  0x20   : > { %10300 = sst [smem:[#allocation16_spill]] %s10299_s24  ;;  %p632_p8 = scmp.lt.s32.totalorder %s8760_s20, 5 }
  0x21   : > { %s10345_s23 = smov (%p49_p5, %s10343_s23), 0  ;;  %p8926_p9 = por %p485_p6, %p484_p4 }
  0x22   : > { %10301 = sst [smem:[#allocation17_spill]] %s10345_s23  ;;  %p633_p10 = pnand %p7062_p7, %p632_p8 }
  0x23   : > { %s10302_s25 = scalar_select %p8926_p9, 1, 0 }
  0x24   : > { %s465_s26 = ssub.s32 %s8756_s1, %s10345_s23  ;;  %s468_s21 = sadd.s32 1, %s8740_s29 }
  0x25   : > { %10303 = sst [smem:[#allocation18_spill]] %s10302_s25  ;;  %p466_p11 = scmp.eq.s32.totalorder %s465_s26, 0 }
  0x26   : > { %636 = sbr.rel (%p633_p10) target bundleno = 3388 (0xd3c), region = 88 }
  0x27   : > { %s8934_s2 = scalar_select %p466_p11, %s8740_s29, %s468_s21  }
  0x29   : > { %10304 = sst [smem:[#allocation19_spill]] %s8934_s2 }
  0x2d   : > { %s8937_s22 = sand.u32 1, %s8736_s28   ;;  %p738_p12 = scmp.lt.s32.totalorder %s8748_s0, 1 }
  0x2e   : > { %10305 = sst [smem:[#allocation20_spill]] %s8937_s22  ;;  %s7063_s19 = sshll.u32 %s8937_s22, 3 }
  0x2f   : > { %s7064_s27 = sshll.u32 %s8937_s22, 4  ;;  %p751_p13 = scmp.lt.s32.totalorder %s8744_s30, 1 }
  0x30   : > { %s8943_s25 = scalar_select %p738_p12, %s8748_s0, 1 }
  0x31   : > { %s10308_s28 = sld [smem:[#allocation23_spill]]  ;;  %s10309_s16 = sld [smem:[#allocation24_spill]] }
  0x32   : > { %10306 = sst [smem:[#allocation21_spill]] %s8943_s25  ;;  %s7065_s26 = sshll.u32 %s8943_s25, 3 }
  0x33   : > { %s752_s22 = scalar_select %p751_p13, %s8744_s30, 1 }
  0x34   : > { %s7068_s0 = sshll.u32 %s8943_s25, 2  ;;  %s10311_s8 = sld [smem:[#allocation30_spill]] }
  0x35   : > { %s8961_s4 = sshll.u32 %s752_s22, 1  ;;  %s7679_s5 = sshll.u32 %s752_s22, 11 }
  0x36   : > { %s755_s7 = sadd.s32 %s7068_s0, %s8961_s4  ;;  %s7680_s29 = sshll.u32 %s752_s22, 8 }
  0x37   : > { %s741_s18 = scalar_lea.vmem %s10308_s28, %s7065_s26  ;;  %s8957_s15 = scalar_lea.vmem %s10309_s16, %s7065_s26 }
  0x38   : > { %10310 = sst [smem:[#allocation22_spill]] %s8957_s15  ;;  %s7069_s28 = sshll.u32 %s755_s7, 2 }
  0x39   : > { %s8972_s16 = scalar_lea.vmem %s10242_s3, %s7069_s28  ;;  %s8977_s2 = scalar_lea.vmem %s10248_s9, %s7680_s29 }
  0x3a   : > { %s8967_s21 = scalar_lea.vmem %s10311_s8, %s7679_s5  ;;  %s7681_s6 = sshll.u32 %s752_s22, 10 }
  0x3b   : > { %s8986_s7 = scalar_lea.vmem %s10250_s11, %s7681_s6  ;;  %s7077_s1 = sshll.u32 %s752_s22, 3 }
  0x3c   : > { %s8991_s28 = scalar_lea.vmem %s10251_s12, %s7077_s1  ;;  %s8996_s29 = scalar_lea.vmem %s10252_s13, %s7681_s6 }
  0x3d   : > { %s789_s25 = scalar_lea.vmem %s10253_s14, %s8961_s4  ;;  %s9002_s0 = scalar_lea.vmem [#allocation2], %s7063_s19 }
  0x3e   : > { %s9004_s23 = scalar_lea.vmem [#allocation4], %s7064_s27  ;;  %p7081_p0 = scmp.ne.s32.totalorder %s8744_s30, 0 }
  0x3f   : > { %s10312_s5 = sld [smem:[#allocation28_spill]] (!%p7081_p0)  ;;  %v8762_v2 = vmov (!%p7081_p0), 0   ;;  %v795_v3 = vld [vmem:[%s741_s18] sm:$0xff] (!%p7081_p0)  ;;  %vm821_vm0 = vcmask (!%p7081_p0), 130048   ;;  %v801_v5 = vlaneseq (!%p7081_p0)  ;;  %s10313_s19 = sld [smem:[#allocation29_spill]] (!%p7081_p0) }
  0x40   : > { %794 = sbr.rel (%p7081_p0) target bundleno = 290 (0x122), region = 92  ;;  %857 = vmatprep.mubr.bf16.mxu0 (!%p7081_p0), %v8762_v2  ;;  %v796_v4 = vpack.c.bf16 (!%p7081_p0), %v795_v3, %v795_v3 }
  0x41   : > { %v802_v6 = vshrl.u32 (!%p7081_p0), %v801_v5, 7 }
  0x43   : > { %v803_v7 = vsub.s32 (!%p7081_p0), 0, %v802_v6  ;;  %v807_v9 = vsub.s32 (!%p7081_p0), 1, %v802_v6 }
  0x45   : > { %v7918_v0 = vld [vmem:[%s10312_s5 + $0x4] ss:$8 sps:$4 sm:$0xff] (!%p7081_p0)   ;;  %v7920_v1 = vld [vmem:[%s10312_s5] ss:$8 sps:$4 sm:$0xff] (!%p7081_p0)  }
  0x46   : > { %825 = vmatprep.subr.bf16.mxu0 (!%p7081_p0), %v7918_v0  ;;  %v799_v8 = vld [vmem:[%s10313_s19] sm:$0x3] (!%p7081_p0) }
  0x47   : > { %826 = vmatpush1.bf16.msra.mxu0 %v7920_v1  ;;  %v804_v10 = vrot.slane %v799_v8, %v803_v7  ;;  %v808_v11 = vrot.slane %v799_v8, %v807_v9 }
  0x4a   : > { %7084 = vmatmul.mubr.msk.bf16.vlgmr.msra.gmra.mrb[0].mxu0 %vm821_vm0, %v796_v4 }
 0x11d   : > { %v859_v12 = vpop.f32.mrb[0].mxu0 }
 0x11e   : > { %v860_v13 = vadd.f32 %v859_v12, %v804_v10  ;;  %v861_v14 = vpop.f32.mrb[1].mxu0 }
 0x11f   : > { %v862_v15 = vadd.f32 %v861_v14, %v808_v11  ;;  %v863_v16 = vpop.f32.mrb[2].mxu0 }
 0x120   : > { %866 = vst [vmem:[%s9004_s23] sm:$0xff] %v860_v13  ;;  %v864_v17 = vpop.f32.mrb[3].mxu0 }
 0x121   : > { %867 = vst [vmem:[%s9004_s23 + $0x8] sm:$0xff] %v862_v15 }
 0x122 PF: > { %v7922_v21 = vld [vmem:[%s8967_s21 + $0x4] ss:$8 sps:$4 sm:$0xff]   ;;  %v7926_v23 = vld [vmem:[%s8967_s21] ss:$8 sps:$4 sm:$0xff]   ;;  %v7928_v25 = vld [vmem:[%s8967_s21 + $0x14] ss:$8 sps:$4 sm:$0xff]   ;;  %s10320_s22 = scalar_lea.vmem %s10249_s10, %s8961_s4 }
 0x123   : > { %v7924_v22 = vld [vmem:[%s8967_s21 + $0x104] ss:$8 sps:$4 sm:$0xff]   ;;  %v7927_v24 = vld [vmem:[%s8967_s21 + $0x100] ss:$8 sps:$4 sm:$0xff]   ;;  %v7930_v26 = vld [vmem:[%s8967_s21 + $0x114] ss:$8 sps:$4 sm:$0xff]   ;;  %1364 = vmatprep.subr.bf16.mxu0 %v7922_v21 }
 0x124   : > { %1565 = vmatprep.subr.bf16.mxu1 %v7924_v22  ;;  %1365 = vmatpush1.bf16.msra.mxu0 %v7926_v23  ;;  %v7932_v27 = vld [vmem:[%s8967_s21 + $0x10] ss:$8 sps:$4 sm:$0xff]   ;;  %v7934_v29 = vld [vmem:[%s8967_s21 + $0x24] ss:$8 sps:$4 sm:$0xff]   ;;  %v7938_v31 = vld [vmem:[%s8967_s21 + $0x20] ss:$8 sps:$4 sm:$0xff]  }
 0x125   : > { %1566 = vmatpush1.bf16.msra.mxu1 %v7927_v24  ;;  %v7933_v28 = vld [vmem:[%s8967_s21 + $0x110] ss:$8 sps:$4 sm:$0xff]   ;;  %1366 = vmatprep.subr.bf16.mxu0 %v7928_v25  ;;  %v7936_v30 = vld [vmem:[%s8967_s21 + $0x124] ss:$8 sps:$4 sm:$0xff]   ;;  %v7939_v32 = vld [vmem:[%s8967_s21 + $0x120] ss:$8 sps:$4 sm:$0xff]  }
 0x126   : > { %1567 = vmatprep.subr.bf16.mxu1 %v7930_v26  ;;  %v7940_v33 = vld [vmem:[%s8967_s21 + $0x34] ss:$8 sps:$4 sm:$0xff]   ;;  %v7944_v35 = vld [vmem:[%s8967_s21 + $0x30] ss:$8 sps:$4 sm:$0xff]   ;;  %v7946_v37 = vld [vmem:[%s8967_s21 + $0x44] ss:$8 sps:$4 sm:$0xff]  }
 0x127   : > { %v9019_v18 = vld [vmem:[%s9004_s23] sm:$0xff]  ;;  %s10314_s24 = sld [smem:[#allocation27_spill]]  ;;  %s8763_s26 = smov 96   ;;  %vm8767_vm1 = vmmov 0   ;;  %vm2954_vm2 = vcmask 261120   ;;  %vm3462_vm3 = vcmask 1043456  }
 0x128   : > { %v9022_v19 = vld [vmem:[%s9004_s23 + $0x8] sm:$0xff]  ;;  %1367 = vmatpush1.bf16.msra.mxu0 %v7932_v27  ;;  %s10315_s8 = sld [smem:[#allocation26_spill]]  ;;  %s8764_s1 = smov 64   ;;  %vm3354_vm5 = vcmask 64512  }
 0x129   : > { %v888_v20 = vadd.f32 %v9022_v19, %v9019_v18  ;;  %1568 = vmatpush1.bf16.msra.mxu1 %v7933_v28  ;;  %1368 = vmatprep.subr.bf16.mxu0 %v7934_v29  ;;  %v7942_v34 = vld [vmem:[%s8967_s21 + $0x134] ss:$8 sps:$4 sm:$0xff]   ;;  %v7945_v36 = vld [vmem:[%s8967_s21 + $0x130] ss:$8 sps:$4 sm:$0xff]   ;;  %v7948_v38 = vld [vmem:[%s8967_s21 + $0x144] ss:$8 sps:$4 sm:$0xff]  }
 0x12a   : > { %1569 = vmatprep.subr.bf16.mxu1 %v7936_v30  ;;  %v7950_v39 = vld [vmem:[%s8967_s21 + $0x40] ss:$8 sps:$4 sm:$0xff]   ;;  %v7952_v41 = vld [vmem:[%s8967_s21 + $0x54] ss:$8 sps:$4 sm:$0xff]   ;;  %v7956_v43 = vld [vmem:[%s8967_s21 + $0x50] ss:$8 sps:$4 sm:$0xff]  }
 0x12b   : > { %889 = vadd.xlane.f32.xlu0 %v888_v20  ;;  %v7951_v40 = vld [vmem:[%s8967_s21 + $0x140] ss:$8 sps:$4 sm:$0xff]   ;;  %v7954_v42 = vld [vmem:[%s8967_s21 + $0x154] ss:$8 sps:$4 sm:$0xff]   ;;  %v7957_v44 = vld [vmem:[%s8967_s21 + $0x150] ss:$8 sps:$4 sm:$0xff]  }
 0x12c   : > { %1369 = vmatpush1.bf16.msra.mxu0 %v7938_v31  ;;  %v7958_v45 = vld [vmem:[%s8967_s21 + $0x64] ss:$8 sps:$4 sm:$0xff]   ;;  %v7962_v47 = vld [vmem:[%s8967_s21 + $0x60] ss:$8 sps:$4 sm:$0xff]   ;;  %v7964_v49 = vld [vmem:[%s8967_s21 + $0x74] ss:$8 sps:$4 sm:$0xff]  }
 0x12d   : > { %1570 = vmatpush1.bf16.msra.mxu1 %v7939_v32  ;;  %1370 = vmatprep.subr.bf16.mxu0 %v7940_v33  ;;  %v7960_v46 = vld [vmem:[%s8967_s21 + $0x164] ss:$8 sps:$4 sm:$0xff]   ;;  %v7963_v48 = vld [vmem:[%s8967_s21 + $0x160] ss:$8 sps:$4 sm:$0xff]   ;;  %v7966_v50 = vld [vmem:[%s8967_s21 + $0x174] ss:$8 sps:$4 sm:$0xff]   ;;  %v906_v32 = vlaneseq }
 0x12e   : > { %1571 = vmatprep.subr.bf16.mxu1 %v7942_v34  ;;  %v7968_v51 = vld [vmem:[%s8967_s21 + $0x70] ss:$8 sps:$4 sm:$0xff]   ;;  %v7970_v53 = vld [vmem:[%s8967_s21 + $0x84] ss:$8 sps:$4 sm:$0xff]   ;;  %v7974_v55 = vld [vmem:[%s8967_s21 + $0x80] ss:$8 sps:$4 sm:$0xff]  }
 0x12f   : > { %v7969_v52 = vld [vmem:[%s8967_s21 + $0x170] ss:$8 sps:$4 sm:$0xff]   ;;  %v7972_v54 = vld [vmem:[%s8967_s21 + $0x184] ss:$8 sps:$4 sm:$0xff]   ;;  %v7975_v56 = vld [vmem:[%s8967_s21 + $0x180] ss:$8 sps:$4 sm:$0xff]  }
 0x130   : > { %1371 = vmatpush1.bf16.msra.mxu0 %v7944_v35  ;;  %v7976_v57 = vld [vmem:[%s8967_s21 + $0x94] ss:$8 sps:$4 sm:$0xff]   ;;  %v7980_v59 = vld [vmem:[%s8967_s21 + $0x90] ss:$8 sps:$4 sm:$0xff]   ;;  %v7982_v61 = vld [vmem:[%s8967_s21 + $0xa4] ss:$8 sps:$4 sm:$0xff]  }
 0x131   : > { %1572 = vmatpush1.bf16.msra.mxu1 %v7945_v36  ;;  %1372 = vmatprep.subr.bf16.mxu0 %v7946_v37  ;;  %v7978_v58 = vld [vmem:[%s8967_s21 + $0x194] ss:$8 sps:$4 sm:$0xff]   ;;  %v7981_v60 = vld [vmem:[%s8967_s21 + $0x190] ss:$8 sps:$4 sm:$0xff]   ;;  %v7984_v62 = vld [vmem:[%s8967_s21 + $0x1a4] ss:$8 sps:$4 sm:$0xff]  }
 0x132   : > { %1573 = vmatprep.subr.bf16.mxu1 %v7948_v38  ;;  %v7986_v6 = vld [vmem:[%s8967_s21 + $0xa0] ss:$8 sps:$4 sm:$0xff]   ;;  %v7988_v8 = vld [vmem:[%s8967_s21 + $0xb4] ss:$8 sps:$4 sm:$0xff]   ;;  %v7992_v10 = vld [vmem:[%s8967_s21 + $0xb0] ss:$8 sps:$4 sm:$0xff]  }
 0x133   : > { %v7987_v7 = vld [vmem:[%s8967_s21 + $0x1a0] ss:$8 sps:$4 sm:$0xff]   ;;  %v7990_v9 = vld [vmem:[%s8967_s21 + $0x1b4] ss:$8 sps:$4 sm:$0xff]   ;;  %v7993_v11 = vld [vmem:[%s8967_s21 + $0x1b0] ss:$8 sps:$4 sm:$0xff]  }
 0x134   : > { %1373 = vmatpush1.bf16.msra.mxu0 %v7950_v39  ;;  %v7994_v12 = vld [vmem:[%s8967_s21 + $0xc4] ss:$8 sps:$4 sm:$0xff]   ;;  %v7998_v14 = vld [vmem:[%s8967_s21 + $0xc0] ss:$8 sps:$4 sm:$0xff]   ;;  %v8000_v16 = vld [vmem:[%s8967_s21 + $0xd4] ss:$8 sps:$4 sm:$0xff]  }
 0x135   : > { %1574 = vmatpush1.bf16.msra.mxu1 %v7951_v40  ;;  %1374 = vmatprep.subr.bf16.mxu0 %v7952_v41  ;;  %v7996_v13 = vld [vmem:[%s8967_s21 + $0x1c4] ss:$8 sps:$4 sm:$0xff]   ;;  %v7999_v15 = vld [vmem:[%s8967_s21 + $0x1c0] ss:$8 sps:$4 sm:$0xff]   ;;  %v8002_v17 = vld [vmem:[%s8967_s21 + $0x1d4] ss:$8 sps:$4 sm:$0xff]  }
 0x136   : > { %1575 = vmatprep.subr.bf16.mxu1 %v7954_v42  ;;  %v8006_v20 = vld [vmem:[%s8967_s21 + $0xe4] ss:$8 sps:$4 sm:$0xff]   ;;  %v8010_v22 = vld [vmem:[%s8967_s21 + $0xe0] ss:$8 sps:$4 sm:$0xff]   ;;  %v8012_v24 = vld [vmem:[%s8967_s21 + $0xf4] ss:$8 sps:$4 sm:$0xff]  }
 0x137   : > { %v8008_v21 = vld [vmem:[%s8967_s21 + $0x1e4] ss:$8 sps:$4 sm:$0xff]   ;;  %v8011_v23 = vld [vmem:[%s8967_s21 + $0x1e0] ss:$8 sps:$4 sm:$0xff]   ;;  %v8014_v25 = vld [vmem:[%s8967_s21 + $0x1f4] ss:$8 sps:$4 sm:$0xff]  }
 0x138   : > { %1375 = vmatpush1.bf16.msra.mxu0 %v7956_v43  ;;  %v8016_v26 = vld [vmem:[%s8967_s21 + $0xf0] ss:$8 sps:$4 sm:$0xff]   ;;  %v8020_v28 = vld [vmem:[%s8967_s21 + $0x204] ss:$8 sps:$4 sm:$0xff]   ;;  %s8765_s20 = smov 32   ;;  %v9110_v35 = vshrl.u32 %v906_v32, 7 }
 0x139   : > { %1576 = vmatpush1.bf16.msra.mxu1 %v7957_v44  ;;  %1376 = vmatprep.subr.bf16.mxu0 %v7958_v45  ;;  %v8017_v27 = vld [vmem:[%s8967_s21 + $0x1f0] ss:$8 sps:$4 sm:$0xff]   ;;  %v8023_v29 = vld [vmem:[%s8967_s21 + $0x304] ss:$8 sps:$4 sm:$0xff]   ;;  %s10317_s19 = sld [smem:[#allocation21_spill]]  ;;  %p7654_p1 = scmp.ne.s32.totalorder %s8744_s30, 1 }
 0x13a   : > { %1577 = vmatprep.subr.bf16.mxu1 %v7960_v46  ;;  %v871_v30 = vld [vmem:[%s10314_s24] sm:$0xff]  ;;  %v9113_v37 = vsub.s32 0, %v9110_v35  ;;  %v912_v38 = vsub.s32 4, %v9110_v35  ;;  %v9118_v40 = vsub.s32 2, %v9110_v35  ;;  %v932_v41 = vsub.s32 6, %v9110_v35  ;;  %s10318_s24 = sld [smem:[#allocation25_spill]] }
 0x13b   : > { %2884 = vrot.lane.b32.xlu1 %v871_v30, %s8763_s26  ;;  %v870_v31 = vld [vmem:[%s10315_s8] sm:$0xff]  ;;  %v8075_v32 = vld [vmem:[%s8967_s21 + $0x390] ss:$8 sps:$4 sm:$0xff]   ;;  %vm6795_vm14 = vcmask (!%p7654_p1), 130048  }
 0x13c   : > { %1377 = vmatpush1.bf16.msra.mxu0 %v7962_v47  ;;  %v887_v39 = vld [vmem:[%s8972_s16] sm:$0xff] }
 0x13d   : > { %1578 = vmatpush1.bf16.msra.mxu1 %v7963_v48  ;;  %1378 = vmatprep.subr.bf16.mxu0 %v7964_v49  ;;  %v909_v42 = vrot.slane %v887_v39, %v9113_v37  ;;  %v913_v43 = vrot.slane %v887_v39, %v912_v38  ;;  %v929_v44 = vrot.slane %v887_v39, %v9118_v40 }
 0x13e   : > { %1579 = vmatprep.subr.bf16.mxu1 %v7966_v50  ;;  %v933_v45 = vrot.slane %v887_v39, %v932_v41  ;;  %v8081_v39 = vld [vmem:[%s8967_s21 + $0x3a0] ss:$8 sps:$4 sm:$0xff]  }
 0x13f   : > { %2873 = vrot.lane.b32.xlu1 %v870_v31, %s8764_s1  ;;  %v919_v46 = vrot.slane %v909_v42, %v9113_v37  ;;  %v923_v47 = vrot.slane %v913_v43, %v9113_v37  ;;  %v939_v49 = vrot.slane %v929_v44, %v9118_v40  ;;  %v8072_v31 = vld [vmem:[%s8967_s21 + $0x290] ss:$8 sps:$4 sm:$0xff]   ;;  %v8086_v42 = vld [vmem:[%s8967_s21 + $0x2b4] ss:$8 sps:$4 sm:$0xff]  }
 0x140   : > { %1379 = vmatpush1.bf16.msra.mxu0 %v7968_v51  ;;  %v943_v50 = vrot.slane %v933_v45, %v9118_v40  ;;  %v8089_v43 = vld [vmem:[%s8967_s21 + $0x3b4] ss:$8 sps:$4 sm:$0xff]   ;;  %v8084_v44 = vld [vmem:[%s8967_s21 + $0x2b0] ss:$8 sps:$4 sm:$0xff]  }
 0x141   : > { %1580 = vmatpush1.bf16.msra.mxu1 %v7969_v52  ;;  %1380 = vmatprep.subr.bf16.mxu0 %v7970_v53  ;;  %v8087_v45 = vld [vmem:[%s8967_s21 + $0x3b0] ss:$8 sps:$4 sm:$0xff]  }
 0x142   : > { %1581 = vmatprep.subr.bf16.mxu1 %v7972_v54 }
 0x143   : > { %2821 = vrot.lane.b32.xlu1 %v871_v30, %s8765_s20  ;;  %v8077_v30 = vld [vmem:[%s8967_s21 + $0x394] ss:$8 sps:$4 sm:$0xff]  }
 0x144   : > { %1381 = vmatpush1.bf16.msra.mxu0 %v7974_v55 }
 0x145   : > { %1582 = vmatpush1.bf16.msra.mxu1 %v7975_v56  ;;  %1382 = vmatprep.subr.bf16.mxu0 %v7976_v57 }
 0x146   : > { %1583 = vmatprep.subr.bf16.mxu1 %v7978_v58 }
 0x148   : > { %1383 = vmatpush1.bf16.msra.mxu0 %v7980_v59  ;;  %v8018_v59 = vld [vmem:[%s8967_s21 + $0x200] ss:$8 sps:$4 sm:$0xff]  }
 0x149   : > { %1584 = vmatpush1.bf16.msra.mxu1 %v7981_v60  ;;  %1384 = vmatprep.subr.bf16.mxu0 %v7982_v61  ;;  %v8021_v60 = vld [vmem:[%s8967_s21 + $0x300] ss:$8 sps:$4 sm:$0xff]   ;;  %v8026_v61 = vld [vmem:[%s8967_s21 + $0x214] ss:$8 sps:$4 sm:$0xff]  }
 0x14a   : > { %1585 = vmatprep.subr.bf16.mxu1 %v7984_v62  ;;  %v8029_v62 = vld [vmem:[%s8967_s21 + $0x314] ss:$8 sps:$4 sm:$0xff]  }
 0x14c   : > { %1385 = vmatpush1.bf16.msra.mxu0 %v7986_v6  ;;  %v8041_v6 = vld [vmem:[%s8967_s21 + $0x334] ss:$8 sps:$4 sm:$0xff]  }
 0x14d   : > { %1586 = vmatpush1.bf16.msra.mxu1 %v7987_v7  ;;  %1386 = vmatprep.subr.bf16.mxu0 %v7988_v8  ;;  %v8036_v7 = vld [vmem:[%s8967_s21 + $0x230] ss:$8 sps:$4 sm:$0xff]  }
 0x14e   : > { %1587 = vmatprep.subr.bf16.mxu1 %v7990_v9  ;;  %v8039_v8 = vld [vmem:[%s8967_s21 + $0x330] ss:$8 sps:$4 sm:$0xff]   ;;  %v8044_v9 = vld [vmem:[%s8967_s21 + $0x244] ss:$8 sps:$4 sm:$0xff]  }
 0x150   : > { %1387 = vmatpush1.bf16.msra.mxu0 %v7992_v10  ;;  %v8047_v10 = vld [vmem:[%s8967_s21 + $0x344] ss:$8 sps:$4 sm:$0xff]  }
 0x151   : > { %1588 = vmatpush1.bf16.msra.mxu1 %v7993_v11  ;;  %1388 = vmatprep.subr.bf16.mxu0 %v7994_v12  ;;  %v8042_v11 = vld [vmem:[%s8967_s21 + $0x240] ss:$8 sps:$4 sm:$0xff]  }
 0x152   : > { %1589 = vmatprep.subr.bf16.mxu1 %v7996_v13  ;;  %v8045_v12 = vld [vmem:[%s8967_s21 + $0x340] ss:$8 sps:$4 sm:$0xff]   ;;  %v8050_v13 = vld [vmem:[%s8967_s21 + $0x254] ss:$8 sps:$4 sm:$0xff]  }
 0x154   : > { %1389 = vmatpush1.bf16.msra.mxu0 %v7998_v14  ;;  %v8053_v14 = vld [vmem:[%s8967_s21 + $0x354] ss:$8 sps:$4 sm:$0xff]  }
 0x155   : > { %1590 = vmatpush1.bf16.msra.mxu1 %v7999_v15  ;;  %1390 = vmatprep.subr.bf16.mxu0 %v8000_v16  ;;  %v8048_v15 = vld [vmem:[%s8967_s21 + $0x250] ss:$8 sps:$4 sm:$0xff]  }
 0x156   : > { %1591 = vmatprep.subr.bf16.mxu1 %v8002_v17  ;;  %v8051_v16 = vld [vmem:[%s8967_s21 + $0x350] ss:$8 sps:$4 sm:$0xff]   ;;  %v8056_v17 = vld [vmem:[%s8967_s21 + $0x264] ss:$8 sps:$4 sm:$0xff]  }
 0x1b8   : > { %v890_v63 = vpop.xlane.xlu0 %889 }
 0x1b9   : > { %v892_v0 = vmul.f32 0.00390625, %v890_v63  ;;  %v8024_v63 = vld [vmem:[%s8967_s21 + $0x210] ss:$8 sps:$4 sm:$0xff]  }
 0x1bb   : > { %v9069_v1 = vsub.f32 %v9019_v18, %v892_v0  ;;  %v9072_v2 = vsub.f32 %v9022_v19, %v892_v0  ;;  %v8004_v18 = vld [vmem:[%s8967_s21 + $0xd0] ss:$8 sps:$4 sm:$0xff]  }
 0x1bc   : > { %v8005_v19 = vld [vmem:[%s8967_s21 + $0x1d0] ss:$8 sps:$4 sm:$0xff]   ;;  %1391 = vmatpush1.bf16.msra.mxu0 %v8004_v18  ;;  %v8059_v18 = vld [vmem:[%s8967_s21 + $0x364] ss:$8 sps:$4 sm:$0xff]  }
 0x1bd   : > { %v895_v3 = vmul.f32 %v9069_v1, %v9069_v1  ;;  %v896_v4 = vmul.f32 %v9072_v2, %v9072_v2  ;;  %1592 = vmatpush1.bf16.msra.mxu1 %v8005_v19  ;;  %1392 = vmatprep.subr.bf16.mxu0 %v8006_v20  ;;  %v8027_v0 = vld [vmem:[%s8967_s21 + $0x310] ss:$8 sps:$4 sm:$0xff]   ;;  %v8054_v19 = vld [vmem:[%s8967_s21 + $0x260] ss:$8 sps:$4 sm:$0xff]  }
 0x1be   : > { %1593 = vmatprep.subr.bf16.mxu1 %v8008_v21  ;;  %v8057_v20 = vld [vmem:[%s8967_s21 + $0x360] ss:$8 sps:$4 sm:$0xff]   ;;  %v8062_v21 = vld [vmem:[%s8967_s21 + $0x274] ss:$8 sps:$4 sm:$0xff]  }
 0x1bf   : > { %v897_v5 = vadd.f32 %v896_v4, %v895_v3  ;;  %v8030_v3 = vld [vmem:[%s8967_s21 + $0x220] ss:$8 sps:$4 sm:$0xff]  }
 0x1c0   : > { %1393 = vmatpush1.bf16.msra.mxu0 %v8010_v22  ;;  %v8033_v4 = vld [vmem:[%s8967_s21 + $0x320] ss:$8 sps:$4 sm:$0xff]   ;;  %v8065_v22 = vld [vmem:[%s8967_s21 + $0x374] ss:$8 sps:$4 sm:$0xff]  }
 0x1c1   : > { %898 = vadd.xlane.f32.xlu0 %v897_v5  ;;  %1594 = vmatpush1.bf16.msra.mxu1 %v8011_v23  ;;  %v8038_v5 = vld [vmem:[%s8967_s21 + $0x234] ss:$8 sps:$4 sm:$0xff]   ;;  %v8060_v23 = vld [vmem:[%s8967_s21 + $0x270] ss:$8 sps:$4 sm:$0xff]  }
 0x1c2   : > { %1394 = vmatprep.subr.bf16.mxu0 %v8012_v24  ;;  %1595 = vmatprep.subr.bf16.mxu1 %v8014_v25  ;;  %v8063_v24 = vld [vmem:[%s8967_s21 + $0x370] ss:$8 sps:$4 sm:$0xff]   ;;  %v8068_v25 = vld [vmem:[%s8967_s21 + $0x284] ss:$8 sps:$4 sm:$0xff]  }
 0x1c4   : > { %1395 = vmatpush1.bf16.msra.mxu0 %v8016_v26  ;;  %v8071_v26 = vld [vmem:[%s8967_s21 + $0x384] ss:$8 sps:$4 sm:$0xff]  }
 0x1c5   : > { %1596 = vmatpush1.bf16.msra.mxu1 %v8017_v27  ;;  %1766 = vmatprep.subr.bf16.mxu0 %v8020_v28  ;;  %v8066_v27 = vld [vmem:[%s8967_s21 + $0x280] ss:$8 sps:$4 sm:$0xff]  }
 0x1c6   : > { %1967 = vmatprep.subr.bf16.mxu1 %v8023_v29  ;;  %v8069_v28 = vld [vmem:[%s8967_s21 + $0x380] ss:$8 sps:$4 sm:$0xff]   ;;  %v8074_v29 = vld [vmem:[%s8967_s21 + $0x294] ss:$8 sps:$4 sm:$0xff]  }
 0x24e   : > { %v899_v33 = vpop.xlane.xlu0 %898 }
 0x24f   : > { %v900_v34 = vmul.f32 0.00390625, %v899_v33  ;;  %v8080_v33 = vld [vmem:[%s8967_s21 + $0x2a4] ss:$8 sps:$4 sm:$0xff]  }
 0x251   : > { %v901_v36 = vadd.f32 1e-05, %v900_v34  ;;  %v8083_v34 = vld [vmem:[%s8967_s21 + $0x3a4] ss:$8 sps:$4 sm:$0xff]  }
 0x253   : > { %8546 = vrsqrt.f32 %v901_v36  ;;  %v8078_v36 = vld [vmem:[%s8967_s21 + $0x2a0] ss:$8 sps:$4 sm:$0xff]  }
 0x25d   : > { %v8547_v48 = vpop.eup %8546 }
 0x25e   : > { %v903_v51 = vmul.f32 %v8547_v48, %v9069_v1  ;;  %v904_v52 = vmul.f32 %v8547_v48, %v9072_v2  ;;  %v8032_v1 = vld [vmem:[%s8967_s21 + $0x224] ss:$8 sps:$4 sm:$0xff]   ;;  %v8090_v48 = vld [vmem:[%s8967_s21 + $0x2c0] ss:$8 sps:$4 sm:$0xff]  }
 0x25f   : > { %v8035_v2 = vld [vmem:[%s8967_s21 + $0x324] ss:$8 sps:$4 sm:$0xff]  }
 0x260   : > { %v924_v53 = vmul.f32 %v919_v46, %v903_v51  ;;  %v925_v54 = vmul.f32 %v923_v47, %v904_v52  ;;  %v8092_v46 = vld [vmem:[%s8967_s21 + $0x2c4] ss:$8 sps:$4 sm:$0xff]   ;;  %v8101_v51 = vld [vmem:[%s8967_s21 + $0x3d4] ss:$8 sps:$4 sm:$0xff]   ;;  %v8096_v52 = vld [vmem:[%s8967_s21 + $0x2d0] ss:$8 sps:$4 sm:$0xff]  }
 0x261   : > { %v8095_v47 = vld [vmem:[%s8967_s21 + $0x3c4] ss:$8 sps:$4 sm:$0xff]  }
 0x262   : > { %v944_v55 = vadd.f32 %v939_v49, %v924_v53  ;;  %v945_v56 = vadd.f32 %v943_v50, %v925_v54  ;;  %v8093_v49 = vld [vmem:[%s8967_s21 + $0x3c0] ss:$8 sps:$4 sm:$0xff]   ;;  %v8098_v50 = vld [vmem:[%s8967_s21 + $0x2d4] ss:$8 sps:$4 sm:$0xff]   ;;  %v8099_v53 = vld [vmem:[%s8967_s21 + $0x3d0] ss:$8 sps:$4 sm:$0xff]  }
 0x263   : > { %v8104_v54 = vld [vmem:[%s8967_s21 + $0x2e4] ss:$8 sps:$4 sm:$0xff]  }
 0x264   : > { %v9133_v57 = vpack.c.bf16 %v944_v55, %v944_v55  ;;  %v9135_v58 = vpack.c.bf16 %v945_v56, %v945_v56  ;;  %v8107_v55 = vld [vmem:[%s8967_s21 + $0x3e4] ss:$8 sps:$4 sm:$0xff]   ;;  %v8102_v56 = vld [vmem:[%s8967_s21 + $0x2e0] ss:$8 sps:$4 sm:$0xff]  }
 0x266   : > { %1396 = vmatprep.mubr.bf16.mxu0 %v9135_v58  ;;  %1597 = vmatprep.mubr.bf16.mxu1 %v9135_v58 }
 0x267   : > { %1397 = vmatmul.mubr.bf16.vlgmr.msra.gmra.mrb[0].mxu0 %v9133_v57  ;;  %1598 = vmatmul.mubr.bf16.vlgmr.msra.gmra.mrb[0].mxu1 %v9133_v57 }
 0x268   : > { %1767 = vmatpush1.bf16.msra.mxu0 %v8018_v59  ;;  %1968 = vmatpush1.bf16.msra.mxu1 %v8021_v60  ;;  %v8105_v59 = vld [vmem:[%s8967_s21 + $0x3e0] ss:$8 sps:$4 sm:$0xff]   ;;  %v8110_v60 = vld [vmem:[%s8967_s21 + $0x2f4] ss:$8 sps:$4 sm:$0xff]  }
 0x269   : > { %1798 = vmatprep.mubr.bf16.mxu0 %v9135_v58  ;;  %1999 = vmatprep.mubr.bf16.mxu1 %v9135_v58 }
 0x26a   : > { %1768 = vmatprep.subr.bf16.mxu0 %v8026_v61  ;;  %1969 = vmatprep.subr.bf16.mxu1 %v8029_v62  ;;  %v8113_v61 = vld [vmem:[%s8967_s21 + $0x3f4] ss:$8 sps:$4 sm:$0xff]   ;;  %v8108_v62 = vld [vmem:[%s8967_s21 + $0x2f0] ss:$8 sps:$4 sm:$0xff]  }
 0x26c   : > { %1769 = vmatpush1.bf16.msra.mxu0 %v8024_v63  ;;  %1970 = vmatpush1.bf16.msra.mxu1 %v8027_v0  ;;  %v8111_v63 = vld [vmem:[%s8967_s21 + $0x3f0] ss:$8 sps:$4 sm:$0xff]   ;;  %v8116_v0 = vld [vmem:[%s8967_s21 + $0x404] ss:$8 sps:$4 sm:$0xff]  }
 0x26d   : > { %1770 = vmatprep.subr.bf16.mxu0 %v8032_v1  ;;  %1971 = vmatprep.subr.bf16.mxu1 %v8035_v2  ;;  %v8119_v1 = vld [vmem:[%s8967_s21 + $0x504] ss:$8 sps:$4 sm:$0xff]   ;;  %v8114_v2 = vld [vmem:[%s8967_s21 + $0x400] ss:$8 sps:$4 sm:$0xff]  }
 0x270   : > { %1771 = vmatpush1.bf16.msra.mxu0 %v8030_v3  ;;  %1972 = vmatpush1.bf16.msra.mxu1 %v8033_v4  ;;  %v8117_v3 = vld [vmem:[%s8967_s21 + $0x500] ss:$8 sps:$4 sm:$0xff]   ;;  %v8122_v4 = vld [vmem:[%s8967_s21 + $0x414] ss:$8 sps:$4 sm:$0xff]  }
 0x271   : > { %1772 = vmatprep.subr.bf16.mxu0 %v8038_v5  ;;  %1973 = vmatprep.subr.bf16.mxu1 %v8041_v6  ;;  %v8125_v5 = vld [vmem:[%s8967_s21 + $0x514] ss:$8 sps:$4 sm:$0xff]   ;;  %v8120_v6 = vld [vmem:[%s8967_s21 + $0x410] ss:$8 sps:$4 sm:$0xff]  }
 0x274   : > { %1773 = vmatpush1.bf16.msra.mxu0 %v8036_v7  ;;  %1974 = vmatpush1.bf16.msra.mxu1 %v8039_v8  ;;  %v8123_v7 = vld [vmem:[%s8967_s21 + $0x510] ss:$8 sps:$4 sm:$0xff]   ;;  %v8128_v8 = vld [vmem:[%s8967_s21 + $0x424] ss:$8 sps:$4 sm:$0xff]  }
 0x275   : > { %1774 = vmatprep.subr.bf16.mxu0 %v8044_v9  ;;  %1975 = vmatprep.subr.bf16.mxu1 %v8047_v10  ;;  %v8131_v9 = vld [vmem:[%s8967_s21 + $0x524] ss:$8 sps:$4 sm:$0xff]   ;;  %v8126_v10 = vld [vmem:[%s8967_s21 + $0x420] ss:$8 sps:$4 sm:$0xff]  }
 0x278   : > { %1775 = vmatpush1.bf16.msra.mxu0 %v8042_v11  ;;  %1976 = vmatpush1.bf16.msra.mxu1 %v8045_v12  ;;  %v8129_v11 = vld [vmem:[%s8967_s21 + $0x520] ss:$8 sps:$4 sm:$0xff]   ;;  %v8134_v12 = vld [vmem:[%s8967_s21 + $0x434] ss:$8 sps:$4 sm:$0xff]  }
 0x279   : > { %1776 = vmatprep.subr.bf16.mxu0 %v8050_v13  ;;  %1977 = vmatprep.subr.bf16.mxu1 %v8053_v14  ;;  %v8137_v13 = vld [vmem:[%s8967_s21 + $0x534] ss:$8 sps:$4 sm:$0xff]   ;;  %v8132_v14 = vld [vmem:[%s8967_s21 + $0x430] ss:$8 sps:$4 sm:$0xff]  }
 0x27c   : > { %1777 = vmatpush1.bf16.msra.mxu0 %v8048_v15  ;;  %1978 = vmatpush1.bf16.msra.mxu1 %v8051_v16  ;;  %v8135_v15 = vld [vmem:[%s8967_s21 + $0x530] ss:$8 sps:$4 sm:$0xff]   ;;  %v8140_v16 = vld [vmem:[%s8967_s21 + $0x444] ss:$8 sps:$4 sm:$0xff]  }
 0x27d   : > { %1778 = vmatprep.subr.bf16.mxu0 %v8056_v17  ;;  %1979 = vmatprep.subr.bf16.mxu1 %v8059_v18  ;;  %v8143_v17 = vld [vmem:[%s8967_s21 + $0x544] ss:$8 sps:$4 sm:$0xff]   ;;  %v8138_v18 = vld [vmem:[%s8967_s21 + $0x440] ss:$8 sps:$4 sm:$0xff]  }
 0x280   : > { %1779 = vmatpush1.bf16.msra.mxu0 %v8054_v19  ;;  %1980 = vmatpush1.bf16.msra.mxu1 %v8057_v20  ;;  %v8141_v19 = vld [vmem:[%s8967_s21 + $0x540] ss:$8 sps:$4 sm:$0xff]   ;;  %v8146_v20 = vld [vmem:[%s8967_s21 + $0x454] ss:$8 sps:$4 sm:$0xff]  }
 0x281   : > { %1780 = vmatprep.subr.bf16.mxu0 %v8062_v21  ;;  %1981 = vmatprep.subr.bf16.mxu1 %v8065_v22  ;;  %v8149_v21 = vld [vmem:[%s8967_s21 + $0x554] ss:$8 sps:$4 sm:$0xff]   ;;  %v8144_v22 = vld [vmem:[%s8967_s21 + $0x450] ss:$8 sps:$4 sm:$0xff]  }
 0x284   : > { %1781 = vmatpush1.bf16.msra.mxu0 %v8060_v23  ;;  %1982 = vmatpush1.bf16.msra.mxu1 %v8063_v24  ;;  %v8147_v23 = vld [vmem:[%s8967_s21 + $0x550] ss:$8 sps:$4 sm:$0xff]   ;;  %v8152_v24 = vld [vmem:[%s8967_s21 + $0x464] ss:$8 sps:$4 sm:$0xff]  }
 0x285   : > { %1782 = vmatprep.subr.bf16.mxu0 %v8068_v25  ;;  %1983 = vmatprep.subr.bf16.mxu1 %v8071_v26  ;;  %v8155_v25 = vld [vmem:[%s8967_s21 + $0x564] ss:$8 sps:$4 sm:$0xff]   ;;  %v8150_v26 = vld [vmem:[%s8967_s21 + $0x460] ss:$8 sps:$4 sm:$0xff]  }
 0x288   : > { %1783 = vmatpush1.bf16.msra.mxu0 %v8066_v27  ;;  %1984 = vmatpush1.bf16.msra.mxu1 %v8069_v28  ;;  %v8153_v27 = vld [vmem:[%s8967_s21 + $0x560] ss:$8 sps:$4 sm:$0xff]   ;;  %v8158_v28 = vld [vmem:[%s8967_s21 + $0x474] ss:$8 sps:$4 sm:$0xff]  }
 0x289   : > { %1784 = vmatprep.subr.bf16.mxu0 %v8074_v29  ;;  %1985 = vmatprep.subr.bf16.mxu1 %v8077_v30  ;;  %v8161_v29 = vld [vmem:[%s8967_s21 + $0x574] ss:$8 sps:$4 sm:$0xff]   ;;  %v8156_v30 = vld [vmem:[%s8967_s21 + $0x470] ss:$8 sps:$4 sm:$0xff]  }
 0x28c   : > { %1785 = vmatpush1.bf16.msra.mxu0 %v8072_v31  ;;  %1986 = vmatpush1.bf16.msra.mxu1 %v8075_v32  ;;  %v8159_v31 = vld [vmem:[%s8967_s21 + $0x570] ss:$8 sps:$4 sm:$0xff]   ;;  %v8164_v32 = vld [vmem:[%s8967_s21 + $0x484] ss:$8 sps:$4 sm:$0xff]  }
 0x28d   : > { %1786 = vmatprep.subr.bf16.mxu0 %v8080_v33  ;;  %1987 = vmatprep.subr.bf16.mxu1 %v8083_v34  ;;  %v8167_v33 = vld [vmem:[%s8967_s21 + $0x584] ss:$8 sps:$4 sm:$0xff]   ;;  %v8162_v34 = vld [vmem:[%s8967_s21 + $0x480] ss:$8 sps:$4 sm:$0xff]  }
 0x290   : > { %1787 = vmatpush1.bf16.msra.mxu0 %v8078_v36  ;;  %1988 = vmatpush1.bf16.msra.mxu1 %v8081_v39  ;;  %v8165_v36 = vld [vmem:[%s8967_s21 + $0x580] ss:$8 sps:$4 sm:$0xff]   ;;  %v8170_v39 = vld [vmem:[%s8967_s21 + $0x494] ss:$8 sps:$4 sm:$0xff]  }
 0x291   : > { %1788 = vmatprep.subr.bf16.mxu0 %v8086_v42  ;;  %1989 = vmatprep.subr.bf16.mxu1 %v8089_v43  ;;  %v8173_v42 = vld [vmem:[%s8967_s21 + $0x594] ss:$8 sps:$4 sm:$0xff]   ;;  %v8168_v43 = vld [vmem:[%s8967_s21 + $0x490] ss:$8 sps:$4 sm:$0xff]  }
 0x294   : > { %1789 = vmatpush1.bf16.msra.mxu0 %v8084_v44  ;;  %1990 = vmatpush1.bf16.msra.mxu1 %v8087_v45  ;;  %v8171_v44 = vld [vmem:[%s8967_s21 + $0x590] ss:$8 sps:$4 sm:$0xff]   ;;  %v8176_v45 = vld [vmem:[%s8967_s21 + $0x4a4] ss:$8 sps:$4 sm:$0xff]  }
 0x295   : > { %1790 = vmatprep.subr.bf16.mxu0 %v8092_v46  ;;  %1991 = vmatprep.subr.bf16.mxu1 %v8095_v47  ;;  %v8179_v46 = vld [vmem:[%s8967_s21 + $0x5a4] ss:$8 sps:$4 sm:$0xff]   ;;  %v8174_v47 = vld [vmem:[%s8967_s21 + $0x4a0] ss:$8 sps:$4 sm:$0xff]  }
 0x298   : > { %1791 = vmatpush1.bf16.msra.mxu0 %v8090_v48  ;;  %1992 = vmatpush1.bf16.msra.mxu1 %v8093_v49  ;;  %v8177_v48 = vld [vmem:[%s8967_s21 + $0x5a0] ss:$8 sps:$4 sm:$0xff]   ;;  %v8182_v49 = vld [vmem:[%s8967_s21 + $0x4b4] ss:$8 sps:$4 sm:$0xff]  }
 0x299   : > { %1792 = vmatprep.subr.bf16.mxu0 %v8098_v50  ;;  %1993 = vmatprep.subr.bf16.mxu1 %v8101_v51  ;;  %v8185_v50 = vld [vmem:[%s8967_s21 + $0x5b4] ss:$8 sps:$4 sm:$0xff]   ;;  %v8180_v51 = vld [vmem:[%s8967_s21 + $0x4b0] ss:$8 sps:$4 sm:$0xff]  }
 0x29c   : > { %1793 = vmatpush1.bf16.msra.mxu0 %v8096_v52  ;;  %1994 = vmatpush1.bf16.msra.mxu1 %v8099_v53  ;;  %v8183_v52 = vld [vmem:[%s8967_s21 + $0x5b0] ss:$8 sps:$4 sm:$0xff]   ;;  %v8188_v53 = vld [vmem:[%s8967_s21 + $0x4c4] ss:$8 sps:$4 sm:$0xff]  }
 0x29d   : > { %1794 = vmatprep.subr.bf16.mxu0 %v8104_v54  ;;  %1995 = vmatprep.subr.bf16.mxu1 %v8107_v55  ;;  %v8191_v54 = vld [vmem:[%s8967_s21 + $0x5c4] ss:$8 sps:$4 sm:$0xff]   ;;  %v8186_v55 = vld [vmem:[%s8967_s21 + $0x4c0] ss:$8 sps:$4 sm:$0xff]  }
 0x2a0   : > { %1795 = vmatpush1.bf16.msra.mxu0 %v8102_v56  ;;  %1996 = vmatpush1.bf16.msra.mxu1 %v8105_v59  ;;  %v8189_v56 = vld [vmem:[%s8967_s21 + $0x5c0] ss:$8 sps:$4 sm:$0xff]   ;;  %v8194_v59 = vld [vmem:[%s8967_s21 + $0x4d4] ss:$8 sps:$4 sm:$0xff]  }
 0x2a1   : > { %1796 = vmatprep.subr.bf16.mxu0 %v8110_v60  ;;  %1997 = vmatprep.subr.bf16.mxu1 %v8113_v61  ;;  %v8197_v60 = vld [vmem:[%s8967_s21 + $0x5d4] ss:$8 sps:$4 sm:$0xff]   ;;  %v8192_v61 = vld [vmem:[%s8967_s21 + $0x4d0] ss:$8 sps:$4 sm:$0xff]  }
 0x2a4   : > { %1797 = vmatpush1.bf16.msra.mxu0 %v8108_v62  ;;  %1998 = vmatpush1.bf16.msra.mxu1 %v8111_v63  ;;  %v8195_v62 = vld [vmem:[%s8967_s21 + $0x5d0] ss:$8 sps:$4 sm:$0xff]   ;;  %v8200_v63 = vld [vmem:[%s8967_s21 + $0x4e4] ss:$8 sps:$4 sm:$0xff]  }
 0x2a5   : > { %2168 = vmatprep.subr.bf16.mxu0 %v8116_v0  ;;  %2369 = vmatprep.subr.bf16.mxu1 %v8119_v1  ;;  %v8203_v0 = vld [vmem:[%s8967_s21 + $0x5e4] ss:$8 sps:$4 sm:$0xff]   ;;  %v8198_v1 = vld [vmem:[%s8967_s21 + $0x4e0] ss:$8 sps:$4 sm:$0xff]  }
 0x2a7   : > { %1799 = vmatmul.mubr.bf16.vlgmr.msra.gmra.mrb[4].mxu0 %v9133_v57  ;;  %2000 = vmatmul.mubr.bf16.vlgmr.msra.gmra.mrb[4].mxu1 %v9133_v57 }
 0x2a8   : > { %2169 = vmatpush1.bf16.msra.mxu0 %v8114_v2  ;;  %2200 = vmatprep.mubr.bf16.mxu0 %v9135_v58  ;;  %v8201_v2 = vld [vmem:[%s8967_s21 + $0x5e0] ss:$8 sps:$4 sm:$0xff]  }
 0x2a9   : > { %2370 = vmatpush1.bf16.msra.mxu1 %v8117_v3  ;;  %2401 = vmatprep.mubr.bf16.mxu1 %v9135_v58  ;;  %v8206_v3 = vld [vmem:[%s8967_s21 + $0x4f4] ss:$8 sps:$4 sm:$0xff]  }
 0x2aa   : > { %2170 = vmatprep.subr.bf16.mxu0 %v8122_v4  ;;  %2371 = vmatprep.subr.bf16.mxu1 %v8125_v5  ;;  %v8209_v4 = vld [vmem:[%s8967_s21 + $0x5f4] ss:$8 sps:$4 sm:$0xff]   ;;  %v8204_v5 = vld [vmem:[%s8967_s21 + $0x4f0] ss:$8 sps:$4 sm:$0xff]  }
 0x2ac   : > { %2171 = vmatpush1.bf16.msra.mxu0 %v8120_v6  ;;  %v8207_v6 = vld [vmem:[%s8967_s21 + $0x5f0] ss:$8 sps:$4 sm:$0xff]  }
 0x2ad   : > { %2372 = vmatpush1.bf16.msra.mxu1 %v8123_v7  ;;  %2172 = vmatprep.subr.bf16.mxu0 %v8128_v8  ;;  %v8212_v7 = vld [vmem:[%s8967_s21 + $0x604] ss:$8 sps:$4 sm:$0xff]  }
 0x2ae   : > { %2373 = vmatprep.subr.bf16.mxu1 %v8131_v9  ;;  %v8215_v8 = vld [vmem:[%s8967_s21 + $0x704] ss:$8 sps:$4 sm:$0xff]   ;;  %v8210_v9 = vld [vmem:[%s8967_s21 + $0x600] ss:$8 sps:$4 sm:$0xff]  }
 0x2b0   : > { %2173 = vmatpush1.bf16.msra.mxu0 %v8126_v10  ;;  %v8213_v10 = vld [vmem:[%s8967_s21 + $0x700] ss:$8 sps:$4 sm:$0xff]  }
 0x2b1   : > { %2374 = vmatpush1.bf16.msra.mxu1 %v8129_v11  ;;  %2174 = vmatprep.subr.bf16.mxu0 %v8134_v12  ;;  %v8218_v11 = vld [vmem:[%s8967_s21 + $0x614] ss:$8 sps:$4 sm:$0xff]  }
 0x2b2   : > { %2375 = vmatprep.subr.bf16.mxu1 %v8137_v13  ;;  %v8221_v12 = vld [vmem:[%s8967_s21 + $0x714] ss:$8 sps:$4 sm:$0xff]   ;;  %v8216_v13 = vld [vmem:[%s8967_s21 + $0x610] ss:$8 sps:$4 sm:$0xff]  }
 0x2b4   : > { %2175 = vmatpush1.bf16.msra.mxu0 %v8132_v14  ;;  %v8219_v14 = vld [vmem:[%s8967_s21 + $0x710] ss:$8 sps:$4 sm:$0xff]  }
 0x2b5   : > { %2376 = vmatpush1.bf16.msra.mxu1 %v8135_v15  ;;  %2176 = vmatprep.subr.bf16.mxu0 %v8140_v16  ;;  %v8224_v15 = vld [vmem:[%s8967_s21 + $0x624] ss:$8 sps:$4 sm:$0xff]  }
 0x2b6   : > { %2377 = vmatprep.subr.bf16.mxu1 %v8143_v17  ;;  %v8227_v16 = vld [vmem:[%s8967_s21 + $0x724] ss:$8 sps:$4 sm:$0xff]   ;;  %v8222_v17 = vld [vmem:[%s8967_s21 + $0x620] ss:$8 sps:$4 sm:$0xff]  }
 0x2b8   : > { %2177 = vmatpush1.bf16.msra.mxu0 %v8138_v18  ;;  %v8225_v18 = vld [vmem:[%s8967_s21 + $0x720] ss:$8 sps:$4 sm:$0xff]  }
 0x2b9   : > { %2378 = vmatpush1.bf16.msra.mxu1 %v8141_v19  ;;  %2178 = vmatprep.subr.bf16.mxu0 %v8146_v20  ;;  %v8230_v19 = vld [vmem:[%s8967_s21 + $0x634] ss:$8 sps:$4 sm:$0xff]  }
 0x2ba   : > { %2379 = vmatprep.subr.bf16.mxu1 %v8149_v21  ;;  %v8233_v20 = vld [vmem:[%s8967_s21 + $0x734] ss:$8 sps:$4 sm:$0xff]   ;;  %v8231_v21 = vld [vmem:[%s8967_s21 + $0x730] ss:$8 sps:$4 sm:$0xff]  }
 0x2bc   : > { %2179 = vmatpush1.bf16.msra.mxu0 %v8144_v22  ;;  %v8236_v22 = vld [vmem:[%s8967_s21 + $0x644] ss:$8 sps:$4 sm:$0xff]  }
 0x2bd   : > { %2380 = vmatpush1.bf16.msra.mxu1 %v8147_v23  ;;  %2180 = vmatprep.subr.bf16.mxu0 %v8152_v24  ;;  %v8239_v23 = vld [vmem:[%s8967_s21 + $0x744] ss:$8 sps:$4 sm:$0xff]   ;;  %v8234_v24 = vld [vmem:[%s8967_s21 + $0x640] ss:$8 sps:$4 sm:$0xff]  }
 0x2be   : > { %2381 = vmatprep.subr.bf16.mxu1 %v8155_v25  ;;  %v8237_v25 = vld [vmem:[%s8967_s21 + $0x740] ss:$8 sps:$4 sm:$0xff]  }
 0x2c0   : > { %2181 = vmatpush1.bf16.msra.mxu0 %v8150_v26  ;;  %v8242_v26 = vld [vmem:[%s8967_s21 + $0x654] ss:$8 sps:$4 sm:$0xff]  }
 0x2c1   : > { %2382 = vmatpush1.bf16.msra.mxu1 %v8153_v27  ;;  %2182 = vmatprep.subr.bf16.mxu0 %v8158_v28  ;;  %v8245_v27 = vld [vmem:[%s8967_s21 + $0x754] ss:$8 sps:$4 sm:$0xff]   ;;  %v8240_v28 = vld [vmem:[%s8967_s21 + $0x650] ss:$8 sps:$4 sm:$0xff]  }
 0x2c2   : > { %2383 = vmatprep.subr.bf16.mxu1 %v8161_v29  ;;  %v8243_v29 = vld [vmem:[%s8967_s21 + $0x750] ss:$8 sps:$4 sm:$0xff]  }
 0x2c4   : > { %2183 = vmatpush1.bf16.msra.mxu0 %v8156_v30  ;;  %v8248_v30 = vld [vmem:[%s8967_s21 + $0x664] ss:$8 sps:$4 sm:$0xff]  }
 0x2c5   : > { %2384 = vmatpush1.bf16.msra.mxu1 %v8159_v31  ;;  %2184 = vmatprep.subr.bf16.mxu0 %v8164_v32  ;;  %v8251_v31 = vld [vmem:[%s8967_s21 + $0x764] ss:$8 sps:$4 sm:$0xff]   ;;  %v8246_v32 = vld [vmem:[%s8967_s21 + $0x660] ss:$8 sps:$4 sm:$0xff]  }
 0x2c6   : > { %2385 = vmatprep.subr.bf16.mxu1 %v8167_v33  ;;  %v8249_v33 = vld [vmem:[%s8967_s21 + $0x760] ss:$8 sps:$4 sm:$0xff]  }
 0x2c8   : > { %2185 = vmatpush1.bf16.msra.mxu0 %v8162_v34  ;;  %v8254_v34 = vld [vmem:[%s8967_s21 + $0x674] ss:$8 sps:$4 sm:$0xff]  }
 0x2c9   : > { %2386 = vmatpush1.bf16.msra.mxu1 %v8165_v36  ;;  %2186 = vmatprep.subr.bf16.mxu0 %v8170_v39  ;;  %v8257_v36 = vld [vmem:[%s8967_s21 + $0x774] ss:$8 sps:$4 sm:$0xff]   ;;  %v8252_v39 = vld [vmem:[%s8967_s21 + $0x670] ss:$8 sps:$4 sm:$0xff]  }
 0x2ca   : > { %2387 = vmatprep.subr.bf16.mxu1 %v8173_v42  ;;  %v8255_v42 = vld [vmem:[%s8967_s21 + $0x770] ss:$8 sps:$4 sm:$0xff]  }
 0x2cc   : > { %2187 = vmatpush1.bf16.msra.mxu0 %v8168_v43  ;;  %v8260_v43 = vld [vmem:[%s8967_s21 + $0x684] ss:$8 sps:$4 sm:$0xff]  }
 0x2cd   : > { %2388 = vmatpush1.bf16.msra.mxu1 %v8171_v44  ;;  %2188 = vmatprep.subr.bf16.mxu0 %v8176_v45  ;;  %v8263_v44 = vld [vmem:[%s8967_s21 + $0x784] ss:$8 sps:$4 sm:$0xff]   ;;  %v8258_v45 = vld [vmem:[%s8967_s21 + $0x680] ss:$8 sps:$4 sm:$0xff]  }
 0x2ce   : > { %2389 = vmatprep.subr.bf16.mxu1 %v8179_v46  ;;  %v8261_v46 = vld [vmem:[%s8967_s21 + $0x780] ss:$8 sps:$4 sm:$0xff]  }
 0x2d0   : > { %2189 = vmatpush1.bf16.msra.mxu0 %v8174_v47  ;;  %v8266_v47 = vld [vmem:[%s8967_s21 + $0x694] ss:$8 sps:$4 sm:$0xff]  }
 0x2d1   : > { %2390 = vmatpush1.bf16.msra.mxu1 %v8177_v48  ;;  %2190 = vmatprep.subr.bf16.mxu0 %v8182_v49  ;;  %v8269_v48 = vld [vmem:[%s8967_s21 + $0x794] ss:$8 sps:$4 sm:$0xff]   ;;  %v8264_v49 = vld [vmem:[%s8967_s21 + $0x690] ss:$8 sps:$4 sm:$0xff]  }
 0x2d2   : > { %2391 = vmatprep.subr.bf16.mxu1 %v8185_v50  ;;  %v8267_v50 = vld [vmem:[%s8967_s21 + $0x790] ss:$8 sps:$4 sm:$0xff]  }
 0x2d4   : > { %2191 = vmatpush1.bf16.msra.mxu0 %v8180_v51  ;;  %v8272_v51 = vld [vmem:[%s8967_s21 + $0x6a4] ss:$8 sps:$4 sm:$0xff]  }
 0x2d5   : > { %2392 = vmatpush1.bf16.msra.mxu1 %v8183_v52  ;;  %2192 = vmatprep.subr.bf16.mxu0 %v8188_v53  ;;  %v8275_v52 = vld [vmem:[%s8967_s21 + $0x7a4] ss:$8 sps:$4 sm:$0xff]   ;;  %v8270_v53 = vld [vmem:[%s8967_s21 + $0x6a0] ss:$8 sps:$4 sm:$0xff]  }
 0x2d6   : > { %2393 = vmatprep.subr.bf16.mxu1 %v8191_v54  ;;  %v8273_v54 = vld [vmem:[%s8967_s21 + $0x7a0] ss:$8 sps:$4 sm:$0xff]  }
 0x2d8   : > { %2193 = vmatpush1.bf16.msra.mxu0 %v8186_v55  ;;  %v8278_v55 = vld [vmem:[%s8967_s21 + $0x6b4] ss:$8 sps:$4 sm:$0xff]  }
 0x2d9   : > { %2394 = vmatpush1.bf16.msra.mxu1 %v8189_v56  ;;  %2194 = vmatprep.subr.bf16.mxu0 %v8194_v59  ;;  %v8281_v56 = vld [vmem:[%s8967_s21 + $0x7b4] ss:$8 sps:$4 sm:$0xff]   ;;  %v8276_v59 = vld [vmem:[%s8967_s21 + $0x6b0] ss:$8 sps:$4 sm:$0xff]  }
 0x2da   : > { %2395 = vmatprep.subr.bf16.mxu1 %v8197_v60  ;;  %v8279_v60 = vld [vmem:[%s8967_s21 + $0x7b0] ss:$8 sps:$4 sm:$0xff]  }
 0x2dc   : > { %2195 = vmatpush1.bf16.msra.mxu0 %v8192_v61  ;;  %v8284_v61 = vld [vmem:[%s8967_s21 + $0x6c4] ss:$8 sps:$4 sm:$0xff]  }
 0x2dd   : > { %2396 = vmatpush1.bf16.msra.mxu1 %v8195_v62  ;;  %2196 = vmatprep.subr.bf16.mxu0 %v8200_v63  ;;  %v8287_v62 = vld [vmem:[%s8967_s21 + $0x7c4] ss:$8 sps:$4 sm:$0xff]   ;;  %v8282_v63 = vld [vmem:[%s8967_s21 + $0x6c0] ss:$8 sps:$4 sm:$0xff]  }
 0x2de   : > { %2397 = vmatprep.subr.bf16.mxu1 %v8203_v0  ;;  %v8285_v0 = vld [vmem:[%s8967_s21 + $0x7c0] ss:$8 sps:$4 sm:$0xff]  }
 0x2e0   : > { %2197 = vmatpush1.bf16.msra.mxu0 %v8198_v1  ;;  %v8290_v1 = vld [vmem:[%s8967_s21 + $0x6d4] ss:$8 sps:$4 sm:$0xff]  }
 0x2e1   : > { %2398 = vmatpush1.bf16.msra.mxu1 %v8201_v2  ;;  %2198 = vmatprep.subr.bf16.mxu0 %v8206_v3  ;;  %v8293_v2 = vld [vmem:[%s8967_s21 + $0x7d4] ss:$8 sps:$4 sm:$0xff]   ;;  %v8288_v3 = vld [vmem:[%s8967_s21 + $0x6d0] ss:$8 sps:$4 sm:$0xff]  }
 0x2e2   : > { %2399 = vmatprep.subr.bf16.mxu1 %v8209_v4  ;;  %v8291_v4 = vld [vmem:[%s8967_s21 + $0x7d0] ss:$8 sps:$4 sm:$0xff]  }
 0x2e4   : > { %2199 = vmatpush1.bf16.msra.mxu0 %v8204_v5  ;;  %v8296_v5 = vld [vmem:[%s8967_s21 + $0x6e4] ss:$8 sps:$4 sm:$0xff]  }
 0x2e5   : > { %2400 = vmatpush1.bf16.msra.mxu1 %v8207_v6  ;;  %2570 = vmatprep.subr.bf16.mxu0 %v8212_v7  ;;  %v8299_v6 = vld [vmem:[%s8967_s21 + $0x7e4] ss:$8 sps:$4 sm:$0xff]   ;;  %v8294_v7 = vld [vmem:[%s8967_s21 + $0x6e0] ss:$8 sps:$4 sm:$0xff]  }
 0x2e6   : > { %2771 = vmatprep.subr.bf16.mxu1 %v8215_v8  ;;  %v8297_v8 = vld [vmem:[%s8967_s21 + $0x7e0] ss:$8 sps:$4 sm:$0xff]  }
 0x2e7   : > { %2201 = vmatmul.mubr.bf16.vlgmr.msra.gmra.mrb[8].mxu0 %v9133_v57 }
 0x2e8   : > { %2402 = vmatmul.mubr.bf16.vlgmr.msra.gmra.mrb[8].mxu1 %v9133_v57  ;;  %2571 = vmatpush1.bf16.msra.mxu0 %v8210_v9  ;;  %v8302_v9 = vld [vmem:[%s8967_s21 + $0x6f4] ss:$8 sps:$4 sm:$0xff]  }
 0x2e9   : > { %2602 = vmatprep.mubr.bf16.mxu0 %v9135_v58  ;;  %2772 = vmatpush1.bf16.msra.mxu1 %v8213_v10  ;;  %v8305_v10 = vld [vmem:[%s8967_s21 + $0x7f4] ss:$8 sps:$4 sm:$0xff]  }
 0x2ea   : > { %2803 = vmatprep.mubr.bf16.mxu1 %v9135_v58  ;;  %2572 = vmatprep.subr.bf16.mxu0 %v8218_v11  ;;  %v8228_v58 = vld [vmem:[%s8967_s21 + $0x630] ss:$8 sps:$4 sm:$0xff]  }
 0x2eb   : > { %2773 = vmatprep.subr.bf16.mxu1 %v8221_v12  ;;  %v8300_v11 = vld [vmem:[%s8967_s21 + $0x6f0] ss:$8 sps:$4 sm:$0xff]  }
 0x2ec   : > { %2573 = vmatpush1.bf16.msra.mxu0 %v8216_v13  ;;  %v8303_v12 = vld [vmem:[%s8967_s21 + $0x7f0] ss:$8 sps:$4 sm:$0xff]   ;;  %v2885_v13 = vpop.permute.xlu1 %2884  ;;  %s10316_s21 = sld [smem:[#allocation22_spill]] }
 0x2ed   : > { %2774 = vmatpush1.bf16.msra.mxu1 %v8219_v14  ;;  %2574 = vmatprep.subr.bf16.mxu0 %v8224_v15 }
 0x2ee   : > { %2775 = vmatprep.subr.bf16.mxu1 %v8227_v16 }
 0x2f0   : > { %2575 = vmatpush1.bf16.msra.mxu0 %v8222_v17 }
 0x2f1   : > { %2776 = vmatpush1.bf16.msra.mxu1 %v8225_v18  ;;  %2576 = vmatprep.subr.bf16.mxu0 %v8230_v19 }
 0x2f2   : > { %2777 = vmatprep.subr.bf16.mxu1 %v8233_v20 }
 0x2f4   : > { %2577 = vmatpush1.bf16.msra.mxu0 %v8228_v58 }
 0x2f5   : > { %2778 = vmatpush1.bf16.msra.mxu1 %v8231_v21  ;;  %2578 = vmatprep.subr.bf16.mxu0 %v8236_v22 }
 0x2f6   : > { %2779 = vmatprep.subr.bf16.mxu1 %v8239_v23 }
 0x2f8   : > { %2579 = vmatpush1.bf16.msra.mxu0 %v8234_v24 }
 0x2f9   : > { %2780 = vmatpush1.bf16.msra.mxu1 %v8237_v25  ;;  %2580 = vmatprep.subr.bf16.mxu0 %v8242_v26 }
 0x2fa   : > { %2781 = vmatprep.subr.bf16.mxu1 %v8245_v27 }
 0x2fc   : > { %2581 = vmatpush1.bf16.msra.mxu0 %v8240_v28 }
 0x2fd   : > { %2782 = vmatpush1.bf16.msra.mxu1 %v8243_v29  ;;  %2582 = vmatprep.subr.bf16.mxu0 %v8248_v30 }
 0x2fe   : > { %2783 = vmatprep.subr.bf16.mxu1 %v8251_v31 }
 0x300   : > { %2583 = vmatpush1.bf16.msra.mxu0 %v8246_v32 }
 0x301   : > { %2784 = vmatpush1.bf16.msra.mxu1 %v8249_v33  ;;  %2584 = vmatprep.subr.bf16.mxu0 %v8254_v34 }
 0x302   : > { %2785 = vmatprep.subr.bf16.mxu1 %v8257_v36 }
 0x304   : > { %2585 = vmatpush1.bf16.msra.mxu0 %v8252_v39 }
 0x305   : > { %2786 = vmatpush1.bf16.msra.mxu1 %v8255_v42  ;;  %2586 = vmatprep.subr.bf16.mxu0 %v8260_v43 }
 0x306   : > { %2787 = vmatprep.subr.bf16.mxu1 %v8263_v44 }
 0x308   : > { %2587 = vmatpush1.bf16.msra.mxu0 %v8258_v45 }
 0x309   : > { %2788 = vmatpush1.bf16.msra.mxu1 %v8261_v46  ;;  %2588 = vmatprep.subr.bf16.mxu0 %v8266_v47  ;;  %v9379_v47 = vpop.permute.xlu1 %2873 }
 0x30a   : > { %2789 = vmatprep.subr.bf16.mxu1 %v8269_v48 }
 0x30c   : > { %2589 = vmatpush1.bf16.msra.mxu0 %v8264_v49 }
 0x30d   : > { %2790 = vmatpush1.bf16.msra.mxu1 %v8267_v50  ;;  %2590 = vmatprep.subr.bf16.mxu0 %v8272_v51  ;;  %v9381_v48 = vpop.permute.xlu1 %2821  ;;  %v8766_v50 = vmov 0.0  }
 0x30e   : > { %2791 = vmatprep.subr.bf16.mxu1 %v8275_v52 }
 0x310   : > { %2591 = vmatpush1.bf16.msra.mxu0 %v8270_v53 }
 0x311   : > { %2792 = vmatpush1.bf16.msra.mxu1 %v8273_v54  ;;  %2592 = vmatprep.subr.bf16.mxu0 %v8278_v55 }
 0x312   : > { %2793 = vmatprep.subr.bf16.mxu1 %v8281_v56 }
 0x314   : > { %2593 = vmatpush1.bf16.msra.mxu0 %v8276_v59 }
 0x315   : > { %2794 = vmatpush1.bf16.msra.mxu1 %v8279_v60  ;;  %2594 = vmatprep.subr.bf16.mxu0 %v8284_v61 }
 0x316   : > { %2795 = vmatprep.subr.bf16.mxu1 %v8287_v62 }
 0x318   : > { %2595 = vmatpush1.bf16.msra.mxu0 %v8282_v63 }
 0x319   : > { %2796 = vmatpush1.bf16.msra.mxu1 %v8285_v0  ;;  %2596 = vmatprep.subr.bf16.mxu0 %v8290_v1 }
 0x31a   : > { %2797 = vmatprep.subr.bf16.mxu1 %v8293_v2 }
 0x31c   : > { %2597 = vmatpush1.bf16.msra.mxu0 %v8288_v3 }
 0x31d   : > { %2798 = vmatpush1.bf16.msra.mxu1 %v8291_v4  ;;  %2598 = vmatprep.subr.bf16.mxu0 %v8296_v5 }
 0x31e   : > { %2799 = vmatprep.subr.bf16.mxu1 %v8299_v6 }
 0x320   : > { %2599 = vmatpush1.bf16.msra.mxu0 %v8294_v7 }
 0x321   : > { %2800 = vmatpush1.bf16.msra.mxu1 %v8297_v8  ;;  %2600 = vmatprep.subr.bf16.mxu0 %v8302_v9 }
 0x322   : > { %2801 = vmatprep.subr.bf16.mxu1 %v8305_v10 }
 0x324   : > { %2601 = vmatpush1.bf16.msra.mxu0 %v8300_v11 }
 0x325   : > { %2802 = vmatpush1.bf16.msra.mxu1 %v8303_v12  ;;  %7738 = vmatprep.subr.bf16.mxu0 %v8766_v50 }
 0x326   : > { %7744 = vmatprep.subr.bf16.mxu1 %v8766_v50 }
 0x327   : > { %2603 = vmatmul.mubr.bf16.vlgmr.msra.gmra.mrb[12].mxu0 %v9133_v57 }
 0x328   : > { %2804 = vmatmul.mubr.bf16.vlgmr.msra.gmra.mrb[12].mxu1 %v9133_v57  ;;  %7740 = vmatprep.mubr.msk.bf16.mxu0 %vm8767_vm1, %v8766_v50 }
 0x329   : > { %7746 = vmatprep.mubr.msk.bf16.mxu1 %vm8767_vm1, %v8766_v50 }
 0x33a   : > { %v9343_v14 = vpop.f32.mrb[0].mxu0  ;;  %v9345_v15 = vpop.f32.mrb[0].mxu1 }
 0x33b   : > { %v9347_v16 = vpop.f32.mrb[1].mxu0  ;;  %v9349_v17 = vpop.f32.mrb[1].mxu1  ;;  %v2888_v18 = vmul.f32 %v2885_v13, %v9345_v15  ;;  %v2887_v19 = vmul.f32 %v2885_v13, %v9343_v14  ;;  %v2876_v52 = vmul.f32 %v9379_v47, %v9343_v14  ;;  %v2877_v53 = vmul.f32 %v9379_v47, %v9345_v15 }
 0x33c   : > { %v1402_v20 = vpop.f32.mrb[2].mxu0  ;;  %v1603_v58 = vpop.f32.mrb[2].mxu1  ;;  %v2824_v11 = vmul.f32 %v9381_v48, %v9343_v14 }
 0x33d   : > { %2905 = vrot.lane.b32.xlu1 %v2888_v18, %s8763_s26  ;;  %v1604_v21 = vpop.f32.mrb[3].mxu1  ;;  %2903 = vrot.lane.b32.xlu0 %v2887_v19, %s8763_s26  ;;  %v1403_v57 = vpop.f32.mrb[3].mxu0 }
 0x37a   : > { %v9355_v22 = vpop.f32.mrb[4].mxu0  ;;  %v9357_v23 = vpop.f32.mrb[4].mxu1 }
 0x37b   : > { %v9359_v24 = vpop.f32.mrb[5].mxu0  ;;  %v9361_v25 = vpop.f32.mrb[5].mxu1  ;;  %v2889_v26 = vmul.f32 %v2885_v13, %v9355_v22  ;;  %v2890_v31 = vmul.f32 %v2885_v13, %v9357_v23  ;;  %v2878_v7 = vmul.f32 %v9379_v47, %v9355_v22  ;;  %v2879_v9 = vmul.f32 %v9379_v47, %v9357_v23 }
 0x37c   : > { %v1804_v27 = vpop.f32.mrb[6].mxu0  ;;  %v2005_v28 = vpop.f32.mrb[6].mxu1  ;;  %v2826_v20 = vmul.f32 %v9381_v48, %v9355_v22  ;;  %v2827_v58 = vmul.f32 %v9381_v48, %v9357_v23 }
 0x37d   : > { %v2006_v29 = vpop.f32.mrb[7].mxu1  ;;  %2907 = vrot.lane.b32.xlu1 %v2889_v26, %s8763_s26  ;;  %v1805_v30 = vpop.f32.mrb[7].mxu0 }
 0x381   : > { %2909 = vrot.lane.b32.xlu1 %v2890_v31, %s8763_s26  ;;  %v8768_v31 = vmov 0  }
 0x382   : > { %7921 = vset.pattern.permute.xlu0 %v8768_v31 }
 0x3af   : > { %v2906_v49 = vpop.permute.xlu1 %2905  ;;  %v2904_v51 = vpop.permute.xlu0 %2903 }
 0x3b0   : > { %v2927_v56 = vadd.f32 %v2904_v51, %v2876_v52  ;;  %v2928_v62 = vadd.f32 %v2906_v49, %v2877_v53 }
 0x3b2   : > { %v2943_v5 = vpack.c.bf16 %v2927_v56, %v2927_v56  ;;  %v2944_v6 = vpack.c.bf16 %v2928_v62, %v2928_v62 }
 0x3ba   : > { %v9367_v32 = vpop.f32.mrb[8].mxu0 }
 0x3bb   : > { %v9369_v33 = vpop.f32.mrb[8].mxu1  ;;  %v9371_v34 = vpop.f32.mrb[9].mxu0  ;;  %v2891_v36 = vmul.f32 %v2885_v13, %v9367_v32  ;;  %v2880_v21 = vmul.f32 %v9379_v47, %v9367_v32 }
 0x3bc   : > { %v9374_v39 = vpop.f32.mrb[9].mxu1  ;;  %v2206_v42 = vpop.f32.mrb[10].mxu0  ;;  %v2892_v46 = vmul.f32 %v2885_v13, %v9369_v33  ;;  %v2881_v28 = vmul.f32 %v9379_v47, %v9369_v33 }
 0x3bd   : > { %v2407_v43 = vpop.f32.mrb[10].mxu1  ;;  %2911 = vrot.lane.b32.xlu1 %v2891_v36, %s8763_s26  ;;  %v2207_v44 = vpop.f32.mrb[11].mxu0  ;;  %v2828_v42 = vmul.f32 %v9381_v48, %v9367_v32 }
 0x3be   : > { %v2408_v45 = vpop.f32.mrb[11].mxu1  ;;  %v2829_v43 = vmul.f32 %v9381_v48, %v9369_v33 }
 0x3c1   : > { %2913 = vrot.lane.b32.xlu1 %v2892_v46, %s8763_s26 }
 0x3ef   : > { %v2908_v54 = vpop.permute.xlu1 %2907 }
 0x3f0   : > { %v2929_v10 = vadd.f32 %v2908_v54, %v2878_v7 }
 0x3f2   : > { %v2945_v18 = vpack.c.bf16 %v2929_v10, %v2929_v10 }
 0x3f3   : > { %v2910_v8 = vpop.permute.xlu1 %2909 }
 0x3f4   : > { %v2930_v12 = vadd.f32 %v2910_v8, %v2879_v9 }
 0x3f6   : > { %v2946_v19 = vpack.c.bf16 %v2930_v12, %v2930_v12 }
 0x3fa   : > { %v9389_v55 = vpop.f32.mrb[12].mxu0 }
 0x3fb   : > { %v9391_v59 = vpop.f32.mrb[12].mxu1  ;;  %v9393_v60 = vpop.f32.mrb[13].mxu0  ;;  %v2893_v61 = vmul.f32 %v2885_v13, %v9389_v55  ;;  %v2882_v44 = vmul.f32 %v9379_v47, %v9389_v55 }
 0x3fc   : > { %v9396_v63 = vpop.f32.mrb[13].mxu1  ;;  %v2608_v0 = vpop.f32.mrb[14].mxu0  ;;  %v2894_v1 = vmul.f32 %v2885_v13, %v9391_v59  ;;  %v2825_v13 = vmul.f32 %v9381_v48, %v9345_v15  ;;  %v2883_v45 = vmul.f32 %v9379_v47, %v9391_v59  ;;  %v9449_v47 = vld [vmem:[%s10315_s8] sm:$0xff] }
 0x3fd   : > { %v2809_v2 = vpop.f32.mrb[14].mxu1  ;;  %2915 = vrot.lane.b32.xlu0 %v2893_v61, %s8763_s26  ;;  %v2609_v3 = vpop.f32.mrb[15].mxu0 }
 0x3fe   : > { %v2810_v4 = vpop.f32.mrb[15].mxu1  ;;  %2917 = vrot.lane.b32.xlu1 %v2894_v1, %s8763_s26  ;;  %v2812_v1 = vmul.f32 %v9449_v47, %v9343_v14  ;;  %v2830_v2 = vmul.f32 %v9381_v48, %v9389_v55  ;;  %v2813_v3 = vmul.f32 %v9449_v47, %v9345_v15  ;;  %v872_v14 = vld [vmem:[%s10316_s21] sm:$0xff] }
 0x401   : > { %2952 = vrot.lane.b32.xlu0 %v2943_v5, %s8764_s1  ;;  %v2831_v5 = vmul.f32 %v9381_v48, %v9391_v59 }
 0x402   : > { %3002 = vrot.lane.b32.xlu1 %v2944_v6, %s8764_s1 }
 0x405   : > { %2840 = vrot.lane.b32.xlu0 %v2824_v11, %s8763_s26 }
 0x406   : > { %2842 = vrot.lane.b32.xlu1 %v2825_v13, %s8763_s26  ;;  %v2814_v13 = vmul.f32 %v9449_v47, %v9355_v22 }
 0x409   : > { %3051 = vrot.lane.b32.xlu0 %v2945_v18, %s8764_s1  ;;  %v2815_v18 = vmul.f32 %v9449_v47, %v9357_v23 }
 0x40a   : > { %3100 = vrot.lane.b32.xlu1 %v2946_v19, %s8764_s1 }
 0x40d   : > { %2844 = vrot.lane.b32.xlu0 %v2826_v20, %s8763_s26 }
 0x40e   : > { %2846 = vrot.lane.b32.xlu1 %v2827_v58, %s8763_s26 }
 0x42f   : > { %v2912_v57 = vpop.permute.xlu1 %2911 }
 0x430   : > { %v2931_v26 = vadd.f32 %v2912_v57, %v2880_v21 }
 0x432   : > { %v2947_v27 = vpack.c.bf16 %v2931_v26, %v2931_v26 }
 0x433   : > { %v2914_v29 = vpop.permute.xlu1 %2913 }
 0x434   : > { %v2932_v30 = vadd.f32 %v2914_v29, %v2881_v28  ;;  %3149 = vrot.lane.b32.xlu0 %v2947_v27, %s8764_s1  ;;  %v2816_v27 = vmul.f32 %v9449_v47, %v9367_v32 }
 0x436   : > { %v2948_v36 = vpack.c.bf16 %v2932_v30, %v2932_v30 }
 0x438   : > { %3198 = vrot.lane.b32.xlu1 %v2948_v36, %s8764_s1  ;;  %2848 = vrot.lane.b32.xlu0 %v2828_v42, %s8763_s26 }
 0x43c   : > { %2850 = vrot.lane.b32.xlu1 %v2829_v43, %s8763_s26  ;;  %v2817_v43 = vmul.f32 %v9449_v47, %v9369_v33 }
 0x46f   : > { %v2916_v46 = vpop.permute.xlu0 %2915 }
 0x470   : > { %v2918_v49 = vpop.permute.xlu1 %2917  ;;  %v2933_v51 = vadd.f32 %v2916_v46, %v2882_v44 }
 0x471   : > { %v2934_v52 = vadd.f32 %v2918_v49, %v2883_v45 }
 0x472   : > { %v2949_v53 = vpack.c.bf16 %v2933_v51, %v2933_v51 }
 0x473   : > { %v2950_v54 = vpack.c.bf16 %v2934_v52, %v2934_v52  ;;  %v2953_v56 = vpop.permute.xlu0 %2952  ;;  %v2818_v52 = vmul.f32 %v9449_v47, %v9389_v55 }
 0x474   : > { %v3003_v61 = vpop.permute.xlu1 %3002  ;;  %v2959_v62 = vsel %vm2954_vm2, %v2953_v56, 0  ;;  %3247 = vrot.lane.b32.xlu0 %v2949_v53, %s8764_s1  ;;  %v2819_v53 = vmul.f32 %v9449_v47, %v9391_v59  ;;  %v3451_v56 = vpack.c.bf16 %v9347_v16, %v9347_v16 }
 0x475   : > { %v3008_v0 = vsel %vm2954_vm2, %v3003_v61, 0  ;;  %3296 = vrot.lane.b32.xlu1 %v2950_v54, %s8764_s1  ;;  %7739 = vmatpush3.bf16.xpose.msra.mxu0 %v2959_v62 }
 0x476   : > { %7745 = vmatpush3.bf16.xpose.msra.mxu1 %v3008_v0  ;;  %7750 = vmatprep.subr.bf16.mxu0 %v8766_v50  ;;  %v3452_v0 = vpack.c.bf16 %v9349_v17, %v9349_v17 }
 0x477   : > { %v2841_v4 = vpop.permute.xlu0 %2840  ;;  %7756 = vmatprep.subr.bf16.mxu1 %v8766_v50 }
 0x478   : > { %v2843_v6 = vpop.permute.xlu1 %2842  ;;  %v2864_v7 = vadd.f32 %v2841_v4, %v2812_v1  ;;  %2852 = vrot.lane.b32.xlu0 %v2830_v2, %s8763_s26  ;;  %v3510_v59 = vsel %vm3462_vm3, %v3452_v0, 0 }
 0x479   : > { %v2865_v8 = vadd.f32 %v2843_v6, %v2813_v3  ;;  %2854 = vrot.lane.b32.xlu1 %v2831_v5, %s8763_s26  ;;  %v3464_v3 = vsel %vm3462_vm3, %v3451_v56, 0  ;;  %s10319_s26 = scalar_lea.vmem %s10318_s24, %s10317_s19 }
 0x47a   : > { %v2935_v9 = vpack.c.bf16 %v2864_v7, %v2864_v7  ;;  %v7085_v16 = vld [vmem:[%s10319_s26] ss:$0 sm:$0xff] }
 0x47b   : > { %v2936_v10 = vpack.c.bf16 %v2865_v8, %v2865_v8  ;;  %v3052_v11 = vpop.permute.xlu0 %3051 }
 0x47c   : > { %v3101_v12 = vpop.permute.xlu1 %3100  ;;  %v3057_v15 = vsel %vm2954_vm2, %v3052_v11, 0  ;;  %7741 = vmatmul.mubr.msk.bf16.vlgmr.msra.gmra.mrb[16].mxu0 %vm2954_vm2, %v2935_v9  ;;  %876 = vperm.xlu0 %7921, %v872_v14  }
 0x47d   : > { %v3106_v48 = vsel %vm2954_vm2, %v3101_v12, 0  ;;  %7747 = vmatmul.mubr.msk.bf16.vlgmr.msra.gmra.mrb[16].mxu1 %vm2954_vm2, %v2936_v10  ;;  %7751 = vmatpush3.bf16.xpose.msra.mxu0 %v3057_v15 }
 0x47e   : > { %7757 = vmatpush3.bf16.xpose.msra.mxu1 %v3106_v48  ;;  %7752 = vmatprep.mubr.msk.bf16.mxu0 %vm8767_vm1, %v8766_v50 }
 0x47f   : > { %v2845_v19 = vpop.permute.xlu0 %2844  ;;  %7758 = vmatprep.mubr.msk.bf16.mxu1 %vm8767_vm1, %v8766_v50  ;;  %7762 = vmatprep.subr.bf16.mxu0 %v8766_v50 }
 0x480   : > { %v2847_v20 = vpop.permute.xlu1 %2846  ;;  %v2866_v58 = vadd.f32 %v2845_v19, %v2814_v13  ;;  %7768 = vmatprep.subr.bf16.mxu1 %v8766_v50 }
 0x481   : > { %v2867_v21 = vadd.f32 %v2847_v20, %v2815_v18 }
 0x482   : > { %v2937_v57 = vpack.c.bf16 %v2866_v58, %v2866_v58 }
 0x483   : > { %v2938_v26 = vpack.c.bf16 %v2867_v21, %v2867_v21 }
 0x484   : > { %7753 = vmatmul.mubr.msk.bf16.vlgmr.msra.gmra.mrb[20].mxu0 %vm2954_vm2, %v2937_v57 }
 0x485   : > { %7759 = vmatmul.mubr.msk.bf16.vlgmr.msra.gmra.mrb[20].mxu1 %vm2954_vm2, %v2938_v26  ;;  %7764 = vmatprep.mubr.msk.bf16.mxu0 %vm8767_vm1, %v8766_v50 }
 0x486   : > { %7770 = vmatprep.mubr.msk.bf16.mxu1 %vm8767_vm1, %v8766_v50 }
 0x4a6   : > { %v3150_v22 = vpop.permute.xlu0 %3149 }
 0x4a7   : > { %v3155_v23 = vsel %vm2954_vm2, %v3150_v22, 0 }
 0x4a8   : > { %7763 = vmatpush3.bf16.xpose.msra.mxu0 %v3155_v23 }
 0x4a9   : > { %7774 = vmatprep.subr.bf16.mxu0 %v8766_v50 }
 0x4aa   : > { %v3199_v28 = vpop.permute.xlu1 %3198  ;;  %v2849_v29 = vpop.permute.xlu0 %2848 }
 0x4ab   : > { %v3204_v30 = vsel %vm2954_vm2, %v3199_v28, 0  ;;  %v2868_v36 = vadd.f32 %v2849_v29, %v2816_v27 }
 0x4ac   : > { %7769 = vmatpush3.bf16.xpose.msra.mxu1 %v3204_v30 }
 0x4ad   : > { %v2939_v42 = vpack.c.bf16 %v2868_v36, %v2868_v36  ;;  %7780 = vmatprep.subr.bf16.mxu1 %v8766_v50 }
 0x4ae   : > { %v2851_v44 = vpop.permute.xlu1 %2850 }
 0x4af   : > { %v2869_v45 = vadd.f32 %v2851_v44, %v2817_v43  ;;  %7765 = vmatmul.mubr.msk.bf16.vlgmr.msra.gmra.mrb[24].mxu0 %vm2954_vm2, %v2939_v42 }
 0x4b0   : > { %7776 = vmatprep.mubr.msk.bf16.mxu0 %vm8767_vm1, %v8766_v50 }
 0x4b1   : > { %v2940_v32 = vpack.c.bf16 %v2869_v45, %v2869_v45 }
 0x4b3   : > { %7771 = vmatmul.mubr.msk.bf16.vlgmr.msra.gmra.mrb[24].mxu1 %vm2954_vm2, %v2940_v32 }
 0x4b4   : > { %7782 = vmatprep.mubr.msk.bf16.mxu1 %vm8767_vm1, %v8766_v50 }
 0x4e6   : > { %v3248_v46 = vpop.permute.xlu0 %3247 }
 0x4e7   : > { %v3297_v49 = vpop.permute.xlu1 %3296  ;;  %v3253_v51 = vsel %vm2954_vm2, %v3248_v46, 0 }
 0x4e8   : > { %v3302_v33 = vsel %vm2954_vm2, %v3297_v49, 0  ;;  %7775 = vmatpush3.bf16.xpose.msra.mxu0 %v3253_v51 }
 0x4e9   : > { %7781 = vmatpush3.bf16.xpose.msra.mxu1 %v3302_v33  ;;  %7786 = vmatprep.subr.bf16.mxu0 %v8766_v50 }
 0x4ea   : > { %v2853_v54 = vpop.permute.xlu0 %2852  ;;  %7792 = vmatprep.subr.bf16.mxu1 %v8766_v50 }
 0x4eb   : > { %v2855_v61 = vpop.permute.xlu1 %2854  ;;  %v2870_v62 = vadd.f32 %v2853_v54, %v2818_v52 }
 0x4ec   : > { %v2871_v1 = vadd.f32 %v2855_v61, %v2819_v53 }
 0x4ed   : > { %v2941_v55 = vpack.c.bf16 %v2870_v62, %v2870_v62 }
 0x4ee   : > { %v2942_v2 = vpack.c.bf16 %v2871_v1, %v2871_v1 }
 0x4ef   : > { %7777 = vmatmul.mubr.msk.bf16.vlgmr.msra.gmra.mrb[28].mxu0 %vm2954_vm2, %v2941_v55 }
 0x4f0   : > { %7783 = vmatmul.mubr.msk.bf16.vlgmr.msra.gmra.mrb[28].mxu1 %vm2954_vm2, %v2942_v2  ;;  %7787 = vmatpush3.bf16.msra.mxu0 %v3464_v3 }
 0x4f1   : > { %7793 = vmatpush3.bf16.msra.mxu1 %v3510_v59  ;;  %7788 = vmatprep.mubr.msk.bf16.mxu0 %vm8767_vm1, %v8766_v50 }
 0x4f2   : > { %7794 = vmatprep.mubr.msk.bf16.mxu1 %vm8767_vm1, %v8766_v50  ;;  %7798 = vmatprep.subr.bf16.mxu0 %v8766_v50 }
 0x4f3   : > { %7804 = vmatprep.subr.bf16.mxu1 %v8766_v50 }
 0x4fb   : > { %v877_v17 = vpop.permute.xlu0 %876 }
 0x4fc   : > { %v885_v47 = vmul.f32 %v7085_v16, %v877_v17 }
 0x4fe   : > { %vm886_vm4 = vcmp.gt.f32.partialorder %v885_v47, 0.5 }
 0x54f   : > { %v2995_v4 = vpop.f32.mrb[16].mxu0 }
 0x550   : > { %v3346_v5 = vsel %vm886_vm4, %v2995_v4, -1e+09  ;;  %v3044_v6 = vpop.f32.mrb[16].mxu1  ;;  %v7742_v7 = vpop.f32.mrb[17].mxu0 }
 0x551   : > { %v3347_v8 = vsel %vm886_vm4, %v3044_v6, -1e+09  ;;  %v7748_v14 = vpop.f32.mrb[17].mxu1  ;;  %v2998_v9 = vpop.f32.mrb[18].mxu0  ;;  %v3355_v10 = vsel %vm3354_vm5, %v3346_v5, -inf }
 0x552   : > { %v3047_v11 = vpop.f32.mrb[18].mxu1  ;;  %v3358_v12 = vsel %vm3354_vm5, %v3347_v8, -inf  ;;  %3356 = vmax.xlane.f32.xlu1 %v3355_v10  ;;  %v7743_v15 = vpop.f32.mrb[19].mxu0 }
 0x553   : > { %v7749_v48 = vpop.f32.mrb[19].mxu1  ;;  %3359 = vmax.xlane.f32.xlu0 %v3358_v12 }
 0x557   : > { %v3093_v13 = vpop.f32.mrb[20].mxu0 }
 0x558   : > { %v3348_v18 = vsel %vm886_vm4, %v3093_v13, -1e+09  ;;  %v3142_v19 = vpop.f32.mrb[20].mxu1  ;;  %v7754_v20 = vpop.f32.mrb[21].mxu0 }
 0x559   : > { %v3349_v58 = vsel %vm886_vm4, %v3142_v19, -1e+09  ;;  %v7760_v21 = vpop.f32.mrb[21].mxu1  ;;  %v3096_v57 = vpop.f32.mrb[22].mxu0  ;;  %v3361_v26 = vsel %vm3354_vm5, %v3348_v18, -inf }
 0x55a   : > { %v3145_v22 = vpop.f32.mrb[22].mxu1  ;;  %v3364_v23 = vsel %vm3354_vm5, %v3349_v58, -inf  ;;  %3362 = vmax.xlane.f32.xlu1 %v3361_v26  ;;  %v7755_v27 = vpop.f32.mrb[23].mxu0 }
 0x55b   : > { %v7761_v28 = vpop.f32.mrb[23].mxu1  ;;  %3365 = vmax.xlane.f32.xlu0 %v3364_v23 }
 0x582   : > { %v3191_v29 = vpop.f32.mrb[24].mxu0 }
 0x583   : > { %v3350_v30 = vsel %vm886_vm4, %v3191_v29, -1e+09  ;;  %v7766_v36 = vpop.f32.mrb[25].mxu0 }
 0x584   : > { %v3194_v42 = vpop.f32.mrb[26].mxu0  ;;  %v3367_v43 = vsel %vm3354_vm5, %v3350_v30, -inf }
 0x585   : > { %3368 = vmax.xlane.f32.xlu1 %v3367_v43  ;;  %v7767_v44 = vpop.f32.mrb[27].mxu0 }
 0x586   : > { %v3240_v45 = vpop.f32.mrb[24].mxu1 }
 0x587   : > { %v3351_v32 = vsel %vm886_vm4, %v3240_v45, -1e+09  ;;  %v7772_v46 = vpop.f32.mrb[25].mxu1 }
 0x588   : > { %v3243_v49 = vpop.f32.mrb[26].mxu1  ;;  %v3370_v51 = vsel %vm3354_vm5, %v3351_v32, -inf }
 0x589   : > { %v7773_v33 = vpop.f32.mrb[27].mxu1  ;;  %3371 = vmax.xlane.f32.xlu0 %v3370_v51 }
 0x5c2   : > { %v3289_v52 = vpop.f32.mrb[28].mxu0 }
 0x5c3   : > { %v3352_v53 = vsel %vm886_vm4, %v3289_v52, -1e+09  ;;  %v3338_v54 = vpop.f32.mrb[28].mxu1  ;;  %v7778_v56 = vpop.f32.mrb[29].mxu0 }
 0x5c4   : > { %v3353_v61 = vsel %vm886_vm4, %v3338_v54, -1e+09  ;;  %v7784_v62 = vpop.f32.mrb[29].mxu1  ;;  %v3292_v0 = vpop.f32.mrb[30].mxu0  ;;  %v3373_v1 = vsel %vm3354_vm5, %v3352_v53, -inf }
 0x5c5   : > { %v3341_v55 = vpop.f32.mrb[30].mxu1  ;;  %v3376_v2 = vsel %vm3354_vm5, %v3353_v61, -inf  ;;  %3374 = vmax.xlane.f32.xlu1 %v3373_v1  ;;  %v7779_v3 = vpop.f32.mrb[31].mxu0  ;;  %v3453_v1 = vpack.c.bf16 %v9359_v24, %v9359_v24 }
 0x5c6   : > { %v7785_v59 = vpop.f32.mrb[31].mxu1  ;;  %3377 = vmax.xlane.f32.xlu0 %v3376_v2  ;;  %v3454_v2 = vpack.c.bf16 %v9361_v25, %v9361_v25 }
 0x5df   : > { %v3357_v16 = vpop.xlane.xlu1 %3356 }
 0x5e0   : > { %v3360_v17 = vpop.xlane.xlu0 %3359  ;;  %v3379_v4 = vsub.f32 %v3346_v5, %v3357_v16 }
 0x5e1   : > { %v3380_v6 = vsub.f32 %v3347_v8, %v3360_v17  ;;  %v3556_v17 = vsel %vm3462_vm3, %v3453_v1, 0  ;;  %v8329_v1 = vld [vmem:[%s8977_s2 + $0x74] ss:$8 sps:$4 sm:$0xff]  }
 0x5e2   : > { %v3387_v7 = vmul.f32 1.442695, %v3379_v4  ;;  %v3602_v4 = vsel %vm3462_vm3, %v3454_v2, 0 }
 0x5e3   : > { %v3389_v14 = vmul.f32 1.442695, %v3380_v6  ;;  %v3455_v6 = vpack.c.bf16 %v9371_v34, %v9371_v34 }
 0x5e4   : > { %8548 = vpow2.f32 %v3387_v7 }
 0x5e5   : > { %8550 = vpow2.f32 %v3389_v14  ;;  %v3456_v14 = vpack.c.bf16 %v9374_v39, %v9374_v39 }
 0x5e7   : > { %v3363_v47 = vpop.xlane.xlu1 %3362 }
 0x5e8   : > { %v3366_v9 = vpop.xlane.xlu0 %3365  ;;  %v3381_v10 = vsub.f32 %v3348_v18, %v3363_v47 }
 0x5e9   : > { %v3382_v11 = vsub.f32 %v3349_v58, %v3366_v9 }
 0x5ea   : > { %v3391_v12 = vmul.f32 1.442695, %v3381_v10 }
 0x5eb   : > { %v3393_v15 = vmul.f32 1.442695, %v3382_v11  ;;  %v3648_v11 = vsel %vm3462_vm3, %v3455_v6, 0 }
 0x5ec   : > { %8552 = vpow2.f32 %v3391_v12  ;;  %v3694_v12 = vsel %vm3462_vm3, %v3456_v14, 0 }
 0x5ed   : > { %8554 = vpow2.f32 %v3393_v15 }
 0x5ee   : > { %v8549_v48 = vpop.eup %8548 }
 0x5ef   : > { %v8551_v13 = vpop.eup %8550  ;;  %v3403_v19 = vsel %vm3354_vm5, %v8549_v48, 0.0 }
 0x5f0   : > { %v3406_v20 = vsel %vm3354_vm5, %v8551_v13, 0.0  ;;  %3404 = vadd.xlane.f32.xlu1 %v3403_v19 }
 0x5f1   : > { %3407 = vadd.xlane.f32.xlu0 %v3406_v20  ;;  %v8308_v20 = vld [vmem:[%s8977_s2 + $0x4] ss:$8 sps:$4 sm:$0xff]  }
 0x5f6   : > { %v8553_v5 = vpop.eup %8552 }
 0x5f7   : > { %v9543_v8 = vpop.eup %8554  ;;  %v3409_v21 = vsel %vm3354_vm5, %v8553_v5, 0.0 }
 0x5f8   : > { %v3412_v18 = vsel %vm3354_vm5, %v9543_v8, 0.0  ;;  %3410 = vadd.xlane.f32.xlu1 %v3409_v21  ;;  %v3458_v21 = vpack.c.bf16 %v9396_v63, %v9396_v63 }
 0x5f9   : > { %3413 = vadd.xlane.f32.xlu0 %v3412_v18 }
 0x612   : > { %v3369_v58 = vpop.xlane.xlu1 %3368 }
 0x613   : > { %v3383_v57 = vsub.f32 %v3350_v30, %v3369_v58 }
 0x615   : > { %v3395_v26 = vmul.f32 1.442695, %v3383_v57  ;;  %v3786_v57 = vsel %vm3462_vm3, %v3458_v21, 0  ;;  %v8342_v21 = vld [vmem:[%s8977_s2 + $0xc0] ss:$8 sps:$4 sm:$0xff]  }
 0x616   : > { %v3372_v22 = vpop.xlane.xlu0 %3371 }
 0x617   : > { %8556 = vpow2.f32 %v3395_v26  ;;  %v3384_v23 = vsub.f32 %v3351_v32, %v3372_v22 }
 0x619   : > { %v3397_v27 = vmul.f32 1.442695, %v3384_v23 }
 0x61b   : > { %8558 = vpow2.f32 %v3397_v27 }
 0x621   : > { %v9548_v28 = vpop.eup %8556 }
 0x622   : > { %v3415_v29 = vsel %vm3354_vm5, %v9548_v28, 0.0 }
 0x623   : > { %3416 = vadd.xlane.f32.xlu1 %v3415_v29  ;;  %v8306_v29 = vld [vmem:[%s8977_s2] ss:$8 sps:$4 sm:$0xff]  }
 0x625   : > { %v9552_v36 = vpop.eup %8558 }
 0x626   : > { %v3418_v42 = vsel %vm3354_vm5, %v9552_v36, 0.0 }
 0x627   : > { %3419 = vadd.xlane.f32.xlu0 %v3418_v42  ;;  %v8309_v42 = vld [vmem:[%s8977_s2 + $0x20] ss:$8 sps:$4 sm:$0xff]  }
 0x652   : > { %v3375_v43 = vpop.xlane.xlu1 %3374 }
 0x653   : > { %v3378_v30 = vpop.xlane.xlu0 %3377  ;;  %v3385_v44 = vsub.f32 %v3352_v53, %v3375_v43  ;;  %v8314_v43 = vld [vmem:[%s8977_s2 + $0x14] ss:$8 sps:$4 sm:$0xff]  }
 0x654   : > { %v3386_v45 = vsub.f32 %v3353_v61, %v3378_v30  ;;  %v8317_v30 = vld [vmem:[%s8977_s2 + $0x34] ss:$8 sps:$4 sm:$0xff]  }
 0x655   : > { %v3399_v46 = vmul.f32 1.442695, %v3385_v44  ;;  %v8312_v44 = vld [vmem:[%s8977_s2 + $0x10] ss:$8 sps:$4 sm:$0xff]  }
 0x656   : > { %v3401_v32 = vmul.f32 1.442695, %v3386_v45  ;;  %v8315_v45 = vld [vmem:[%s8977_s2 + $0x30] ss:$8 sps:$4 sm:$0xff]  }
 0x657   : > { %8560 = vpow2.f32 %v3399_v46  ;;  %v8320_v46 = vld [vmem:[%s8977_s2 + $0x44] ss:$8 sps:$4 sm:$0xff]  }
 0x658   : > { %8562 = vpow2.f32 %v3401_v32  ;;  %v8323_v32 = vld [vmem:[%s8977_s2 + $0x64] ss:$8 sps:$4 sm:$0xff]  }
 0x661   : > { %v9556_v49 = vpop.eup %8560 }
 0x662   : > { %v9558_v51 = vpop.eup %8562  ;;  %v3421_v33 = vsel %vm3354_vm5, %v9556_v49, 0.0 }
 0x663   : > { %v3424_v52 = vsel %vm3354_vm5, %v9558_v51, 0.0  ;;  %3422 = vadd.xlane.f32.xlu1 %v3421_v33 }
 0x664   : > { %3425 = vadd.xlane.f32.xlu0 %v3424_v52 }
 0x67d   : > { %v3405_v54 = vpop.xlane.xlu1 %3404 }
 0x67e   : > { %v3408_v56 = vpop.xlane.xlu0 %3407  ;;  %8564 = vrcp.f32 %v3405_v54 }
 0x67f   : > { %8566 = vrcp.f32 %v3408_v56  ;;  %v8321_v56 = vld [vmem:[%s8977_s2 + $0x60] ss:$8 sps:$4 sm:$0xff]  }
 0x685   : > { %v3411_v53 = vpop.xlane.xlu1 %3410 }
 0x686   : > { %v3414_v61 = vpop.xlane.xlu0 %3413  ;;  %8568 = vrcp.f32 %v3411_v53  ;;  %v8326_v53 = vld [vmem:[%s8977_s2 + $0x54] ss:$8 sps:$4 sm:$0xff]  }
 0x687   : > { %8570 = vrcp.f32 %v3414_v61 }
 0x688   : > { %v8565_v62 = vpop.eup %8564 }
 0x689   : > { %v8567_v0 = vpop.eup %8566  ;;  %v3435_v55 = vmul.f32 %v8565_v62, %v8549_v48  ;;  %v3457_v48 = vpack.c.bf16 %v9393_v60, %v9393_v60  ;;  %v8311_v60 = vld [vmem:[%s8977_s2 + $0x24] ss:$8 sps:$4 sm:$0xff]  }
 0x68a   : > { %v3436_v3 = vmul.f32 %v8567_v0, %v8551_v13 }
 0x68b   : > { %v3443_v59 = vpack.c.bf16 %v3435_v55, %v3435_v55 }
 0x68c   : > { %v3444_v16 = vpack.c.bf16 %v3436_v3, %v3436_v3 }
 0x68d   : > { %7789 = vmatmul.mubr.msk.bf16.vlgmr.msra.gmra.mrb[32].mxu0 %vm3354_vm5, %v3443_v59  ;;  %v8324_v59 = vld [vmem:[%s8977_s2 + $0x50] ss:$8 sps:$4 sm:$0xff]  }
 0x68e   : > { %7795 = vmatmul.mubr.msk.bf16.vlgmr.msra.gmra.mrb[32].mxu1 %vm3354_vm5, %v3444_v16  ;;  %7799 = vmatpush3.bf16.msra.mxu0 %v3556_v17  ;;  %v8327_v16 = vld [vmem:[%s8977_s2 + $0x70] ss:$8 sps:$4 sm:$0xff]   ;;  %v8332_v17 = vld [vmem:[%s8977_s2 + $0x84] ss:$8 sps:$4 sm:$0xff]  }
 0x68f   : > { %7805 = vmatpush3.bf16.msra.mxu1 %v3602_v4  ;;  %7800 = vmatprep.mubr.msk.bf16.mxu0 %vm8767_vm1, %v8766_v50  ;;  %v8338_v4 = vld [vmem:[%s8977_s2 + $0xa4] ss:$8 sps:$4 sm:$0xff]  }
 0x690   : > { %v8569_v24 = vpop.eup %8568  ;;  %7806 = vmatprep.mubr.msk.bf16.mxu1 %vm8767_vm1, %v8766_v50  ;;  %7810 = vmatprep.subr.bf16.mxu0 %v8766_v50 }
 0x691   : > { %v8571_v25 = vpop.eup %8570  ;;  %v3437_v7 = vmul.f32 %v8569_v24, %v8553_v5  ;;  %7816 = vmatprep.subr.bf16.mxu1 %v8766_v50 }
 0x692   : > { %v3438_v47 = vmul.f32 %v8571_v25, %v9543_v8  ;;  %v3740_v8 = vsel %vm3462_vm3, %v3457_v48, 0  ;;  %v8330_v25 = vld [vmem:[%s8977_s2 + $0x80] ss:$8 sps:$4 sm:$0xff]  }
 0x693   : > { %v3445_v9 = vpack.c.bf16 %v3437_v7, %v3437_v7 }
 0x694   : > { %v3446_v10 = vpack.c.bf16 %v3438_v47, %v3438_v47  ;;  %v8335_v47 = vld [vmem:[%s8977_s2 + $0x94] ss:$8 sps:$4 sm:$0xff]  }
 0x695   : > { %7801 = vmatmul.mubr.msk.bf16.vlgmr.msra.gmra.mrb[36].mxu0 %vm3354_vm5, %v3445_v9  ;;  %v8336_v9 = vld [vmem:[%s8977_s2 + $0xa0] ss:$8 sps:$4 sm:$0xff]  }
 0x696   : > { %7807 = vmatmul.mubr.msk.bf16.vlgmr.msra.gmra.mrb[36].mxu1 %vm3354_vm5, %v3446_v10  ;;  %7811 = vmatpush3.bf16.msra.mxu0 %v3648_v11 }
 0x697   : > { %7817 = vmatpush3.bf16.msra.mxu1 %v3694_v12  ;;  %7812 = vmatprep.mubr.msk.bf16.mxu0 %vm8767_vm1, %v8766_v50 }
 0x698   : > { %7822 = vmatprep.subr.bf16.mxu0 %v8766_v50  ;;  %7818 = vmatprep.mubr.msk.bf16.mxu1 %vm8767_vm1, %v8766_v50 }
 0x699   : > { %7828 = vmatprep.subr.bf16.mxu1 %v8766_v50 }
 0x6b0   : > { %v3417_v34 = vpop.xlane.xlu1 %3416 }
 0x6b1   : > { %8572 = vrcp.f32 %v3417_v34  ;;  %v8341_v34 = vld [vmem:[%s8977_s2 + $0xb4] ss:$8 sps:$4 sm:$0xff]  }
 0x6b4   : > { %v3420_v39 = vpop.xlane.xlu0 %3419 }
 0x6b5   : > { %8574 = vrcp.f32 %v3420_v39 }
 0x6bb   : > { %v8573_v15 = vpop.eup %8572 }
 0x6bc   : > { %v3439_v13 = vmul.f32 %v8573_v15, %v9548_v28 }
 0x6be   : > { %v3447_v19 = vpack.c.bf16 %v3439_v13, %v3439_v13  ;;  %v8333_v13 = vld [vmem:[%s8977_s2 + $0x90] ss:$8 sps:$4 sm:$0xff]  }
 0x6bf   : > { %v8575_v5 = vpop.eup %8574 }
 0x6c0   : > { %v3440_v18 = vmul.f32 %v8575_v5, %v9552_v36  ;;  %7813 = vmatmul.mubr.msk.bf16.vlgmr.msra.gmra.mrb[40].mxu0 %vm3354_vm5, %v3447_v19  ;;  %v8339_v19 = vld [vmem:[%s8977_s2 + $0xb0] ss:$8 sps:$4 sm:$0xff]   ;;  %v8347_v5 = vld [vmem:[%s8977_s2 + $0xe4] ss:$8 sps:$4 sm:$0xff]  }
 0x6c1   : > { %7823 = vmatpush3.bf16.msra.mxu0 %v3740_v8  ;;  %7824 = vmatprep.mubr.msk.bf16.mxu0 %vm8767_vm1, %v8766_v50 }
 0x6c2   : > { %v3448_v58 = vpack.c.bf16 %v3440_v18, %v3440_v18  ;;  %3891 = vmatprep.subr.bf16.mxu0 %v8308_v20  ;;  %v8344_v20 = vld [vmem:[%s8977_s2 + $0xc4] ss:$8 sps:$4 sm:$0xff]  }
 0x6c4   : > { %7819 = vmatmul.mubr.msk.bf16.vlgmr.msra.gmra.mrb[40].mxu1 %vm3354_vm5, %v3448_v58 }
 0x6c5   : > { %7829 = vmatpush3.bf16.msra.mxu1 %v3786_v57  ;;  %7830 = vmatprep.mubr.msk.bf16.mxu1 %vm8767_vm1, %v8766_v50 }
 0x6c6   : > { %3955 = vmatprep.subr.bf16.mxu1 %v8311_v60  ;;  %v8350_v60 = vld [vmem:[%s8977_s2 + $0xd4] ss:$8 sps:$4 sm:$0xff]  }
 0x6f0   : > { %v3423_v63 = vpop.xlane.xlu1 %3422 }
 0x6f1   : > { %v3426_v26 = vpop.xlane.xlu0 %3425  ;;  %8576 = vrcp.f32 %v3423_v63 }
 0x6f2   : > { %8578 = vrcp.f32 %v3426_v26 }
 0x6fb   : > { %v8577_v22 = vpop.eup %8576 }
 0x6fc   : > { %v8579_v23 = vpop.eup %8578  ;;  %v3441_v27 = vmul.f32 %v8577_v22, %v9556_v49  ;;  %v8345_v22 = vld [vmem:[%s8977_s2 + $0xe0] ss:$8 sps:$4 sm:$0xff]  }
 0x6fd   : > { %v3442_v28 = vmul.f32 %v8579_v23, %v9558_v51  ;;  %v8318_v51 = vld [vmem:[%s8977_s2 + $0x40] ss:$8 sps:$4 sm:$0xff]   ;;  %v8348_v23 = vld [vmem:[%s8977_s2 + $0xd0] ss:$8 sps:$4 sm:$0xff]  }
 0x6fe   : > { %v3449_v36 = vpack.c.bf16 %v3441_v27, %v3441_v27 }
 0x6ff   : > { %v3450_v50 = vpack.c.bf16 %v3442_v28, %v3442_v28 }
 0x700   : > { %7825 = vmatmul.mubr.msk.bf16.vlgmr.msra.gmra.mrb[44].mxu0 %vm3354_vm5, %v3449_v36 }
 0x701   : > { %7831 = vmatmul.mubr.msk.bf16.vlgmr.msra.gmra.mrb[44].mxu1 %vm3354_vm5, %v3450_v50  ;;  %3892 = vmatpush1.bf16.msra.mxu0 %v8306_v29  ;;  %v8353_v29 = vld [vmem:[%s8977_s2 + $0xf4] ss:$8 sps:$4 sm:$0xff]  }
 0x702   : > { %3956 = vmatpush1.bf16.msra.mxu1 %v8309_v42  ;;  %3893 = vmatprep.subr.bf16.mxu0 %v8314_v43  ;;  %v8351_v43 = vld [vmem:[%s8977_s2 + $0xf0] ss:$8 sps:$4 sm:$0xff]  }
 0x703   : > { %3957 = vmatprep.subr.bf16.mxu1 %v8317_v30  ;;  %3923 = vmatprep.mubr.bf16.mxu0 %v8768_v31 }
 0x704   : > { %3987 = vmatprep.mubr.bf16.mxu1 %v8768_v31 }
 0x705   : > { %3894 = vmatpush1.bf16.msra.mxu0 %v8312_v44 }
 0x706   : > { %3958 = vmatpush1.bf16.msra.mxu1 %v8315_v45  ;;  %4019 = vmatprep.subr.bf16.mxu0 %v8320_v46 }
 0x707   : > { %4083 = vmatprep.subr.bf16.mxu1 %v8323_v32 }
 0x760   : > { %v3500_v49 = vpop.f32.mrb[32].mxu0 }
 0x761   : > { %v3828_v33 = vpack.c.bf16 %v3500_v49, %v3500_v49  ;;  %v3546_v52 = vpop.f32.mrb[32].mxu1  ;;  %v7790_v54 = vpop.f32.mrb[33].mxu0 }
 0x762   : > { %v3829_v61 = vpack.c.bf16 %v3546_v52, %v3546_v52  ;;  %v7796_v62 = vpop.f32.mrb[33].mxu1  ;;  %v3503_v0 = vpop.f32.mrb[34].mxu0 }
 0x763   : > { %v3549_v55 = vpop.f32.mrb[34].mxu1  ;;  %v7791_v2 = vpop.f32.mrb[35].mxu0  ;;  %7362 = vmatmul.mubr.msk.bf16.vlgmr.msra.gmra.mrb[48].mxu0 %vm2954_vm2, %v3828_v33 }
 0x764   : > { %v7797_v3 = vpop.f32.mrb[35].mxu1  ;;  %7367 = vmatmul.mubr.msk.bf16.vlgmr.msra.gmra.mrb[48].mxu1 %vm2954_vm2, %v3829_v61  ;;  %4020 = vmatpush1.bf16.msra.mxu0 %v8318_v51 }
 0x765   : > { %4084 = vmatpush1.bf16.msra.mxu1 %v8321_v56  ;;  %4021 = vmatprep.subr.bf16.mxu0 %v8326_v53 }
 0x766   : > { %4085 = vmatprep.subr.bf16.mxu1 %v8329_v1  ;;  %4051 = vmatprep.mubr.bf16.mxu0 %v8768_v31 }
 0x767   : > { %4115 = vmatprep.mubr.bf16.mxu1 %v8768_v31 }
 0x768   : > { %v3592_v24 = vpop.f32.mrb[36].mxu0  ;;  %4022 = vmatpush1.bf16.msra.mxu0 %v8324_v59 }
 0x769   : > { %v3830_v6 = vpack.c.bf16 %v3592_v24, %v3592_v24  ;;  %v3638_v7 = vpop.f32.mrb[36].mxu1  ;;  %4086 = vmatpush1.bf16.msra.mxu1 %v8327_v16  ;;  %v7802_v14 = vpop.f32.mrb[37].mxu0  ;;  %4147 = vmatprep.subr.bf16.mxu0 %v8332_v17 }
 0x76a   : > { %v3831_v10 = vpack.c.bf16 %v3638_v7, %v3638_v7  ;;  %v7808_v11 = vpop.f32.mrb[37].mxu1  ;;  %v3595_v12 = vpop.f32.mrb[38].mxu0  ;;  %4211 = vmatprep.subr.bf16.mxu1 %v8338_v4 }
 0x76b   : > { %v3641_v39 = vpop.f32.mrb[38].mxu1  ;;  %v7803_v15 = vpop.f32.mrb[39].mxu0  ;;  %7372 = vmatmul.mubr.msk.bf16.vlgmr.msra.gmra.mrb[52].mxu0 %vm2954_vm2, %v3830_v6 }
 0x76c   : > { %v7809_v48 = vpop.f32.mrb[39].mxu1  ;;  %7377 = vmatmul.mubr.msk.bf16.vlgmr.msra.gmra.mrb[52].mxu1 %vm2954_vm2, %v3831_v10  ;;  %4148 = vmatpush1.bf16.msra.mxu0 %v8330_v25 }
 0x76d   : > { %4149 = vmatprep.subr.bf16.mxu0 %v8335_v47  ;;  %4212 = vmatpush1.bf16.msra.mxu1 %v8336_v9 }
 0x76e   : > { %4179 = vmatprep.mubr.bf16.mxu0 %v8768_v31  ;;  %4213 = vmatprep.subr.bf16.mxu1 %v8341_v34 }
 0x76f   : > { %4243 = vmatprep.mubr.bf16.mxu1 %v8768_v31 }
 0x770   : > { %4150 = vmatpush1.bf16.msra.mxu0 %v8333_v13 }
 0x771   : > { %4214 = vmatpush1.bf16.msra.mxu1 %v8339_v19  ;;  %4275 = vmatprep.subr.bf16.mxu0 %v8344_v20 }
 0x772   : > { %4339 = vmatprep.subr.bf16.mxu1 %v8347_v5 }
 0x793   : > { %v3684_v8 = vpop.f32.mrb[40].mxu0 }
 0x794   : > { %v3832_v18 = vpack.c.bf16 %v3684_v8, %v3684_v8  ;;  %v7814_v58 = vpop.f32.mrb[41].mxu0 }
 0x795   : > { %v3687_v57 = vpop.f32.mrb[42].mxu0 }
 0x796   : > { %v7815_v63 = vpop.f32.mrb[43].mxu0  ;;  %7382 = vmatmul.mubr.msk.bf16.vlgmr.msra.gmra.mrb[56].mxu0 %vm2954_vm2, %v3832_v18  ;;  %v9665_v18 = vsub.s32 1, %v9110_v35 }
 0x797   : > { %v3730_v26 = vpop.f32.mrb[40].mxu1  ;;  %4276 = vmatpush1.bf16.msra.mxu0 %v8342_v21  ;;  %4307 = vmatprep.mubr.bf16.mxu0 %v8768_v31  ;;  %v4394_v21 = vld [vmem:[%s10320_s22] sm:$0x3]  ;;  %s10323_s22 = sld [smem:[#allocation32_spill]] (!%p7654_p1) }
 0x798   : > { %v3833_v27 = vpack.c.bf16 %v3730_v26, %v3730_v26  ;;  %v7820_v28 = vpop.f32.mrb[41].mxu1  ;;  %4277 = vmatprep.subr.bf16.mxu0 %v8350_v60  ;;  %v4399_v63 = vrot.slane %v4394_v21, %v9113_v37 }
 0x799   : > { %v3733_v36 = vpop.f32.mrb[42].mxu1 }
 0x79a   : > { %v7821_v42 = vpop.f32.mrb[43].mxu1  ;;  %7387 = vmatmul.mubr.msk.bf16.vlgmr.msra.gmra.mrb[56].mxu1 %vm2954_vm2, %v3833_v27  ;;  %v4403_v27 = vrot.slane %v4394_v21, %v9665_v18 }
 0x79b   : > { %4340 = vmatpush1.bf16.msra.mxu1 %v8345_v22  ;;  %4278 = vmatpush1.bf16.msra.mxu0 %v8348_v23 }
 0x79c   : > { %4341 = vmatprep.subr.bf16.mxu1 %v8353_v29  ;;  %4371 = vmatprep.mubr.bf16.mxu1 %v8768_v31 }
 0x79f   : > { %4342 = vmatpush1.bf16.msra.mxu1 %v8351_v43 }
 0x7d3   : > { %v3776_v50 = vpop.f32.mrb[44].mxu0 }
 0x7d4   : > { %v3834_v30 = vpack.c.bf16 %v3776_v50, %v3776_v50  ;;  %v3822_v44 = vpop.f32.mrb[44].mxu1  ;;  %v7826_v45 = vpop.f32.mrb[45].mxu0 }
 0x7d5   : > { %v3835_v46 = vpack.c.bf16 %v3822_v44, %v3822_v44  ;;  %v7832_v32 = vpop.f32.mrb[45].mxu1  ;;  %v3779_v49 = vpop.f32.mrb[46].mxu0  ;;  %v8615_v45 = vld [vmem:[%s9004_s23] sm:$0xff] }
 0x7d6   : > { %v3825_v51 = vpop.f32.mrb[46].mxu1  ;;  %v7827_v33 = vpop.f32.mrb[47].mxu0  ;;  %7392 = vmatmul.mubr.msk.bf16.vlgmr.msra.gmra.mrb[60].mxu0 %vm2954_vm2, %v3834_v30  ;;  %v8616_v32 = vld [vmem:[%s9004_s23 + $0x8] sm:$0xff] }
 0x7d7   : > { %v7833_v52 = vpop.f32.mrb[47].mxu1  ;;  %7397 = vmatmul.mubr.msk.bf16.vlgmr.msra.gmra.mrb[60].mxu1 %vm2954_vm2, %v3835_v46  ;;  %v4468_v33 = vld [vmem:[%s8986_s7] sm:$0xff] }
 0x7d8   : > { %v4472_v52 = vld [vmem:[%s8986_s7 + $0x20] sm:$0xff] }
 0x836   : > { %v3925_v54 = vpop.f32.mrb[48].mxu0 }
 0x837   : > { %v3989_v56 = vpop.f32.mrb[48].mxu1  ;;  %v3927_v53 = vpop.f32.mrb[49].mxu0 }
 0x838   : > { %v4380_v61 = vadd.f32 %v3989_v56, %v3925_v54  ;;  %v3991_v31 = vpop.f32.mrb[49].mxu1  ;;  %v3929_v62 = vpop.f32.mrb[50].mxu0  ;;  %v4469_v54 = vld [vmem:[%s8986_s7 + $0x8] sm:$0xff]  ;;  %v7398_v56 = vcombine.low %v4468_v33, %v4472_v52 }
 0x839   : > { %v4381_v0 = vadd.f32 %v3991_v31, %v3927_v53  ;;  %v3993_v1 = vpop.f32.mrb[50].mxu1  ;;  %v3930_v55 = vpop.f32.mrb[51].mxu0  ;;  %v7399_v53 = vcombine.high %v4468_v33, %v4472_v52  ;;  %v4476_v31 = vld [vmem:[%s8986_s7 + $0x40] sm:$0xff]  ;;  %v4525_v33 = vld [vmem:[%s8986_s7 + $0x1c8] sm:$0xff] }
 0x83a   : > { %v3994_v2 = vpop.f32.mrb[51].mxu1  ;;  %v4480_v62 = vld [vmem:[%s8986_s7 + $0x60] sm:$0xff]  ;;  %v4529_v52 = vld [vmem:[%s8986_s7 + $0x1e8] sm:$0xff] }
 0x83b   : > { %v7407_v55 = vcombine.high %v4476_v31, %v4480_v62  ;;  %v4477_v2 = vld [vmem:[%s8986_s7 + $0x48] sm:$0xff]  ;;  %5278 = vmatprep.subr.bf16.mxu0 %v7399_v53 }
 0x83c   : > { %5279 = vmatpush1.bf16.msra.mxu0 %v7398_v56 }
 0x83d   : > { %5280 = vmatprep.subr.bf16.mxu0 %v7407_v55 }
 0x83e   : > { %v4053_v3 = vpop.f32.mrb[52].mxu0 }
 0x83f   : > { %v4382_v59 = vadd.f32 %v4380_v61, %v4053_v3  ;;  %v4117_v16 = vpop.f32.mrb[52].mxu1  ;;  %v4055_v17 = vpop.f32.mrb[53].mxu0  ;;  %v4473_v61 = vld [vmem:[%s8986_s7 + $0x28] sm:$0xff] }
 0x840   : > { %v4383_v4 = vadd.f32 %v4381_v0, %v4055_v17  ;;  %v4119_v24 = vpop.f32.mrb[53].mxu1  ;;  %v4057_v25 = vpop.f32.mrb[54].mxu0  ;;  %v7400_v0 = vcombine.low %v4469_v54, %v4473_v61  ;;  %v7401_v1 = vcombine.high %v4469_v54, %v4473_v61  ;;  %v4481_v3 = vld [vmem:[%s8986_s7 + $0x68] sm:$0xff]  ;;  %v4488_v17 = vld [vmem:[%s8986_s7 + $0xa0] sm:$0xff]  ;;  %v7457_v61 = vcombine.high %v4525_v33, %v4529_v52 }
 0x841   : > { %v4384_v6 = vadd.f32 %v4382_v59, %v4117_v16  ;;  %v4121_v7 = vpop.f32.mrb[54].mxu1  ;;  %v4058_v14 = vpop.f32.mrb[55].mxu0  ;;  %v4484_v59 = vld [vmem:[%s8986_s7 + $0x80] sm:$0xff]  ;;  %v7409_v16 = vcombine.high %v4477_v2, %v4481_v3  ;;  %v7406_v25 = vcombine.low %v4476_v31, %v4480_v62 }
 0x842   : > { %v4385_v47 = vadd.f32 %v4383_v4, %v4119_v24  ;;  %v4122_v9 = vpop.f32.mrb[55].mxu1  ;;  %v4485_v4 = vld [vmem:[%s8986_s7 + $0x88] sm:$0xff]  ;;  %5319 = vmatprep.subr.bf16.mxu1 %v7401_v1  ;;  %v7415_v7 = vcombine.high %v4484_v59, %v4488_v17  ;;  %v4532_v31 = vld [vmem:[%s8986_s7 + $0x200] sm:$0xff] }
 0x843   : > { %v4489_v24 = vld [vmem:[%s8986_s7 + $0xa8] sm:$0xff]  ;;  %5320 = vmatpush1.bf16.msra.mxu1 %v7400_v0  ;;  %v4496_v9 = vld [vmem:[%s8986_s7 + $0xe0] sm:$0xff]  ;;  %5281 = vmatpush1.bf16.msra.mxu0 %v7406_v25 }
 0x844   : > { %5321 = vmatprep.subr.bf16.mxu1 %v7409_v16  ;;  %v7417_v14 = vcombine.high %v4485_v4, %v4489_v24  ;;  %5282 = vmatprep.subr.bf16.mxu0 %v7415_v7  ;;  %v4536_v62 = vld [vmem:[%s8986_s7 + $0x220] sm:$0xff]  ;;  %v4533_v0 = vld [vmem:[%s8986_s7 + $0x208] sm:$0xff] }
 0x845   : > { %v4537_v1 = vld [vmem:[%s8986_s7 + $0x228] sm:$0xff]  ;;  %v4540_v16 = vld [vmem:[%s8986_s7 + $0x240] sm:$0xff]  ;;  %v7462_v25 = vcombine.low %v4532_v31, %v4536_v62 }
 0x869   : > { %v4181_v10 = vpop.f32.mrb[56].mxu0 }
 0x86a   : > { %v4386_v11 = vadd.f32 %v4384_v6, %v4181_v10  ;;  %v4183_v12 = vpop.f32.mrb[57].mxu0  ;;  %v7408_v6 = vcombine.low %v4477_v2, %v4481_v3  ;;  %v4493_v10 = vld [vmem:[%s8986_s7 + $0xc8] sm:$0xff]  ;;  %v7456_v2 = vcombine.low %v4525_v33, %v4529_v52  ;;  %v7463_v3 = vcombine.high %v4532_v31, %v4536_v62  ;;  %v4576_v33 = vld [vmem:[%s8986_s7 + $0x360] sm:$0xff] }
 0x86b   : > { %v4387_v34 = vadd.f32 %v4385_v47, %v4183_v12  ;;  %v4185_v39 = vpop.f32.mrb[58].mxu0  ;;  %v4492_v47 = vld [vmem:[%s8986_s7 + $0xc0] sm:$0xff]  ;;  %v7414_v12 = vcombine.low %v4484_v59, %v4488_v17  ;;  %v7465_v59 = vcombine.high %v4533_v0, %v4537_v1  ;;  %v4573_v52 = vld [vmem:[%s8986_s7 + $0x348] sm:$0xff] }
 0x86c   : > { %v4186_v15 = vpop.f32.mrb[59].mxu0  ;;  %5322 = vmatpush1.bf16.msra.mxu1 %v7408_v6  ;;  %v7423_v39 = vcombine.high %v4492_v47, %v4496_v9  ;;  %v4544_v17 = vld [vmem:[%s8986_s7 + $0x260] sm:$0xff]  ;;  %v7464_v6 = vcombine.low %v4533_v0, %v4537_v1  ;;  %v4581_v1 = vld [vmem:[%s8986_s7 + $0x388] sm:$0xff] }
 0x86d   : > { %v4245_v48 = vpop.f32.mrb[56].mxu1  ;;  %5323 = vmatprep.subr.bf16.mxu1 %v7417_v14  ;;  %5283 = vmatpush1.bf16.msra.mxu0 %v7414_v12  ;;  %v7471_v7 = vcombine.high %v4540_v16, %v4544_v17  ;;  %v7470_v12 = vcombine.low %v4540_v16, %v4544_v17  ;;  %v4580_v62 = vld [vmem:[%s8986_s7 + $0x380] sm:$0xff] }
 0x86e   : > { %v4388_v13 = vadd.f32 %v4386_v11, %v4245_v48  ;;  %v4247_v19 = vpop.f32.mrb[57].mxu1  ;;  %v4497_v11 = vld [vmem:[%s8986_s7 + $0xe8] sm:$0xff]  ;;  %v4500_v48 = vld [vmem:[%s8986_s7 + $0x100] sm:$0xff]  ;;  %5284 = vmatprep.subr.bf16.mxu0 %v7423_v39 }
 0x86f   : > { %v4389_v20 = vadd.f32 %v4387_v34, %v4247_v19  ;;  %v4249_v5 = vpop.f32.mrb[58].mxu1  ;;  %v7416_v34 = vcombine.low %v4485_v4, %v4489_v24  ;;  %v7425_v15 = vcombine.high %v4493_v10, %v4497_v11  ;;  %v4501_v19 = vld [vmem:[%s8986_s7 + $0x108] sm:$0xff]  ;;  %v4584_v0 = vld [vmem:[%s8986_s7 + $0x3a0] sm:$0xff] }
 0x870   : > { %v4250_v8 = vpop.f32.mrb[59].mxu1  ;;  %v7422_v5 = vcombine.low %v4492_v47, %v4496_v9  ;;  %v4541_v4 = vld [vmem:[%s8986_s7 + $0x248] sm:$0xff]  ;;  %v4548_v47 = vld [vmem:[%s8986_s7 + $0x280] sm:$0xff] }
 0x871   : > { %5324 = vmatpush1.bf16.msra.mxu1 %v7416_v34  ;;  %v7424_v8 = vcombine.low %v4493_v10, %v4497_v11  ;;  %v4545_v24 = vld [vmem:[%s8986_s7 + $0x268] sm:$0xff]  ;;  %v4552_v9 = vld [vmem:[%s8986_s7 + $0x2a0] sm:$0xff] }
 0x872   : > { %5325 = vmatprep.subr.bf16.mxu1 %v7425_v15  ;;  %5285 = vmatpush1.bf16.msra.mxu0 %v7422_v5  ;;  %v7473_v14 = vcombine.high %v4541_v4, %v4545_v24  ;;  %v4549_v10 = vld [vmem:[%s8986_s7 + $0x288] sm:$0xff]  ;;  %v7472_v34 = vcombine.low %v4541_v4, %v4545_v24  ;;  %v7479_v39 = vcombine.high %v4548_v47, %v4552_v9  ;;  %v4592_v16 = vld [vmem:[%s8986_s7 + $0x3e0] sm:$0xff] }
 0x873   : > { %v4553_v11 = vld [vmem:[%s8986_s7 + $0x2a8] sm:$0xff] }
 0x874   : > { %v7481_v15 = vcombine.high %v4549_v10, %v4553_v11 }
 0x875   : > { %5326 = vmatpush1.bf16.msra.mxu1 %v7424_v8 }
 0x8a9   : > { %v4309_v58 = vpop.f32.mrb[60].mxu0 }
 0x8aa   : > { %v4390_v60 = vadd.f32 %v4388_v13, %v4309_v58  ;;  %v4373_v57 = vpop.f32.mrb[60].mxu1  ;;  %v4311_v26 = vpop.f32.mrb[61].mxu0  ;;  %v4504_v13 = vld [vmem:[%s8986_s7 + $0x120] sm:$0xff] }
 0x8ab   : > { %v4391_v22 = vadd.f32 %v4389_v20, %v4311_v26  ;;  %v4375_v23 = vpop.f32.mrb[61].mxu1  ;;  %v4313_v28 = vpop.f32.mrb[62].mxu0  ;;  %v4505_v20 = vld [vmem:[%s8986_s7 + $0x128] sm:$0xff]  ;;  %v7431_v21 = vcombine.high %v4500_v48, %v4504_v13 }
 0x8ac   : > { %v4392_v29 = vadd.f32 %v4390_v60, %v4373_v57  ;;  %v4377_v36 = vpop.f32.mrb[62].mxu1  ;;  %v4314_v42 = vpop.f32.mrb[63].mxu0  ;;  %v7433_v58 = vcombine.high %v4501_v19, %v4505_v20  ;;  %v4508_v60 = vld [vmem:[%s8986_s7 + $0x140] sm:$0xff]  ;;  %v4513_v26 = vld [vmem:[%s8986_s7 + $0x168] sm:$0xff] }
 0x8ad   : > { %v4393_v43 = vadd.f32 %v4391_v22, %v4375_v23  ;;  %v4378_v50 = vpop.f32.mrb[63].mxu1  ;;  %v4512_v57 = vld [vmem:[%s8986_s7 + $0x160] sm:$0xff]  ;;  %v7430_v22 = vcombine.low %v4500_v48, %v4504_v13  ;;  %5286 = vmatprep.subr.bf16.mxu0 %v7431_v21  ;;  %v7432_v23 = vcombine.low %v4501_v19, %v4505_v20  ;;  %v4517_v42 = vld [vmem:[%s8986_s7 + $0x188] sm:$0xff]  ;;  %v7478_v48 = vcombine.low %v4548_v47, %v4552_v9  ;;  %v4470_v9 = vld [vmem:[%s8986_s7 + $0x10] sm:$0xff] }
 0x8ae   : > { %v4406_v30 = vadd.f32 %v4399_v63, %v4392_v29  ;;  %v4509_v63 = vld [vmem:[%s8986_s7 + $0x148] sm:$0xff]  ;;  %5327 = vmatprep.subr.bf16.mxu1 %v7433_v58  ;;  %v4516_v29 = vld [vmem:[%s8986_s7 + $0x180] sm:$0xff]  ;;  %v7438_v50 = vcombine.low %v4508_v60, %v4512_v57  ;;  %v7480_v13 = vcombine.low %v4549_v10, %v4553_v11  ;;  %v4474_v10 = vld [vmem:[%s8986_s7 + $0x30] sm:$0xff] }
 0x8af   : > { %v4407_v44 = vadd.f32 %v4403_v27, %v4393_v43  ;;  %v7439_v27 = vcombine.high %v4508_v60, %v4512_v57  ;;  %v7441_v28 = vcombine.high %v4509_v63, %v4513_v26  ;;  %v4520_v36 = vld [vmem:[%s8986_s7 + $0x1a0] sm:$0xff]  ;;  %v4521_v43 = vld [vmem:[%s8986_s7 + $0x1a8] sm:$0xff]  ;;  %5287 = vmatpush1.bf16.msra.mxu0 %v7430_v22  ;;  %5328 = vmatpush1.bf16.msra.mxu1 %v7432_v23  ;;  %v4471_v11 = vld [vmem:[%s8986_s7 + $0x18] sm:$0xff] }
 0x8b0   : > { %v9670_v46 = vadd.f32 %v8615_v45, %v4406_v30  ;;  %v7440_v30 = vcombine.low %v4509_v63, %v4513_v26  ;;  %v7449_v45 = vcombine.high %v4517_v42, %v4521_v43  ;;  %v7446_v54 = vcombine.low %v4516_v29, %v4520_v36  ;;  %v4556_v57 = vld [vmem:[%s8986_s7 + $0x2c0] sm:$0xff]  ;;  %v4557_v26 = vld [vmem:[%s8986_s7 + $0x2c8] sm:$0xff] }
 0x8b1   : > { %v9673_v49 = vadd.f32 %v8616_v32, %v4407_v44  ;;  %5288 = vmatprep.subr.bf16.mxu0 %v7439_v27  ;;  %v7447_v44 = vcombine.high %v4516_v29, %v4520_v36  ;;  %5329 = vmatprep.subr.bf16.mxu1 %v7441_v28  ;;  %v4524_v32 = vld [vmem:[%s8986_s7 + $0x1c0] sm:$0xff]  ;;  %v7448_v56 = vcombine.low %v4517_v42, %v4521_v43  ;;  %v4561_v23 = vld [vmem:[%s8986_s7 + $0x2e8] sm:$0xff] }
 0x8b2   : > { %v4560_v63 = vld [vmem:[%s8986_s7 + $0x2e0] sm:$0xff]  ;;  %v7488_v28 = vcombine.low %v4557_v26, %v4561_v23  ;;  %v7489_v29 = vcombine.high %v4557_v26, %v4561_v23  ;;  %v4565_v43 = vld [vmem:[%s8986_s7 + $0x308] sm:$0xff] }
 0x8b3   : > { %v4410_v51 = vadd.f32 %v9673_v49, %v9670_v46  ;;  %5289 = vmatpush1.bf16.msra.mxu0 %v7438_v50  ;;  %5330 = vmatpush1.bf16.msra.mxu1 %v7440_v30  ;;  %v7487_v22 = vcombine.high %v4556_v57, %v4560_v63  ;;  %v7486_v27 = vcombine.low %v4556_v57, %v4560_v63  ;;  %v4564_v36 = vld [vmem:[%s8986_s7 + $0x300] sm:$0xff]  ;;  %v4569_v30 = vld [vmem:[%s8986_s7 + $0x328] sm:$0xff] }
 0x8b4   : > { %5290 = vmatprep.subr.bf16.mxu0 %v7447_v44  ;;  %5331 = vmatprep.subr.bf16.mxu1 %v7449_v45  ;;  %v4568_v42 = vld [vmem:[%s8986_s7 + $0x320] sm:$0xff]  ;;  %v7496_v45 = vcombine.low %v4565_v43, %v4569_v30 }
 0x8b5   : > { %4411 = vadd.xlane.f32.xlu1 %v4410_v51  ;;  %v4528_v51 = vld [vmem:[%s8986_s7 + $0x1e0] sm:$0xff]  ;;  %v7495_v50 = vcombine.high %v4564_v36, %v4568_v42  ;;  %v7494_v44 = vcombine.low %v4564_v36, %v4568_v42 }
 0x8b6   : > { %v7455_v53 = vcombine.high %v4524_v32, %v4528_v51  ;;  %v7454_v55 = vcombine.low %v4524_v32, %v4528_v51  ;;  %v7497_v32 = vcombine.high %v4565_v43, %v4569_v30  ;;  %v4572_v51 = vld [vmem:[%s8986_s7 + $0x340] sm:$0xff] }
 0x8b7   : > { %5291 = vmatpush1.bf16.msra.mxu0 %v7446_v54  ;;  %5332 = vmatpush1.bf16.msra.mxu1 %v7448_v56  ;;  %v7503_v54 = vcombine.high %v4572_v51, %v4576_v33  ;;  %v4577_v56 = vld [vmem:[%s8986_s7 + $0x368] sm:$0xff]  ;;  %v8617_v57 = vld [vmem:[%s8972_s16] sm:$0xff] }
 0x8b8   : > { %5292 = vmatprep.subr.bf16.mxu0 %v7455_v53  ;;  %5333 = vmatprep.subr.bf16.mxu1 %v7457_v61  ;;  %v7502_v53 = vcombine.low %v4572_v51, %v4576_v33  ;;  %v7504_v61 = vcombine.low %v4573_v52, %v4577_v56  ;;  %v7505_v31 = vcombine.high %v4573_v52, %v4577_v56  ;;  %v4478_v51 = vld [vmem:[%s8986_s7 + $0x50] sm:$0xff]  ;;  %v4479_v52 = vld [vmem:[%s8986_s7 + $0x58] sm:$0xff] }
 0x8b9   : > { %v4429_v26 = vrot.slane %v8617_v57, %v9665_v18  ;;  %v4482_v33 = vld [vmem:[%s8986_s7 + $0x70] sm:$0xff] }
 0x8bb   : > { %5293 = vmatpush1.bf16.msra.mxu0 %v7454_v55  ;;  %5334 = vmatpush1.bf16.msra.mxu1 %v7456_v2  ;;  %v7510_v55 = vcombine.low %v4580_v62, %v4584_v0  ;;  %v7511_v2 = vcombine.high %v4580_v62, %v4584_v0  ;;  %v4487_v62 = vld [vmem:[%s8986_s7 + $0x98] sm:$0xff] }
 0x8bc   : > { %5294 = vmatprep.subr.bf16.mxu0 %v7463_v3  ;;  %5335 = vmatprep.subr.bf16.mxu1 %v7465_v59  ;;  %v4585_v3 = vld [vmem:[%s8986_s7 + $0x3a8] sm:$0xff]  ;;  %v4588_v59 = vld [vmem:[%s8986_s7 + $0x3c0] sm:$0xff]  ;;  %v4491_v0 = vld [vmem:[%s8986_s7 + $0xb8] sm:$0xff] }
 0x8bd   : > { %v7512_v17 = vcombine.low %v4581_v1, %v4585_v3  ;;  %v7513_v4 = vcombine.high %v4581_v1, %v4585_v3  ;;  %v7519_v24 = vcombine.high %v4588_v59, %v4592_v16  ;;  %v7410_v1 = vcombine.low %v4478_v51, %v4482_v33 }
 0x8be   : > { %v7421_v3 = vcombine.high %v4487_v62, %v4491_v0 }
 0x8bf   : > { %5295 = vmatpush1.bf16.msra.mxu0 %v7462_v25  ;;  %5336 = vmatpush1.bf16.msra.mxu1 %v7464_v6  ;;  %v4589_v25 = vld [vmem:[%s8986_s7 + $0x3c8] sm:$0xff] }
 0x8c0   : > { %5296 = vmatprep.subr.bf16.mxu0 %v7471_v7  ;;  %5337 = vmatprep.subr.bf16.mxu1 %v7473_v14  ;;  %v4593_v6 = vld [vmem:[%s8986_s7 + $0x3e8] sm:$0xff]  ;;  %v7518_v14 = vcombine.low %v4588_v59, %v4592_v16  ;;  %v4494_v59 = vld [vmem:[%s8986_s7 + $0xd0] sm:$0xff] }
 0x8c1   : > { %v7521_v7 = vcombine.high %v4589_v25, %v4593_v6  ;;  %v7520_v47 = vcombine.low %v4589_v25, %v4593_v6  ;;  %v4498_v16 = vld [vmem:[%s8986_s7 + $0xf0] sm:$0xff]  ;;  %v7420_v25 = vcombine.low %v4487_v62, %v4491_v0 }
 0x8c2   : > { %v7427_v6 = vcombine.high %v4494_v59, %v4498_v16 }
 0x8c3   : > { %5297 = vmatpush1.bf16.msra.mxu0 %v7470_v12  ;;  %5338 = vmatpush1.bf16.msra.mxu1 %v7472_v34  ;;  %v7402_v12 = vcombine.low %v4470_v9, %v4474_v10  ;;  %v7403_v34 = vcombine.high %v4470_v9, %v4474_v10  ;;  %v4503_v9 = vld [vmem:[%s8986_s7 + $0x118] sm:$0xff] }
 0x8c4   : > { %5298 = vmatprep.subr.bf16.mxu0 %v7479_v39  ;;  %5339 = vmatprep.subr.bf16.mxu1 %v7481_v15  ;;  %v4475_v39 = vld [vmem:[%s8986_s7 + $0x38] sm:$0xff] }
 0x8c5   : > { %v7404_v15 = vcombine.low %v4471_v11, %v4475_v39  ;;  %v4507_v10 = vld [vmem:[%s8986_s7 + $0x138] sm:$0xff] }
 0x8c7   : > { %5299 = vmatpush1.bf16.msra.mxu0 %v7478_v48  ;;  %5340 = vmatpush1.bf16.msra.mxu1 %v7480_v13  ;;  %v7405_v48 = vcombine.high %v4471_v11, %v4475_v39  ;;  %v7426_v11 = vcombine.low %v4494_v59, %v4498_v16  ;;  %v7437_v39 = vcombine.high %v4503_v9, %v4507_v10 }
 0x8c8   : > { %5300 = vmatprep.subr.bf16.mxu0 %v7487_v22  ;;  %5341 = vmatprep.subr.bf16.mxu1 %v7489_v29 }
 0x8cb   : > { %5301 = vmatpush1.bf16.msra.mxu0 %v7486_v27  ;;  %5342 = vmatpush1.bf16.msra.mxu1 %v7488_v28  ;;  %v4439_v28 = vrot.slane %v4429_v26, %v9665_v18 }
 0x8cc   : > { %5302 = vmatprep.subr.bf16.mxu0 %v7495_v50  ;;  %5343 = vmatprep.subr.bf16.mxu1 %v7497_v32 }
 0x8cf   : > { %5303 = vmatpush1.bf16.msra.mxu0 %v7494_v44  ;;  %5344 = vmatpush1.bf16.msra.mxu1 %v7496_v45 }
 0x8d0   : > { %5304 = vmatprep.subr.bf16.mxu0 %v7503_v54  ;;  %5345 = vmatprep.subr.bf16.mxu1 %v7505_v31  ;;  %v4483_v54 = vld [vmem:[%s8986_s7 + $0x78] sm:$0xff]  ;;  %v4490_v31 = vld [vmem:[%s8986_s7 + $0xb0] sm:$0xff] }
 0x8d3   : > { %5305 = vmatpush1.bf16.msra.mxu0 %v7502_v53  ;;  %5346 = vmatpush1.bf16.msra.mxu1 %v7504_v61  ;;  %v7413_v61 = vcombine.high %v4479_v52, %v4483_v54 }
 0x8d4   : > { %5306 = vmatprep.subr.bf16.mxu0 %v7511_v2  ;;  %5347 = vmatprep.subr.bf16.mxu1 %v7513_v4  ;;  %v4499_v4 = vld [vmem:[%s8986_s7 + $0xf8] sm:$0xff] }
 0x8d7   : > { %5307 = vmatpush1.bf16.msra.mxu0 %v7510_v55  ;;  %5348 = vmatpush1.bf16.msra.mxu1 %v7512_v17  ;;  %v7412_v55 = vcombine.low %v4479_v52, %v4483_v54  ;;  %v4495_v17 = vld [vmem:[%s8986_s7 + $0xd8] sm:$0xff]  ;;  %v4534_v54 = vld [vmem:[%s8986_s7 + $0x210] sm:$0xff] }
 0x8d8   : > { %5308 = vmatprep.subr.bf16.mxu0 %v7519_v24  ;;  %5349 = vmatprep.subr.bf16.mxu1 %v7521_v7  ;;  %v7429_v7 = vcombine.high %v4495_v17, %v4499_v4 }
 0x8db   : > { %5309 = vmatpush1.bf16.msra.mxu0 %v7518_v14  ;;  %5350 = vmatpush1.bf16.msra.mxu1 %v7520_v47  ;;  %v4502_v14 = vld [vmem:[%s8986_s7 + $0x110] sm:$0xff] }
 0x8dc   : > { %5360 = vmatprep.subr.bf16.mxu0 %v7403_v34  ;;  %5401 = vmatprep.subr.bf16.mxu1 %v7405_v48  ;;  %v4506_v47 = vld [vmem:[%s8986_s7 + $0x130] sm:$0xff] }
 0x8dd   : > { %v7435_v34 = vcombine.high %v4502_v14, %v4506_v47  ;;  %v4514_v48 = vld [vmem:[%s8986_s7 + $0x170] sm:$0xff] }
 0x942   : > { %v4412_v19 = vpop.xlane.xlu1 %4411 }
 0x943   : > { %v4413_v20 = vmul.f32 0.00390625, %v4412_v19 }
 0x945   : > { %v9722_v5 = vsub.f32 %v9670_v46, %v4413_v20  ;;  %v9725_v8 = vsub.f32 %v9673_v49, %v4413_v20 }
 0x947   : > { %v4416_v21 = vmul.f32 %v9722_v5, %v9722_v5  ;;  %v4417_v58 = vmul.f32 %v9725_v8, %v9725_v8 }
 0x949   : > { %v4418_v60 = vadd.f32 %v4417_v58, %v4416_v21  ;;  %v4432_v21 = vsub.s32 5, %v9110_v35  ;;  %v9757_v58 = vsub.s32 3, %v9110_v35 }
 0x94b   : > { %4419 = vadd.xlane.f32.xlu0 %v4418_v60  ;;  %v4452_v60 = vsub.s32 7, %v9110_v35  ;;  %v4433_v63 = vrot.slane %v8617_v57, %v4432_v21  ;;  %v4449_v23 = vrot.slane %v8617_v57, %v9757_v58  ;;  %v8473_v35 = vld [vmem:[%s8996_s29 + $0x334] ss:$8 sps:$4 sm:$0xff]  }
 0x94d   : > { %v4453_v22 = vrot.slane %v8617_v57, %v4452_v60  ;;  %v4443_v27 = vrot.slane %v4433_v63, %v9665_v18  ;;  %v4459_v50 = vrot.slane %v4449_v23, %v9757_v58  ;;  %v7436_v57 = vcombine.low %v4503_v9, %v4507_v10  ;;  %v4522_v23 = vld [vmem:[%s8986_s7 + $0x1b0] sm:$0xff] }
 0x94f   : > { %v4463_v43 = vrot.slane %v4453_v22, %v9757_v58  ;;  %v4518_v22 = vld [vmem:[%s8986_s7 + $0x190] sm:$0xff] }
 0x9d8   : > { %v4420_v13 = vpop.xlane.xlu0 %4419 }
 0x9d9   : > { %v4421_v19 = vmul.f32 0.00390625, %v4420_v13  ;;  %v4511_v13 = vld [vmem:[%s8986_s7 + $0x158] sm:$0xff] }
 0x9db   : > { %v4422_v20 = vadd.f32 1e-05, %v4421_v19  ;;  %v4515_v19 = vld [vmem:[%s8986_s7 + $0x178] sm:$0xff] }
 0x9dc   : > { %v7445_v26 = vcombine.high %v4511_v13, %v4515_v19 }
 0x9dd   : > { %8580 = vrsqrt.f32 %v4422_v20  ;;  %v7434_v20 = vcombine.low %v4502_v14, %v4506_v47 }
 0x9e7   : > { %v8581_v29 = vpop.eup %8580 }
 0x9e8   : > { %v4424_v36 = vmul.f32 %v8581_v29, %v9722_v5  ;;  %v4425_v42 = vmul.f32 %v8581_v29, %v9725_v8  ;;  %v4486_v5 = vld [vmem:[%s8986_s7 + $0x90] sm:$0xff]  ;;  %v7411_v8 = vcombine.high %v4478_v51, %v4482_v33 }
 0x9e9   : > { %v7419_v2 = vcombine.high %v4486_v5, %v4490_v31  ;;  %v7418_v24 = vcombine.low %v4486_v5, %v4490_v31  ;;  %v4535_v5 = vld [vmem:[%s8986_s7 + $0x218] sm:$0xff] }
 0x9ea   : > { %v4445_v30 = vmul.f32 %v4443_v27, %v4425_v42  ;;  %v4444_v44 = vmul.f32 %v4439_v28, %v4424_v36  ;;  %v4519_v27 = vld [vmem:[%s8986_s7 + $0x198] sm:$0xff]  ;;  %v7444_v36 = vcombine.low %v4511_v13, %v4515_v19  ;;  %v7451_v42 = vcombine.high %v4518_v22, %v4522_v23 }
 0x9eb   : > { %v4523_v28 = vld [vmem:[%s8986_s7 + $0x1b8] sm:$0xff] }
 0x9ec   : > { %v4465_v45 = vadd.f32 %v4463_v43, %v4445_v30  ;;  %v4464_v32 = vadd.f32 %v4459_v50, %v4444_v44  ;;  %v7453_v43 = vcombine.high %v4519_v27, %v4523_v28  ;;  %v4526_v50 = vld [vmem:[%s8986_s7 + $0x1d0] sm:$0xff]  ;;  %v4527_v44 = vld [vmem:[%s8986_s7 + $0x1d8] sm:$0xff]  ;;  %v7452_v51 = vcombine.low %v4519_v27, %v4523_v28 }
 0x9ed   : > { %v4530_v30 = vld [vmem:[%s8986_s7 + $0x1f0] sm:$0xff] }
 0x9ee   : > { %v4467_v56 = vpack.c.bf16 %v4465_v45, %v4465_v45  ;;  %v9777_v53 = vpack.c.bf16 %v4464_v32, %v4464_v32  ;;  %v4531_v45 = vld [vmem:[%s8986_s7 + $0x1f8] sm:$0xff]  ;;  %v7450_v32 = vcombine.low %v4518_v22, %v4522_v23  ;;  %v7459_v33 = vcombine.high %v4526_v50, %v4530_v30 }
 0x9ef   : > { %v7461_v52 = vcombine.high %v4527_v44, %v4531_v45  ;;  %v7460_v31 = vcombine.low %v4527_v44, %v4531_v45 }
 0x9f0   : > { %5310 = vmatprep.mubr.bf16.mxu0 %v4467_v56  ;;  %5351 = vmatprep.mubr.bf16.mxu1 %v4467_v56 }
 0x9f1   : > { %5311 = vmatmul.mubr.bf16.vlgmr.msra.gmra.mrb[64].mxu0 %v9777_v53  ;;  %5352 = vmatmul.mubr.bf16.vlgmr.msra.gmra.mrb[64].mxu1 %v9777_v53 }
 0x9f2   : > { %5361 = vmatpush1.bf16.msra.mxu0 %v7402_v12  ;;  %5402 = vmatpush1.bf16.msra.mxu1 %v7404_v15  ;;  %v7428_v12 = vcombine.low %v4495_v17, %v4499_v4  ;;  %v4510_v15 = vld [vmem:[%s8986_s7 + $0x150] sm:$0xff] }
 0x9f3   : > { %5392 = vmatprep.mubr.bf16.mxu0 %v4467_v56  ;;  %5433 = vmatprep.mubr.bf16.mxu1 %v4467_v56  ;;  %v7443_v63 = vcombine.high %v4510_v15, %v4514_v48  ;;  %v7442_v29 = vcombine.low %v4510_v15, %v4514_v48  ;;  %v4538_v56 = vld [vmem:[%s8986_s7 + $0x230] sm:$0xff] }
 0x9f4   : > { %5362 = vmatprep.subr.bf16.mxu0 %v7411_v8  ;;  %5403 = vmatprep.subr.bf16.mxu1 %v7413_v61  ;;  %v4539_v8 = vld [vmem:[%s8986_s7 + $0x238] sm:$0xff]  ;;  %v7458_v61 = vcombine.low %v4526_v50, %v4530_v30  ;;  %v7467_v62 = vcombine.high %v4534_v54, %v4538_v56  ;;  %v7466_v59 = vcombine.low %v4534_v54, %v4538_v56 }
 0x9f5   : > { %v7469_v0 = vcombine.high %v4535_v5, %v4539_v8  ;;  %v7468_v16 = vcombine.low %v4535_v5, %v4539_v8 }
 0x9f6   : > { %5363 = vmatpush1.bf16.msra.mxu0 %v7410_v1  ;;  %5404 = vmatpush1.bf16.msra.mxu1 %v7412_v55  ;;  %v4542_v1 = vld [vmem:[%s8986_s7 + $0x250] sm:$0xff] }
 0x9f7   : > { %5364 = vmatprep.subr.bf16.mxu0 %v7419_v2  ;;  %5405 = vmatprep.subr.bf16.mxu1 %v7421_v3  ;;  %v4546_v55 = vld [vmem:[%s8986_s7 + $0x270] sm:$0xff]  ;;  %v4543_v2 = vld [vmem:[%s8986_s7 + $0x258] sm:$0xff] }
 0x9f8   : > { %v4547_v3 = vld [vmem:[%s8986_s7 + $0x278] sm:$0xff]  ;;  %v7475_v17 = vcombine.high %v4542_v1, %v4546_v55  ;;  %v7474_v14 = vcombine.low %v4542_v1, %v4546_v55 }
 0x9f9   : > { %v7477_v4 = vcombine.high %v4543_v2, %v4547_v3  ;;  %v7476_v47 = vcombine.low %v4543_v2, %v4547_v3 }
 0x9fa   : > { %5365 = vmatpush1.bf16.msra.mxu0 %v7418_v24  ;;  %5406 = vmatpush1.bf16.msra.mxu1 %v7420_v25  ;;  %v4550_v24 = vld [vmem:[%s8986_s7 + $0x290] sm:$0xff] }
 0x9fb   : > { %5366 = vmatprep.subr.bf16.mxu0 %v7427_v6  ;;  %5407 = vmatprep.subr.bf16.mxu1 %v7429_v7  ;;  %v4554_v25 = vld [vmem:[%s8986_s7 + $0x2b0] sm:$0xff]  ;;  %v4551_v6 = vld [vmem:[%s8986_s7 + $0x298] sm:$0xff] }
 0x9fc   : > { %v4555_v7 = vld [vmem:[%s8986_s7 + $0x2b8] sm:$0xff]  ;;  %v7483_v9 = vcombine.high %v4550_v24, %v4554_v25  ;;  %v7482_v15 = vcombine.low %v4550_v24, %v4554_v25  ;;  %v8354_v24 = vld [vmem:[%s8996_s29] ss:$8 sps:$4 sm:$0xff]  }
 0x9fd   : > { %v7485_v10 = vcombine.high %v4551_v6, %v4555_v7  ;;  %v7484_v48 = vcombine.low %v4551_v6, %v4555_v7  ;;  %v8357_v25 = vld [vmem:[%s8996_s29 + $0x100] ss:$8 sps:$4 sm:$0xff]   ;;  %v8362_v6 = vld [vmem:[%s8996_s29 + $0x14] ss:$8 sps:$4 sm:$0xff]  }
 0x9fe   : > { %5367 = vmatpush1.bf16.msra.mxu0 %v7426_v11  ;;  %5408 = vmatpush1.bf16.msra.mxu1 %v7428_v12  ;;  %v4558_v11 = vld [vmem:[%s8986_s7 + $0x2d0] sm:$0xff] }
 0x9ff   : > { %5368 = vmatprep.subr.bf16.mxu0 %v7435_v34  ;;  %5409 = vmatprep.subr.bf16.mxu1 %v7437_v39  ;;  %v4562_v12 = vld [vmem:[%s8986_s7 + $0x2f0] sm:$0xff]  ;;  %v4559_v34 = vld [vmem:[%s8986_s7 + $0x2d8] sm:$0xff] }
 0xa00   : > { %v4563_v39 = vld [vmem:[%s8986_s7 + $0x2f8] sm:$0xff]  ;;  %v7491_v13 = vcombine.high %v4558_v11, %v4562_v12  ;;  %v7490_v22 = vcombine.low %v4558_v11, %v4562_v12  ;;  %v8366_v11 = vld [vmem:[%s8996_s29 + $0x20] ss:$8 sps:$4 sm:$0xff]  }
 0xa01   : > { %v7493_v19 = vcombine.high %v4559_v34, %v4563_v39  ;;  %v7492_v23 = vcombine.low %v4559_v34, %v4563_v39  ;;  %v8365_v7 = vld [vmem:[%s8996_s29 + $0x114] ss:$8 sps:$4 sm:$0xff]   ;;  %v8369_v12 = vld [vmem:[%s8996_s29 + $0x120] ss:$8 sps:$4 sm:$0xff]   ;;  %v8372_v39 = vld [vmem:[%s8996_s29 + $0x30] ss:$8 sps:$4 sm:$0xff]  }
 0xa02   : > { %5369 = vmatpush1.bf16.msra.mxu0 %v7434_v20  ;;  %5410 = vmatpush1.bf16.msra.mxu1 %v7436_v57  ;;  %v4566_v20 = vld [vmem:[%s8986_s7 + $0x310] sm:$0xff] }
 0xa03   : > { %5370 = vmatprep.subr.bf16.mxu0 %v7443_v63  ;;  %5411 = vmatprep.subr.bf16.mxu1 %v7445_v26  ;;  %v4570_v57 = vld [vmem:[%s8986_s7 + $0x330] sm:$0xff]  ;;  %v4567_v63 = vld [vmem:[%s8986_s7 + $0x318] sm:$0xff] }
 0xa04   : > { %v4571_v26 = vld [vmem:[%s8986_s7 + $0x338] sm:$0xff]  ;;  %v7499_v27 = vcombine.high %v4566_v20, %v4570_v57  ;;  %v7498_v50 = vcombine.low %v4566_v20, %v4570_v57  ;;  %v8381_v20 = vld [vmem:[%s8996_s29 + $0x140] ss:$8 sps:$4 sm:$0xff]  }
 0xa05   : > { %v7501_v28 = vcombine.high %v4567_v63, %v4571_v26  ;;  %v7500_v30 = vcombine.low %v4567_v63, %v4571_v26  ;;  %v8377_v34 = vld [vmem:[%s8996_s29 + $0x134] ss:$8 sps:$4 sm:$0xff]   ;;  %v8384_v26 = vld [vmem:[%s8996_s29 + $0x50] ss:$8 sps:$4 sm:$0xff]  }
 0xa06   : > { %5371 = vmatpush1.bf16.msra.mxu0 %v7442_v29  ;;  %5412 = vmatpush1.bf16.msra.mxu1 %v7444_v36  ;;  %v4574_v29 = vld [vmem:[%s8986_s7 + $0x350] sm:$0xff] }
 0xa07   : > { %5372 = vmatprep.subr.bf16.mxu0 %v7451_v42  ;;  %5413 = vmatprep.subr.bf16.mxu1 %v7453_v43  ;;  %v4578_v36 = vld [vmem:[%s8986_s7 + $0x370] sm:$0xff]  ;;  %v4575_v42 = vld [vmem:[%s8986_s7 + $0x358] sm:$0xff] }
 0xa08   : > { %v4579_v43 = vld [vmem:[%s8986_s7 + $0x378] sm:$0xff]  ;;  %v7507_v44 = vcombine.high %v4574_v29, %v4578_v36  ;;  %v7506_v54 = vcombine.low %v4574_v29, %v4578_v36  ;;  %v8393_v29 = vld [vmem:[%s8996_s29 + $0x160] ss:$8 sps:$4 sm:$0xff]  }
 0xa09   : > { %v7509_v45 = vcombine.high %v4575_v42, %v4579_v43  ;;  %v7508_v56 = vcombine.low %v4575_v42, %v4579_v43  ;;  %v8386_v57 = vld [vmem:[%s8996_s29 + $0x54] ss:$8 sps:$4 sm:$0xff]   ;;  %v8396_v43 = vld [vmem:[%s8996_s29 + $0x70] ss:$8 sps:$4 sm:$0xff]  }
 0xa0a   : > { %5373 = vmatpush1.bf16.msra.mxu0 %v7450_v32  ;;  %5414 = vmatpush1.bf16.msra.mxu1 %v7452_v51  ;;  %v4582_v32 = vld [vmem:[%s8986_s7 + $0x390] sm:$0xff] }
 0xa0b   : > { %5374 = vmatprep.subr.bf16.mxu0 %v7459_v33  ;;  %5415 = vmatprep.subr.bf16.mxu1 %v7461_v52  ;;  %v4586_v51 = vld [vmem:[%s8986_s7 + $0x3b0] sm:$0xff]  ;;  %v4583_v33 = vld [vmem:[%s8986_s7 + $0x398] sm:$0xff] }
 0xa0c   : > { %v4587_v52 = vld [vmem:[%s8986_s7 + $0x3b8] sm:$0xff]  ;;  %v7515_v5 = vcombine.high %v4582_v32, %v4586_v51  ;;  %v7514_v1 = vcombine.low %v4582_v32, %v4586_v51  ;;  %v8405_v32 = vld [vmem:[%s8996_s29 + $0x180] ss:$8 sps:$4 sm:$0xff]  }
 0xa0d   : > { %v7517_v8 = vcombine.high %v4583_v33, %v4587_v52  ;;  %v7516_v55 = vcombine.low %v4583_v33, %v4587_v52  ;;  %v8389_v63 = vld [vmem:[%s8996_s29 + $0x154] ss:$8 sps:$4 sm:$0xff]   ;;  %v8408_v52 = vld [vmem:[%s8996_s29 + $0x90] ss:$8 sps:$4 sm:$0xff]  }
 0xa0e   : > { %5375 = vmatpush1.bf16.msra.mxu0 %v7458_v61  ;;  %5416 = vmatpush1.bf16.msra.mxu1 %v7460_v31  ;;  %v4590_v61 = vld [vmem:[%s8986_s7 + $0x3d0] sm:$0xff] }
 0xa0f   : > { %5376 = vmatprep.subr.bf16.mxu0 %v7467_v62  ;;  %5417 = vmatprep.subr.bf16.mxu1 %v7469_v0  ;;  %v4594_v31 = vld [vmem:[%s8986_s7 + $0x3f0] sm:$0xff]  ;;  %v4591_v62 = vld [vmem:[%s8986_s7 + $0x3d8] sm:$0xff] }
 0xa10   : > { %v4595_v0 = vld [vmem:[%s8986_s7 + $0x3f8] sm:$0xff]  ;;  %v7523_v2 = vcombine.high %v4590_v61, %v4594_v31 }
 0xa11   : > { %v7525_v3 = vcombine.high %v4591_v62, %v4595_v0  ;;  %v8398_v36 = vld [vmem:[%s8996_s29 + $0x74] ss:$8 sps:$4 sm:$0xff]  }
 0xa12   : > { %5377 = vmatpush1.bf16.msra.mxu0 %v7466_v59  ;;  %5418 = vmatpush1.bf16.msra.mxu1 %v7468_v16  ;;  %v7522_v59 = vcombine.low %v4590_v61, %v4594_v31  ;;  %v7524_v16 = vcombine.low %v4591_v62, %v4595_v0  ;;  %v8401_v42 = vld [vmem:[%s8996_s29 + $0x174] ss:$8 sps:$4 sm:$0xff]   ;;  %v8417_v61 = vld [vmem:[%s8996_s29 + $0x1a0] ss:$8 sps:$4 sm:$0xff]   ;;  %v8420_v0 = vld [vmem:[%s8996_s29 + $0xb0] ss:$8 sps:$4 sm:$0xff]  }
 0xa13   : > { %5378 = vmatprep.subr.bf16.mxu0 %v7475_v17  ;;  %5419 = vmatprep.subr.bf16.mxu1 %v7477_v4  ;;  %v8356_v17 = vld [vmem:[%s8996_s29 + $0x4] ss:$8 sps:$4 sm:$0xff]   ;;  %v8410_v51 = vld [vmem:[%s8996_s29 + $0x94] ss:$8 sps:$4 sm:$0xff]  }
 0xa14   : > { %v8359_v4 = vld [vmem:[%s8996_s29 + $0x104] ss:$8 sps:$4 sm:$0xff]   ;;  %v8413_v33 = vld [vmem:[%s8996_s29 + $0x194] ss:$8 sps:$4 sm:$0xff]  }
 0xa15   : > { %v8422_v31 = vld [vmem:[%s8996_s29 + $0xb4] ss:$8 sps:$4 sm:$0xff]  }
 0xa16   : > { %5379 = vmatpush1.bf16.msra.mxu0 %v7474_v14  ;;  %5420 = vmatpush1.bf16.msra.mxu1 %v7476_v47  ;;  %v8360_v14 = vld [vmem:[%s8996_s29 + $0x10] ss:$8 sps:$4 sm:$0xff]   ;;  %v8425_v62 = vld [vmem:[%s8996_s29 + $0x1b4] ss:$8 sps:$4 sm:$0xff]  }
 0xa17   : > { %5380 = vmatprep.subr.bf16.mxu0 %v7483_v9  ;;  %5421 = vmatprep.subr.bf16.mxu1 %v7485_v10  ;;  %v8363_v47 = vld [vmem:[%s8996_s29 + $0x110] ss:$8 sps:$4 sm:$0xff]   ;;  %v8368_v9 = vld [vmem:[%s8996_s29 + $0x24] ss:$8 sps:$4 sm:$0xff]  }
 0xa18   : > { %v8371_v10 = vld [vmem:[%s8996_s29 + $0x124] ss:$8 sps:$4 sm:$0xff]  }
 0xa1a   : > { %5381 = vmatpush1.bf16.msra.mxu0 %v7482_v15  ;;  %5422 = vmatpush1.bf16.msra.mxu1 %v7484_v48  ;;  %v8375_v15 = vld [vmem:[%s8996_s29 + $0x130] ss:$8 sps:$4 sm:$0xff]   ;;  %v8380_v48 = vld [vmem:[%s8996_s29 + $0x44] ss:$8 sps:$4 sm:$0xff]  }
 0xa1b   : > { %5382 = vmatprep.subr.bf16.mxu0 %v7491_v13  ;;  %5423 = vmatprep.subr.bf16.mxu1 %v7493_v19  ;;  %v8383_v13 = vld [vmem:[%s8996_s29 + $0x144] ss:$8 sps:$4 sm:$0xff]   ;;  %v8378_v19 = vld [vmem:[%s8996_s29 + $0x40] ss:$8 sps:$4 sm:$0xff]  }
 0xa1e   : > { %5383 = vmatpush1.bf16.msra.mxu0 %v7490_v22  ;;  %5424 = vmatpush1.bf16.msra.mxu1 %v7492_v23  ;;  %v8387_v22 = vld [vmem:[%s8996_s29 + $0x150] ss:$8 sps:$4 sm:$0xff]   ;;  %v8392_v23 = vld [vmem:[%s8996_s29 + $0x64] ss:$8 sps:$4 sm:$0xff]  }
 0xa1f   : > { %5384 = vmatprep.subr.bf16.mxu0 %v7499_v27  ;;  %5425 = vmatprep.subr.bf16.mxu1 %v7501_v28  ;;  %v8395_v27 = vld [vmem:[%s8996_s29 + $0x164] ss:$8 sps:$4 sm:$0xff]   ;;  %v8390_v28 = vld [vmem:[%s8996_s29 + $0x60] ss:$8 sps:$4 sm:$0xff]  }
 0xa22   : > { %5385 = vmatpush1.bf16.msra.mxu0 %v7498_v50  ;;  %5426 = vmatpush1.bf16.msra.mxu1 %v7500_v30  ;;  %v8399_v50 = vld [vmem:[%s8996_s29 + $0x170] ss:$8 sps:$4 sm:$0xff]   ;;  %v8404_v30 = vld [vmem:[%s8996_s29 + $0x84] ss:$8 sps:$4 sm:$0xff]  }
 0xa23   : > { %5386 = vmatprep.subr.bf16.mxu0 %v7507_v44  ;;  %5427 = vmatprep.subr.bf16.mxu1 %v7509_v45  ;;  %v8407_v44 = vld [vmem:[%s8996_s29 + $0x184] ss:$8 sps:$4 sm:$0xff]   ;;  %v8402_v45 = vld [vmem:[%s8996_s29 + $0x80] ss:$8 sps:$4 sm:$0xff]  }
 0xa26   : > { %5387 = vmatpush1.bf16.msra.mxu0 %v7506_v54  ;;  %5428 = vmatpush1.bf16.msra.mxu1 %v7508_v56  ;;  %v8411_v54 = vld [vmem:[%s8996_s29 + $0x190] ss:$8 sps:$4 sm:$0xff]   ;;  %v8416_v56 = vld [vmem:[%s8996_s29 + $0xa4] ss:$8 sps:$4 sm:$0xff]  }
 0xa27   : > { %5388 = vmatprep.subr.bf16.mxu0 %v7515_v5  ;;  %5429 = vmatprep.subr.bf16.mxu1 %v7517_v8  ;;  %v8419_v5 = vld [vmem:[%s8996_s29 + $0x1a4] ss:$8 sps:$4 sm:$0xff]   ;;  %v8414_v8 = vld [vmem:[%s8996_s29 + $0xa0] ss:$8 sps:$4 sm:$0xff]  }
 0xa2a   : > { %5389 = vmatpush1.bf16.msra.mxu0 %v7514_v1  ;;  %5430 = vmatpush1.bf16.msra.mxu1 %v7516_v55  ;;  %v8423_v1 = vld [vmem:[%s8996_s29 + $0x1b0] ss:$8 sps:$4 sm:$0xff]   ;;  %v8428_v55 = vld [vmem:[%s8996_s29 + $0xc4] ss:$8 sps:$4 sm:$0xff]  }
 0xa2b   : > { %5390 = vmatprep.subr.bf16.mxu0 %v7523_v2  ;;  %5431 = vmatprep.subr.bf16.mxu1 %v7525_v3  ;;  %v8431_v2 = vld [vmem:[%s8996_s29 + $0x1c4] ss:$8 sps:$4 sm:$0xff]   ;;  %v8426_v3 = vld [vmem:[%s8996_s29 + $0xc0] ss:$8 sps:$4 sm:$0xff]  }
 0xa2e   : > { %5391 = vmatpush1.bf16.msra.mxu0 %v7522_v59  ;;  %5432 = vmatpush1.bf16.msra.mxu1 %v7524_v16  ;;  %v8429_v59 = vld [vmem:[%s8996_s29 + $0x1c0] ss:$8 sps:$4 sm:$0xff]   ;;  %v8434_v16 = vld [vmem:[%s8996_s29 + $0xd4] ss:$8 sps:$4 sm:$0xff]  }
 0xa2f   : > { %6446 = vmatprep.subr.bf16.mxu0 %v8356_v17  ;;  %6487 = vmatprep.subr.bf16.mxu1 %v8359_v4  ;;  %v8437_v17 = vld [vmem:[%s8996_s29 + $0x1d4] ss:$8 sps:$4 sm:$0xff]   ;;  %v8432_v4 = vld [vmem:[%s8996_s29 + $0xd0] ss:$8 sps:$4 sm:$0xff]  }
 0xa31   : > { %5393 = vmatmul.mubr.bf16.vlgmr.msra.gmra.mrb[68].mxu0 %v9777_v53  ;;  %5434 = vmatmul.mubr.bf16.vlgmr.msra.gmra.mrb[68].mxu1 %v9777_v53  ;;  %v8374_v53 = vld [vmem:[%s8996_s29 + $0x34] ss:$8 sps:$4 sm:$0xff]  }
 0xa32   : > { %6447 = vmatpush1.bf16.msra.mxu0 %v8354_v24  ;;  %6488 = vmatpush1.bf16.msra.mxu1 %v8357_v25  ;;  %v8435_v24 = vld [vmem:[%s8996_s29 + $0x1d0] ss:$8 sps:$4 sm:$0xff]   ;;  %v8440_v25 = vld [vmem:[%s8996_s29 + $0xe4] ss:$8 sps:$4 sm:$0xff]  }
 0xa33   : > { %6448 = vmatprep.subr.bf16.mxu0 %v8362_v6  ;;  %6489 = vmatprep.subr.bf16.mxu1 %v8365_v7  ;;  %v8443_v6 = vld [vmem:[%s8996_s29 + $0x1e4] ss:$8 sps:$4 sm:$0xff]   ;;  %v8438_v7 = vld [vmem:[%s8996_s29 + $0xe0] ss:$8 sps:$4 sm:$0xff]  }
 0xa36   : > { %6449 = vmatpush1.bf16.msra.mxu0 %v8360_v14  ;;  %6490 = vmatpush1.bf16.msra.mxu1 %v8363_v47  ;;  %v8441_v14 = vld [vmem:[%s8996_s29 + $0x1e0] ss:$8 sps:$4 sm:$0xff]   ;;  %v8444_v47 = vld [vmem:[%s8996_s29 + $0xf0] ss:$8 sps:$4 sm:$0xff]  }
 0xa37   : > { %6450 = vmatprep.subr.bf16.mxu0 %v8368_v9  ;;  %6491 = vmatprep.subr.bf16.mxu1 %v8371_v10  ;;  %v8446_v9 = vld [vmem:[%s8996_s29 + $0xf4] ss:$8 sps:$4 sm:$0xff]   ;;  %v8447_v10 = vld [vmem:[%s8996_s29 + $0x1f0] ss:$8 sps:$4 sm:$0xff]  }
 0xa3a   : > { %6451 = vmatpush1.bf16.msra.mxu0 %v8366_v11  ;;  %6492 = vmatpush1.bf16.msra.mxu1 %v8369_v12  ;;  %v8449_v11 = vld [vmem:[%s8996_s29 + $0x1f4] ss:$8 sps:$4 sm:$0xff]   ;;  %v8452_v12 = vld [vmem:[%s8996_s29 + $0x204] ss:$8 sps:$4 sm:$0xff]  }
 0xa3b   : > { %6452 = vmatprep.subr.bf16.mxu0 %v8374_v53  ;;  %6493 = vmatprep.subr.bf16.mxu1 %v8377_v34  ;;  %v8455_v53 = vld [vmem:[%s8996_s29 + $0x304] ss:$8 sps:$4 sm:$0xff]  }
 0xa3c   : > { %v9906_v34 = vld [vmem:[%s8991_s28] sm:$0xff] }
 0xa3e   : > { %6453 = vmatpush1.bf16.msra.mxu0 %v8372_v39  ;;  %6494 = vmatpush1.bf16.msra.mxu1 %v8375_v15  ;;  %v4601_v39 = vrot.slane %v9906_v34, %v9113_v37  ;;  %v4609_v15 = vrot.slane %v9906_v34, %v9118_v40 }
 0xa3f   : > { %6454 = vmatprep.subr.bf16.mxu0 %v8380_v48  ;;  %6495 = vmatprep.subr.bf16.mxu1 %v8383_v13  ;;  %v4605_v48 = vrot.slane %v9906_v34, %v9665_v18  ;;  %v4613_v13 = vrot.slane %v9906_v34, %v9757_v58 }
 0xa42   : > { %6455 = vmatpush1.bf16.msra.mxu0 %v8378_v19  ;;  %6496 = vmatpush1.bf16.msra.mxu1 %v8381_v20 }
 0xa43   : > { %6456 = vmatprep.subr.bf16.mxu0 %v8386_v57  ;;  %6497 = vmatprep.subr.bf16.mxu1 %v8389_v63 }
 0xa46   : > { %6457 = vmatpush1.bf16.msra.mxu0 %v8384_v26  ;;  %6498 = vmatpush1.bf16.msra.mxu1 %v8387_v22 }
 0xa47   : > { %6458 = vmatprep.subr.bf16.mxu0 %v8392_v23  ;;  %6499 = vmatprep.subr.bf16.mxu1 %v8395_v27 }
 0xa4a   : > { %6459 = vmatpush1.bf16.msra.mxu0 %v8390_v28  ;;  %6500 = vmatpush1.bf16.msra.mxu1 %v8393_v29 }
 0xa4b   : > { %6460 = vmatprep.subr.bf16.mxu0 %v8398_v36  ;;  %6501 = vmatprep.subr.bf16.mxu1 %v8401_v42 }
 0xa4e   : > { %6461 = vmatpush1.bf16.msra.mxu0 %v8396_v43  ;;  %6502 = vmatpush1.bf16.msra.mxu1 %v8399_v50 }
 0xa4f   : > { %6462 = vmatprep.subr.bf16.mxu0 %v8404_v30  ;;  %6503 = vmatprep.subr.bf16.mxu1 %v8407_v44 }
 0xa52   : > { %6463 = vmatpush1.bf16.msra.mxu0 %v8402_v45  ;;  %6504 = vmatpush1.bf16.msra.mxu1 %v8405_v32 }
 0xa53   : > { %6464 = vmatprep.subr.bf16.mxu0 %v8410_v51  ;;  %6505 = vmatprep.subr.bf16.mxu1 %v8413_v33 }
 0xa56   : > { %6465 = vmatpush1.bf16.msra.mxu0 %v8408_v52  ;;  %6506 = vmatpush1.bf16.msra.mxu1 %v8411_v54 }
 0xa57   : > { %6466 = vmatprep.subr.bf16.mxu0 %v8416_v56  ;;  %6507 = vmatprep.subr.bf16.mxu1 %v8419_v5 }
 0xa5a   : > { %6467 = vmatpush1.bf16.msra.mxu0 %v8414_v8  ;;  %6508 = vmatpush1.bf16.msra.mxu1 %v8417_v61 }
 0xa5b   : > { %6468 = vmatprep.subr.bf16.mxu0 %v8422_v31  ;;  %6509 = vmatprep.subr.bf16.mxu1 %v8425_v62 }
 0xa5e   : > { %6469 = vmatpush1.bf16.msra.mxu0 %v8420_v0  ;;  %6510 = vmatpush1.bf16.msra.mxu1 %v8423_v1 }
 0xa5f   : > { %6470 = vmatprep.subr.bf16.mxu0 %v8428_v55  ;;  %6511 = vmatprep.subr.bf16.mxu1 %v8431_v2 }
 0xa62   : > { %6471 = vmatpush1.bf16.msra.mxu0 %v8426_v3  ;;  %6512 = vmatpush1.bf16.msra.mxu1 %v8429_v59 }
 0xa63   : > { %6472 = vmatprep.subr.bf16.mxu0 %v8434_v16  ;;  %6513 = vmatprep.subr.bf16.mxu1 %v8437_v17 }
 0xa66   : > { %6473 = vmatpush1.bf16.msra.mxu0 %v8432_v4  ;;  %6514 = vmatpush1.bf16.msra.mxu1 %v8435_v24 }
 0xa67   : > { %6474 = vmatprep.subr.bf16.mxu0 %v8440_v25  ;;  %6515 = vmatprep.subr.bf16.mxu1 %v8443_v6 }
 0xa6a   : > { %6475 = vmatpush1.bf16.msra.mxu0 %v8438_v7  ;;  %6516 = vmatpush1.bf16.msra.mxu1 %v8441_v14 }
 0xa6b   : > { %6476 = vmatprep.subr.bf16.mxu0 %v8446_v9  ;;  %6517 = vmatprep.subr.bf16.mxu1 %v8449_v11 }
 0xa6e   : > { %6477 = vmatpush1.bf16.msra.mxu0 %v8444_v47  ;;  %6518 = vmatpush1.bf16.msra.mxu1 %v8447_v10 }
 0xa6f   : > { %6528 = vmatprep.subr.bf16.mxu0 %v8452_v12  ;;  %6569 = vmatprep.subr.bf16.mxu1 %v8455_v53 }
 0xac4   : > { %v5312_v19 = vpop.f32.mrb[64].mxu0  ;;  %v5353_v20 = vpop.f32.mrb[64].mxu1 }
 0xac5   : > { %v9916_v57 = vadd.f32 %v5312_v19, %v4601_v39  ;;  %v9918_v63 = vadd.f32 %v5353_v20, %v4609_v15  ;;  %v5314_v26 = vpop.f32.mrb[65].mxu0  ;;  %v5355_v22 = vpop.f32.mrb[65].mxu1 }
 0xac6   : > { %v9920_v23 = vadd.f32 %v5314_v26, %v4605_v48  ;;  %v9922_v27 = vadd.f32 %v5355_v22, %v4613_v13  ;;  %v5316_v28 = vpop.f32.mrb[66].mxu0  ;;  %v5357_v40 = vpop.f32.mrb[66].mxu1 }
 0xac7   : > { %v9925_v29 = vmul.f32 0.70710677, %v9916_v57  ;;  %v9928_v36 = vmul.f32 0.70710677, %v9918_v63  ;;  %v5317_v44 = vpop.f32.mrb[67].mxu0  ;;  %v5358_v33 = vpop.f32.mrb[67].mxu1 }
 0xac8   : > { %v9931_v58 = vmul.f32 0.70710677, %v9920_v23  ;;  %v9937_v30 = vmul.f32 0.70710677, %v9922_v27 }
 0xac9   : > { %v5474_v42 = vand.u32 2147483647, %v9925_v29  ;;  %v5476_v43 = vand.u32 2147483647, %v9928_v36  ;;  %vm5458_vm6 = vcmp.lt.f32.partialorder %v9925_v29, 0.0  ;;  %vm5460_vm7 = vcmp.lt.f32.partialorder %v9928_v36, 0.0 }
 0xaca   : > { %v5475_v50 = vand.u32 2147483647, %v9931_v58  ;;  %v5477_v56 = vand.u32 2147483647, %v9937_v30  ;;  %vm5459_vm8 = vcmp.lt.f32.partialorder %v9931_v58, 0.0  ;;  %vm5461_vm9 = vcmp.lt.f32.partialorder %v9937_v30, 0.0 }
 0xacb   : > { %v5482_v45 = vmul.f32 0.3275911, %v5474_v42  ;;  %v5484_v32 = vmul.f32 0.3275911, %v5476_v43  ;;  %v5586_v31 = vsub.f32 0.0, %v5474_v42  ;;  %v5588_v62 = vsub.f32 0.0, %v5476_v43 }
 0xacc   : > { %v5483_v51 = vmul.f32 0.3275911, %v5475_v50  ;;  %v5485_v8 = vmul.f32 0.3275911, %v5477_v56  ;;  %v5587_v55 = vsub.f32 0.0, %v5475_v50  ;;  %v5589_v17 = vsub.f32 0.0, %v5477_v56 }
 0xacd   : > { %v5490_v52 = vadd.f32 1.0, %v5482_v45  ;;  %v5492_v54 = vadd.f32 1.0, %v5484_v32  ;;  %v5594_v1 = vmul.f32 %v5586_v31, %v5474_v42  ;;  %v5596_v59 = vmul.f32 %v5588_v62, %v5476_v43 }
 0xace   : > { %v5491_v5 = vadd.f32 1.0, %v5483_v51  ;;  %v5493_v61 = vadd.f32 1.0, %v5485_v8  ;;  %v5595_v7 = vmul.f32 %v5587_v55, %v5475_v50  ;;  %v5597_v12 = vmul.f32 %v5589_v17, %v5477_v56 }
 0xacf   : > { %8582 = vrcp.f32 %v5490_v52  ;;  %v5602_v25 = vmul.f32 1.442695, %v5594_v1  ;;  %v5606_v47 = vmul.f32 1.442695, %v5596_v59  ;;  %v5444_v30 = vmul.f32 0.5, %v9918_v63 }
 0xad0   : > { %8584 = vrcp.f32 %v5492_v54  ;;  %v5604_v13 = vmul.f32 1.442695, %v5595_v7  ;;  %v5608_v28 = vmul.f32 1.442695, %v5597_v12  ;;  %v8769_v7 = vmov 1.0  }
 0xad1   : > { %8586 = vrcp.f32 %v5491_v5  ;;  %v5469_v58 = vsel %vm5461_vm9, -1.0, %v8769_v7  ;;  %v8461_v63 = vld [vmem:[%s8996_s29 + $0x314] ss:$8 sps:$4 sm:$0xff]  }
 0xad2   : > { %8588 = vrcp.f32 %v5493_v61 }
 0xad3   : > { %8590 = vpow2.f32 %v5602_v25 }
 0xad4   : > { %8592 = vpow2.f32 %v5606_v47 }
 0xad5   : > { %8594 = vpow2.f32 %v5604_v13  ;;  %v5442_v13 = vmul.f32 0.5, %v9916_v57 }
 0xad6   : > { %8596 = vpow2.f32 %v5608_v28  ;;  %v5445_v28 = vmul.f32 0.5, %v9922_v27  ;;  %v8456_v27 = vld [vmem:[%s8996_s29 + $0x210] ss:$8 sps:$4 sm:$0xff]  }
 0xad9   : > { %v8583_v0 = vpop.eup %8582 }
 0xada   : > { %v8585_v2 = vpop.eup %8584  ;;  %v5514_v3 = vmul.f32 1.0614054, %v8583_v0 }
 0xadb   : > { %v5516_v16 = vmul.f32 1.0614054, %v8585_v2  ;;  %v8587_v24 = vpop.eup %8586 }
 0xadc   : > { %v5522_v4 = vadd.f32 -1.4531521, %v5514_v3  ;;  %v5515_v9 = vmul.f32 1.0614054, %v8587_v24  ;;  %v8589_v10 = vpop.eup %8588 }
 0xadd   : > { %v5524_v6 = vadd.f32 -1.4531521, %v5516_v16  ;;  %v5517_v15 = vmul.f32 1.0614054, %v8589_v10  ;;  %v8591_v31 = vpop.eup %8590 }
 0xade   : > { %v5530_v14 = vmul.f32 %v8583_v0, %v5522_v4  ;;  %v5523_v39 = vadd.f32 -1.4531521, %v5515_v9  ;;  %v8593_v1 = vpop.eup %8592 }
 0xadf   : > { %v5532_v11 = vmul.f32 %v8585_v2, %v5524_v6  ;;  %v5525_v26 = vadd.f32 -1.4531521, %v5517_v15  ;;  %v8595_v6 = vpop.eup %8594 }
 0xae0   : > { %v5538_v53 = vadd.f32 1.4214138, %v5530_v14  ;;  %v5531_v20 = vmul.f32 %v8587_v24, %v5523_v39  ;;  %v5468_v14 = vsel %vm5460_vm7, -1.0, %v8769_v7  ;;  %v5467_v39 = vsel %vm5459_vm8, -1.0, %v8769_v7 }
 0xae1   : > { %v5540_v48 = vadd.f32 1.4214138, %v5532_v11  ;;  %v5533_v43 = vmul.f32 %v8589_v10, %v5525_v26  ;;  %v8597_v11 = vpop.eup %8596 }
 0xae2   : > { %v5546_v19 = vmul.f32 %v8583_v0, %v5538_v53  ;;  %v5539_v42 = vadd.f32 1.4214138, %v5531_v20 }
 0xae3   : > { %v5548_v22 = vmul.f32 %v8585_v2, %v5540_v48  ;;  %v5541_v32 = vadd.f32 1.4214138, %v5533_v43 }
 0xae4   : > { %v5554_v40 = vadd.f32 -0.28449672, %v5546_v19  ;;  %v5547_v45 = vmul.f32 %v8587_v24, %v5539_v42 }
 0xae5   : > { %v5556_v50 = vadd.f32 -0.28449672, %v5548_v22  ;;  %v5549_v54 = vmul.f32 %v8589_v10, %v5541_v32 }
 0xae6   : > { %v5562_v44 = vmul.f32 %v8583_v0, %v5554_v40  ;;  %v5555_v52 = vadd.f32 -0.28449672, %v5547_v45 }
 0xae7   : > { %v5564_v51 = vmul.f32 %v8585_v2, %v5556_v50  ;;  %v5557_v61 = vadd.f32 -0.28449672, %v5549_v54  ;;  %v8459_v54 = vld [vmem:[%s8996_s29 + $0x310] ss:$8 sps:$4 sm:$0xff]  }
 0xae8   : > { %v5570_v33 = vadd.f32 0.2548296, %v5562_v44  ;;  %v5563_v8 = vmul.f32 %v8587_v24, %v5555_v52  ;;  %v8450_v44 = vld [vmem:[%s8996_s29 + $0x200] ss:$8 sps:$4 sm:$0xff]   ;;  %v8464_v52 = vld [vmem:[%s8996_s29 + $0x224] ss:$8 sps:$4 sm:$0xff]  }
 0xae9   : > { %v5572_v56 = vadd.f32 0.2548296, %v5564_v51  ;;  %v5565_v59 = vmul.f32 %v8589_v10, %v5557_v61  ;;  %v8453_v51 = vld [vmem:[%s8996_s29 + $0x300] ss:$8 sps:$4 sm:$0xff]  }
 0xaea   : > { %v5578_v5 = vmul.f32 %v8583_v0, %v5570_v33  ;;  %v5571_v3 = vadd.f32 0.2548296, %v5563_v8  ;;  %v5466_v0 = vsel %vm5458_vm6, -1.0, %v8769_v7  ;;  %v4625_v8 = vrot.slane %v9906_v34, %v932_v41  ;;  %v8462_v61 = vld [vmem:[%s8996_s29 + $0x220] ss:$8 sps:$4 sm:$0xff]  }
 0xaeb   : > { %v5580_v62 = vmul.f32 %v8585_v2, %v5572_v56  ;;  %v5573_v25 = vadd.f32 0.2548296, %v5565_v59  ;;  %v8467_v56 = vld [vmem:[%s8996_s29 + $0x324] ss:$8 sps:$4 sm:$0xff]  }
 0xaec   : > { %v5618_v55 = vmul.f32 %v8591_v31, %v5578_v5  ;;  %v5579_v4 = vmul.f32 %v8587_v24, %v5571_v3  ;;  %v4617_v5 = vrot.slane %v9906_v34, %v912_v38  ;;  %v4621_v31 = vrot.slane %v9906_v34, %v4432_v21  ;;  %v8465_v38 = vld [vmem:[%s8996_s29 + $0x320] ss:$8 sps:$4 sm:$0xff]  }
 0xaed   : > { %v5620_v16 = vmul.f32 %v8593_v1, %v5580_v62  ;;  %v5581_v2 = vmul.f32 %v8589_v10, %v5573_v25  ;;  %v5443_v10 = vmul.f32 0.5, %v9920_v23  ;;  %v8458_v23 = vld [vmem:[%s8996_s29 + $0x214] ss:$8 sps:$4 sm:$0xff]   ;;  %v4629_v62 = vrot.slane %v9906_v34, %v4452_v60  ;;  %v8468_v25 = vld [vmem:[%s8996_s29 + $0x230] ss:$8 sps:$4 sm:$0xff]  }
 0xaee   : > { %v5626_v17 = vsub.f32 1.0, %v5618_v55  ;;  %v5619_v29 = vmul.f32 %v8595_v6, %v5579_v4  ;;  %v8470_v1 = vld [vmem:[%s8996_s29 + $0x234] ss:$8 sps:$4 sm:$0xff]  }
 0xaef   : > { %v5628_v47 = vsub.f32 1.0, %v5620_v16  ;;  %v5621_v53 = vmul.f32 %v8597_v11, %v5581_v2 }
 0xaf0   : > { %v5634_v9 = vmul.f32 %v5626_v17, %v5466_v0  ;;  %v5627_v12 = vsub.f32 1.0, %v5619_v29  ;;  %v8479_v29 = vld [vmem:[%s8996_s29 + $0x344] ss:$8 sps:$4 sm:$0xff]  }
 0xaf1   : > { %v5636_v36 = vmul.f32 %v5628_v47, %v5468_v14  ;;  %v5629_v48 = vsub.f32 1.0, %v5621_v53  ;;  %v8476_v14 = vld [vmem:[%s8996_s29 + $0x244] ss:$8 sps:$4 sm:$0xff]  }
 0xaf2   : > { %v5642_v24 = vadd.f32 1.0, %v5634_v9  ;;  %v5635_v15 = vmul.f32 %v5627_v12, %v5467_v39  ;;  %v8471_v9 = vld [vmem:[%s8996_s29 + $0x330] ss:$8 sps:$4 sm:$0xff]  }
 0xaf3   : > { %v5644_v19 = vadd.f32 1.0, %v5636_v36  ;;  %v5637_v20 = vmul.f32 %v5629_v48, %v5469_v58  ;;  %v8474_v36 = vld [vmem:[%s8996_s29 + $0x240] ss:$8 sps:$4 sm:$0xff]   ;;  %v8482_v48 = vld [vmem:[%s8996_s29 + $0x254] ss:$8 sps:$4 sm:$0xff]  }
 0xaf4   : > { %v5643_v26 = vadd.f32 1.0, %v5635_v15  ;;  %v5650_v22 = vmul.f32 %v5642_v24, %v5442_v13  ;;  %v8477_v58 = vld [vmem:[%s8996_s29 + $0x340] ss:$8 sps:$4 sm:$0xff]  }
 0xaf5   : > { %v5645_v42 = vadd.f32 1.0, %v5637_v20  ;;  %v5652_v43 = vmul.f32 %v5644_v19, %v5444_v30  ;;  %v8480_v30 = vld [vmem:[%s8996_s29 + $0x250] ss:$8 sps:$4 sm:$0xff]  }
 0xaf6   : > { %v5651_v40 = vmul.f32 %v5643_v26, %v5443_v10  ;;  %v5658_v45 = vpack.c.bf16 %v5650_v22, %v5650_v22  ;;  %v8485_v26 = vld [vmem:[%s8996_s29 + $0x354] ss:$8 sps:$4 sm:$0xff]  }
 0xaf7   : > { %v5653_v50 = vmul.f32 %v5645_v42, %v5445_v28  ;;  %v5660_v33 = vpack.c.bf16 %v5652_v43, %v5652_v43  ;;  %v8483_v43 = vld [vmem:[%s8996_s29 + $0x350] ss:$8 sps:$4 sm:$0xff]  }
 0xaf8   : > { %v5659_v57 = vpack.c.bf16 %v5651_v40, %v5651_v40  ;;  %v8488_v40 = vld [vmem:[%s8996_s29 + $0x264] ss:$8 sps:$4 sm:$0xff]  }
 0xaf9   : > { %v5661_v32 = vpack.c.bf16 %v5653_v50, %v5653_v50 }
 0xafa   : > { %6478 = vmatprep.mubr.bf16.mxu0 %v5659_v57  ;;  %v8491_v57 = vld [vmem:[%s8996_s29 + $0x364] ss:$8 sps:$4 sm:$0xff]  }
 0xafb   : > { %6479 = vmatmul.mubr.bf16.vlgmr.msra.gmra.mrb[72].mxu0 %v5658_v45  ;;  %6519 = vmatprep.mubr.bf16.mxu1 %v5661_v32  ;;  %v8494_v45 = vld [vmem:[%s8996_s29 + $0x274] ss:$8 sps:$4 sm:$0xff]  }
 0xafc   : > { %6529 = vmatpush1.bf16.msra.mxu0 %v8450_v44  ;;  %6520 = vmatmul.mubr.bf16.vlgmr.msra.gmra.mrb[72].mxu1 %v5660_v33  ;;  %v8486_v44 = vld [vmem:[%s8996_s29 + $0x260] ss:$8 sps:$4 sm:$0xff]  }
 0xafd   : > { %6530 = vmatprep.subr.bf16.mxu0 %v8458_v23  ;;  %6570 = vmatpush1.bf16.msra.mxu1 %v8453_v51  ;;  %v8489_v23 = vld [vmem:[%s8996_s29 + $0x360] ss:$8 sps:$4 sm:$0xff]   ;;  %v8497_v51 = vld [vmem:[%s8996_s29 + $0x374] ss:$8 sps:$4 sm:$0xff]  }
 0xafe   : > { %6571 = vmatprep.subr.bf16.mxu1 %v8461_v63  ;;  %v8492_v63 = vld [vmem:[%s8996_s29 + $0x270] ss:$8 sps:$4 sm:$0xff]  }
 0xb00   : > { %6531 = vmatpush1.bf16.msra.mxu0 %v8456_v27  ;;  %v8500_v27 = vld [vmem:[%s8996_s29 + $0x284] ss:$8 sps:$4 sm:$0xff]  }
 0xb01   : > { %6532 = vmatprep.subr.bf16.mxu0 %v8464_v52  ;;  %6572 = vmatpush1.bf16.msra.mxu1 %v8459_v54  ;;  %v8495_v52 = vld [vmem:[%s8996_s29 + $0x370] ss:$8 sps:$4 sm:$0xff]  }
 0xb02   : > { %6573 = vmatprep.subr.bf16.mxu1 %v8467_v56 }
 0xb04   : > { %v5394_v55 = vpop.f32.mrb[68].mxu0  ;;  %v5435_v3 = vpop.f32.mrb[68].mxu1  ;;  %6533 = vmatpush1.bf16.msra.mxu0 %v8462_v61 }
 0xb05   : > { %v9975_v41 = vadd.f32 %v5394_v55, %v4617_v5  ;;  %v9977_v59 = vadd.f32 %v5435_v3, %v4625_v8  ;;  %v5396_v16 = vpop.f32.mrb[69].mxu0  ;;  %v5437_v21 = vpop.f32.mrb[69].mxu1  ;;  %6534 = vmatprep.subr.bf16.mxu0 %v8470_v1  ;;  %6574 = vmatpush1.bf16.msra.mxu1 %v8465_v38  ;;  %v8503_v8 = vld [vmem:[%s8996_s29 + $0x384] ss:$8 sps:$4 sm:$0xff]   ;;  %v8498_v1 = vld [vmem:[%s8996_s29 + $0x280] ss:$8 sps:$4 sm:$0xff]  }
 0xb06   : > { %v9980_v60 = vadd.f32 %v5396_v16, %v4621_v31  ;;  %v9982_v34 = vadd.f32 %v5437_v21, %v4629_v62  ;;  %v5398_v17 = vpop.f32.mrb[70].mxu0  ;;  %v5439_v4 = vpop.f32.mrb[70].mxu1  ;;  %6575 = vmatprep.subr.bf16.mxu1 %v8473_v35  ;;  %v8506_v3 = vld [vmem:[%s8996_s29 + $0x294] ss:$8 sps:$4 sm:$0xff]   ;;  %v8501_v21 = vld [vmem:[%s8996_s29 + $0x380] ss:$8 sps:$4 sm:$0xff]  }
 0xb07   : > { %v9986_v6 = vmul.f32 0.70710677, %v9975_v41  ;;  %v9989_v0 = vmul.f32 0.70710677, %v9977_v59  ;;  %v5399_v24 = vpop.f32.mrb[71].mxu0  ;;  %v5440_v19 = vpop.f32.mrb[71].mxu1 }
 0xb08   : > { %v9993_v47 = vmul.f32 0.70710677, %v9980_v60  ;;  %v10004_v53 = vmul.f32 0.70710677, %v9982_v34  ;;  %6535 = vmatpush1.bf16.msra.mxu0 %v8468_v25 }
 0xb09   : > { %v5478_v2 = vand.u32 2147483647, %v9986_v6  ;;  %v5480_v11 = vand.u32 2147483647, %v9989_v0  ;;  %6536 = vmatprep.subr.bf16.mxu0 %v8476_v14  ;;  %6576 = vmatpush1.bf16.msra.mxu1 %v8471_v9  ;;  %v8509_v14 = vld [vmem:[%s8996_s29 + $0x394] ss:$8 sps:$4 sm:$0xff]  }
 0xb0a   : > { %v10001_v12 = vand.u32 2147483647, %v9993_v47  ;;  %6577 = vmatprep.subr.bf16.mxu1 %v8479_v29  ;;  %v5481_v22 = vand.u32 2147483647, %v10004_v53  ;;  %vm5462_vm10 = vcmp.lt.f32.partialorder %v9986_v6, 0.0  ;;  %vm5464_vm11 = vcmp.lt.f32.partialorder %v9989_v0, 0.0 }
 0xb0b   : > { %v5486_v39 = vmul.f32 0.3275911, %v5478_v2  ;;  %v5488_v15 = vmul.f32 0.3275911, %v5480_v11  ;;  %v5590_v32 = vsub.f32 0.0, %v5478_v2  ;;  %v5592_v33 = vsub.f32 0.0, %v5480_v11 }
 0xb0c   : > { %v5487_v13 = vmul.f32 0.3275911, %v10001_v12  ;;  %6537 = vmatpush1.bf16.msra.mxu0 %v8474_v36  ;;  %v5489_v42 = vmul.f32 0.3275911, %v5481_v22  ;;  %v5591_v5 = vsub.f32 0.0, %v10001_v12  ;;  %v5593_v55 = vsub.f32 0.0, %v5481_v22 }
 0xb0d   : > { %v5494_v10 = vadd.f32 1.0, %v5486_v39  ;;  %v5496_v20 = vadd.f32 1.0, %v5488_v15  ;;  %6538 = vmatprep.subr.bf16.mxu0 %v8482_v48  ;;  %6578 = vmatpush1.bf16.msra.mxu1 %v8477_v58  ;;  %v5598_v56 = vmul.f32 %v5590_v32, %v5478_v2  ;;  %v5600_v62 = vmul.f32 %v5592_v33, %v5480_v11  ;;  %v8504_v11 = vld [vmem:[%s8996_s29 + $0x290] ss:$8 sps:$4 sm:$0xff]   ;;  %v8512_v48 = vld [vmem:[%s8996_s29 + $0x2a4] ss:$8 sps:$4 sm:$0xff]  }
 0xb0e   : > { %v5495_v28 = vadd.f32 1.0, %v5487_v13  ;;  %6579 = vmatprep.subr.bf16.mxu1 %v8485_v26  ;;  %v5497_v50 = vadd.f32 1.0, %v5489_v42  ;;  %v5599_v25 = vmul.f32 %v5591_v5, %v10001_v12  ;;  %v5601_v39 = vmul.f32 %v5593_v55, %v5481_v22  ;;  %v8507_v15 = vld [vmem:[%s8996_s29 + $0x390] ss:$8 sps:$4 sm:$0xff]   ;;  %v8521_v32 = vld [vmem:[%s8996_s29 + $0x3b4] ss:$8 sps:$4 sm:$0xff]  }
 0xb0f   : > { %8598 = vrcp.f32 %v5494_v10  ;;  %v5610_v17 = vmul.f32 1.442695, %v5598_v56  ;;  %v5614_v29 = vmul.f32 1.442695, %v5600_v62  ;;  %v8524_v56 = vld [vmem:[%s8996_s29 + $0x2c4] ss:$8 sps:$4 sm:$0xff]  }
 0xb10   : > { %8600 = vrcp.f32 %v5496_v20  ;;  %6539 = vmatpush1.bf16.msra.mxu0 %v8480_v30  ;;  %v5612_v10 = vmul.f32 1.442695, %v5599_v25  ;;  %v8515_v20 = vld [vmem:[%s8996_s29 + $0x3a4] ss:$8 sps:$4 sm:$0xff]   ;;  %v5616_v42 = vmul.f32 1.442695, %v5601_v39 }
 0xb11   : > { %8602 = vrcp.f32 %v5495_v28  ;;  %6540 = vmatprep.subr.bf16.mxu0 %v8488_v40  ;;  %6580 = vmatpush1.bf16.msra.mxu1 %v8483_v43  ;;  %v8510_v28 = vld [vmem:[%s8996_s29 + $0x2a0] ss:$8 sps:$4 sm:$0xff]   ;;  %v8518_v43 = vld [vmem:[%s8996_s29 + $0x2b4] ss:$8 sps:$4 sm:$0xff]   ;;  %v8519_v62 = vld [vmem:[%s8996_s29 + $0x3b0] ss:$8 sps:$4 sm:$0xff]  }
 0xb12   : > { %8604 = vrcp.f32 %v5497_v50  ;;  %6581 = vmatprep.subr.bf16.mxu1 %v8491_v57  ;;  %v8530_v25 = vld [vmem:[%s8996_s29 + $0x2d4] ss:$8 sps:$4 sm:$0xff]   ;;  %v5470_v0 = vsel %vm5462_vm10, -1.0, %v8769_v7  ;;  %vm5463_vm12 = vcmp.lt.f32.partialorder %v9993_v47, 0.0  ;;  %v8539_v6 = vld [vmem:[%s8996_s29 + $0x3e4] ss:$8 sps:$4 sm:$0xff]  }
 0xb13   : > { %8606 = vpow2.f32 %v5610_v17  ;;  %vm5465_vm13 = vcmp.lt.f32.partialorder %v10004_v53, 0.0  ;;  %v5471_v47 = vsel %vm5463_vm12, -1.0, %v8769_v7 }
 0xb14   : > { %6541 = vmatpush1.bf16.msra.mxu0 %v8486_v44  ;;  %8608 = vpow2.f32 %v5614_v29  ;;  %v5473_v53 = vsel %vm5465_vm13, -1.0, %v8769_v7 }
 0xb15   : > { %6542 = vmatprep.subr.bf16.mxu0 %v8494_v45  ;;  %6582 = vmatpush1.bf16.msra.mxu1 %v8489_v23  ;;  %v8513_v45 = vld [vmem:[%s8996_s29 + $0x3a0] ss:$8 sps:$4 sm:$0xff]   ;;  %8610 = vpow2.f32 %v5612_v10 }
 0xb16   : > { %6583 = vmatprep.subr.bf16.mxu1 %v8497_v51  ;;  %8612 = vpow2.f32 %v5616_v42  ;;  %v8534_v42 = vld [vmem:[%s8996_s29 + $0x2e0] ss:$8 sps:$4 sm:$0xff]  }
 0xb18   : > { %6543 = vmatpush1.bf16.msra.mxu0 %v8492_v63 }
 0xb19   : > { %v10022_v54 = vpop.eup %8598  ;;  %6544 = vmatprep.subr.bf16.mxu0 %v8500_v27  ;;  %6584 = vmatpush1.bf16.msra.mxu1 %v8495_v52  ;;  %v8516_v27 = vld [vmem:[%s8996_s29 + $0x2b0] ss:$8 sps:$4 sm:$0xff]  }
 0xb1a   : > { %v10026_v61 = vpop.eup %8600  ;;  %v5518_v31 = vmul.f32 1.0614054, %v10022_v54  ;;  %6585 = vmatprep.subr.bf16.mxu1 %v8503_v8 }
 0xb1b   : > { %v5520_v38 = vmul.f32 1.0614054, %v10026_v61  ;;  %v10033_v35 = vpop.eup %8602 }
 0xb1c   : > { %v5526_v16 = vadd.f32 -1.4531521, %v5518_v31  ;;  %v5519_v2 = vmul.f32 1.0614054, %v10033_v35  ;;  %6545 = vmatpush1.bf16.msra.mxu0 %v8498_v1  ;;  %v10040_v36 = vpop.eup %8604 }
 0xb1d   : > { %v5528_v4 = vadd.f32 -1.4531521, %v5520_v38  ;;  %6546 = vmatprep.subr.bf16.mxu0 %v8506_v3  ;;  %v5521_v19 = vmul.f32 1.0614054, %v10040_v36  ;;  %6586 = vmatpush1.bf16.msra.mxu1 %v8501_v21  ;;  %v8527_v38 = vld [vmem:[%s8996_s29 + $0x3c4] ss:$8 sps:$4 sm:$0xff]   ;;  %v8607_v17 = vpop.eup %8606 }
 0xb1e   : > { %v5534_v9 = vmul.f32 %v10022_v54, %v5526_v16  ;;  %v5527_v13 = vadd.f32 -1.4531521, %v5519_v2  ;;  %6587 = vmatprep.subr.bf16.mxu1 %v8509_v14  ;;  %v8522_v21 = vld [vmem:[%s8996_s29 + $0x2c0] ss:$8 sps:$4 sm:$0xff]   ;;  %v8609_v14 = vpop.eup %8608 }
 0xb1f   : > { %v5536_v24 = vmul.f32 %v10026_v61, %v5528_v4  ;;  %v5529_v30 = vadd.f32 -1.4531521, %v5521_v19  ;;  %v8525_v2 = vld [vmem:[%s8996_s29 + $0x3c0] ss:$8 sps:$4 sm:$0xff]  }
 0xb20   : > { %v5542_v12 = vadd.f32 1.4214138, %v5534_v9  ;;  %v5535_v22 = vmul.f32 %v10033_v35, %v5527_v13  ;;  %6547 = vmatpush1.bf16.msra.mxu0 %v8504_v11  ;;  %v5472_v13 = vsel %vm5464_vm11, -1.0, %v8769_v7 }
 0xb21   : > { %v5544_v58 = vadd.f32 1.4214138, %v5536_v24  ;;  %6548 = vmatprep.subr.bf16.mxu0 %v8512_v48  ;;  %v5537_v44 = vmul.f32 %v10040_v36, %v5529_v30  ;;  %6588 = vmatpush1.bf16.msra.mxu1 %v8507_v15  ;;  %v8533_v24 = vld [vmem:[%s8996_s29 + $0x3d4] ss:$8 sps:$4 sm:$0xff]   ;;  %v8528_v48 = vld [vmem:[%s8996_s29 + $0x2d0] ss:$8 sps:$4 sm:$0xff]  }
 0xb22   : > { %v5550_v26 = vmul.f32 %v10022_v54, %v5542_v12  ;;  %v5543_v50 = vadd.f32 1.4214138, %v5535_v22  ;;  %6589 = vmatprep.subr.bf16.mxu1 %v8515_v20  ;;  %v8611_v12 = vpop.eup %8610 }
 0xb23   : > { %v5552_v40 = vmul.f32 %v10026_v61, %v5544_v58  ;;  %v5545_v63 = vadd.f32 1.4214138, %v5537_v44  ;;  %v8536_v58 = vld [vmem:[%s8996_s29 + $0x2e4] ss:$8 sps:$4 sm:$0xff]   ;;  %v8613_v22 = vpop.eup %8612  ;;  %v8537_v44 = vld [vmem:[%s8996_s29 + $0x3e0] ss:$8 sps:$4 sm:$0xff]  }
 0xb24   : > { %v5558_v57 = vadd.f32 -0.28449672, %v5550_v26  ;;  %v5551_v33 = vmul.f32 %v10033_v35, %v5543_v50  ;;  %6549 = vmatpush1.bf16.msra.mxu0 %v8510_v28  ;;  %v8531_v26 = vld [vmem:[%s8996_s29 + $0x3d0] ss:$8 sps:$4 sm:$0xff]  }
 0xb25   : > { %v5560_v23 = vadd.f32 -0.28449672, %v5552_v40  ;;  %6550 = vmatprep.subr.bf16.mxu0 %v8518_v43  ;;  %v5553_v31 = vmul.f32 %v10040_v36, %v5545_v63  ;;  %6590 = vmatpush1.bf16.msra.mxu1 %v8513_v45  ;;  %v5446_v45 = vmul.f32 0.5, %v9975_v41  ;;  %v8540_v63 = vld [vmem:[%s8996_s29 + $0x2f0] ss:$8 sps:$4 sm:$0xff]  }
 0xb26   : > { %v5566_v51 = vmul.f32 %v10022_v54, %v5558_v57  ;;  %v5559_v8 = vadd.f32 -0.28449672, %v5551_v33  ;;  %6591 = vmatprep.subr.bf16.mxu1 %v8521_v32  ;;  %v8545_v32 = vld [vmem:[%s8996_s29 + $0x3f4] ss:$8 sps:$4 sm:$0xff]  }
 0xb27   : > { %v5568_v52 = vmul.f32 %v10026_v61, %v5560_v23  ;;  %v5561_v16 = vadd.f32 -0.28449672, %v5553_v31 }
 0xb28   : > { %v5574_v5 = vadd.f32 0.2548296, %v5566_v51  ;;  %v5567_v3 = vmul.f32 %v10033_v35, %v5559_v8  ;;  %6551 = vmatpush1.bf16.msra.mxu0 %v8516_v27  ;;  %v5447_v51 = vmul.f32 0.5, %v9980_v60  ;;  %v8543_v8 = vld [vmem:[%s8996_s29 + $0x3f0] ss:$8 sps:$4 sm:$0xff]  }
 0xb29   : > { %v5576_v1 = vadd.f32 0.2548296, %v5568_v52  ;;  %6552 = vmatprep.subr.bf16.mxu0 %v8524_v56  ;;  %v5569_v29 = vmul.f32 %v10040_v36, %v5561_v16  ;;  %6592 = vmatpush1.bf16.msra.mxu1 %v8519_v62  ;;  %v5448_v56 = vmul.f32 0.5, %v9977_v59  ;;  %v5794_v59 = vld [vmem:[%s789_s25] sm:$0x3] }
 0xb2a   : > { %v5582_v55 = vmul.f32 %v10022_v54, %v5574_v5  ;;  %v5575_v54 = vadd.f32 0.2548296, %v5567_v3  ;;  %6593 = vmatprep.subr.bf16.mxu1 %v8527_v38  ;;  %v5449_v5 = vmul.f32 0.5, %v9982_v34  ;;  %v5799_v34 = vrot.slane %v5794_v59, %v9113_v37 }
 0xb2b   : > { %v5584_v4 = vmul.f32 %v10026_v61, %v5576_v1  ;;  %v5577_v15 = vadd.f32 0.2548296, %v5569_v29  ;;  %v5803_v3 = vrot.slane %v5794_v59, %v9665_v18 }
 0xb2c   : > { %v5622_v9 = vmul.f32 %v8607_v17, %v5582_v55  ;;  %v5583_v61 = vmul.f32 %v10033_v35, %v5575_v54  ;;  %6553 = vmatpush1.bf16.msra.mxu0 %v8522_v21 }
 0xb2d   : > { %v5624_v11 = vmul.f32 %v8609_v14, %v5584_v4  ;;  %6554 = vmatprep.subr.bf16.mxu0 %v8530_v25  ;;  %v5585_v35 = vmul.f32 %v10040_v36, %v5577_v15  ;;  %6594 = vmatpush1.bf16.msra.mxu1 %v8525_v2  ;;  %v8542_v36 = vld [vmem:[%s8996_s29 + $0x2f4] ss:$8 sps:$4 sm:$0xff]   ;;  %s10321_s29 = sld [smem:[#allocation31_spill]] (!%p7654_p1) }
 0xb2e   : > { %v5630_v39 = vsub.f32 1.0, %v5622_v9  ;;  %v5623_v20 = vmul.f32 %v8611_v12, %v5583_v61  ;;  %6595 = vmatprep.subr.bf16.mxu1 %v8533_v24 }
 0xb2f   : > { %v5632_v19 = vsub.f32 1.0, %v5624_v11  ;;  %v5625_v40 = vmul.f32 %v8613_v22, %v5585_v35 }
 0xb30   : > { %v5638_v10 = vmul.f32 %v5630_v39, %v5470_v0  ;;  %v5631_v28 = vsub.f32 1.0, %v5623_v20  ;;  %6555 = vmatpush1.bf16.msra.mxu0 %v8528_v48 }
 0xb31   : > { %v5640_v30 = vmul.f32 %v5632_v19, %v5472_v13  ;;  %6556 = vmatprep.subr.bf16.mxu0 %v8536_v58  ;;  %v5633_v50 = vsub.f32 1.0, %v5625_v40  ;;  %6596 = vmatpush1.bf16.msra.mxu1 %v8531_v26 }
 0xb32   : > { %v5646_v43 = vadd.f32 1.0, %v5638_v10  ;;  %v5639_v57 = vmul.f32 %v5631_v28, %v5471_v47  ;;  %6597 = vmatprep.subr.bf16.mxu1 %v8539_v6 }
 0xb33   : > { %v5648_v23 = vadd.f32 1.0, %v5640_v30  ;;  %v5641_v33 = vmul.f32 %v5633_v50, %v5473_v53  ;;  %s10322_s25 = smov (!%p7654_p1), %s10321_s29  ;;  %v8618_v26 = vld [vmem:[%s10321_s29 + $0x40] sm:$0xff] (!%p7654_p1)  }
 0xb34   : > { %6557 = vmatpush1.bf16.msra.mxu0 %v8534_v42  ;;  %v5647_v27 = vadd.f32 1.0, %v5639_v57  ;;  %v5654_v52 = vmul.f32 %v5646_v43, %v5446_v45  ;;  %v8619_v30 = vld [vmem:[%s10322_s25] sm:$0xff] (!%p7654_p1)   ;;  %v8622_v6 = vld [vmem:[%s10322_s25 + $0x50] sm:$0xff] (!%p7654_p1)   ;;  %v8624_v40 = vld [vmem:[%s10322_s25 + $0x58] sm:$0xff] (!%p7654_p1)  }
 0xb35   : > { %6558 = vmatprep.subr.bf16.mxu0 %v8542_v36  ;;  %6598 = vmatpush1.bf16.msra.mxu1 %v8537_v44  ;;  %v5649_v31 = vadd.f32 1.0, %v5641_v33  ;;  %v5656_v7 = vmul.f32 %v5648_v23, %v5448_v56  ;;  %v8623_v28 = vld [vmem:[%s10322_s25 + $0x10] sm:$0xff] (!%p7654_p1)   ;;  %v8625_v42 = vld [vmem:[%s10322_s25 + $0x18] sm:$0xff] (!%p7654_p1)   ;;  %v8626_v43 = vld [vmem:[%s10322_s25 + $0x60] sm:$0xff] (!%p7654_p1)  }
 0xb36   : > { %v5655_v41 = vmul.f32 %v5647_v27, %v5447_v51  ;;  %6599 = vmatprep.subr.bf16.mxu1 %v8545_v32  ;;  %v5662_v1 = vpack.c.bf16 %v5654_v52, %v5654_v52  ;;  %v8627_v47 = vld [vmem:[%s10322_s25 + $0x20] sm:$0xff] (!%p7654_p1)   ;;  %v8628_v36 = vld [vmem:[%s10322_s25 + $0x68] sm:$0xff] (!%p7654_p1)   ;;  %v8630_v50 = vld [vmem:[%s10322_s25 + $0x70] sm:$0xff] (!%p7654_p1)  }
 0xb37   : > { %v5657_v60 = vmul.f32 %v5649_v31, %v5449_v5  ;;  %v5664_v55 = vpack.c.bf16 %v5656_v7, %v5656_v7  ;;  %v8629_v57 = vld [vmem:[%s10322_s25 + $0x28] sm:$0xff] (!%p7654_p1)   ;;  %v8631_v44 = vld [vmem:[%s10322_s25 + $0x30] sm:$0xff] (!%p7654_p1)   ;;  %v8632_v45 = vld [vmem:[%s10322_s25 + $0x78] sm:$0xff] (!%p7654_p1)  }
 0xb38   : > { %6559 = vmatpush1.bf16.msra.mxu0 %v8540_v63  ;;  %v5663_v62 = vpack.c.bf16 %v5655_v41, %v5655_v41  ;;  %v8633_v23 = vld [vmem:[%s10322_s25 + $0x38] sm:$0xff] (!%p7654_p1)   ;;  %v7655_v51 = vld [vmem:[%s10323_s22] ss:$0 sm:$0xff] (!%p7654_p1) }
 0xb39   : > { %6600 = vmatpush1.bf16.msra.mxu1 %v8543_v8  ;;  %v5665_v38 = vpack.c.bf16 %v5657_v60, %v5657_v60  ;;  %7716 = vmatprep.subr.bf16.mxu0 (!%p7654_p1), %v8618_v26 }
 0xb3a   : > { %6560 = vmatprep.mubr.bf16.mxu0 %v5663_v62 }
 0xb3b   : > { %6561 = vmatmul.mubr.bf16.vlgmr.msra.gmra.mrb[76].mxu0 %v5662_v1  ;;  %6601 = vmatprep.mubr.bf16.mxu1 %v5665_v38 }
 0xb3c   : > { %6602 = vmatmul.mubr.bf16.vlgmr.msra.gmra.mrb[76].mxu1 %v5664_v55  ;;  %7717 = vmatpush3.bf16.msra.mxu0 (!%p7654_p1), %v8619_v30 }
 0xbce   : > { %v6480_v16 = vpop.f32.mrb[72].mxu0 }
 0xbcf   : > { %v6481_v21 = vadd.f32 %v6480_v16, %v5799_v34  ;;  %v6482_v17 = vpop.f32.mrb[73].mxu0  ;;  %v6521_v4 = vpop.f32.mrb[72].mxu1 }
 0xbd0   : > { %v6483_v25 = vadd.f32 %v6482_v17, %v5803_v3  ;;  %v6484_v14 = vpop.f32.mrb[74].mxu0  ;;  %v6523_v54 = vpop.f32.mrb[73].mxu1 }
 0xbd1   : > { %v6522_v9 = vadd.f32 %v6521_v4, %v6481_v21  ;;  %v6485_v29 = vpop.f32.mrb[75].mxu0  ;;  %v6525_v11 = vpop.f32.mrb[74].mxu1 }
 0xbd2   : > { %v6524_v2 = vadd.f32 %v6523_v54, %v6483_v25  ;;  %v6526_v24 = vpop.f32.mrb[75].mxu1 }
 0xc0e   : > { %v6562_v39 = vpop.f32.mrb[76].mxu0 }
 0xc0f   : > { %v6563_v61 = vadd.f32 %v6562_v39, %v6522_v9  ;;  %v6564_v15 = vpop.f32.mrb[77].mxu0  ;;  %v6603_v37 = vpop.f32.mrb[76].mxu1 }
 0xc10   : > { %v6565_v48 = vadd.f32 %v6564_v15, %v6524_v2  ;;  %v6566_v18 = vpop.f32.mrb[78].mxu0  ;;  %v6605_v0 = vpop.f32.mrb[77].mxu1  ;;  %6617 = sbr.rel (%p7654_p1) target bundleno = 3338 (0xd0a), region = 96 }
 0xc11   : > { %v6604_v12 = vadd.f32 %v6603_v37, %v6563_v61  ;;  %v6567_v13 = vpop.f32.mrb[79].mxu0  ;;  %v6607_v58 = vpop.f32.mrb[78].mxu1 }
 0xc12   : > { %v6606_v19 = vadd.f32 %v6605_v0, %v6565_v48  ;;  %v6608_v20 = vpop.f32.mrb[79].mxu1 }
 0xc13   : > { %v6610_v10 = vadd.f32 %v6604_v12, %v9670_v46  ;;  %v8620_v46 = vld [vmem:[%s10322_s25 + $0x48] sm:$0xff] (!%p7654_p1)  }
 0xc14   : > { %v6611_v35 = vadd.f32 %v6606_v19, %v9673_v49  ;;  %v8621_v49 = vld [vmem:[%s10322_s25 + $0x8] sm:$0xff] (!%p7654_p1)   ;;  %7718 = vmatprep.subr.bf16.mxu0 (!%p7654_p1), %v8620_v46 }
 0xc15   : > { %6612 = vst [vmem:[%s9004_s23] sm:$0xff] %v6610_v10  ;;  %7719 = vmatpush3.bf16.msra.mxu0 (!%p7654_p1), %v8621_v49  ;;  %v6618_v53 = vpack.c.bf16 (!%p7654_p1), %v6610_v10, %v6610_v10 }
 0xc16   : > { %6613 = vst [vmem:[%s9004_s23 + $0x8] sm:$0xff] %v6611_v35  ;;  %v6619_v22 = vpack.c.bf16 (!%p7654_p1), %v6611_v35, %v6611_v35  ;;  %7720 = vmatprep.subr.bf16.mxu0 (!%p7654_p1), %v8622_v6 }
 0xc18   : > { %6787 = vmatprep.mubr.bf16.mxu0 %v6619_v22 }
 0xc19   : > { %7721 = vmatpush3.bf16.msra.mxu0 %v8623_v28 }
 0xc1a   : > { %7722 = vmatprep.subr.bf16.mxu0 %v8624_v40 }
 0xc1d   : > { %7723 = vmatpush3.bf16.msra.mxu0 %v8625_v42 }
 0xc1e   : > { %7724 = vmatprep.subr.bf16.mxu0 %v8626_v43 }
 0xc21   : > { %7725 = vmatpush3.bf16.msra.mxu0 %v8627_v47 }
 0xc22   : > { %7726 = vmatprep.subr.bf16.mxu0 %v8628_v36 }
 0xc25   : > { %7727 = vmatpush3.bf16.msra.mxu0 %v8629_v57 }
 0xc26   : > { %7728 = vmatprep.subr.bf16.mxu0 %v8630_v50 }
 0xc29   : > { %7729 = vmatpush3.bf16.msra.mxu0 %v8631_v44 }
 0xc2a   : > { %7730 = vmatprep.subr.bf16.mxu0 %v8632_v45 }
 0xc2d   : > { %7731 = vmatpush3.bf16.msra.mxu0 %v8633_v23 }
 0xc30   : > { %6788 = vmatmul.mubr.bf16.vlgmr.msra.gmra.mrb[0].mxu0 %v6618_v53 }
 0xd03   : > { %v7732_v32 = vpop.f32.mrb[0].mxu0 }
 0xd04   : > { %v7733_v33 = vpop.f32.mrb[1].mxu0 }
 0xd05   : > { %v7734_v63 = vadd.f32 %v7733_v33, %v7732_v32  ;;  %v7735_v27 = vpop.f32.mrb[2].mxu0 }
 0xd06   : > { %v7736_v52 = vpop.f32.mrb[3].mxu0 }
 0xd07   : > { %v6790_v56 = vadd.f32 %v7734_v63, %v7655_v51 }
 0xd09   : > { %6796 = vst.msk [vmem:[%s9002_s0] sm:$0xff] %vm6795_vm14, %v6790_v56 }
 0xd0a PF: > { %s10324_s16 = sld [smem:[#allocation11_spill]]  ;;  %s10325_s7 = sld [smem:[#allocation20_spill]] }
 0xd0b   : > { %s10327_s20 = sld [smem:[#allocation33_spill]]  ;;  %s6816_s27 = sshll.u32 %s9002_s0, 4  ;;  %s6817_s27 = int_to_ptr.vmem [resolvable:$true] %s6816_s27 }
 0xd0c   : > { %s8634_s30 = scalar_lea.vmem %s6817_s27, 128  ;;  %s8770_s18 = smov [#allocation2]  }
 0xd0d   : > { %p8635_p2 = scmp.ne.s32.totalorder %s6817_s27, %s8634_s30  ;;  %s8638_s17 = sshll.u32 %s8770_s18, 4  ;;  %s8639_s17 = int_to_ptr.vmem [resolvable:$false] %s8638_s17 }
 0xd0e   : > { %s8640_s24 = scalar_lea.vmem %s8639_s17, 256  ;;  %p8641_p6 = scmp.lt.s32.totalorder %s6817_s27, %s8639_s17 }
 0xd0f   : > { %p8636_p4 = pnand %p8635_p2, %p8916_p3  ;;  %p8642_p7 = scmp.lt.s32.totalorder %s8640_s24, %s8634_s30 }
 0xd10   : > { %s7674_s28 = sshll.u32 %s10324_s16, 7  ;;  %s6798_s19 = scalar_lea.sflag [#allocation3], %s10325_s7 }
 0xd11   : > { %s10328_s21 = smov %s10327_s20  ;;  %s10165_s6 = scalar_lea.hbm %s10327_s20, %s7674_s28 }
 0xd12   : > { %p8637_p5 = pneg %p8636_p4  ;;  %p8643_p8 = por %p8642_p7, %p8641_p6 }
 0xd14   : > { %p8644_p10 = pnand %p8643_p8, %p8637_p5 }
 0xd16   : > { %8647 = shalt.err (!%p8644_p10)
}
 0xd17   : > { %s8648_s0 = scalar_lea.hbm %s10165_s6, 128  ;;  %s8652_s15 = scalar_lea.hbm %s10328_s21, 256 }
 0xd18   : > { %p8649_p11 = scmp.ne.s32.totalorder %s10165_s6, %s8648_s0  ;;  %p8653_p0 = scmp.lt.u32.totalorder %s10165_s6, %s10328_s21 }
 0xd19   : > { %p8654_p1 = scmp.lt.u32.totalorder %s8652_s15, %s8648_s0  ;;  %p8656_p4 = scmp.lt.u32.totalorder %s8648_s0, %s10165_s6 }
 0xd1a   : > { %p8650_p12 = pnand %p8649_p11, %p8916_p3 }
 0xd1b   : > { %p8655_p2 = por %p8654_p1, %p8653_p0 }
 0xd1c   : > { %p8651_p13 = pneg %p8650_p12 }
 0xd1d   : > { %p8657_p5 = por %p8656_p4, %p8655_p2 }
 0xd1f   : > { %p8658_p6 = pnand %p8657_p5, %p8651_p13 }
 0xd21   : > { %8661 = shalt.err (!%p8658_p6)
}
 0xd22   : > { %7834 = dma.vmem_to_hbm [thread:$0]  (%p8916_p3), %s6817_s27, 128, %s10165_s6, %s6798_s19  }
 0xd23   : > { %s7683_s29 = sshll.u32 %s10324_s16, 8  ;;  %s6830_s1 = sshll.u32 %s9004_s23, 4  ;;  %s6831_s1 = int_to_ptr.vmem [resolvable:$true] %s6830_s1 }
 0xd24   : > { %s10329_s18 = sld [smem:[#allocation34_spill]]  ;;  %s6803_s24 = scalar_lea.sflag [#allocation5], %s10325_s7 }
 0xd25   : > { %s8662_s0 = scalar_lea.vmem %s6831_s1, 256  ;;  %s8771_s26 = smov [#allocation4]  }
 0xd26   : > { %p8663_p7 = scmp.ne.s32.totalorder %s6831_s1, %s8662_s0  ;;  %s8666_s2 = sshll.u32 %s8771_s26, 4  ;;  %s8667_s2 = int_to_ptr.vmem [resolvable:$false] %s8666_s2 }
 0xd27   : > { %s8668_s15 = scalar_lea.vmem %s8667_s2, 512  ;;  %p8669_p11 = scmp.lt.s32.totalorder %s6831_s1, %s8667_s2 }
 0xd28   : > { %p8664_p8 = pnand %p8663_p7, %p8916_p3  ;;  %p8670_p12 = scmp.lt.s32.totalorder %s8668_s15, %s8662_s0 }
 0xd2a   : > { %s10191_s17 = scalar_lea.hbm %s10329_s18, %s7683_s29  ;;  %p8665_p10 = pneg %p8664_p8 }
 0xd2b   : > { %p8671_p13 = por %p8670_p12, %p8669_p11 }
 0xd2d   : > { %p8672_p0 = pnand %p8671_p13, %p8665_p10 }
 0xd2f   : > { %8675 = shalt.err (!%p8672_p0)
}
 0xd30   : > { %s8676_s23 = scalar_lea.hbm %s10191_s17, 256  ;;  %s8680_s6 = scalar_lea.hbm %s10329_s18, 512 }
 0xd31   : > { %p8677_p1 = scmp.ne.s32.totalorder %s10191_s17, %s8676_s23  ;;  %p8681_p5 = scmp.lt.u32.totalorder %s10191_s17, %s10329_s18 }
 0xd32   : > { %p8682_p6 = scmp.lt.u32.totalorder %s8680_s6, %s8676_s23  ;;  %p8684_p8 = scmp.lt.u32.totalorder %s8676_s23, %s10191_s17 }
 0xd33   : > { %p8678_p2 = pnand %p8677_p1, %p8916_p3 }
 0xd34   : > { %p8683_p7 = por %p8682_p6, %p8681_p5 }
 0xd35   : > { %p8679_p4 = pneg %p8678_p2 }
 0xd36   : > { %p8685_p10 = por %p8684_p8, %p8683_p7 }
 0xd38   : > { %p8686_p11 = pnand %p8685_p10, %p8679_p4 }
 0xd3a   : > { %8689 = shalt.err (!%p8686_p11)
}
 0xd3b   : > { %7835 = dma.vmem_to_hbm [thread:$0]  (%p8916_p3), %s6831_s1, 256, %s10191_s17, %s6803_s24  }
 0xd3c PF: > { %s10330_s22 = sld [smem:[#allocation14_spill]]  ;;  %s10331_s28 = sld [smem:[#allocation8_spill]] }
 0xd42   : > { %p7845_p12 = scmp.ge.s32.totalorder %s10330_s22, 2  ;;  %s6842_s20 = sand.u32 1, %s10331_s28  }
 0xd43   : > { %s6843_s30 = scalar_lea.sflag [#allocation3], %s6842_s20 }
 0xd44   : > { %p7839_p13 = pnand %p7845_p12, %p8926_p9 }
 0xd46   : > { %8723 = dma.done.wait (!%p7839_p13), %s6843_s30, 128  }
 0xd47   : > { %8725 = vsyncadd (!%p7839_p13), %s6843_s30, 4294967168  ;;  %s6852_s0 = scalar_lea.sflag [#allocation5], %s6842_s20 }
 0xd48   : > { %8727 = dma.done.wait (!%p7839_p13), %s6852_s0, 256  }
 0xd49   : > { %8729 = vsyncadd (!%p7839_p13), %s6852_s0, 4294967040  ;;  %s35_s20 = sadd.s32 1, %s10330_s22   ;;  %s10333_s27 = sld [smem:[#allocation9_spill]] }
 0xd4a   : > { %p32_p0 = scmp.ge.s32.totalorder %s35_s20, 6   ;;  %s10334_s28 = sld [smem:[#allocation10_spill]] }
 0xd4b   : > { %s10335_s29 = sld [smem:[#allocation19_spill]]  ;;  %s10336_s30 = sld [smem:[#allocation12_spill]] }
 0xd4c   : > { %s10337_s0 = sld [smem:[#allocation13_spill]]  ;;  %s10338_s19 = sld [smem:[#allocation15_spill]] }
 0xd4d   : > { %s10339_s1 = sld [smem:[#allocation17_spill]]  ;;  %34 = sbr.rel (!%p32_p0) target bundleno = 20 (0x14), region = 178 }
 0xd54   :  { %6857 = vsyncpa [#allocation3], 1 }
 0xd55   :  { %6859 = vsyncpa [#allocation3 + $0x1], 1 }
 0xd56   :  { %6860 = vsyncpa [#allocation5], 1 }
 0xd57   :  { %6862 = vsyncpa [#allocation5 + $0x1], 1 }

</bundles_post_ra>
